<compile_context>
chip_gen: v7x
topology: tpu7x:2x2x1
jax: 0.10.0
libtpu: 0.0.40
codegen_flags: <defaults>
</compile_context>

<pallas_src>
import math
import random

import jax
import jax.numpy as jnp
from jax.experimental import pallas as pl
from jax.experimental.pallas import tpu as pltpu

INPUT_DIM = 32     # source vocab size (encoder.input_dim)
OUTPUT_DIM = 32    # target vocab size (decoder.output_dim)
EMB_DIM = 16
HID_DIM = 32
N_LAYERS = 2
V_PAD = 128        # logits padded to a full lane width (lane-dense stores / matmuls)
NEG_BIAS = -1e9    # bias on padded logit lanes so argmax never selects them


# ------------------------------ Pallas kernel --------------------------------

def _lstm_stack(x, wih_ref, whh_ref, b_ref, h_ref, c_ref):
    """One time step through the N_LAYERS-deep LSTM stack; h/c live in VMEM scratch."""
    H = HID_DIM
    for l in range(N_LAYERS):
        gates = (jnp.dot(x, wih_ref[l], preferred_element_type=jnp.float32)
                 + jnp.dot(h_ref[l], whh_ref[l], preferred_element_type=jnp.float32)
                 + b_ref[l])
        # One full-width (4H = 128 lanes = one vreg row) sigmoid for i/f/o, and a single
        # quarter-width tanh only where needed (g slice) -> less EUP work on the serial path.
        sg = jax.nn.sigmoid(gates)
        i = sg[:, 0 * H:1 * H]
        f = sg[:, 1 * H:2 * H]
        o = sg[:, 3 * H:4 * H]
        g = jnp.tanh(gates[:, 2 * H:3 * H])
        c_new = f * c_ref[l] + i * g
        h_new = o * jnp.tanh(c_new)
        c_ref[l] = c_new
        h_ref[l] = h_new
        x = h_new
    return x


def _seq2seq_kernel(tf_ref,                                   # SMEM: [T] int32 teacher-forcing mask
                    src_emb_ref, trg_emb_ref,                 # VMEM: [S,B,H], [T,B,H]
                    enc_wih_ref, enc_whh_ref, enc_b_ref,      # VMEM: [L,H,4H], [L,H,4H], [L,1,4H]
                    dec_wih_ref, dec_whh_ref, dec_b_ref,
                    dec_emb_ref, fc_w_ref, fc_b_ref,          # VMEM: [Vp,H], [H,Vp], [1,Vp]
                    out_ref,                                  # VMEM out: [T,B,Vp]
                    h_ref, c_ref):                            # VMEM scratch: [L,B,H] each
    S = src_emb_ref.shape[0]
    T, B, Vp = out_ref.shape

    # ---------------- encoder: S steps, weights resident, state in scratch ----------------
    h_ref[...] = jnp.zeros_like(h_ref)
    c_ref[...] = jnp.zeros_like(c_ref)
    for t in range(S):                       # static trip count -> fully unrolled
        _lstm_stack(src_emb_ref[t], enc_wih_ref, enc_whh_ref, enc_b_ref, h_ref, c_ref)

    # ---------------- decoder: greedy loop, logits written straight to out[t] -------------
    out_ref[0] = jnp.zeros((B, Vp), jnp.float32)              # outputs[0] stays zero
    lane = jax.lax.broadcasted_iota(jnp.int32, (B, Vp), 1)    # hoisted out of the loop
    x = trg_emb_ref[0]                                        # <sos> embedding
    for t in range(1, T):
        top = _lstm_stack(x, dec_wih_ref, dec_whh_ref, dec_b_ref, h_ref, c_ref)
        # (B,H) @ (H,128) -> lane-dense logits; padded lanes carry NEG_BIAS.
        logits = (jnp.dot(top, fc_w_ref[...], preferred_element_type=jnp.float32)
                  + fc_b_ref[...])
        out_ref[t] = logits                                   # unmasked full-vreg store
        # Greedy next token, entirely in-kernel: first-occurrence argmax as a one-hot row,
        # then one-hot @ embedding table (tiny MXU matmul) -> next-step input embedding.
        maxv = jnp.max(logits, axis=1, keepdims=True)
        cand = jnp.where(logits == maxv, lane, Vp)            # first index achieving max
        idx = jnp.min(cand, axis=1, keepdims=True)            # (B,1) int32
        onehot = jnp.where(lane == idx, 1.0, 0.0)             # (B,Vp) f32
        x_greedy = jnp.dot(onehot, dec_emb_ref[...], preferred_element_type=jnp.float32)
        # Teacher forcing: scalar 0/1 from SMEM selects ground-truth embedding vs greedy.
        m = jnp.where(tf_ref[t] > 0, 1.0, 0.0)
        x = m * trg_emb_ref[t] + (1.0 - m) * x_greedy


# ------------------------------ parameters -----------------------------------

def init_params(key):
    k = 1.0 / math.sqrt(HID_DIM)

    def uni(kk, shape, bound):
        return jax.random.uniform(kk, shape, jnp.float32, -bound, bound)

    keys = iter(jax.random.split(key, 32))
    params = {}

    # Embedding tables, zero-padded along features EMB_DIM -> HID_DIM so every LSTM layer
    # sees a HID_DIM-wide input (padded lanes are zero and multiply zero W_ih rows).
    pad_feat = ((0, 0), (0, HID_DIM - EMB_DIM))
    params['enc_emb'] = jnp.pad(
        jax.random.normal(next(keys), (INPUT_DIM, EMB_DIM), jnp.float32), pad_feat)
    dec_emb = jnp.pad(
        jax.random.normal(next(keys), (OUTPUT_DIM, EMB_DIM), jnp.float32), pad_feat)
    # Decoder table also zero-padded along vocab rows OUTPUT_DIM -> V_PAD for the in-kernel
    # one-hot lookup (padded rows are never selected by argmax).
    params['dec_emb'] = jnp.pad(dec_emb, ((0, V_PAD - OUTPUT_DIM), (0, 0)))

    for tag in ('enc', 'dec'):
        wih, whh, b = [], [], []
        for l in range(N_LAYERS):
            in_dim = EMB_DIM if l == 0 else HID_DIM
            w = uni(next(keys), (in_dim, 4 * HID_DIM), k)
            w = jnp.pad(w, ((0, HID_DIM - in_dim), (0, 0)))   # zero-pad rows to HID_DIM
            wih.append(w)
            whh.append(uni(next(keys), (HID_DIM, 4 * HID_DIM), k))
            b.append(uni(next(keys), (1, 4 * HID_DIM), k))    # b_ih + b_hh folded
        params[f'{tag}_wih'] = jnp.stack(wih)                 # (L, HID_DIM, 4H)
        params[f'{tag}_whh'] = jnp.stack(whh)                 # (L, HID_DIM, 4H)
        params[f'{tag}_b'] = jnp.stack(b)                     # (L, 1, 4H)

    # FC layer padded OUTPUT_DIM -> V_PAD lanes: zero weights + very negative bias on the
    # padded columns (never win argmax; sliced off in the wrapper).
    fc_w = uni(next(keys), (HID_DIM, OUTPUT_DIM), k)
    fc_b = uni(next(keys), (1, OUTPUT_DIM), k)
    params['fc_w'] = jnp.pad(fc_w, ((0, 0), (0, V_PAD - OUTPUT_DIM)))
    params['fc_b'] = jnp.pad(fc_b, ((0, 0), (0, V_PAD - OUTPUT_DIM)),
                             constant_values=NEG_BIAS)
    # TODO(synk): optional bf16 weight cast for v6e/v7x skipped; kept f32 for a single
    #             code path that is also correct on v5e (no bf16 VPU/EUP there).
    return params


# ------------------------------ model wrapper ---------------------------------

def _round_up(x, m):
    return ((x + m - 1) // m) * m


def make_tf_mask(trg_len, teacher_forcing_ratio=0.5, seed=0):
    """Precomputed teacher-forcing decisions (deterministic stand-in for random.random())."""
    rng = random.Random(seed)
    mask = [0] * trg_len
    for t in range(1, trg_len):
        mask[t] = 1 if rng.random() < teacher_forcing_ratio else 0
    return jnp.asarray(mask, dtype=jnp.int32)


@jax.jit
def seq2seq_forward(src, trg, tf_mask, params):
    """src:[S,B] int32, trg:[T,B] int32, tf_mask:[T] int32 -> [T,B,OUTPUT_DIM] f32."""
    S, B = src.shape
    T, _ = trg.shape
    B_pad = _round_up(max(B, 8), 8)          # explicit pad to the 8-sublane f32 tile

    pad_b = ((0, 0), (0, B_pad - B))
    src_p = jnp.pad(src, pad_b)
    trg_p = jnp.pad(trg, pad_b)

    # Embedding gathers done once outside the kernel (glue); dropout omitted (eval identity).
    src_emb = jnp.take(params['enc_emb'], src_p, axis=0)      # [S, B_pad, HID_DIM]
    trg_emb = jnp.take(params['dec_emb'], trg_p, axis=0)      # [T, B_pad, HID_DIM]

    smem = pl.BlockSpec(memory_space=pltpu.MemorySpace.SMEM)
    vmem = pl.BlockSpec(memory_space=pltpu.MemorySpace.VMEM)

    out = pl.pallas_call(
        _seq2seq_kernel,
        out_shape=jax.ShapeDtypeStruct((T, B_pad, V_PAD), jnp.float32),
        in_specs=[smem] + [vmem] * 11,
        out_specs=vmem,
        scratch_shapes=[pltpu.VMEM((N_LAYERS, B_pad, HID_DIM), jnp.float32),   # hidden
                        pltpu.VMEM((N_LAYERS, B_pad, HID_DIM), jnp.float32)],  # cell
    )(tf_mask, src_emb, trg_emb,
      params['enc_wih'], params['enc_whh'], params['enc_b'],
      params['dec_wih'], params['dec_whh'], params['dec_b'],
      params['dec_emb'], params['fc_w'], params['fc_b'])

    return out[:, :B, :OUTPUT_DIM]


# --------------------------------- driver -------------------------------------

if __name__ == "__main__":
    key = jax.random.PRNGKey(0)
    pkey, skey, tkey = jax.random.split(key, 3)
    params = init_params(pkey)

    SRC_LEN, TRG_LEN, BATCH = 8, 8, 2
    src = jax.random.randint(skey, (SRC_LEN, BATCH), 0, INPUT_DIM, dtype=jnp.int32)
    trg = jax.random.randint(tkey, (TRG_LEN, BATCH), 0, OUTPUT_DIM, dtype=jnp.int32)
    tf_mask = make_tf_mask(TRG_LEN, teacher_forcing_ratio=0.5, seed=0)

    out = seq2seq_forward(src, trg, tf_mask, params)
    out = jax.block_until_ready(out)
    assert out.shape == (TRG_LEN, BATCH, OUTPUT_DIM)
    assert out.dtype == jnp.float32
    print("KERNEL_OK")
</pallas_src>

<mosaic_0001>
module attributes {stable_mosaic.version = 11 : i64} {
  func.func @_seq2seq_kernel(%arg0: memref<8xi32, #tpu.memory_space<smem>>, %arg1: memref<8x8x32xf32, #tpu.memory_space<vmem>>, %arg2: memref<8x8x32xf32, #tpu.memory_space<vmem>>, %arg3: memref<2x32x128xf32, #tpu.memory_space<vmem>>, %arg4: memref<2x32x128xf32, #tpu.memory_space<vmem>>, %arg5: memref<2x1x128xf32, #tpu.memory_space<vmem>>, %arg6: memref<2x32x128xf32, #tpu.memory_space<vmem>>, %arg7: memref<2x32x128xf32, #tpu.memory_space<vmem>>, %arg8: memref<2x1x128xf32, #tpu.memory_space<vmem>>, %arg9: memref<128x32xf32, #tpu.memory_space<vmem>>, %arg10: memref<32x128xf32, #tpu.memory_space<vmem>>, %arg11: memref<1x128xf32, #tpu.memory_space<vmem>>, %arg12: memref<8x8x128xf32, #tpu.memory_space<vmem>>, %arg13: memref<2x8x32xf32, #tpu.memory_space<vmem>>, %arg14: memref<2x8x32xf32, #tpu.memory_space<vmem>>) attributes {dimension_semantics = [], scalar_prefetch = 0 : i64, scratch_operands = 2 : i64, tpu.core_type = #tpu.core_type<tc>} {
    %cst = arith.constant 0.000000e+00 : f32
    %0 = vector.broadcast %cst : f32 to vector<2x8x32xf32>
    %c0 = arith.constant 0 : index
    %c0_0 = arith.constant 0 : index
    %c0_1 = arith.constant 0 : index
    %1 = vector.load %arg13[%c0, %c0_0, %c0_1] : memref<2x8x32xf32, #tpu.memory_space<vmem>>, vector<2x8x32xf32>
    tpu.vector_store %arg13[%c0, %c0_0, %c0_1], %0 {strides = array<i32>} : memref<2x8x32xf32, #tpu.memory_space<vmem>>, vector<2x8x32xf32>,
    %cst_2 = arith.constant 0.000000e+00 : f32
    %2 = vector.broadcast %cst_2 : f32 to vector<2x8x32xf32>
    %c0_3 = arith.constant 0 : index
    %c0_4 = arith.constant 0 : index
    %c0_5 = arith.constant 0 : index
    %3 = vector.load %arg14[%c0_3, %c0_4, %c0_5] : memref<2x8x32xf32, #tpu.memory_space<vmem>>, vector<2x8x32xf32>
    tpu.vector_store %arg14[%c0_3, %c0_4, %c0_5], %2 {strides = array<i32>} : memref<2x8x32xf32, #tpu.memory_space<vmem>>, vector<2x8x32xf32>,
    %c0_6 = arith.constant 0 : index
    %c0_7 = arith.constant 0 : index
    %c0_8 = arith.constant 0 : index
    %4 = vector.load %arg1[%c0_6, %c0_7, %c0_8] : memref<8x8x32xf32, #tpu.memory_space<vmem>>, vector<1x8x32xf32>
    %5 = vector.shape_cast %4 : vector<1x8x32xf32> to vector<8x32xf32>
    %c0_9 = arith.constant 0 : index
    %c0_10 = arith.constant 0 : index
    %c0_11 = arith.constant 0 : index
    %6 = vector.load %arg3[%c0_9, %c0_10, %c0_11] : memref<2x32x128xf32, #tpu.memory_space<vmem>>, vector<1x32x128xf32>
    %7 = vector.shape_cast %6 : vector<1x32x128xf32> to vector<32x128xf32>
    %cst_12 = arith.constant dense<0.000000e+00> : vector<8x128xf32>
    %8 = tpu.matmul %5, %7, %cst_12 {dimension_numbers = #tpu.dot_dimension_numbers<[1], [0], [0], [1], [0, 0, 1, 1], [], []>} : vector<8x32xf32>, vector<32x128xf32>, vector<8x128xf32> -> vector<8x128xf32>
    %c0_13 = arith.constant 0 : index
    %c0_14 = arith.constant 0 : index
    %c0_15 = arith.constant 0 : index
    %9 = vector.load %arg13[%c0_13, %c0_14, %c0_15] : memref<2x8x32xf32, #tpu.memory_space<vmem>>, vector<1x8x32xf32>
    %10 = vector.shape_cast %9 : vector<1x8x32xf32> to vector<8x32xf32>
    %c0_16 = arith.constant 0 : index
    %c0_17 = arith.constant 0 : index
    %c0_18 = arith.constant 0 : index
    %11 = vector.load %arg4[%c0_16, %c0_17, %c0_18] : memref<2x32x128xf32, #tpu.memory_space<vmem>>, vector<1x32x128xf32>
    %12 = vector.shape_cast %11 : vector<1x32x128xf32> to vector<32x128xf32>
    %cst_19 = arith.constant dense<0.000000e+00> : vector<8x128xf32>
    %13 = tpu.matmul %10, %12, %cst_19 {dimension_numbers = #tpu.dot_dimension_numbers<[1], [0], [0], [1], [0, 0, 1, 1], [], []>} : vector<8x32xf32>, vector<32x128xf32>, vector<8x128xf32> -> vector<8x128xf32>
    %14 = arith.addf %8, %13 : vector<8x128xf32>
    %c0_20 = arith.constant 0 : index
    %c0_21 = arith.constant 0 : index
    %c0_22 = arith.constant 0 : index
    %15 = vector.load %arg5[%c0_20, %c0_21, %c0_22] : memref<2x1x128xf32, #tpu.memory_space<vmem>>, vector<1x1x128xf32>
    %16 = vector.shape_cast %15 : vector<1x1x128xf32> to vector<1x128xf32>
    %17 = vector.broadcast %16 : vector<1x128xf32> to vector<8x128xf32>
    %18 = arith.addf %14, %17 : vector<8x128xf32>
    %19 = arith.negf %18 : vector<8x128xf32>
    %20 = math.exp %19 : vector<8x128xf32>
    %cst_23 = arith.constant 1.000000e+00 : f32
    %21 = vector.broadcast %cst_23 : f32 to vector<8x128xf32>
    %22 = arith.addf %21, %20 : vector<8x128xf32>
    %23 = arith.divf %21, %22 : vector<8x128xf32>
    %24 = vector.extract_strided_slice %23 {offsets = [0, 0], sizes = [8, 32], strides = [1, 1]} : vector<8x128xf32> to vector<8x32xf32>
    %25 = vector.extract_strided_slice %23 {offsets = [0, 32], sizes = [8, 32], strides = [1, 1]} : vector<8x128xf32> to vector<8x32xf32>
    %26 = vector.extract_strided_slice %23 {offsets = [0, 96], sizes = [8, 32], strides = [1, 1]} : vector<8x128xf32> to vector<8x32xf32>
    %27 = vector.extract_strided_slice %18 {offsets = [0, 64], sizes = [8, 32], strides = [1, 1]} : vector<8x128xf32> to vector<8x32xf32>
    %28 = math.tanh %27 : vector<8x32xf32>
    %c0_24 = arith.constant 0 : index
    %c0_25 = arith.constant 0 : index
    %c0_26 = arith.constant 0 : index
    %29 = vector.load %arg14[%c0_24, %c0_25, %c0_26] : memref<2x8x32xf32, #tpu.memory_space<vmem>>, vector<1x8x32xf32>
    %30 = vector.shape_cast %29 : vector<1x8x32xf32> to vector<8x32xf32>
    %31 = arith.mulf %25, %30 : vector<8x32xf32>
    %32 = arith.mulf %24, %28 : vector<8x32xf32>
    %33 = arith.addf %31, %32 : vector<8x32xf32>
    %34 = math.tanh %33 : vector<8x32xf32>
    %35 = arith.mulf %26, %34 : vector<8x32xf32>
    %c0_27 = arith.constant 0 : index
    %c0_28 = arith.constant 0 : index
    %c0_29 = arith.constant 0 : index
    %36 = vector.load %arg14[%c0_27, %c0_28, %c0_29] : memref<2x8x32xf32, #tpu.memory_space<vmem>>, vector<1x8x32xf32>
    %37 = vector.shape_cast %36 : vector<1x8x32xf32> to vector<8x32xf32>
    %38 = vector.shape_cast %33 : vector<8x32xf32> to vector<1x8x32xf32>
    tpu.vector_store %arg14[%c0_27, %c0_28, %c0_29], %38 {strides = array<i32>} : memref<2x8x32xf32, #tpu.memory_space<vmem>>, vector<1x8x32xf32>,
    %c0_30 = arith.constant 0 : index
    %c0_31 = arith.constant 0 : index
    %c0_32 = arith.constant 0 : index
    %39 = vector.load %arg13[%c0_30, %c0_31, %c0_32] : memref<2x8x32xf32, #tpu.memory_space<vmem>>, vector<1x8x32xf32>
    %40 = vector.shape_cast %39 : vector<1x8x32xf32> to vector<8x32xf32>
    %41 = vector.shape_cast %35 : vector<8x32xf32> to vector<1x8x32xf32>
    tpu.vector_store %arg13[%c0_30, %c0_31, %c0_32], %41 {strides = array<i32>} : memref<2x8x32xf32, #tpu.memory_space<vmem>>, vector<1x8x32xf32>,
    %c1 = arith.constant 1 : index
    %c0_33 = arith.constant 0 : index
    %c0_34 = arith.constant 0 : index
    %42 = vector.load %arg3[%c1, %c0_33, %c0_34] : memref<2x32x128xf32, #tpu.memory_space<vmem>>, vector<1x32x128xf32>
    %43 = vector.shape_cast %42 : vector<1x32x128xf32> to vector<32x128xf32>
    %cst_35 = arith.constant dense<0.000000e+00> : vector<8x128xf32>
    %44 = tpu.matmul %35, %43, %cst_35 {dimension_numbers = #tpu.dot_dimension_numbers<[1], [0], [0], [1], [0, 0, 1, 1], [], []>} : vector<8x32xf32>, vector<32x128xf32>, vector<8x128xf32> -> vector<8x128xf32>
    %c1_36 = arith.constant 1 : index
    %c0_37 = arith.constant 0 : index
    %c0_38 = arith.constant 0 : index
    %45 = vector.load %arg13[%c1_36, %c0_37, %c0_38] : memref<2x8x32xf32, #tpu.memory_space<vmem>>, vector<1x8x32xf32>
    %46 = vector.shape_cast %45 : vector<1x8x32xf32> to vector<8x32xf32>
    %c1_39 = arith.constant 1 : index
    %c0_40 = arith.constant 0 : index
    %c0_41 = arith.constant 0 : index
    %47 = vector.load %arg4[%c1_39, %c0_40, %c0_41] : memref<2x32x128xf32, #tpu.memory_space<vmem>>, vector<1x32x128xf32>
    %48 = vector.shape_cast %47 : vector<1x32x128xf32> to vector<32x128xf32>
    %cst_42 = arith.constant dense<0.000000e+00> : vector<8x128xf32>
    %49 = tpu.matmul %46, %48, %cst_42 {dimension_numbers = #tpu.dot_dimension_numbers<[1], [0], [0], [1], [0, 0, 1, 1], [], []>} : vector<8x32xf32>, vector<32x128xf32>, vector<8x128xf32> -> vector<8x128xf32>
    %50 = arith.addf %44, %49 : vector<8x128xf32>
    %c1_43 = arith.constant 1 : index
    %c0_44 = arith.constant 0 : index
    %c0_45 = arith.constant 0 : index
    %51 = vector.load %arg5[%c1_43, %c0_44, %c0_45] : memref<2x1x128xf32, #tpu.memory_space<vmem>>, vector<1x1x128xf32>
    %52 = vector.shape_cast %51 : vector<1x1x128xf32> to vector<1x128xf32>
    %53 = vector.broadcast %52 : vector<1x128xf32> to vector<8x128xf32>
    %54 = arith.addf %50, %53 : vector<8x128xf32>
    %55 = arith.negf %54 : vector<8x128xf32>
    %56 = math.exp %55 : vector<8x128xf32>
    %cst_46 = arith.constant 1.000000e+00 : f32
    %57 = vector.broadcast %cst_46 : f32 to vector<8x128xf32>
    %58 = arith.addf %57, %56 : vector<8x128xf32>
    %59 = arith.divf %57, %58 : vector<8x128xf32>
    %60 = vector.extract_strided_slice %59 {offsets = [0, 0], sizes = [8, 32], strides = [1, 1]} : vector<8x128xf32> to vector<8x32xf32>
    %61 = vector.extract_strided_slice %59 {offsets = [0, 32], sizes = [8, 32], strides = [1, 1]} : vector<8x128xf32> to vector<8x32xf32>
    %62 = vector.extract_strided_slice %59 {offsets = [0, 96], sizes = [8, 32], strides = [1, 1]} : vector<8x128xf32> to vector<8x32xf32>
    %63 = vector.extract_strided_slice %54 {offsets = [0, 64], sizes = [8, 32], strides = [1, 1]} : vector<8x128xf32> to vector<8x32xf32>
    %64 = math.tanh %63 : vector<8x32xf32>
    %c1_47 = arith.constant 1 : index
    %c0_48 = arith.constant 0 : index
    %c0_49 = arith.constant 0 : index
    %65 = vector.load %arg14[%c1_47, %c0_48, %c0_49] : memref<2x8x32xf32, #tpu.memory_space<vmem>>, vector<1x8x32xf32>
    %66 = vector.shape_cast %65 : vector<1x8x32xf32> to vector<8x32xf32>
    %67 = arith.mulf %61, %66 : vector<8x32xf32>
    %68 = arith.mulf %60, %64 : vector<8x32xf32>
    %69 = arith.addf %67, %68 : vector<8x32xf32>
    %70 = math.tanh %69 : vector<8x32xf32>
    %71 = arith.mulf %62, %70 : vector<8x32xf32>
    %c1_50 = arith.constant 1 : index
    %c0_51 = arith.constant 0 : index
    %c0_52 = arith.constant 0 : index
    %72 = vector.load %arg14[%c1_50, %c0_51, %c0_52] : memref<2x8x32xf32, #tpu.memory_space<vmem>>, vector<1x8x32xf32>
    %73 = vector.shape_cast %72 : vector<1x8x32xf32> to vector<8x32xf32>
    %74 = vector.shape_cast %69 : vector<8x32xf32> to vector<1x8x32xf32>
    tpu.vector_store %arg14[%c1_50, %c0_51, %c0_52], %74 {strides = array<i32>} : memref<2x8x32xf32, #tpu.memory_space<vmem>>, vector<1x8x32xf32>,
    %c1_53 = arith.constant 1 : index
    %c0_54 = arith.constant 0 : index
    %c0_55 = arith.constant 0 : index
    %75 = vector.load %arg13[%c1_53, %c0_54, %c0_55] : memref<2x8x32xf32, #tpu.memory_space<vmem>>, vector<1x8x32xf32>
    %76 = vector.shape_cast %75 : vector<1x8x32xf32> to vector<8x32xf32>
    %77 = vector.shape_cast %71 : vector<8x32xf32> to vector<1x8x32xf32>
    tpu.vector_store %arg13[%c1_53, %c0_54, %c0_55], %77 {strides = array<i32>} : memref<2x8x32xf32, #tpu.memory_space<vmem>>, vector<1x8x32xf32>,
    %c1_56 = arith.constant 1 : index
    %c0_57 = arith.constant 0 : index
    %c0_58 = arith.constant 0 : index
    %78 = vector.load %arg1[%c1_56, %c0_57, %c0_58] : memref<8x8x32xf32, #tpu.memory_space<vmem>>, vector<1x8x32xf32>
    %79 = vector.shape_cast %78 : vector<1x8x32xf32> to vector<8x32xf32>
    %c0_59 = arith.constant 0 : index
    %c0_60 = arith.constant 0 : index
    %c0_61 = arith.constant 0 : index
    %80 = vector.load %arg3[%c0_59, %c0_60, %c0_61] : memref<2x32x128xf32, #tpu.memory_space<vmem>>, vector<1x32x128xf32>
    %81 = vector.shape_cast %80 : vector<1x32x128xf32> to vector<32x128xf32>
    %cst_62 = arith.constant dense<0.000000e+00> : vector<8x128xf32>
    %82 = tpu.matmul %79, %81, %cst_62 {dimension_numbers = #tpu.dot_dimension_numbers<[1], [0], [0], [1], [0, 0, 1, 1], [], []>} : vector<8x32xf32>, vector<32x128xf32>, vector<8x128xf32> -> vector<8x128xf32>
    %c0_63 = arith.constant 0 : index
    %c0_64 = arith.constant 0 : index
    %c0_65 = arith.constant 0 : index
    %83 = vector.load %arg13[%c0_63, %c0_64, %c0_65] : memref<2x8x32xf32, #tpu.memory_space<vmem>>, vector<1x8x32xf32>
    %84 = vector.shape_cast %83 : vector<1x8x32xf32> to vector<8x32xf32>
    %c0_66 = arith.constant 0 : index
    %c0_67 = arith.constant 0 : index
    %c0_68 = arith.constant 0 : index
    %85 = vector.load %arg4[%c0_66, %c0_67, %c0_68] : memref<2x32x128xf32, #tpu.memory_space<vmem>>, vector<1x32x128xf32>
    %86 = vector.shape_cast %85 : vector<1x32x128xf32> to vector<32x128xf32>
    %cst_69 = arith.constant dense<0.000000e+00> : vector<8x128xf32>
    %87 = tpu.matmul %84, %86, %cst_69 {dimension_numbers = #tpu.dot_dimension_numbers<[1], [0], [0], [1], [0, 0, 1, 1], [], []>} : vector<8x32xf32>, vector<32x128xf32>, vector<8x128xf32> -> vector<8x128xf32>
    %88 = arith.addf %82, %87 : vector<8x128xf32>
    %c0_70 = arith.constant 0 : index
    %c0_71 = arith.constant 0 : index
    %c0_72 = arith.constant 0 : index
    %89 = vector.load %arg5[%c0_70, %c0_71, %c0_72] : memref<2x1x128xf32, #tpu.memory_space<vmem>>, vector<1x1x128xf32>
    %90 = vector.shape_cast %89 : vector<1x1x128xf32> to vector<1x128xf32>
    %91 = vector.broadcast %90 : vector<1x128xf32> to vector<8x128xf32>
    %92 = arith.addf %88, %91 : vector<8x128xf32>
    %93 = arith.negf %92 : vector<8x128xf32>
    %94 = math.exp %93 : vector<8x128xf32>
    %cst_73 = arith.constant 1.000000e+00 : f32
    %95 = vector.broadcast %cst_73 : f32 to vector<8x128xf32>
    %96 = arith.addf %95, %94 : vector<8x128xf32>
    %97 = arith.divf %95, %96 : vector<8x128xf32>
    %98 = vector.extract_strided_slice %97 {offsets = [0, 0], sizes = [8, 32], strides = [1, 1]} : vector<8x128xf32> to vector<8x32xf32>
    %99 = vector.extract_strided_slice %97 {offsets = [0, 32], sizes = [8, 32], strides = [1, 1]} : vector<8x128xf32> to vector<8x32xf32>
    %100 = vector.extract_strided_slice %97 {offsets = [0, 96], sizes = [8, 32], strides = [1, 1]} : vector<8x128xf32> to vector<8x32xf32>
    %101 = vector.extract_strided_slice %92 {offsets = [0, 64], sizes = [8, 32], strides = [1, 1]} : vector<8x128xf32> to vector<8x32xf32>
    %102 = math.tanh %101 : vector<8x32xf32>
    %c0_74 = arith.constant 0 : index
    %c0_75 = arith.constant 0 : index
    %c0_76 = arith.constant 0 : index
    %103 = vector.load %arg14[%c0_74, %c0_75, %c0_76] : memref<2x8x32xf32, #tpu.memory_space<vmem>>, vector<1x8x32xf32>
    %104 = vector.shape_cast %103 : vector<1x8x32xf32> to vector<8x32xf32>
    %105 = arith.mulf %99, %104 : vector<8x32xf32>
    %106 = arith.mulf %98, %102 : vector<8x32xf32>
    %107 = arith.addf %105, %106 : vector<8x32xf32>
    %108 = math.tanh %107 : vector<8x32xf32>
    %109 = arith.mulf %100, %108 : vector<8x32xf32>
    %c0_77 = arith.constant 0 : index
    %c0_78 = arith.constant 0 : index
    %c0_79 = arith.constant 0 : index
    %110 = vector.load %arg14[%c0_77, %c0_78, %c0_79] : memref<2x8x32xf32, #tpu.memory_space<vmem>>, vector<1x8x32xf32>
    %111 = vector.shape_cast %110 : vector<1x8x32xf32> to vector<8x32xf32>
    %112 = vector.shape_cast %107 : vector<8x32xf32> to vector<1x8x32xf32>
    tpu.vector_store %arg14[%c0_77, %c0_78, %c0_79], %112 {strides = array<i32>} : memref<2x8x32xf32, #tpu.memory_space<vmem>>, vector<1x8x32xf32>,
    %c0_80 = arith.constant 0 : index
    %c0_81 = arith.constant 0 : index
    %c0_82 = arith.constant 0 : index
    %113 = vector.load %arg13[%c0_80, %c0_81, %c0_82] : memref<2x8x32xf32, #tpu.memory_space<vmem>>, vector<1x8x32xf32>
    %114 = vector.shape_cast %113 : vector<1x8x32xf32> to vector<8x32xf32>
    %115 = vector.shape_cast %109 : vector<8x32xf32> to vector<1x8x32xf32>
    tpu.vector_store %arg13[%c0_80, %c0_81, %c0_82], %115 {strides = array<i32>} : memref<2x8x32xf32, #tpu.memory_space<vmem>>, vector<1x8x32xf32>,
    %c1_83 = arith.constant 1 : index
    %c0_84 = arith.constant 0 : index
    %c0_85 = arith.constant 0 : index
    %116 = vector.load %arg3[%c1_83, %c0_84, %c0_85] : memref<2x32x128xf32, #tpu.memory_space<vmem>>, vector<1x32x128xf32>
    %117 = vector.shape_cast %116 : vector<1x32x128xf32> to vector<32x128xf32>
    %cst_86 = arith.constant dense<0.000000e+00> : vector<8x128xf32>
    %118 = tpu.matmul %109, %117, %cst_86 {dimension_numbers = #tpu.dot_dimension_numbers<[1], [0], [0], [1], [0, 0, 1, 1], [], []>} : vector<8x32xf32>, vector<32x128xf32>, vector<8x128xf32> -> vector<8x128xf32>
    %c1_87 = arith.constant 1 : index
    %c0_88 = arith.constant 0 : index
    %c0_89 = arith.constant 0 : index
    %119 = vector.load %arg13[%c1_87, %c0_88, %c0_89] : memref<2x8x32xf32, #tpu.memory_space<vmem>>, vector<1x8x32xf32>
    %120 = vector.shape_cast %119 : vector<1x8x32xf32> to vector<8x32xf32>
    %c1_90 = arith.constant 1 : index
    %c0_91 = arith.constant 0 : index
    %c0_92 = arith.constant 0 : index
    %121 = vector.load %arg4[%c1_90, %c0_91, %c0_92] : memref<2x32x128xf32, #tpu.memory_space<vmem>>, vector<1x32x128xf32>
    %122 = vector.shape_cast %121 : vector<1x32x128xf32> to vector<32x128xf32>
    %cst_93 = arith.constant dense<0.000000e+00> : vector<8x128xf32>
    %123 = tpu.matmul %120, %122, %cst_93 {dimension_numbers = #tpu.dot_dimension_numbers<[1], [0], [0], [1], [0, 0, 1, 1], [], []>} : vector<8x32xf32>, vector<32x128xf32>, vector<8x128xf32> -> vector<8x128xf32>
    %124 = arith.addf %118, %123 : vector<8x128xf32>
    %c1_94 = arith.constant 1 : index
    %c0_95 = arith.constant 0 : index
    %c0_96 = arith.constant 0 : index
    %125 = vector.load %arg5[%c1_94, %c0_95, %c0_96] : memref<2x1x128xf32, #tpu.memory_space<vmem>>, vector<1x1x128xf32>
    %126 = vector.shape_cast %125 : vector<1x1x128xf32> to vector<1x128xf32>
    %127 = vector.broadcast %126 : vector<1x128xf32> to vector<8x128xf32>
    %128 = arith.addf %124, %127 : vector<8x128xf32>
    %129 = arith.negf %128 : vector<8x128xf32>
    %130 = math.exp %129 : vector<8x128xf32>
    %cst_97 = arith.constant 1.000000e+00 : f32
    %131 = vector.broadcast %cst_97 : f32 to vector<8x128xf32>
    %132 = arith.addf %131, %130 : vector<8x128xf32>
    %133 = arith.divf %131, %132 : vector<8x128xf32>
    %134 = vector.extract_strided_slice %133 {offsets = [0, 0], sizes = [8, 32], strides = [1, 1]} : vector<8x128xf32> to vector<8x32xf32>
    %135 = vector.extract_strided_slice %133 {offsets = [0, 32], sizes = [8, 32], strides = [1, 1]} : vector<8x128xf32> to vector<8x32xf32>
    %136 = vector.extract_strided_slice %133 {offsets = [0, 96], sizes = [8, 32], strides = [1, 1]} : vector<8x128xf32> to vector<8x32xf32>
    %137 = vector.extract_strided_slice %128 {offsets = [0, 64], sizes = [8, 32], strides = [1, 1]} : vector<8x128xf32> to vector<8x32xf32>
    %138 = math.tanh %137 : vector<8x32xf32>
    %c1_98 = arith.constant 1 : index
    %c0_99 = arith.constant 0 : index
    %c0_100 = arith.constant 0 : index
    %139 = vector.load %arg14[%c1_98, %c0_99, %c0_100] : memref<2x8x32xf32, #tpu.memory_space<vmem>>, vector<1x8x32xf32>
    %140 = vector.shape_cast %139 : vector<1x8x32xf32> to vector<8x32xf32>
    %141 = arith.mulf %135, %140 : vector<8x32xf32>
    %142 = arith.mulf %134, %138 : vector<8x32xf32>
    %143 = arith.addf %141, %142 : vector<8x32xf32>
    %144 = math.tanh %143 : vector<8x32xf32>
    %145 = arith.mulf %136, %144 : vector<8x32xf32>
    %c1_101 = arith.constant 1 : index
    %c0_102 = arith.constant 0 : index
    %c0_103 = arith.constant 0 : index
    %146 = vector.load %arg14[%c1_101, %c0_102, %c0_103] : memref<2x8x32xf32, #tpu.memory_space<vmem>>, vector<1x8x32xf32>
    %147 = vector.shape_cast %146 : vector<1x8x32xf32> to vector<8x32xf32>
    %148 = vector.shape_cast %143 : vector<8x32xf32> to vector<1x8x32xf32>
    tpu.vector_store %arg14[%c1_101, %c0_102, %c0_103], %148 {strides = array<i32>} : memref<2x8x32xf32, #tpu.memory_space<vmem>>, vector<1x8x32xf32>,
    %c1_104 = arith.constant 1 : index
    %c0_105 = arith.constant 0 : index
    %c0_106 = arith.constant 0 : index
    %149 = vector.load %arg13[%c1_104, %c0_105, %c0_106] : memref<2x8x32xf32, #tpu.memory_space<vmem>>, vector<1x8x32xf32>
    %150 = vector.shape_cast %149 : vector<1x8x32xf32> to vector<8x32xf32>
    %151 = vector.shape_cast %145 : vector<8x32xf32> to vector<1x8x32xf32>
    tpu.vector_store %arg13[%c1_104, %c0_105, %c0_106], %151 {strides = array<i32>} : memref<2x8x32xf32, #tpu.memory_space<vmem>>, vector<1x8x32xf32>,
    %c2 = arith.constant 2 : index
    %c0_107 = arith.constant 0 : index
    %c0_108 = arith.constant 0 : index
    %152 = vector.load %arg1[%c2, %c0_107, %c0_108] : memref<8x8x32xf32, #tpu.memory_space<vmem>>, vector<1x8x32xf32>
    %153 = vector.shape_cast %152 : vector<1x8x32xf32> to vector<8x32xf32>
    %c0_109 = arith.constant 0 : index
    %c0_110 = arith.constant 0 : index
    %c0_111 = arith.constant 0 : index
    %154 = vector.load %arg3[%c0_109, %c0_110, %c0_111] : memref<2x32x128xf32, #tpu.memory_space<vmem>>, vector<1x32x128xf32>
    %155 = vector.shape_cast %154 : vector<1x32x128xf32> to vector<32x128xf32>
    %cst_112 = arith.constant dense<0.000000e+00> : vector<8x128xf32>
    %156 = tpu.matmul %153, %155, %cst_112 {dimension_numbers = #tpu.dot_dimension_numbers<[1], [0], [0], [1], [0, 0, 1, 1], [], []>} : vector<8x32xf32>, vector<32x128xf32>, vector<8x128xf32> -> vector<8x128xf32>
    %c0_113 = arith.constant 0 : index
    %c0_114 = arith.constant 0 : index
    %c0_115 = arith.constant 0 : index
    %157 = vector.load %arg13[%c0_113, %c0_114, %c0_115] : memref<2x8x32xf32, #tpu.memory_space<vmem>>, vector<1x8x32xf32>
    %158 = vector.shape_cast %157 : vector<1x8x32xf32> to vector<8x32xf32>
    %c0_116 = arith.constant 0 : index
    %c0_117 = arith.constant 0 : index
    %c0_118 = arith.constant 0 : index
    %159 = vector.load %arg4[%c0_116, %c0_117, %c0_118] : memref<2x32x128xf32, #tpu.memory_space<vmem>>, vector<1x32x128xf32>
    %160 = vector.shape_cast %159 : vector<1x32x128xf32> to vector<32x128xf32>
    %cst_119 = arith.constant dense<0.000000e+00> : vector<8x128xf32>
    %161 = tpu.matmul %158, %160, %cst_119 {dimension_numbers = #tpu.dot_dimension_numbers<[1], [0], [0], [1], [0, 0, 1, 1], [], []>} : vector<8x32xf32>, vector<32x128xf32>, vector<8x128xf32> -> vector<8x128xf32>
    %162 = arith.addf %156, %161 : vector<8x128xf32>
    %c0_120 = arith.constant 0 : index
    %c0_121 = arith.constant 0 : index
    %c0_122 = arith.constant 0 : index
    %163 = vector.load %arg5[%c0_120, %c0_121, %c0_122] : memref<2x1x128xf32, #tpu.memory_space<vmem>>, vector<1x1x128xf32>
    %164 = vector.shape_cast %163 : vector<1x1x128xf32> to vector<1x128xf32>
    %165 = vector.broadcast %164 : vector<1x128xf32> to vector<8x128xf32>
    %166 = arith.addf %162, %165 : vector<8x128xf32>
    %167 = arith.negf %166 : vector<8x128xf32>
    %168 = math.exp %167 : vector<8x128xf32>
    %cst_123 = arith.constant 1.000000e+00 : f32
    %169 = vector.broadcast %cst_123 : f32 to vector<8x128xf32>
    %170 = arith.addf %169, %168 : vector<8x128xf32>
    %171 = arith.divf %169, %170 : vector<8x128xf32>
    %172 = vector.extract_strided_slice %171 {offsets = [0, 0], sizes = [8, 32], strides = [1, 1]} : vector<8x128xf32> to vector<8x32xf32>
    %173 = vector.extract_strided_slice %171 {offsets = [0, 32], sizes = [8, 32], strides = [1, 1]} : vector<8x128xf32> to vector<8x32xf32>
    %174 = vector.extract_strided_slice %171 {offsets = [0, 96], sizes = [8, 32], strides = [1, 1]} : vector<8x128xf32> to vector<8x32xf32>
    %175 = vector.extract_strided_slice %166 {offsets = [0, 64], sizes = [8, 32], strides = [1, 1]} : vector<8x128xf32> to vector<8x32xf32>
    %176 = math.tanh %175 : vector<8x32xf32>
    %c0_124 = arith.constant 0 : index
    %c0_125 = arith.constant 0 : index
    %c0_126 = arith.constant 0 : index
    %177 = vector.load %arg14[%c0_124, %c0_125, %c0_126] : memref<2x8x32xf32, #tpu.memory_space<vmem>>, vector<1x8x32xf32>
    %178 = vector.shape_cast %177 : vector<1x8x32xf32> to vector<8x32xf32>
    %179 = arith.mulf %173, %178 : vector<8x32xf32>
    %180 = arith.mulf %172, %176 : vector<8x32xf32>
    %181 = arith.addf %179, %180 : vector<8x32xf32>
    %182 = math.tanh %181 : vector<8x32xf32>
    %183 = arith.mulf %174, %182 : vector<8x32xf32>
    %c0_127 = arith.constant 0 : index
    %c0_128 = arith.constant 0 : index
    %c0_129 = arith.constant 0 : index
    %184 = vector.load %arg14[%c0_127, %c0_128, %c0_129] : memref<2x8x32xf32, #tpu.memory_space<vmem>>, vector<1x8x32xf32>
    %185 = vector.shape_cast %184 : vector<1x8x32xf32> to vector<8x32xf32>
    %186 = vector.shape_cast %181 : vector<8x32xf32> to vector<1x8x32xf32>
    tpu.vector_store %arg14[%c0_127, %c0_128, %c0_129], %186 {strides = array<i32>} : memref<2x8x32xf32, #tpu.memory_space<vmem>>, vector<1x8x32xf32>,
    %c0_130 = arith.constant 0 : index
    %c0_131 = arith.constant 0 : index
    %c0_132 = arith.constant 0 : index
    %187 = vector.load %arg13[%c0_130, %c0_131, %c0_132] : memref<2x8x32xf32, #tpu.memory_space<vmem>>, vector<1x8x32xf32>
    %188 = vector.shape_cast %187 : vector<1x8x32xf32> to vector<8x32xf32>
    %189 = vector.shape_cast %183 : vector<8x32xf32> to vector<1x8x32xf32>
    tpu.vector_store %arg13[%c0_130, %c0_131, %c0_132], %189 {strides = array<i32>} : memref<2x8x32xf32, #tpu.memory_space<vmem>>, vector<1x8x32xf32>,
    %c1_133 = arith.constant 1 : index
    %c0_134 = arith.constant 0 : index
    %c0_135 = arith.constant 0 : index
    %190 = vector.load %arg3[%c1_133, %c0_134, %c0_135] : memref<2x32x128xf32, #tpu.memory_space<vmem>>, vector<1x32x128xf32>
    %191 = vector.shape_cast %190 : vector<1x32x128xf32> to vector<32x128xf32>
    %cst_136 = arith.constant dense<0.000000e+00> : vector<8x128xf32>
    %192 = tpu.matmul %183, %191, %cst_136 {dimension_numbers = #tpu.dot_dimension_numbers<[1], [0], [0], [1], [0, 0, 1, 1], [], []>} : vector<8x32xf32>, vector<32x128xf32>, vector<8x128xf32> -> vector<8x128xf32>
    %c1_137 = arith.constant 1 : index
    %c0_138 = arith.constant 0 : index
    %c0_139 = arith.constant 0 : index
    %193 = vector.load %arg13[%c1_137, %c0_138, %c0_139] : memref<2x8x32xf32, #tpu.memory_space<vmem>>, vector<1x8x32xf32>
    %194 = vector.shape_cast %193 : vector<1x8x32xf32> to vector<8x32xf32>
    %c1_140 = arith.constant 1 : index
    %c0_141 = arith.constant 0 : index
    %c0_142 = arith.constant 0 : index
    %195 = vector.load %arg4[%c1_140, %c0_141, %c0_142] : memref<2x32x128xf32, #tpu.memory_space<vmem>>, vector<1x32x128xf32>
    %196 = vector.shape_cast %195 : vector<1x32x128xf32> to vector<32x128xf32>
    %cst_143 = arith.constant dense<0.000000e+00> : vector<8x128xf32>
    %197 = tpu.matmul %194, %196, %cst_143 {dimension_numbers = #tpu.dot_dimension_numbers<[1], [0], [0], [1], [0, 0, 1, 1], [], []>} : vector<8x32xf32>, vector<32x128xf32>, vector<8x128xf32> -> vector<8x128xf32>
    %198 = arith.addf %192, %197 : vector<8x128xf32>
    %c1_144 = arith.constant 1 : index
    %c0_145 = arith.constant 0 : index
    %c0_146 = arith.constant 0 : index
    %199 = vector.load %arg5[%c1_144, %c0_145, %c0_146] : memref<2x1x128xf32, #tpu.memory_space<vmem>>, vector<1x1x128xf32>
    %200 = vector.shape_cast %199 : vector<1x1x128xf32> to vector<1x128xf32>
    %201 = vector.broadcast %200 : vector<1x128xf32> to vector<8x128xf32>
    %202 = arith.addf %198, %201 : vector<8x128xf32>
    %203 = arith.negf %202 : vector<8x128xf32>
    %204 = math.exp %203 : vector<8x128xf32>
    %cst_147 = arith.constant 1.000000e+00 : f32
    %205 = vector.broadcast %cst_147 : f32 to vector<8x128xf32>
    %206 = arith.addf %205, %204 : vector<8x128xf32>
    %207 = arith.divf %205, %206 : vector<8x128xf32>
    %208 = vector.extract_strided_slice %207 {offsets = [0, 0], sizes = [8, 32], strides = [1, 1]} : vector<8x128xf32> to vector<8x32xf32>
    %209 = vector.extract_strided_slice %207 {offsets = [0, 32], sizes = [8, 32], strides = [1, 1]} : vector<8x128xf32> to vector<8x32xf32>
    %210 = vector.extract_strided_slice %207 {offsets = [0, 96], sizes = [8, 32], strides = [1, 1]} : vector<8x128xf32> to vector<8x32xf32>
    %211 = vector.extract_strided_slice %202 {offsets = [0, 64], sizes = [8, 32], strides = [1, 1]} : vector<8x128xf32> to vector<8x32xf32>
    %212 = math.tanh %211 : vector<8x32xf32>
    %c1_148 = arith.constant 1 : index
    %c0_149 = arith.constant 0 : index
    %c0_150 = arith.constant 0 : index
    %213 = vector.load %arg14[%c1_148, %c0_149, %c0_150] : memref<2x8x32xf32, #tpu.memory_space<vmem>>, vector<1x8x32xf32>
    %214 = vector.shape_cast %213 : vector<1x8x32xf32> to vector<8x32xf32>
    %215 = arith.mulf %209, %214 : vector<8x32xf32>
    %216 = arith.mulf %208, %212 : vector<8x32xf32>
    %217 = arith.addf %215, %216 : vector<8x32xf32>
    %218 = math.tanh %217 : vector<8x32xf32>
    %219 = arith.mulf %210, %218 : vector<8x32xf32>
    %c1_151 = arith.constant 1 : index
    %c0_152 = arith.constant 0 : index
    %c0_153 = arith.constant 0 : index
    %220 = vector.load %arg14[%c1_151, %c0_152, %c0_153] : memref<2x8x32xf32, #tpu.memory_space<vmem>>, vector<1x8x32xf32>
    %221 = vector.shape_cast %220 : vector<1x8x32xf32> to vector<8x32xf32>
    %222 = vector.shape_cast %217 : vector<8x32xf32> to vector<1x8x32xf32>
    tpu.vector_store %arg14[%c1_151, %c0_152, %c0_153], %222 {strides = array<i32>} : memref<2x8x32xf32, #tpu.memory_space<vmem>>, vector<1x8x32xf32>,
    %c1_154 = arith.constant 1 : index
    %c0_155 = arith.constant 0 : index
    %c0_156 = arith.constant 0 : index
    %223 = vector.load %arg13[%c1_154, %c0_155, %c0_156] : memref<2x8x32xf32, #tpu.memory_space<vmem>>, vector<1x8x32xf32>
    %224 = vector.shape_cast %223 : vector<1x8x32xf32> to vector<8x32xf32>
    %225 = vector.shape_cast %219 : vector<8x32xf32> to vector<1x8x32xf32>
    tpu.vector_store %arg13[%c1_154, %c0_155, %c0_156], %225 {strides = array<i32>} : memref<2x8x32xf32, #tpu.memory_space<vmem>>, vector<1x8x32xf32>,
    %c3 = arith.constant 3 : index
    %c0_157 = arith.constant 0 : index
    %c0_158 = arith.constant 0 : index
    %226 = vector.load %arg1[%c3, %c0_157, %c0_158] : memref<8x8x32xf32, #tpu.memory_space<vmem>>, vector<1x8x32xf32>
    %227 = vector.shape_cast %226 : vector<1x8x32xf32> to vector<8x32xf32>
    %c0_159 = arith.constant 0 : index
    %c0_160 = arith.constant 0 : index
    %c0_161 = arith.constant 0 : index
    %228 = vector.load %arg3[%c0_159, %c0_160, %c0_161] : memref<2x32x128xf32, #tpu.memory_space<vmem>>, vector<1x32x128xf32>
    %229 = vector.shape_cast %228 : vector<1x32x128xf32> to vector<32x128xf32>
    %cst_162 = arith.constant dense<0.000000e+00> : vector<8x128xf32>
    %230 = tpu.matmul %227, %229, %cst_162 {dimension_numbers = #tpu.dot_dimension_numbers<[1], [0], [0], [1], [0, 0, 1, 1], [], []>} : vector<8x32xf32>, vector<32x128xf32>, vector<8x128xf32> -> vector<8x128xf32>
    %c0_163 = arith.constant 0 : index
    %c0_164 = arith.constant 0 : index
    %c0_165 = arith.constant 0 : index
    %231 = vector.load %arg13[%c0_163, %c0_164, %c0_165] : memref<2x8x32xf32, #tpu.memory_space<vmem>>, vector<1x8x32xf32>
    %232 = vector.shape_cast %231 : vector<1x8x32xf32> to vector<8x32xf32>
    %c0_166 = arith.constant 0 : index
    %c0_167 = arith.constant 0 : index
    %c0_168 = arith.constant 0 : index
    %233 = vector.load %arg4[%c0_166, %c0_167, %c0_168] : memref<2x32x128xf32, #tpu.memory_space<vmem>>, vector<1x32x128xf32>
    %234 = vector.shape_cast %233 : vector<1x32x128xf32> to vector<32x128xf32>
    %cst_169 = arith.constant dense<0.000000e+00> : vector<8x128xf32>
    %235 = tpu.matmul %232, %234, %cst_169 {dimension_numbers = #tpu.dot_dimension_numbers<[1], [0], [0], [1], [0, 0, 1, 1], [], []>} : vector<8x32xf32>, vector<32x128xf32>, vector<8x128xf32> -> vector<8x128xf32>
    %236 = arith.addf %230, %235 : vector<8x128xf32>
    %c0_170 = arith.constant 0 : index
    %c0_171 = arith.constant 0 : index
    %c0_172 = arith.constant 0 : index
    %237 = vector.load %arg5[%c0_170, %c0_171, %c0_172] : memref<2x1x128xf32, #tpu.memory_space<vmem>>, vector<1x1x128xf32>
    %238 = vector.shape_cast %237 : vector<1x1x128xf32> to vector<1x128xf32>
    %239 = vector.broadcast %238 : vector<1x128xf32> to vector<8x128xf32>
    %240 = arith.addf %236, %239 : vector<8x128xf32>
    %241 = arith.negf %240 : vector<8x128xf32>
    %242 = math.exp %241 : vector<8x128xf32>
    %cst_173 = arith.constant 1.000000e+00 : f32
    %243 = vector.broadcast %cst_173 : f32 to vector<8x128xf32>
    %244 = arith.addf %243, %242 : vector<8x128xf32>
    %245 = arith.divf %243, %244 : vector<8x128xf32>
    %246 = vector.extract_strided_slice %245 {offsets = [0, 0], sizes = [8, 32], strides = [1, 1]} : vector<8x128xf32> to vector<8x32xf32>
    %247 = vector.extract_strided_slice %245 {offsets = [0, 32], sizes = [8, 32], strides = [1, 1]} : vector<8x128xf32> to vector<8x32xf32>
    %248 = vector.extract_strided_slice %245 {offsets = [0, 96], sizes = [8, 32], strides = [1, 1]} : vector<8x128xf32> to vector<8x32xf32>
    %249 = vector.extract_strided_slice %240 {offsets = [0, 64], sizes = [8, 32], strides = [1, 1]} : vector<8x128xf32> to vector<8x32xf32>
    %250 = math.tanh %249 : vector<8x32xf32>
    %c0_174 = arith.constant 0 : index
    %c0_175 = arith.constant 0 : index
    %c0_176 = arith.constant 0 : index
    %251 = vector.load %arg14[%c0_174, %c0_175, %c0_176] : memref<2x8x32xf32, #tpu.memory_space<vmem>>, vector<1x8x32xf32>
    %252 = vector.shape_cast %251 : vector<1x8x32xf32> to vector<8x32xf32>
    %253 = arith.mulf %247, %252 : vector<8x32xf32>
    %254 = arith.mulf %246, %250 : vector<8x32xf32>
    %255 = arith.addf %253, %254 : vector<8x32xf32>
    %256 = math.tanh %255 : vector<8x32xf32>
    %257 = arith.mulf %248, %256 : vector<8x32xf32>
    %c0_177 = arith.constant 0 : index
    %c0_178 = arith.constant 0 : index
    %c0_179 = arith.constant 0 : index
    %258 = vector.load %arg14[%c0_177, %c0_178, %c0_179] : memref<2x8x32xf32, #tpu.memory_space<vmem>>, vector<1x8x32xf32>
    %259 = vector.shape_cast %258 : vector<1x8x32xf32> to vector<8x32xf32>
    %260 = vector.shape_cast %255 : vector<8x32xf32> to vector<1x8x32xf32>
    tpu.vector_store %arg14[%c0_177, %c0_178, %c0_179], %260 {strides = array<i32>} : memref<2x8x32xf32, #tpu.memory_space<vmem>>, vector<1x8x32xf32>,
    %c0_180 = arith.constant 0 : index
    %c0_181 = arith.constant 0 : index
    %c0_182 = arith.constant 0 : index
    %261 = vector.load %arg13[%c0_180, %c0_181, %c0_182] : memref<2x8x32xf32, #tpu.memory_space<vmem>>, vector<1x8x32xf32>
    %262 = vector.shape_cast %261 : vector<1x8x32xf32> to vector<8x32xf32>
    %263 = vector.shape_cast %257 : vector<8x32xf32> to vector<1x8x32xf32>
    tpu.vector_store %arg13[%c0_180, %c0_181, %c0_182], %263 {strides = array<i32>} : memref<2x8x32xf32, #tpu.memory_space<vmem>>, vector<1x8x32xf32>,
    %c1_183 = arith.constant 1 : index
    %c0_184 = arith.constant 0 : index
    %c0_185 = arith.constant 0 : index
    %264 = vector.load %arg3[%c1_183, %c0_184, %c0_185] : memref<2x32x128xf32, #tpu.memory_space<vmem>>, vector<1x32x128xf32>
    %265 = vector.shape_cast %264 : vector<1x32x128xf32> to vector<32x128xf32>
    %cst_186 = arith.constant dense<0.000000e+00> : vector<8x128xf32>
    %266 = tpu.matmul %257, %265, %cst_186 {dimension_numbers = #tpu.dot_dimension_numbers<[1], [0], [0], [1], [0, 0, 1, 1], [], []>} : vector<8x32xf32>, vector<32x128xf32>, vector<8x128xf32> -> vector<8x128xf32>
    %c1_187 = arith.constant 1 : index
    %c0_188 = arith.constant 0 : index
    %c0_189 = arith.constant 0 : index
    %267 = vector.load %arg13[%c1_187, %c0_188, %c0_189] : memref<2x8x32xf32, #tpu.memory_space<vmem>>, vector<1x8x32xf32>
    %268 = vector.shape_cast %267 : vector<1x8x32xf32> to vector<8x32xf32>
    %c1_190 = arith.constant 1 : index
    %c0_191 = arith.constant 0 : index
    %c0_192 = arith.constant 0 : index
    %269 = vector.load %arg4[%c1_190, %c0_191, %c0_192] : memref<2x32x128xf32, #tpu.memory_space<vmem>>, vector<1x32x128xf32>
    %270 = vector.shape_cast %269 : vector<1x32x128xf32> to vector<32x128xf32>
    %cst_193 = arith.constant dense<0.000000e+00> : vector<8x128xf32>
    %271 = tpu.matmul %268, %270, %cst_193 {dimension_numbers = #tpu.dot_dimension_numbers<[1], [0], [0], [1], [0, 0, 1, 1], [], []>} : vector<8x32xf32>, vector<32x128xf32>, vector<8x128xf32> -> vector<8x128xf32>
    %272 = arith.addf %266, %271 : vector<8x128xf32>
    %c1_194 = arith.constant 1 : index
    %c0_195 = arith.constant 0 : index
    %c0_196 = arith.constant 0 : index
    %273 = vector.load %arg5[%c1_194, %c0_195, %c0_196] : memref<2x1x128xf32, #tpu.memory_space<vmem>>, vector<1x1x128xf32>
    %274 = vector.shape_cast %273 : vector<1x1x128xf32> to vector<1x128xf32>
    %275 = vector.broadcast %274 : vector<1x128xf32> to vector<8x128xf32>
    %276 = arith.addf %272, %275 : vector<8x128xf32>
    %277 = arith.negf %276 : vector<8x128xf32>
    %278 = math.exp %277 : vector<8x128xf32>
    %cst_197 = arith.constant 1.000000e+00 : f32
    %279 = vector.broadcast %cst_197 : f32 to vector<8x128xf32>
    %280 = arith.addf %279, %278 : vector<8x128xf32>
    %281 = arith.divf %279, %280 : vector<8x128xf32>
    %282 = vector.extract_strided_slice %281 {offsets = [0, 0], sizes = [8, 32], strides = [1, 1]} : vector<8x128xf32> to vector<8x32xf32>
    %283 = vector.extract_strided_slice %281 {offsets = [0, 32], sizes = [8, 32], strides = [1, 1]} : vector<8x128xf32> to vector<8x32xf32>
    %284 = vector.extract_strided_slice %281 {offsets = [0, 96], sizes = [8, 32], strides = [1, 1]} : vector<8x128xf32> to vector<8x32xf32>
    %285 = vector.extract_strided_slice %276 {offsets = [0, 64], sizes = [8, 32], strides = [1, 1]} : vector<8x128xf32> to vector<8x32xf32>
    %286 = math.tanh %285 : vector<8x32xf32>
    %c1_198 = arith.constant 1 : index
    %c0_199 = arith.constant 0 : index
    %c0_200 = arith.constant 0 : index
    %287 = vector.load %arg14[%c1_198, %c0_199, %c0_200] : memref<2x8x32xf32, #tpu.memory_space<vmem>>, vector<1x8x32xf32>
    %288 = vector.shape_cast %287 : vector<1x8x32xf32> to vector<8x32xf32>
    %289 = arith.mulf %283, %288 : vector<8x32xf32>
    %290 = arith.mulf %282, %286 : vector<8x32xf32>
    %291 = arith.addf %289, %290 : vector<8x32xf32>
    %292 = math.tanh %291 : vector<8x32xf32>
    %293 = arith.mulf %284, %292 : vector<8x32xf32>
    %c1_201 = arith.constant 1 : index
    %c0_202 = arith.constant 0 : index
    %c0_203 = arith.constant 0 : index
    %294 = vector.load %arg14[%c1_201, %c0_202, %c0_203] : memref<2x8x32xf32, #tpu.memory_space<vmem>>, vector<1x8x32xf32>
    %295 = vector.shape_cast %294 : vector<1x8x32xf32> to vector<8x32xf32>
    %296 = vector.shape_cast %291 : vector<8x32xf32> to vector<1x8x32xf32>
    tpu.vector_store %arg14[%c1_201, %c0_202, %c0_203], %296 {strides = array<i32>} : memref<2x8x32xf32, #tpu.memory_space<vmem>>, vector<1x8x32xf32>,
    %c1_204 = arith.constant 1 : index
    %c0_205 = arith.constant 0 : index
    %c0_206 = arith.constant 0 : index
    %297 = vector.load %arg13[%c1_204, %c0_205, %c0_206] : memref<2x8x32xf32, #tpu.memory_space<vmem>>, vector<1x8x32xf32>
    %298 = vector.shape_cast %297 : vector<1x8x32xf32> to vector<8x32xf32>
    %299 = vector.shape_cast %293 : vector<8x32xf32> to vector<1x8x32xf32>
    tpu.vector_store %arg13[%c1_204, %c0_205, %c0_206], %299 {strides = array<i32>} : memref<2x8x32xf32, #tpu.memory_space<vmem>>, vector<1x8x32xf32>,
    %c4 = arith.constant 4 : index
    %c0_207 = arith.constant 0 : index
    %c0_208 = arith.constant 0 : index
    %300 = vector.load %arg1[%c4, %c0_207, %c0_208] : memref<8x8x32xf32, #tpu.memory_space<vmem>>, vector<1x8x32xf32>
    %301 = vector.shape_cast %300 : vector<1x8x32xf32> to vector<8x32xf32>
    %c0_209 = arith.constant 0 : index
    %c0_210 = arith.constant 0 : index
    %c0_211 = arith.constant 0 : index
    %302 = vector.load %arg3[%c0_209, %c0_210, %c0_211] : memref<2x32x128xf32, #tpu.memory_space<vmem>>, vector<1x32x128xf32>
    %303 = vector.shape_cast %302 : vector<1x32x128xf32> to vector<32x128xf32>
    %cst_212 = arith.constant dense<0.000000e+00> : vector<8x128xf32>
    %304 = tpu.matmul %301, %303, %cst_212 {dimension_numbers = #tpu.dot_dimension_numbers<[1], [0], [0], [1], [0, 0, 1, 1], [], []>} : vector<8x32xf32>, vector<32x128xf32>, vector<8x128xf32> -> vector<8x128xf32>
    %c0_213 = arith.constant 0 : index
    %c0_214 = arith.constant 0 : index
    %c0_215 = arith.constant 0 : index
    %305 = vector.load %arg13[%c0_213, %c0_214, %c0_215] : memref<2x8x32xf32, #tpu.memory_space<vmem>>, vector<1x8x32xf32>
    %306 = vector.shape_cast %305 : vector<1x8x32xf32> to vector<8x32xf32>
    %c0_216 = arith.constant 0 : index
    %c0_217 = arith.constant 0 : index
    %c0_218 = arith.constant 0 : index
    %307 = vector.load %arg4[%c0_216, %c0_217, %c0_218] : memref<2x32x128xf32, #tpu.memory_space<vmem>>, vector<1x32x128xf32>
    %308 = vector.shape_cast %307 : vector<1x32x128xf32> to vector<32x128xf32>
    %cst_219 = arith.constant dense<0.000000e+00> : vector<8x128xf32>
    %309 = tpu.matmul %306, %308, %cst_219 {dimension_numbers = #tpu.dot_dimension_numbers<[1], [0], [0], [1], [0, 0, 1, 1], [], []>} : vector<8x32xf32>, vector<32x128xf32>, vector<8x128xf32> -> vector<8x128xf32>
    %310 = arith.addf %304, %309 : vector<8x128xf32>
    %c0_220 = arith.constant 0 : index
    %c0_221 = arith.constant 0 : index
    %c0_222 = arith.constant 0 : index
    %311 = vector.load %arg5[%c0_220, %c0_221, %c0_222] : memref<2x1x128xf32, #tpu.memory_space<vmem>>, vector<1x1x128xf32>
    %312 = vector.shape_cast %311 : vector<1x1x128xf32> to vector<1x128xf32>
    %313 = vector.broadcast %312 : vector<1x128xf32> to vector<8x128xf32>
    %314 = arith.addf %310, %313 : vector<8x128xf32>
    %315 = arith.negf %314 : vector<8x128xf32>
    %316 = math.exp %315 : vector<8x128xf32>
    %cst_223 = arith.constant 1.000000e+00 : f32
    %317 = vector.broadcast %cst_223 : f32 to vector<8x128xf32>
    %318 = arith.addf %317, %316 : vector<8x128xf32>
    %319 = arith.divf %317, %318 : vector<8x128xf32>
    %320 = vector.extract_strided_slice %319 {offsets = [0, 0], sizes = [8, 32], strides = [1, 1]} : vector<8x128xf32> to vector<8x32xf32>
    %321 = vector.extract_strided_slice %319 {offsets = [0, 32], sizes = [8, 32], strides = [1, 1]} : vector<8x128xf32> to vector<8x32xf32>
    %322 = vector.extract_strided_slice %319 {offsets = [0, 96], sizes = [8, 32], strides = [1, 1]} : vector<8x128xf32> to vector<8x32xf32>
    %323 = vector.extract_strided_slice %314 {offsets = [0, 64], sizes = [8, 32], strides = [1, 1]} : vector<8x128xf32> to vector<8x32xf32>
    %324 = math.tanh %323 : vector<8x32xf32>
    %c0_224 = arith.constant 0 : index
    %c0_225 = arith.constant 0 : index
    %c0_226 = arith.constant 0 : index
    %325 = vector.load %arg14[%c0_224, %c0_225, %c0_226] : memref<2x8x32xf32, #tpu.memory_space<vmem>>, vector<1x8x32xf32>
    %326 = vector.shape_cast %325 : vector<1x8x32xf32> to vector<8x32xf32>
    %327 = arith.mulf %321, %326 : vector<8x32xf32>
    %328 = arith.mulf %320, %324 : vector<8x32xf32>
    %329 = arith.addf %327, %328 : vector<8x32xf32>
    %330 = math.tanh %329 : vector<8x32xf32>
    %331 = arith.mulf %322, %330 : vector<8x32xf32>
    %c0_227 = arith.constant 0 : index
    %c0_228 = arith.constant 0 : index
    %c0_229 = arith.constant 0 : index
    %332 = vector.load %arg14[%c0_227, %c0_228, %c0_229] : memref<2x8x32xf32, #tpu.memory_space<vmem>>, vector<1x8x32xf32>
    %333 = vector.shape_cast %332 : vector<1x8x32xf32> to vector<8x32xf32>
    %334 = vector.shape_cast %329 : vector<8x32xf32> to vector<1x8x32xf32>
    tpu.vector_store %arg14[%c0_227, %c0_228, %c0_229], %334 {strides = array<i32>} : memref<2x8x32xf32, #tpu.memory_space<vmem>>, vector<1x8x32xf32>,
    %c0_230 = arith.constant 0 : index
    %c0_231 = arith.constant 0 : index
    %c0_232 = arith.constant 0 : index
    %335 = vector.load %arg13[%c0_230, %c0_231, %c0_232] : memref<2x8x32xf32, #tpu.memory_space<vmem>>, vector<1x8x32xf32>
    %336 = vector.shape_cast %335 : vector<1x8x32xf32> to vector<8x32xf32>
    %337 = vector.shape_cast %331 : vector<8x32xf32> to vector<1x8x32xf32>
    tpu.vector_store %arg13[%c0_230, %c0_231, %c0_232], %337 {strides = array<i32>} : memref<2x8x32xf32, #tpu.memory_space<vmem>>, vector<1x8x32xf32>,
    %c1_233 = arith.constant 1 : index
    %c0_234 = arith.constant 0 : index
    %c0_235 = arith.constant 0 : index
    %338 = vector.load %arg3[%c1_233, %c0_234, %c0_235] : memref<2x32x128xf32, #tpu.memory_space<vmem>>, vector<1x32x128xf32>
    %339 = vector.shape_cast %338 : vector<1x32x128xf32> to vector<32x128xf32>
    %cst_236 = arith.constant dense<0.000000e+00> : vector<8x128xf32>
    %340 = tpu.matmul %331, %339, %cst_236 {dimension_numbers = #tpu.dot_dimension_numbers<[1], [0], [0], [1], [0, 0, 1, 1], [], []>} : vector<8x32xf32>, vector<32x128xf32>, vector<8x128xf32> -> vector<8x128xf32>
    %c1_237 = arith.constant 1 : index
    %c0_238 = arith.constant 0 : index
    %c0_239 = arith.constant 0 : index
    %341 = vector.load %arg13[%c1_237, %c0_238, %c0_239] : memref<2x8x32xf32, #tpu.memory_space<vmem>>, vector<1x8x32xf32>
    %342 = vector.shape_cast %341 : vector<1x8x32xf32> to vector<8x32xf32>
    %c1_240 = arith.constant 1 : index
    %c0_241 = arith.constant 0 : index
    %c0_242 = arith.constant 0 : index
    %343 = vector.load %arg4[%c1_240, %c0_241, %c0_242] : memref<2x32x128xf32, #tpu.memory_space<vmem>>, vector<1x32x128xf32>
    %344 = vector.shape_cast %343 : vector<1x32x128xf32> to vector<32x128xf32>
    %cst_243 = arith.constant dense<0.000000e+00> : vector<8x128xf32>
    %345 = tpu.matmul %342, %344, %cst_243 {dimension_numbers = #tpu.dot_dimension_numbers<[1], [0], [0], [1], [0, 0, 1, 1], [], []>} : vector<8x32xf32>, vector<32x128xf32>, vector<8x128xf32> -> vector<8x128xf32>
    %346 = arith.addf %340, %345 : vector<8x128xf32>
    %c1_244 = arith.constant 1 : index
    %c0_245 = arith.constant 0 : index
    %c0_246 = arith.constant 0 : index
    %347 = vector.load %arg5[%c1_244, %c0_245, %c0_246] : memref<2x1x128xf32, #tpu.memory_space<vmem>>, vector<1x1x128xf32>
    %348 = vector.shape_cast %347 : vector<1x1x128xf32> to vector<1x128xf32>
    %349 = vector.broadcast %348 : vector<1x128xf32> to vector<8x128xf32>
    %350 = arith.addf %346, %349 : vector<8x128xf32>
    %351 = arith.negf %350 : vector<8x128xf32>
    %352 = math.exp %351 : vector<8x128xf32>
    %cst_247 = arith.constant 1.000000e+00 : f32
    %353 = vector.broadcast %cst_247 : f32 to vector<8x128xf32>
    %354 = arith.addf %353, %352 : vector<8x128xf32>
    %355 = arith.divf %353, %354 : vector<8x128xf32>
    %356 = vector.extract_strided_slice %355 {offsets = [0, 0], sizes = [8, 32], strides = [1, 1]} : vector<8x128xf32> to vector<8x32xf32>
    %357 = vector.extract_strided_slice %355 {offsets = [0, 32], sizes = [8, 32], strides = [1, 1]} : vector<8x128xf32> to vector<8x32xf32>
    %358 = vector.extract_strided_slice %355 {offsets = [0, 96], sizes = [8, 32], strides = [1, 1]} : vector<8x128xf32> to vector<8x32xf32>
    %359 = vector.extract_strided_slice %350 {offsets = [0, 64], sizes = [8, 32], strides = [1, 1]} : vector<8x128xf32> to vector<8x32xf32>
    %360 = math.tanh %359 : vector<8x32xf32>
    %c1_248 = arith.constant 1 : index
    %c0_249 = arith.constant 0 : index
    %c0_250 = arith.constant 0 : index
    %361 = vector.load %arg14[%c1_248, %c0_249, %c0_250] : memref<2x8x32xf32, #tpu.memory_space<vmem>>, vector<1x8x32xf32>
    %362 = vector.shape_cast %361 : vector<1x8x32xf32> to vector<8x32xf32>
    %363 = arith.mulf %357, %362 : vector<8x32xf32>
    %364 = arith.mulf %356, %360 : vector<8x32xf32>
    %365 = arith.addf %363, %364 : vector<8x32xf32>
    %366 = math.tanh %365 : vector<8x32xf32>
    %367 = arith.mulf %358, %366 : vector<8x32xf32>
    %c1_251 = arith.constant 1 : index
    %c0_252 = arith.constant 0 : index
    %c0_253 = arith.constant 0 : index
    %368 = vector.load %arg14[%c1_251, %c0_252, %c0_253] : memref<2x8x32xf32, #tpu.memory_space<vmem>>, vector<1x8x32xf32>
    %369 = vector.shape_cast %368 : vector<1x8x32xf32> to vector<8x32xf32>
    %370 = vector.shape_cast %365 : vector<8x32xf32> to vector<1x8x32xf32>
    tpu.vector_store %arg14[%c1_251, %c0_252, %c0_253], %370 {strides = array<i32>} : memref<2x8x32xf32, #tpu.memory_space<vmem>>, vector<1x8x32xf32>,
    %c1_254 = arith.constant 1 : index
    %c0_255 = arith.constant 0 : index
    %c0_256 = arith.constant 0 : index
    %371 = vector.load %arg13[%c1_254, %c0_255, %c0_256] : memref<2x8x32xf32, #tpu.memory_space<vmem>>, vector<1x8x32xf32>
    %372 = vector.shape_cast %371 : vector<1x8x32xf32> to vector<8x32xf32>
    %373 = vector.shape_cast %367 : vector<8x32xf32> to vector<1x8x32xf32>
    tpu.vector_store %arg13[%c1_254, %c0_255, %c0_256], %373 {strides = array<i32>} : memref<2x8x32xf32, #tpu.memory_space<vmem>>, vector<1x8x32xf32>,
    %c5 = arith.constant 5 : index
    %c0_257 = arith.constant 0 : index
    %c0_258 = arith.constant 0 : index
    %374 = vector.load %arg1[%c5, %c0_257, %c0_258] : memref<8x8x32xf32, #tpu.memory_space<vmem>>, vector<1x8x32xf32>
    %375 = vector.shape_cast %374 : vector<1x8x32xf32> to vector<8x32xf32>
    %c0_259 = arith.constant 0 : index
    %c0_260 = arith.constant 0 : index
    %c0_261 = arith.constant 0 : index
    %376 = vector.load %arg3[%c0_259, %c0_260, %c0_261] : memref<2x32x128xf32, #tpu.memory_space<vmem>>, vector<1x32x128xf32>
    %377 = vector.shape_cast %376 : vector<1x32x128xf32> to vector<32x128xf32>
    %cst_262 = arith.constant dense<0.000000e+00> : vector<8x128xf32>
    %378 = tpu.matmul %375, %377, %cst_262 {dimension_numbers = #tpu.dot_dimension_numbers<[1], [0], [0], [1], [0, 0, 1, 1], [], []>} : vector<8x32xf32>, vector<32x128xf32>, vector<8x128xf32> -> vector<8x128xf32>
    %c0_263 = arith.constant 0 : index
    %c0_264 = arith.constant 0 : index
    %c0_265 = arith.constant 0 : index
    %379 = vector.load %arg13[%c0_263, %c0_264, %c0_265] : memref<2x8x32xf32, #tpu.memory_space<vmem>>, vector<1x8x32xf32>
    %380 = vector.shape_cast %379 : vector<1x8x32xf32> to vector<8x32xf32>
    %c0_266 = arith.constant 0 : index
    %c0_267 = arith.constant 0 : index
    %c0_268 = arith.constant 0 : index
    %381 = vector.load %arg4[%c0_266, %c0_267, %c0_268] : memref<2x32x128xf32, #tpu.memory_space<vmem>>, vector<1x32x128xf32>
    %382 = vector.shape_cast %381 : vector<1x32x128xf32> to vector<32x128xf32>
    %cst_269 = arith.constant dense<0.000000e+00> : vector<8x128xf32>
    %383 = tpu.matmul %380, %382, %cst_269 {dimension_numbers = #tpu.dot_dimension_numbers<[1], [0], [0], [1], [0, 0, 1, 1], [], []>} : vector<8x32xf32>, vector<32x128xf32>, vector<8x128xf32> -> vector<8x128xf32>
    %384 = arith.addf %378, %383 : vector<8x128xf32>
    %c0_270 = arith.constant 0 : index
    %c0_271 = arith.constant 0 : index
    %c0_272 = arith.constant 0 : index
    %385 = vector.load %arg5[%c0_270, %c0_271, %c0_272] : memref<2x1x128xf32, #tpu.memory_space<vmem>>, vector<1x1x128xf32>
    %386 = vector.shape_cast %385 : vector<1x1x128xf32> to vector<1x128xf32>
    %387 = vector.broadcast %386 : vector<1x128xf32> to vector<8x128xf32>
    %388 = arith.addf %384, %387 : vector<8x128xf32>
    %389 = arith.negf %388 : vector<8x128xf32>
    %390 = math.exp %389 : vector<8x128xf32>
    %cst_273 = arith.constant 1.000000e+00 : f32
    %391 = vector.broadcast %cst_273 : f32 to vector<8x128xf32>
    %392 = arith.addf %391, %390 : vector<8x128xf32>
    %393 = arith.divf %391, %392 : vector<8x128xf32>
    %394 = vector.extract_strided_slice %393 {offsets = [0, 0], sizes = [8, 32], strides = [1, 1]} : vector<8x128xf32> to vector<8x32xf32>
    %395 = vector.extract_strided_slice %393 {offsets = [0, 32], sizes = [8, 32], strides = [1, 1]} : vector<8x128xf32> to vector<8x32xf32>
    %396 = vector.extract_strided_slice %393 {offsets = [0, 96], sizes = [8, 32], strides = [1, 1]} : vector<8x128xf32> to vector<8x32xf32>
    %397 = vector.extract_strided_slice %388 {offsets = [0, 64], sizes = [8, 32], strides = [1, 1]} : vector<8x128xf32> to vector<8x32xf32>
    %398 = math.tanh %397 : vector<8x32xf32>
    %c0_274 = arith.constant 0 : index
    %c0_275 = arith.constant 0 : index
    %c0_276 = arith.constant 0 : index
    %399 = vector.load %arg14[%c0_274, %c0_275, %c0_276] : memref<2x8x32xf32, #tpu.memory_space<vmem>>, vector<1x8x32xf32>
    %400 = vector.shape_cast %399 : vector<1x8x32xf32> to vector<8x32xf32>
    %401 = arith.mulf %395, %400 : vector<8x32xf32>
    %402 = arith.mulf %394, %398 : vector<8x32xf32>
    %403 = arith.addf %401, %402 : vector<8x32xf32>
    %404 = math.tanh %403 : vector<8x32xf32>
    %405 = arith.mulf %396, %404 : vector<8x32xf32>
    %c0_277 = arith.constant 0 : index
    %c0_278 = arith.constant 0 : index
    %c0_279 = arith.constant 0 : index
    %406 = vector.load %arg14[%c0_277, %c0_278, %c0_279] : memref<2x8x32xf32, #tpu.memory_space<vmem>>, vector<1x8x32xf32>
    %407 = vector.shape_cast %406 : vector<1x8x32xf32> to vector<8x32xf32>
    %408 = vector.shape_cast %403 : vector<8x32xf32> to vector<1x8x32xf32>
    tpu.vector_store %arg14[%c0_277, %c0_278, %c0_279], %408 {strides = array<i32>} : memref<2x8x32xf32, #tpu.memory_space<vmem>>, vector<1x8x32xf32>,
    %c0_280 = arith.constant 0 : index
    %c0_281 = arith.constant 0 : index
    %c0_282 = arith.constant 0 : index
    %409 = vector.load %arg13[%c0_280, %c0_281, %c0_282] : memref<2x8x32xf32, #tpu.memory_space<vmem>>, vector<1x8x32xf32>
    %410 = vector.shape_cast %409 : vector<1x8x32xf32> to vector<8x32xf32>
    %411 = vector.shape_cast %405 : vector<8x32xf32> to vector<1x8x32xf32>
    tpu.vector_store %arg13[%c0_280, %c0_281, %c0_282], %411 {strides = array<i32>} : memref<2x8x32xf32, #tpu.memory_space<vmem>>, vector<1x8x32xf32>,
    %c1_283 = arith.constant 1 : index
    %c0_284 = arith.constant 0 : index
    %c0_285 = arith.constant 0 : index
    %412 = vector.load %arg3[%c1_283, %c0_284, %c0_285] : memref<2x32x128xf32, #tpu.memory_space<vmem>>, vector<1x32x128xf32>
    %413 = vector.shape_cast %412 : vector<1x32x128xf32> to vector<32x128xf32>
    %cst_286 = arith.constant dense<0.000000e+00> : vector<8x128xf32>
    %414 = tpu.matmul %405, %413, %cst_286 {dimension_numbers = #tpu.dot_dimension_numbers<[1], [0], [0], [1], [0, 0, 1, 1], [], []>} : vector<8x32xf32>, vector<32x128xf32>, vector<8x128xf32> -> vector<8x128xf32>
    %c1_287 = arith.constant 1 : index
    %c0_288 = arith.constant 0 : index
    %c0_289 = arith.constant 0 : index
    %415 = vector.load %arg13[%c1_287, %c0_288, %c0_289] : memref<2x8x32xf32, #tpu.memory_space<vmem>>, vector<1x8x32xf32>
    %416 = vector.shape_cast %415 : vector<1x8x32xf32> to vector<8x32xf32>
    %c1_290 = arith.constant 1 : index
    %c0_291 = arith.constant 0 : index
    %c0_292 = arith.constant 0 : index
    %417 = vector.load %arg4[%c1_290, %c0_291, %c0_292] : memref<2x32x128xf32, #tpu.memory_space<vmem>>, vector<1x32x128xf32>
    %418 = vector.shape_cast %417 : vector<1x32x128xf32> to vector<32x128xf32>
    %cst_293 = arith.constant dense<0.000000e+00> : vector<8x128xf32>
    %419 = tpu.matmul %416, %418, %cst_293 {dimension_numbers = #tpu.dot_dimension_numbers<[1], [0], [0], [1], [0, 0, 1, 1], [], []>} : vector<8x32xf32>, vector<32x128xf32>, vector<8x128xf32> -> vector<8x128xf32>
    %420 = arith.addf %414, %419 : vector<8x128xf32>
    %c1_294 = arith.constant 1 : index
    %c0_295 = arith.constant 0 : index
    %c0_296 = arith.constant 0 : index
    %421 = vector.load %arg5[%c1_294, %c0_295, %c0_296] : memref<2x1x128xf32, #tpu.memory_space<vmem>>, vector<1x1x128xf32>
    %422 = vector.shape_cast %421 : vector<1x1x128xf32> to vector<1x128xf32>
    %423 = vector.broadcast %422 : vector<1x128xf32> to vector<8x128xf32>
    %424 = arith.addf %420, %423 : vector<8x128xf32>
    %425 = arith.negf %424 : vector<8x128xf32>
    %426 = math.exp %425 : vector<8x128xf32>
    %cst_297 = arith.constant 1.000000e+00 : f32
    %427 = vector.broadcast %cst_297 : f32 to vector<8x128xf32>
    %428 = arith.addf %427, %426 : vector<8x128xf32>
    %429 = arith.divf %427, %428 : vector<8x128xf32>
    %430 = vector.extract_strided_slice %429 {offsets = [0, 0], sizes = [8, 32], strides = [1, 1]} : vector<8x128xf32> to vector<8x32xf32>
    %431 = vector.extract_strided_slice %429 {offsets = [0, 32], sizes = [8, 32], strides = [1, 1]} : vector<8x128xf32> to vector<8x32xf32>
    %432 = vector.extract_strided_slice %429 {offsets = [0, 96], sizes = [8, 32], strides = [1, 1]} : vector<8x128xf32> to vector<8x32xf32>
    %433 = vector.extract_strided_slice %424 {offsets = [0, 64], sizes = [8, 32], strides = [1, 1]} : vector<8x128xf32> to vector<8x32xf32>
    %434 = math.tanh %433 : vector<8x32xf32>
    %c1_298 = arith.constant 1 : index
    %c0_299 = arith.constant 0 : index
    %c0_300 = arith.constant 0 : index
    %435 = vector.load %arg14[%c1_298, %c0_299, %c0_300] : memref<2x8x32xf32, #tpu.memory_space<vmem>>, vector<1x8x32xf32>
    %436 = vector.shape_cast %435 : vector<1x8x32xf32> to vector<8x32xf32>
    %437 = arith.mulf %431, %436 : vector<8x32xf32>
    %438 = arith.mulf %430, %434 : vector<8x32xf32>
    %439 = arith.addf %437, %438 : vector<8x32xf32>
    %440 = math.tanh %439 : vector<8x32xf32>
    %441 = arith.mulf %432, %440 : vector<8x32xf32>
    %c1_301 = arith.constant 1 : index
    %c0_302 = arith.constant 0 : index
    %c0_303 = arith.constant 0 : index
    %442 = vector.load %arg14[%c1_301, %c0_302, %c0_303] : memref<2x8x32xf32, #tpu.memory_space<vmem>>, vector<1x8x32xf32>
    %443 = vector.shape_cast %442 : vector<1x8x32xf32> to vector<8x32xf32>
    %444 = vector.shape_cast %439 : vector<8x32xf32> to vector<1x8x32xf32>
    tpu.vector_store %arg14[%c1_301, %c0_302, %c0_303], %444 {strides = array<i32>} : memref<2x8x32xf32, #tpu.memory_space<vmem>>, vector<1x8x32xf32>,
    %c1_304 = arith.constant 1 : index
    %c0_305 = arith.constant 0 : index
    %c0_306 = arith.constant 0 : index
    %445 = vector.load %arg13[%c1_304, %c0_305, %c0_306] : memref<2x8x32xf32, #tpu.memory_space<vmem>>, vector<1x8x32xf32>
    %446 = vector.shape_cast %445 : vector<1x8x32xf32> to vector<8x32xf32>
    %447 = vector.shape_cast %441 : vector<8x32xf32> to vector<1x8x32xf32>
    tpu.vector_store %arg13[%c1_304, %c0_305, %c0_306], %447 {strides = array<i32>} : memref<2x8x32xf32, #tpu.memory_space<vmem>>, vector<1x8x32xf32>,
    %c6 = arith.constant 6 : index
    %c0_307 = arith.constant 0 : index
    %c0_308 = arith.constant 0 : index
    %448 = vector.load %arg1[%c6, %c0_307, %c0_308] : memref<8x8x32xf32, #tpu.memory_space<vmem>>, vector<1x8x32xf32>
    %449 = vector.shape_cast %448 : vector<1x8x32xf32> to vector<8x32xf32>
    %c0_309 = arith.constant 0 : index
    %c0_310 = arith.constant 0 : index
    %c0_311 = arith.constant 0 : index
    %450 = vector.load %arg3[%c0_309, %c0_310, %c0_311] : memref<2x32x128xf32, #tpu.memory_space<vmem>>, vector<1x32x128xf32>
    %451 = vector.shape_cast %450 : vector<1x32x128xf32> to vector<32x128xf32>
    %cst_312 = arith.constant dense<0.000000e+00> : vector<8x128xf32>
    %452 = tpu.matmul %449, %451, %cst_312 {dimension_numbers = #tpu.dot_dimension_numbers<[1], [0], [0], [1], [0, 0, 1, 1], [], []>} : vector<8x32xf32>, vector<32x128xf32>, vector<8x128xf32> -> vector<8x128xf32>
    %c0_313 = arith.constant 0 : index
    %c0_314 = arith.constant 0 : index
    %c0_315 = arith.constant 0 : index
    %453 = vector.load %arg13[%c0_313, %c0_314, %c0_315] : memref<2x8x32xf32, #tpu.memory_space<vmem>>, vector<1x8x32xf32>
    %454 = vector.shape_cast %453 : vector<1x8x32xf32> to vector<8x32xf32>
    %c0_316 = arith.constant 0 : index
    %c0_317 = arith.constant 0 : index
    %c0_318 = arith.constant 0 : index
    %455 = vector.load %arg4[%c0_316, %c0_317, %c0_318] : memref<2x32x128xf32, #tpu.memory_space<vmem>>, vector<1x32x128xf32>
    %456 = vector.shape_cast %455 : vector<1x32x128xf32> to vector<32x128xf32>
    %cst_319 = arith.constant dense<0.000000e+00> : vector<8x128xf32>
    %457 = tpu.matmul %454, %456, %cst_319 {dimension_numbers = #tpu.dot_dimension_numbers<[1], [0], [0], [1], [0, 0, 1, 1], [], []>} : vector<8x32xf32>, vector<32x128xf32>, vector<8x128xf32> -> vector<8x128xf32>
    %458 = arith.addf %452, %457 : vector<8x128xf32>
    %c0_320 = arith.constant 0 : index
    %c0_321 = arith.constant 0 : index
    %c0_322 = arith.constant 0 : index
    %459 = vector.load %arg5[%c0_320, %c0_321, %c0_322] : memref<2x1x128xf32, #tpu.memory_space<vmem>>, vector<1x1x128xf32>
    %460 = vector.shape_cast %459 : vector<1x1x128xf32> to vector<1x128xf32>
    %461 = vector.broadcast %460 : vector<1x128xf32> to vector<8x128xf32>
    %462 = arith.addf %458, %461 : vector<8x128xf32>
    %463 = arith.negf %462 : vector<8x128xf32>
    %464 = math.exp %463 : vector<8x128xf32>
    %cst_323 = arith.constant 1.000000e+00 : f32
    %465 = vector.broadcast %cst_323 : f32 to vector<8x128xf32>
    %466 = arith.addf %465, %464 : vector<8x128xf32>
    %467 = arith.divf %465, %466 : vector<8x128xf32>
    %468 = vector.extract_strided_slice %467 {offsets = [0, 0], sizes = [8, 32], strides = [1, 1]} : vector<8x128xf32> to vector<8x32xf32>
    %469 = vector.extract_strided_slice %467 {offsets = [0, 32], sizes = [8, 32], strides = [1, 1]} : vector<8x128xf32> to vector<8x32xf32>
    %470 = vector.extract_strided_slice %467 {offsets = [0, 96], sizes = [8, 32], strides = [1, 1]} : vector<8x128xf32> to vector<8x32xf32>
    %471 = vector.extract_strided_slice %462 {offsets = [0, 64], sizes = [8, 32], strides = [1, 1]} : vector<8x128xf32> to vector<8x32xf32>
    %472 = math.tanh %471 : vector<8x32xf32>
    %c0_324 = arith.constant 0 : index
    %c0_325 = arith.constant 0 : index
    %c0_326 = arith.constant 0 : index
    %473 = vector.load %arg14[%c0_324, %c0_325, %c0_326] : memref<2x8x32xf32, #tpu.memory_space<vmem>>, vector<1x8x32xf32>
    %474 = vector.shape_cast %473 : vector<1x8x32xf32> to vector<8x32xf32>
    %475 = arith.mulf %469, %474 : vector<8x32xf32>
    %476 = arith.mulf %468, %472 : vector<8x32xf32>
    %477 = arith.addf %475, %476 : vector<8x32xf32>
    %478 = math.tanh %477 : vector<8x32xf32>
    %479 = arith.mulf %470, %478 : vector<8x32xf32>
    %c0_327 = arith.constant 0 : index
    %c0_328 = arith.constant 0 : index
    %c0_329 = arith.constant 0 : index
    %480 = vector.load %arg14[%c0_327, %c0_328, %c0_329] : memref<2x8x32xf32, #tpu.memory_space<vmem>>, vector<1x8x32xf32>
    %481 = vector.shape_cast %480 : vector<1x8x32xf32> to vector<8x32xf32>
    %482 = vector.shape_cast %477 : vector<8x32xf32> to vector<1x8x32xf32>
    tpu.vector_store %arg14[%c0_327, %c0_328, %c0_329], %482 {strides = array<i32>} : memref<2x8x32xf32, #tpu.memory_space<vmem>>, vector<1x8x32xf32>,
    %c0_330 = arith.constant 0 : index
    %c0_331 = arith.constant 0 : index
    %c0_332 = arith.constant 0 : index
    %483 = vector.load %arg13[%c0_330, %c0_331, %c0_332] : memref<2x8x32xf32, #tpu.memory_space<vmem>>, vector<1x8x32xf32>
    %484 = vector.shape_cast %483 : vector<1x8x32xf32> to vector<8x32xf32>
    %485 = vector.shape_cast %479 : vector<8x32xf32> to vector<1x8x32xf32>
    tpu.vector_store %arg13[%c0_330, %c0_331, %c0_332], %485 {strides = array<i32>} : memref<2x8x32xf32, #tpu.memory_space<vmem>>, vector<1x8x32xf32>,
    %c1_333 = arith.constant 1 : index
    %c0_334 = arith.constant 0 : index
    %c0_335 = arith.constant 0 : index
    %486 = vector.load %arg3[%c1_333, %c0_334, %c0_335] : memref<2x32x128xf32, #tpu.memory_space<vmem>>, vector<1x32x128xf32>
    %487 = vector.shape_cast %486 : vector<1x32x128xf32> to vector<32x128xf32>
    %cst_336 = arith.constant dense<0.000000e+00> : vector<8x128xf32>
    %488 = tpu.matmul %479, %487, %cst_336 {dimension_numbers = #tpu.dot_dimension_numbers<[1], [0], [0], [1], [0, 0, 1, 1], [], []>} : vector<8x32xf32>, vector<32x128xf32>, vector<8x128xf32> -> vector<8x128xf32>
    %c1_337 = arith.constant 1 : index
    %c0_338 = arith.constant 0 : index
    %c0_339 = arith.constant 0 : index
    %489 = vector.load %arg13[%c1_337, %c0_338, %c0_339] : memref<2x8x32xf32, #tpu.memory_space<vmem>>, vector<1x8x32xf32>
    %490 = vector.shape_cast %489 : vector<1x8x32xf32> to vector<8x32xf32>
    %c1_340 = arith.constant 1 : index
    %c0_341 = arith.constant 0 : index
    %c0_342 = arith.constant 0 : index
    %491 = vector.load %arg4[%c1_340, %c0_341, %c0_342] : memref<2x32x128xf32, #tpu.memory_space<vmem>>, vector<1x32x128xf32>
    %492 = vector.shape_cast %491 : vector<1x32x128xf32> to vector<32x128xf32>
    %cst_343 = arith.constant dense<0.000000e+00> : vector<8x128xf32>
    %493 = tpu.matmul %490, %492, %cst_343 {dimension_numbers = #tpu.dot_dimension_numbers<[1], [0], [0], [1], [0, 0, 1, 1], [], []>} : vector<8x32xf32>, vector<32x128xf32>, vector<8x128xf32> -> vector<8x128xf32>
    %494 = arith.addf %488, %493 : vector<8x128xf32>
    %c1_344 = arith.constant 1 : index
    %c0_345 = arith.constant 0 : index
    %c0_346 = arith.constant 0 : index
    %495 = vector.load %arg5[%c1_344, %c0_345, %c0_346] : memref<2x1x128xf32, #tpu.memory_space<vmem>>, vector<1x1x128xf32>
    %496 = vector.shape_cast %495 : vector<1x1x128xf32> to vector<1x128xf32>
    %497 = vector.broadcast %496 : vector<1x128xf32> to vector<8x128xf32>
    %498 = arith.addf %494, %497 : vector<8x128xf32>
    %499 = arith.negf %498 : vector<8x128xf32>
    %500 = math.exp %499 : vector<8x128xf32>
    %cst_347 = arith.constant 1.000000e+00 : f32
    %501 = vector.broadcast %cst_347 : f32 to vector<8x128xf32>
    %502 = arith.addf %501, %500 : vector<8x128xf32>
    %503 = arith.divf %501, %502 : vector<8x128xf32>
    %504 = vector.extract_strided_slice %503 {offsets = [0, 0], sizes = [8, 32], strides = [1, 1]} : vector<8x128xf32> to vector<8x32xf32>
    %505 = vector.extract_strided_slice %503 {offsets = [0, 32], sizes = [8, 32], strides = [1, 1]} : vector<8x128xf32> to vector<8x32xf32>
    %506 = vector.extract_strided_slice %503 {offsets = [0, 96], sizes = [8, 32], strides = [1, 1]} : vector<8x128xf32> to vector<8x32xf32>
    %507 = vector.extract_strided_slice %498 {offsets = [0, 64], sizes = [8, 32], strides = [1, 1]} : vector<8x128xf32> to vector<8x32xf32>
    %508 = math.tanh %507 : vector<8x32xf32>
    %c1_348 = arith.constant 1 : index
    %c0_349 = arith.constant 0 : index
    %c0_350 = arith.constant 0 : index
    %509 = vector.load %arg14[%c1_348, %c0_349, %c0_350] : memref<2x8x32xf32, #tpu.memory_space<vmem>>, vector<1x8x32xf32>
    %510 = vector.shape_cast %509 : vector<1x8x32xf32> to vector<8x32xf32>
    %511 = arith.mulf %505, %510 : vector<8x32xf32>
    %512 = arith.mulf %504, %508 : vector<8x32xf32>
    %513 = arith.addf %511, %512 : vector<8x32xf32>
    %514 = math.tanh %513 : vector<8x32xf32>
    %515 = arith.mulf %506, %514 : vector<8x32xf32>
    %c1_351 = arith.constant 1 : index
    %c0_352 = arith.constant 0 : index
    %c0_353 = arith.constant 0 : index
    %516 = vector.load %arg14[%c1_351, %c0_352, %c0_353] : memref<2x8x32xf32, #tpu.memory_space<vmem>>, vector<1x8x32xf32>
    %517 = vector.shape_cast %516 : vector<1x8x32xf32> to vector<8x32xf32>
    %518 = vector.shape_cast %513 : vector<8x32xf32> to vector<1x8x32xf32>
    tpu.vector_store %arg14[%c1_351, %c0_352, %c0_353], %518 {strides = array<i32>} : memref<2x8x32xf32, #tpu.memory_space<vmem>>, vector<1x8x32xf32>,
    %c1_354 = arith.constant 1 : index
    %c0_355 = arith.constant 0 : index
    %c0_356 = arith.constant 0 : index
    %519 = vector.load %arg13[%c1_354, %c0_355, %c0_356] : memref<2x8x32xf32, #tpu.memory_space<vmem>>, vector<1x8x32xf32>
    %520 = vector.shape_cast %519 : vector<1x8x32xf32> to vector<8x32xf32>
    %521 = vector.shape_cast %515 : vector<8x32xf32> to vector<1x8x32xf32>
    tpu.vector_store %arg13[%c1_354, %c0_355, %c0_356], %521 {strides = array<i32>} : memref<2x8x32xf32, #tpu.memory_space<vmem>>, vector<1x8x32xf32>,
    %c7 = arith.constant 7 : index
    %c0_357 = arith.constant 0 : index
    %c0_358 = arith.constant 0 : index
    %522 = vector.load %arg1[%c7, %c0_357, %c0_358] : memref<8x8x32xf32, #tpu.memory_space<vmem>>, vector<1x8x32xf32>
    %523 = vector.shape_cast %522 : vector<1x8x32xf32> to vector<8x32xf32>
    %c0_359 = arith.constant 0 : index
    %c0_360 = arith.constant 0 : index
    %c0_361 = arith.constant 0 : index
    %524 = vector.load %arg3[%c0_359, %c0_360, %c0_361] : memref<2x32x128xf32, #tpu.memory_space<vmem>>, vector<1x32x128xf32>
    %525 = vector.shape_cast %524 : vector<1x32x128xf32> to vector<32x128xf32>
    %cst_362 = arith.constant dense<0.000000e+00> : vector<8x128xf32>
    %526 = tpu.matmul %523, %525, %cst_362 {dimension_numbers = #tpu.dot_dimension_numbers<[1], [0], [0], [1], [0, 0, 1, 1], [], []>} : vector<8x32xf32>, vector<32x128xf32>, vector<8x128xf32> -> vector<8x128xf32>
    %c0_363 = arith.constant 0 : index
    %c0_364 = arith.constant 0 : index
    %c0_365 = arith.constant 0 : index
    %527 = vector.load %arg13[%c0_363, %c0_364, %c0_365] : memref<2x8x32xf32, #tpu.memory_space<vmem>>, vector<1x8x32xf32>
    %528 = vector.shape_cast %527 : vector<1x8x32xf32> to vector<8x32xf32>
    %c0_366 = arith.constant 0 : index
    %c0_367 = arith.constant 0 : index
    %c0_368 = arith.constant 0 : index
    %529 = vector.load %arg4[%c0_366, %c0_367, %c0_368] : memref<2x32x128xf32, #tpu.memory_space<vmem>>, vector<1x32x128xf32>
    %530 = vector.shape_cast %529 : vector<1x32x128xf32> to vector<32x128xf32>
    %cst_369 = arith.constant dense<0.000000e+00> : vector<8x128xf32>
    %531 = tpu.matmul %528, %530, %cst_369 {dimension_numbers = #tpu.dot_dimension_numbers<[1], [0], [0], [1], [0, 0, 1, 1], [], []>} : vector<8x32xf32>, vector<32x128xf32>, vector<8x128xf32> -> vector<8x128xf32>
    %532 = arith.addf %526, %531 : vector<8x128xf32>
    %c0_370 = arith.constant 0 : index
    %c0_371 = arith.constant 0 : index
    %c0_372 = arith.constant 0 : index
    %533 = vector.load %arg5[%c0_370, %c0_371, %c0_372] : memref<2x1x128xf32, #tpu.memory_space<vmem>>, vector<1x1x128xf32>
    %534 = vector.shape_cast %533 : vector<1x1x128xf32> to vector<1x128xf32>
    %535 = vector.broadcast %534 : vector<1x128xf32> to vector<8x128xf32>
    %536 = arith.addf %532, %535 : vector<8x128xf32>
    %537 = arith.negf %536 : vector<8x128xf32>
    %538 = math.exp %537 : vector<8x128xf32>
    %cst_373 = arith.constant 1.000000e+00 : f32
    %539 = vector.broadcast %cst_373 : f32 to vector<8x128xf32>
    %540 = arith.addf %539, %538 : vector<8x128xf32>
    %541 = arith.divf %539, %540 : vector<8x128xf32>
    %542 = vector.extract_strided_slice %541 {offsets = [0, 0], sizes = [8, 32], strides = [1, 1]} : vector<8x128xf32> to vector<8x32xf32>
    %543 = vector.extract_strided_slice %541 {offsets = [0, 32], sizes = [8, 32], strides = [1, 1]} : vector<8x128xf32> to vector<8x32xf32>
    %544 = vector.extract_strided_slice %541 {offsets = [0, 96], sizes = [8, 32], strides = [1, 1]} : vector<8x128xf32> to vector<8x32xf32>
    %545 = vector.extract_strided_slice %536 {offsets = [0, 64], sizes = [8, 32], strides = [1, 1]} : vector<8x128xf32> to vector<8x32xf32>
    %546 = math.tanh %545 : vector<8x32xf32>
    %c0_374 = arith.constant 0 : index
    %c0_375 = arith.constant 0 : index
    %c0_376 = arith.constant 0 : index
    %547 = vector.load %arg14[%c0_374, %c0_375, %c0_376] : memref<2x8x32xf32, #tpu.memory_space<vmem>>, vector<1x8x32xf32>
    %548 = vector.shape_cast %547 : vector<1x8x32xf32> to vector<8x32xf32>
    %549 = arith.mulf %543, %548 : vector<8x32xf32>
    %550 = arith.mulf %542, %546 : vector<8x32xf32>
    %551 = arith.addf %549, %550 : vector<8x32xf32>
    %552 = math.tanh %551 : vector<8x32xf32>
    %553 = arith.mulf %544, %552 : vector<8x32xf32>
    %c0_377 = arith.constant 0 : index
    %c0_378 = arith.constant 0 : index
    %c0_379 = arith.constant 0 : index
    %554 = vector.load %arg14[%c0_377, %c0_378, %c0_379] : memref<2x8x32xf32, #tpu.memory_space<vmem>>, vector<1x8x32xf32>
    %555 = vector.shape_cast %554 : vector<1x8x32xf32> to vector<8x32xf32>
    %556 = vector.shape_cast %551 : vector<8x32xf32> to vector<1x8x32xf32>
    tpu.vector_store %arg14[%c0_377, %c0_378, %c0_379], %556 {strides = array<i32>} : memref<2x8x32xf32, #tpu.memory_space<vmem>>, vector<1x8x32xf32>,
    %c0_380 = arith.constant 0 : index
    %c0_381 = arith.constant 0 : index
    %c0_382 = arith.constant 0 : index
    %557 = vector.load %arg13[%c0_380, %c0_381, %c0_382] : memref<2x8x32xf32, #tpu.memory_space<vmem>>, vector<1x8x32xf32>
    %558 = vector.shape_cast %557 : vector<1x8x32xf32> to vector<8x32xf32>
    %559 = vector.shape_cast %553 : vector<8x32xf32> to vector<1x8x32xf32>
    tpu.vector_store %arg13[%c0_380, %c0_381, %c0_382], %559 {strides = array<i32>} : memref<2x8x32xf32, #tpu.memory_space<vmem>>, vector<1x8x32xf32>,
    %c1_383 = arith.constant 1 : index
    %c0_384 = arith.constant 0 : index
    %c0_385 = arith.constant 0 : index
    %560 = vector.load %arg3[%c1_383, %c0_384, %c0_385] : memref<2x32x128xf32, #tpu.memory_space<vmem>>, vector<1x32x128xf32>
    %561 = vector.shape_cast %560 : vector<1x32x128xf32> to vector<32x128xf32>
    %cst_386 = arith.constant dense<0.000000e+00> : vector<8x128xf32>
    %562 = tpu.matmul %553, %561, %cst_386 {dimension_numbers = #tpu.dot_dimension_numbers<[1], [0], [0], [1], [0, 0, 1, 1], [], []>} : vector<8x32xf32>, vector<32x128xf32>, vector<8x128xf32> -> vector<8x128xf32>
    %c1_387 = arith.constant 1 : index
    %c0_388 = arith.constant 0 : index
    %c0_389 = arith.constant 0 : index
    %563 = vector.load %arg13[%c1_387, %c0_388, %c0_389] : memref<2x8x32xf32, #tpu.memory_space<vmem>>, vector<1x8x32xf32>
    %564 = vector.shape_cast %563 : vector<1x8x32xf32> to vector<8x32xf32>
    %c1_390 = arith.constant 1 : index
    %c0_391 = arith.constant 0 : index
    %c0_392 = arith.constant 0 : index
    %565 = vector.load %arg4[%c1_390, %c0_391, %c0_392] : memref<2x32x128xf32, #tpu.memory_space<vmem>>, vector<1x32x128xf32>
    %566 = vector.shape_cast %565 : vector<1x32x128xf32> to vector<32x128xf32>
    %cst_393 = arith.constant dense<0.000000e+00> : vector<8x128xf32>
    %567 = tpu.matmul %564, %566, %cst_393 {dimension_numbers = #tpu.dot_dimension_numbers<[1], [0], [0], [1], [0, 0, 1, 1], [], []>} : vector<8x32xf32>, vector<32x128xf32>, vector<8x128xf32> -> vector<8x128xf32>
    %568 = arith.addf %562, %567 : vector<8x128xf32>
    %c1_394 = arith.constant 1 : index
    %c0_395 = arith.constant 0 : index
    %c0_396 = arith.constant 0 : index
    %569 = vector.load %arg5[%c1_394, %c0_395, %c0_396] : memref<2x1x128xf32, #tpu.memory_space<vmem>>, vector<1x1x128xf32>
    %570 = vector.shape_cast %569 : vector<1x1x128xf32> to vector<1x128xf32>
    %571 = vector.broadcast %570 : vector<1x128xf32> to vector<8x128xf32>
    %572 = arith.addf %568, %571 : vector<8x128xf32>
    %573 = arith.negf %572 : vector<8x128xf32>
    %574 = math.exp %573 : vector<8x128xf32>
    %cst_397 = arith.constant 1.000000e+00 : f32
    %575 = vector.broadcast %cst_397 : f32 to vector<8x128xf32>
    %576 = arith.addf %575, %574 : vector<8x128xf32>
    %577 = arith.divf %575, %576 : vector<8x128xf32>
    %578 = vector.extract_strided_slice %577 {offsets = [0, 0], sizes = [8, 32], strides = [1, 1]} : vector<8x128xf32> to vector<8x32xf32>
    %579 = vector.extract_strided_slice %577 {offsets = [0, 32], sizes = [8, 32], strides = [1, 1]} : vector<8x128xf32> to vector<8x32xf32>
    %580 = vector.extract_strided_slice %577 {offsets = [0, 96], sizes = [8, 32], strides = [1, 1]} : vector<8x128xf32> to vector<8x32xf32>
    %581 = vector.extract_strided_slice %572 {offsets = [0, 64], sizes = [8, 32], strides = [1, 1]} : vector<8x128xf32> to vector<8x32xf32>
    %582 = math.tanh %581 : vector<8x32xf32>
    %c1_398 = arith.constant 1 : index
    %c0_399 = arith.constant 0 : index
    %c0_400 = arith.constant 0 : index
    %583 = vector.load %arg14[%c1_398, %c0_399, %c0_400] : memref<2x8x32xf32, #tpu.memory_space<vmem>>, vector<1x8x32xf32>
    %584 = vector.shape_cast %583 : vector<1x8x32xf32> to vector<8x32xf32>
    %585 = arith.mulf %579, %584 : vector<8x32xf32>
    %586 = arith.mulf %578, %582 : vector<8x32xf32>
    %587 = arith.addf %585, %586 : vector<8x32xf32>
    %588 = math.tanh %587 : vector<8x32xf32>
    %589 = arith.mulf %580, %588 : vector<8x32xf32>
    %c1_401 = arith.constant 1 : index
    %c0_402 = arith.constant 0 : index
    %c0_403 = arith.constant 0 : index
    %590 = vector.load %arg14[%c1_401, %c0_402, %c0_403] : memref<2x8x32xf32, #tpu.memory_space<vmem>>, vector<1x8x32xf32>
    %591 = vector.shape_cast %590 : vector<1x8x32xf32> to vector<8x32xf32>
    %592 = vector.shape_cast %587 : vector<8x32xf32> to vector<1x8x32xf32>
    tpu.vector_store %arg14[%c1_401, %c0_402, %c0_403], %592 {strides = array<i32>} : memref<2x8x32xf32, #tpu.memory_space<vmem>>, vector<1x8x32xf32>,
    %c1_404 = arith.constant 1 : index
    %c0_405 = arith.constant 0 : index
    %c0_406 = arith.constant 0 : index
    %593 = vector.load %arg13[%c1_404, %c0_405, %c0_406] : memref<2x8x32xf32, #tpu.memory_space<vmem>>, vector<1x8x32xf32>
    %594 = vector.shape_cast %593 : vector<1x8x32xf32> to vector<8x32xf32>
    %595 = vector.shape_cast %589 : vector<8x32xf32> to vector<1x8x32xf32>
    tpu.vector_store %arg13[%c1_404, %c0_405, %c0_406], %595 {strides = array<i32>} : memref<2x8x32xf32, #tpu.memory_space<vmem>>, vector<1x8x32xf32>,
    %cst_407 = arith.constant 0.000000e+00 : f32
    %596 = vector.broadcast %cst_407 : f32 to vector<8x128xf32>
    %c0_408 = arith.constant 0 : index
    %c0_409 = arith.constant 0 : index
    %c0_410 = arith.constant 0 : index
    %597 = vector.load %arg12[%c0_408, %c0_409, %c0_410] : memref<8x8x128xf32, #tpu.memory_space<vmem>>, vector<1x8x128xf32>
    %598 = vector.shape_cast %597 : vector<1x8x128xf32> to vector<8x128xf32>
    %599 = vector.shape_cast %596 : vector<8x128xf32> to vector<1x8x128xf32>
    tpu.vector_store %arg12[%c0_408, %c0_409, %c0_410], %599 {strides = array<i32>} : memref<8x8x128xf32, #tpu.memory_space<vmem>>, vector<1x8x128xf32>,
    %600 = tpu.iota {dimensions = array<i32: 1>} : vector<8x128xi32>
    %c0_411 = arith.constant 0 : index
    %c0_412 = arith.constant 0 : index
    %c0_413 = arith.constant 0 : index
    %601 = vector.load %arg2[%c0_411, %c0_412, %c0_413] : memref<8x8x32xf32, #tpu.memory_space<vmem>>, vector<1x8x32xf32>
    %602 = vector.shape_cast %601 : vector<1x8x32xf32> to vector<8x32xf32>
    %c0_414 = arith.constant 0 : index
    %c0_415 = arith.constant 0 : index
    %c0_416 = arith.constant 0 : index
    %603 = vector.load %arg6[%c0_414, %c0_415, %c0_416] : memref<2x32x128xf32, #tpu.memory_space<vmem>>, vector<1x32x128xf32>
    %604 = vector.shape_cast %603 : vector<1x32x128xf32> to vector<32x128xf32>
    %cst_417 = arith.constant dense<0.000000e+00> : vector<8x128xf32>
    %605 = tpu.matmul %602, %604, %cst_417 {dimension_numbers = #tpu.dot_dimension_numbers<[1], [0], [0], [1], [0, 0, 1, 1], [], []>} : vector<8x32xf32>, vector<32x128xf32>, vector<8x128xf32> -> vector<8x128xf32>
    %c0_418 = arith.constant 0 : index
    %c0_419 = arith.constant 0 : index
    %c0_420 = arith.constant 0 : index
    %606 = vector.load %arg13[%c0_418, %c0_419, %c0_420] : memref<2x8x32xf32, #tpu.memory_space<vmem>>, vector<1x8x32xf32>
    %607 = vector.shape_cast %606 : vector<1x8x32xf32> to vector<8x32xf32>
    %c0_421 = arith.constant 0 : index
    %c0_422 = arith.constant 0 : index
    %c0_423 = arith.constant 0 : index
    %608 = vector.load %arg7[%c0_421, %c0_422, %c0_423] : memref<2x32x128xf32, #tpu.memory_space<vmem>>, vector<1x32x128xf32>
    %609 = vector.shape_cast %608 : vector<1x32x128xf32> to vector<32x128xf32>
    %cst_424 = arith.constant dense<0.000000e+00> : vector<8x128xf32>
    %610 = tpu.matmul %607, %609, %cst_424 {dimension_numbers = #tpu.dot_dimension_numbers<[1], [0], [0], [1], [0, 0, 1, 1], [], []>} : vector<8x32xf32>, vector<32x128xf32>, vector<8x128xf32> -> vector<8x128xf32>
    %611 = arith.addf %605, %610 : vector<8x128xf32>
    %c0_425 = arith.constant 0 : index
    %c0_426 = arith.constant 0 : index
    %c0_427 = arith.constant 0 : index
    %612 = vector.load %arg8[%c0_425, %c0_426, %c0_427] : memref<2x1x128xf32, #tpu.memory_space<vmem>>, vector<1x1x128xf32>
    %613 = vector.shape_cast %612 : vector<1x1x128xf32> to vector<1x128xf32>
    %614 = vector.broadcast %613 : vector<1x128xf32> to vector<8x128xf32>
    %615 = arith.addf %611, %614 : vector<8x128xf32>
    %616 = arith.negf %615 : vector<8x128xf32>
    %617 = math.exp %616 : vector<8x128xf32>
    %cst_428 = arith.constant 1.000000e+00 : f32
    %618 = vector.broadcast %cst_428 : f32 to vector<8x128xf32>
    %619 = arith.addf %618, %617 : vector<8x128xf32>
    %620 = arith.divf %618, %619 : vector<8x128xf32>
    %621 = vector.extract_strided_slice %620 {offsets = [0, 0], sizes = [8, 32], strides = [1, 1]} : vector<8x128xf32> to vector<8x32xf32>
    %622 = vector.extract_strided_slice %620 {offsets = [0, 32], sizes = [8, 32], strides = [1, 1]} : vector<8x128xf32> to vector<8x32xf32>
    %623 = vector.extract_strided_slice %620 {offsets = [0, 96], sizes = [8, 32], strides = [1, 1]} : vector<8x128xf32> to vector<8x32xf32>
    %624 = vector.extract_strided_slice %615 {offsets = [0, 64], sizes = [8, 32], strides = [1, 1]} : vector<8x128xf32> to vector<8x32xf32>
    %625 = math.tanh %624 : vector<8x32xf32>
    %c0_429 = arith.constant 0 : index
    %c0_430 = arith.constant 0 : index
    %c0_431 = arith.constant 0 : index
    %626 = vector.load %arg14[%c0_429, %c0_430, %c0_431] : memref<2x8x32xf32, #tpu.memory_space<vmem>>, vector<1x8x32xf32>
    %627 = vector.shape_cast %626 : vector<1x8x32xf32> to vector<8x32xf32>
    %628 = arith.mulf %622, %627 : vector<8x32xf32>
    %629 = arith.mulf %621, %625 : vector<8x32xf32>
    %630 = arith.addf %628, %629 : vector<8x32xf32>
    %631 = math.tanh %630 : vector<8x32xf32>
    %632 = arith.mulf %623, %631 : vector<8x32xf32>
    %c0_432 = arith.constant 0 : index
    %c0_433 = arith.constant 0 : index
    %c0_434 = arith.constant 0 : index
    %633 = vector.load %arg14[%c0_432, %c0_433, %c0_434] : memref<2x8x32xf32, #tpu.memory_space<vmem>>, vector<1x8x32xf32>
    %634 = vector.shape_cast %633 : vector<1x8x32xf32> to vector<8x32xf32>
    %635 = vector.shape_cast %630 : vector<8x32xf32> to vector<1x8x32xf32>
    tpu.vector_store %arg14[%c0_432, %c0_433, %c0_434], %635 {strides = array<i32>} : memref<2x8x32xf32, #tpu.memory_space<vmem>>, vector<1x8x32xf32>,
    %c0_435 = arith.constant 0 : index
    %c0_436 = arith.constant 0 : index
    %c0_437 = arith.constant 0 : index
    %636 = vector.load %arg13[%c0_435, %c0_436, %c0_437] : memref<2x8x32xf32, #tpu.memory_space<vmem>>, vector<1x8x32xf32>
    %637 = vector.shape_cast %636 : vector<1x8x32xf32> to vector<8x32xf32>
    %638 = vector.shape_cast %632 : vector<8x32xf32> to vector<1x8x32xf32>
    tpu.vector_store %arg13[%c0_435, %c0_436, %c0_437], %638 {strides = array<i32>} : memref<2x8x32xf32, #tpu.memory_space<vmem>>, vector<1x8x32xf32>,
    %c1_438 = arith.constant 1 : index
    %c0_439 = arith.constant 0 : index
    %c0_440 = arith.constant 0 : index
    %639 = vector.load %arg6[%c1_438, %c0_439, %c0_440] : memref<2x32x128xf32, #tpu.memory_space<vmem>>, vector<1x32x128xf32>
    %640 = vector.shape_cast %639 : vector<1x32x128xf32> to vector<32x128xf32>
    %cst_441 = arith.constant dense<0.000000e+00> : vector<8x128xf32>
    %641 = tpu.matmul %632, %640, %cst_441 {dimension_numbers = #tpu.dot_dimension_numbers<[1], [0], [0], [1], [0, 0, 1, 1], [], []>} : vector<8x32xf32>, vector<32x128xf32>, vector<8x128xf32> -> vector<8x128xf32>
    %c1_442 = arith.constant 1 : index
    %c0_443 = arith.constant 0 : index
    %c0_444 = arith.constant 0 : index
    %642 = vector.load %arg13[%c1_442, %c0_443, %c0_444] : memref<2x8x32xf32, #tpu.memory_space<vmem>>, vector<1x8x32xf32>
    %643 = vector.shape_cast %642 : vector<1x8x32xf32> to vector<8x32xf32>
    %c1_445 = arith.constant 1 : index
    %c0_446 = arith.constant 0 : index
    %c0_447 = arith.constant 0 : index
    %644 = vector.load %arg7[%c1_445, %c0_446, %c0_447] : memref<2x32x128xf32, #tpu.memory_space<vmem>>, vector<1x32x128xf32>
    %645 = vector.shape_cast %644 : vector<1x32x128xf32> to vector<32x128xf32>
    %cst_448 = arith.constant dense<0.000000e+00> : vector<8x128xf32>
    %646 = tpu.matmul %643, %645, %cst_448 {dimension_numbers = #tpu.dot_dimension_numbers<[1], [0], [0], [1], [0, 0, 1, 1], [], []>} : vector<8x32xf32>, vector<32x128xf32>, vector<8x128xf32> -> vector<8x128xf32>
    %647 = arith.addf %641, %646 : vector<8x128xf32>
    %c1_449 = arith.constant 1 : index
    %c0_450 = arith.constant 0 : index
    %c0_451 = arith.constant 0 : index
    %648 = vector.load %arg8[%c1_449, %c0_450, %c0_451] : memref<2x1x128xf32, #tpu.memory_space<vmem>>, vector<1x1x128xf32>
    %649 = vector.shape_cast %648 : vector<1x1x128xf32> to vector<1x128xf32>
    %650 = vector.broadcast %649 : vector<1x128xf32> to vector<8x128xf32>
    %651 = arith.addf %647, %650 : vector<8x128xf32>
    %652 = arith.negf %651 : vector<8x128xf32>
    %653 = math.exp %652 : vector<8x128xf32>
    %cst_452 = arith.constant 1.000000e+00 : f32
    %654 = vector.broadcast %cst_452 : f32 to vector<8x128xf32>
    %655 = arith.addf %654, %653 : vector<8x128xf32>
    %656 = arith.divf %654, %655 : vector<8x128xf32>
    %657 = vector.extract_strided_slice %656 {offsets = [0, 0], sizes = [8, 32], strides = [1, 1]} : vector<8x128xf32> to vector<8x32xf32>
    %658 = vector.extract_strided_slice %656 {offsets = [0, 32], sizes = [8, 32], strides = [1, 1]} : vector<8x128xf32> to vector<8x32xf32>
    %659 = vector.extract_strided_slice %656 {offsets = [0, 96], sizes = [8, 32], strides = [1, 1]} : vector<8x128xf32> to vector<8x32xf32>
    %660 = vector.extract_strided_slice %651 {offsets = [0, 64], sizes = [8, 32], strides = [1, 1]} : vector<8x128xf32> to vector<8x32xf32>
    %661 = math.tanh %660 : vector<8x32xf32>
    %c1_453 = arith.constant 1 : index
    %c0_454 = arith.constant 0 : index
    %c0_455 = arith.constant 0 : index
    %662 = vector.load %arg14[%c1_453, %c0_454, %c0_455] : memref<2x8x32xf32, #tpu.memory_space<vmem>>, vector<1x8x32xf32>
    %663 = vector.shape_cast %662 : vector<1x8x32xf32> to vector<8x32xf32>
    %664 = arith.mulf %658, %663 : vector<8x32xf32>
    %665 = arith.mulf %657, %661 : vector<8x32xf32>
    %666 = arith.addf %664, %665 : vector<8x32xf32>
    %667 = math.tanh %666 : vector<8x32xf32>
    %668 = arith.mulf %659, %667 : vector<8x32xf32>
    %c1_456 = arith.constant 1 : index
    %c0_457 = arith.constant 0 : index
    %c0_458 = arith.constant 0 : index
    %669 = vector.load %arg14[%c1_456, %c0_457, %c0_458] : memref<2x8x32xf32, #tpu.memory_space<vmem>>, vector<1x8x32xf32>
    %670 = vector.shape_cast %669 : vector<1x8x32xf32> to vector<8x32xf32>
    %671 = vector.shape_cast %666 : vector<8x32xf32> to vector<1x8x32xf32>
    tpu.vector_store %arg14[%c1_456, %c0_457, %c0_458], %671 {strides = array<i32>} : memref<2x8x32xf32, #tpu.memory_space<vmem>>, vector<1x8x32xf32>,
    %c1_459 = arith.constant 1 : index
    %c0_460 = arith.constant 0 : index
    %c0_461 = arith.constant 0 : index
    %672 = vector.load %arg13[%c1_459, %c0_460, %c0_461] : memref<2x8x32xf32, #tpu.memory_space<vmem>>, vector<1x8x32xf32>
    %673 = vector.shape_cast %672 : vector<1x8x32xf32> to vector<8x32xf32>
    %674 = vector.shape_cast %668 : vector<8x32xf32> to vector<1x8x32xf32>
    tpu.vector_store %arg13[%c1_459, %c0_460, %c0_461], %674 {strides = array<i32>} : memref<2x8x32xf32, #tpu.memory_space<vmem>>, vector<1x8x32xf32>,
    %c0_462 = arith.constant 0 : index
    %c0_463 = arith.constant 0 : index
    %675 = vector.load %arg10[%c0_462, %c0_463] : memref<32x128xf32, #tpu.memory_space<vmem>>, vector<32x128xf32>
    %cst_464 = arith.constant dense<0.000000e+00> : vector<8x128xf32>
    %676 = tpu.matmul %668, %675, %cst_464 {dimension_numbers = #tpu.dot_dimension_numbers<[1], [0], [0], [1], [0, 0, 1, 1], [], []>} : vector<8x32xf32>, vector<32x128xf32>, vector<8x128xf32> -> vector<8x128xf32>
    %c0_465 = arith.constant 0 : index
    %c0_466 = arith.constant 0 : index
    %677 = vector.load %arg11[%c0_465, %c0_466] : memref<1x128xf32, #tpu.memory_space<vmem>>, vector<1x128xf32>
    %678 = vector.broadcast %677 : vector<1x128xf32> to vector<8x128xf32>
    %679 = arith.addf %676, %678 : vector<8x128xf32>
    %c1_467 = arith.constant 1 : index
    %c0_468 = arith.constant 0 : index
    %c0_469 = arith.constant 0 : index
    %680 = vector.load %arg12[%c1_467, %c0_468, %c0_469] : memref<8x8x128xf32, #tpu.memory_space<vmem>>, vector<1x8x128xf32>
    %681 = vector.shape_cast %680 : vector<1x8x128xf32> to vector<8x128xf32>
    %682 = vector.shape_cast %679 : vector<8x128xf32> to vector<1x8x128xf32>
    tpu.vector_store %arg12[%c1_467, %c0_468, %c0_469], %682 {strides = array<i32>} : memref<8x8x128xf32, #tpu.memory_space<vmem>>, vector<1x8x128xf32>,
    %cst_470 = arith.constant dense<0xFF800000> : vector<8xf32>
    %683 = vector.multi_reduction <maximumf>, %679, %cst_470 [1] : vector<8x128xf32> to vector<8xf32>
    %684 = vector.shape_cast %683 : vector<8xf32> to vector<8x1xf32>
    %685 = vector.broadcast %684 : vector<8x1xf32> to vector<8x128xf32>
    %686 = arith.cmpf oeq, %679, %685 : vector<8x128xf32>
    %c128_i32 = arith.constant 128 : i32
    %687 = vector.broadcast %c128_i32 : i32 to vector<8x128xi32>
    %688 = arith.select %686, %600, %687 : vector<8x128xi1>, vector<8x128xi32>
    %cst_471 = arith.constant dense<2147483647> : vector<8xi32>
    %689 = vector.multi_reduction <minsi>, %688, %cst_471 [1] : vector<8x128xi32> to vector<8xi32>
    %690 = vector.shape_cast %689 : vector<8xi32> to vector<8x1xi32>
    %691 = vector.broadcast %690 : vector<8x1xi32> to vector<8x128xi32>
    %692 = arith.cmpi eq, %600, %691 : vector<8x128xi32>
    %cst_472 = arith.constant 1.000000e+00 : f32
    %cst_473 = arith.constant 0.000000e+00 : f32
    %693 = vector.broadcast %cst_472 : f32 to vector<8x128xf32>
    %694 = vector.broadcast %cst_473 : f32 to vector<8x128xf32>
    %695 = arith.select %692, %693, %694 : vector<8x128xi1>, vector<8x128xf32>
    %c0_474 = arith.constant 0 : index
    %c0_475 = arith.constant 0 : index
    %696 = vector.load %arg9[%c0_474, %c0_475] : memref<128x32xf32, #tpu.memory_space<vmem>>, vector<128x32xf32>
    %cst_476 = arith.constant dense<0.000000e+00> : vector<8x32xf32>
    %697 = tpu.matmul %695, %696, %cst_476 {dimension_numbers = #tpu.dot_dimension_numbers<[1], [0], [0], [1], [0, 0, 1, 1], [], []>} : vector<8x128xf32>, vector<128x32xf32>, vector<8x32xf32> -> vector<8x32xf32>
    %c1_477 = arith.constant 1 : index
    %698 = memref.load %arg0[%c1_477] : memref<8xi32, #tpu.memory_space<smem>>
    %c0_i32 = arith.constant 0 : i32
    %699 = arith.cmpi sgt, %698, %c0_i32 : i32
    %cst_478 = arith.constant 1.000000e+00 : f32
    %cst_479 = arith.constant 0.000000e+00 : f32
    %700 = arith.select %699, %cst_478, %cst_479 : f32
    %c1_480 = arith.constant 1 : index
    %c0_481 = arith.constant 0 : index
    %c0_482 = arith.constant 0 : index
    %701 = vector.load %arg2[%c1_480, %c0_481, %c0_482] : memref<8x8x32xf32, #tpu.memory_space<vmem>>, vector<1x8x32xf32>
    %702 = vector.shape_cast %701 : vector<1x8x32xf32> to vector<8x32xf32>
    %703 = vector.broadcast %700 : f32 to vector<8x32xf32>
    %704 = arith.mulf %703, %702 : vector<8x32xf32>
    %cst_483 = arith.constant 1.000000e+00 : f32
    %705 = arith.subf %cst_483, %700 : f32
    %706 = vector.broadcast %705 : f32 to vector<8x32xf32>
    %707 = arith.mulf %706, %697 : vector<8x32xf32>
    %708 = arith.addf %704, %707 : vector<8x32xf32>
    %c0_484 = arith.constant 0 : index
    %c0_485 = arith.constant 0 : index
    %c0_486 = arith.constant 0 : index
    %709 = vector.load %arg6[%c0_484, %c0_485, %c0_486] : memref<2x32x128xf32, #tpu.memory_space<vmem>>, vector<1x32x128xf32>
    %710 = vector.shape_cast %709 : vector<1x32x128xf32> to vector<32x128xf32>
    %cst_487 = arith.constant dense<0.000000e+00> : vector<8x128xf32>
    %711 = tpu.matmul %708, %710, %cst_487 {dimension_numbers = #tpu.dot_dimension_numbers<[1], [0], [0], [1], [0, 0, 1, 1], [], []>} : vector<8x32xf32>, vector<32x128xf32>, vector<8x128xf32> -> vector<8x128xf32>
    %c0_488 = arith.constant 0 : index
    %c0_489 = arith.constant 0 : index
    %c0_490 = arith.constant 0 : index
    %712 = vector.load %arg13[%c0_488, %c0_489, %c0_490] : memref<2x8x32xf32, #tpu.memory_space<vmem>>, vector<1x8x32xf32>
    %713 = vector.shape_cast %712 : vector<1x8x32xf32> to vector<8x32xf32>
    %c0_491 = arith.constant 0 : index
    %c0_492 = arith.constant 0 : index
    %c0_493 = arith.constant 0 : index
    %714 = vector.load %arg7[%c0_491, %c0_492, %c0_493] : memref<2x32x128xf32, #tpu.memory_space<vmem>>, vector<1x32x128xf32>
    %715 = vector.shape_cast %714 : vector<1x32x128xf32> to vector<32x128xf32>
    %cst_494 = arith.constant dense<0.000000e+00> : vector<8x128xf32>
    %716 = tpu.matmul %713, %715, %cst_494 {dimension_numbers = #tpu.dot_dimension_numbers<[1], [0], [0], [1], [0, 0, 1, 1], [], []>} : vector<8x32xf32>, vector<32x128xf32>, vector<8x128xf32> -> vector<8x128xf32>
    %717 = arith.addf %711, %716 : vector<8x128xf32>
    %c0_495 = arith.constant 0 : index
    %c0_496 = arith.constant 0 : index
    %c0_497 = arith.constant 0 : index
    %718 = vector.load %arg8[%c0_495, %c0_496, %c0_497] : memref<2x1x128xf32, #tpu.memory_space<vmem>>, vector<1x1x128xf32>
    %719 = vector.shape_cast %718 : vector<1x1x128xf32> to vector<1x128xf32>
    %720 = vector.broadcast %719 : vector<1x128xf32> to vector<8x128xf32>
    %721 = arith.addf %717, %720 : vector<8x128xf32>
    %722 = arith.negf %721 : vector<8x128xf32>
    %723 = math.exp %722 : vector<8x128xf32>
    %cst_498 = arith.constant 1.000000e+00 : f32
    %724 = vector.broadcast %cst_498 : f32 to vector<8x128xf32>
    %725 = arith.addf %724, %723 : vector<8x128xf32>
    %726 = arith.divf %724, %725 : vector<8x128xf32>
    %727 = vector.extract_strided_slice %726 {offsets = [0, 0], sizes = [8, 32], strides = [1, 1]} : vector<8x128xf32> to vector<8x32xf32>
    %728 = vector.extract_strided_slice %726 {offsets = [0, 32], sizes = [8, 32], strides = [1, 1]} : vector<8x128xf32> to vector<8x32xf32>
    %729 = vector.extract_strided_slice %726 {offsets = [0, 96], sizes = [8, 32], strides = [1, 1]} : vector<8x128xf32> to vector<8x32xf32>
    %730 = vector.extract_strided_slice %721 {offsets = [0, 64], sizes = [8, 32], strides = [1, 1]} : vector<8x128xf32> to vector<8x32xf32>
    %731 = math.tanh %730 : vector<8x32xf32>
    %c0_499 = arith.constant 0 : index
    %c0_500 = arith.constant 0 : index
    %c0_501 = arith.constant 0 : index
    %732 = vector.load %arg14[%c0_499, %c0_500, %c0_501] : memref<2x8x32xf32, #tpu.memory_space<vmem>>, vector<1x8x32xf32>
    %733 = vector.shape_cast %732 : vector<1x8x32xf32> to vector<8x32xf32>
    %734 = arith.mulf %728, %733 : vector<8x32xf32>
    %735 = arith.mulf %727, %731 : vector<8x32xf32>
    %736 = arith.addf %734, %735 : vector<8x32xf32>
    %737 = math.tanh %736 : vector<8x32xf32>
    %738 = arith.mulf %729, %737 : vector<8x32xf32>
    %c0_502 = arith.constant 0 : index
    %c0_503 = arith.constant 0 : index
    %c0_504 = arith.constant 0 : index
    %739 = vector.load %arg14[%c0_502, %c0_503, %c0_504] : memref<2x8x32xf32, #tpu.memory_space<vmem>>, vector<1x8x32xf32>
    %740 = vector.shape_cast %739 : vector<1x8x32xf32> to vector<8x32xf32>
    %741 = vector.shape_cast %736 : vector<8x32xf32> to vector<1x8x32xf32>
    tpu.vector_store %arg14[%c0_502, %c0_503, %c0_504], %741 {strides = array<i32>} : memref<2x8x32xf32, #tpu.memory_space<vmem>>, vector<1x8x32xf32>,
    %c0_505 = arith.constant 0 : index
    %c0_506 = arith.constant 0 : index
    %c0_507 = arith.constant 0 : index
    %742 = vector.load %arg13[%c0_505, %c0_506, %c0_507] : memref<2x8x32xf32, #tpu.memory_space<vmem>>, vector<1x8x32xf32>
    %743 = vector.shape_cast %742 : vector<1x8x32xf32> to vector<8x32xf32>
    %744 = vector.shape_cast %738 : vector<8x32xf32> to vector<1x8x32xf32>
    tpu.vector_store %arg13[%c0_505, %c0_506, %c0_507], %744 {strides = array<i32>} : memref<2x8x32xf32, #tpu.memory_space<vmem>>, vector<1x8x32xf32>,
    %c1_508 = arith.constant 1 : index
    %c0_509 = arith.constant 0 : index
    %c0_510 = arith.constant 0 : index
    %745 = vector.load %arg6[%c1_508, %c0_509, %c0_510] : memref<2x32x128xf32, #tpu.memory_space<vmem>>, vector<1x32x128xf32>
    %746 = vector.shape_cast %745 : vector<1x32x128xf32> to vector<32x128xf32>
    %cst_511 = arith.constant dense<0.000000e+00> : vector<8x128xf32>
    %747 = tpu.matmul %738, %746, %cst_511 {dimension_numbers = #tpu.dot_dimension_numbers<[1], [0], [0], [1], [0, 0, 1, 1], [], []>} : vector<8x32xf32>, vector<32x128xf32>, vector<8x128xf32> -> vector<8x128xf32>
    %c1_512 = arith.constant 1 : index
    %c0_513 = arith.constant 0 : index
    %c0_514 = arith.constant 0 : index
    %748 = vector.load %arg13[%c1_512, %c0_513, %c0_514] : memref<2x8x32xf32, #tpu.memory_space<vmem>>, vector<1x8x32xf32>
    %749 = vector.shape_cast %748 : vector<1x8x32xf32> to vector<8x32xf32>
    %c1_515 = arith.constant 1 : index
    %c0_516 = arith.constant 0 : index
    %c0_517 = arith.constant 0 : index
    %750 = vector.load %arg7[%c1_515, %c0_516, %c0_517] : memref<2x32x128xf32, #tpu.memory_space<vmem>>, vector<1x32x128xf32>
    %751 = vector.shape_cast %750 : vector<1x32x128xf32> to vector<32x128xf32>
    %cst_518 = arith.constant dense<0.000000e+00> : vector<8x128xf32>
    %752 = tpu.matmul %749, %751, %cst_518 {dimension_numbers = #tpu.dot_dimension_numbers<[1], [0], [0], [1], [0, 0, 1, 1], [], []>} : vector<8x32xf32>, vector<32x128xf32>, vector<8x128xf32> -> vector<8x128xf32>
    %753 = arith.addf %747, %752 : vector<8x128xf32>
    %c1_519 = arith.constant 1 : index
    %c0_520 = arith.constant 0 : index
    %c0_521 = arith.constant 0 : index
    %754 = vector.load %arg8[%c1_519, %c0_520, %c0_521] : memref<2x1x128xf32, #tpu.memory_space<vmem>>, vector<1x1x128xf32>
    %755 = vector.shape_cast %754 : vector<1x1x128xf32> to vector<1x128xf32>
    %756 = vector.broadcast %755 : vector<1x128xf32> to vector<8x128xf32>
    %757 = arith.addf %753, %756 : vector<8x128xf32>
    %758 = arith.negf %757 : vector<8x128xf32>
    %759 = math.exp %758 : vector<8x128xf32>
    %cst_522 = arith.constant 1.000000e+00 : f32
    %760 = vector.broadcast %cst_522 : f32 to vector<8x128xf32>
    %761 = arith.addf %760, %759 : vector<8x128xf32>
    %762 = arith.divf %760, %761 : vector<8x128xf32>
    %763 = vector.extract_strided_slice %762 {offsets = [0, 0], sizes = [8, 32], strides = [1, 1]} : vector<8x128xf32> to vector<8x32xf32>
    %764 = vector.extract_strided_slice %762 {offsets = [0, 32], sizes = [8, 32], strides = [1, 1]} : vector<8x128xf32> to vector<8x32xf32>
    %765 = vector.extract_strided_slice %762 {offsets = [0, 96], sizes = [8, 32], strides = [1, 1]} : vector<8x128xf32> to vector<8x32xf32>
    %766 = vector.extract_strided_slice %757 {offsets = [0, 64], sizes = [8, 32], strides = [1, 1]} : vector<8x128xf32> to vector<8x32xf32>
    %767 = math.tanh %766 : vector<8x32xf32>
    %c1_523 = arith.constant 1 : index
    %c0_524 = arith.constant 0 : index
    %c0_525 = arith.constant 0 : index
    %768 = vector.load %arg14[%c1_523, %c0_524, %c0_525] : memref<2x8x32xf32, #tpu.memory_space<vmem>>, vector<1x8x32xf32>
    %769 = vector.shape_cast %768 : vector<1x8x32xf32> to vector<8x32xf32>
    %770 = arith.mulf %764, %769 : vector<8x32xf32>
    %771 = arith.mulf %763, %767 : vector<8x32xf32>
    %772 = arith.addf %770, %771 : vector<8x32xf32>
    %773 = math.tanh %772 : vector<8x32xf32>
    %774 = arith.mulf %765, %773 : vector<8x32xf32>
    %c1_526 = arith.constant 1 : index
    %c0_527 = arith.constant 0 : index
    %c0_528 = arith.constant 0 : index
    %775 = vector.load %arg14[%c1_526, %c0_527, %c0_528] : memref<2x8x32xf32, #tpu.memory_space<vmem>>, vector<1x8x32xf32>
    %776 = vector.shape_cast %775 : vector<1x8x32xf32> to vector<8x32xf32>
    %777 = vector.shape_cast %772 : vector<8x32xf32> to vector<1x8x32xf32>
    tpu.vector_store %arg14[%c1_526, %c0_527, %c0_528], %777 {strides = array<i32>} : memref<2x8x32xf32, #tpu.memory_space<vmem>>, vector<1x8x32xf32>,
    %c1_529 = arith.constant 1 : index
    %c0_530 = arith.constant 0 : index
    %c0_531 = arith.constant 0 : index
    %778 = vector.load %arg13[%c1_529, %c0_530, %c0_531] : memref<2x8x32xf32, #tpu.memory_space<vmem>>, vector<1x8x32xf32>
    %779 = vector.shape_cast %778 : vector<1x8x32xf32> to vector<8x32xf32>
    %780 = vector.shape_cast %774 : vector<8x32xf32> to vector<1x8x32xf32>
    tpu.vector_store %arg13[%c1_529, %c0_530, %c0_531], %780 {strides = array<i32>} : memref<2x8x32xf32, #tpu.memory_space<vmem>>, vector<1x8x32xf32>,
    %c0_532 = arith.constant 0 : index
    %c0_533 = arith.constant 0 : index
    %781 = vector.load %arg10[%c0_532, %c0_533] : memref<32x128xf32, #tpu.memory_space<vmem>>, vector<32x128xf32>
    %cst_534 = arith.constant dense<0.000000e+00> : vector<8x128xf32>
    %782 = tpu.matmul %774, %781, %cst_534 {dimension_numbers = #tpu.dot_dimension_numbers<[1], [0], [0], [1], [0, 0, 1, 1], [], []>} : vector<8x32xf32>, vector<32x128xf32>, vector<8x128xf32> -> vector<8x128xf32>
    %c0_535 = arith.constant 0 : index
    %c0_536 = arith.constant 0 : index
    %783 = vector.load %arg11[%c0_535, %c0_536] : memref<1x128xf32, #tpu.memory_space<vmem>>, vector<1x128xf32>
    %784 = vector.broadcast %783 : vector<1x128xf32> to vector<8x128xf32>
    %785 = arith.addf %782, %784 : vector<8x128xf32>
    %c2_537 = arith.constant 2 : index
    %c0_538 = arith.constant 0 : index
    %c0_539 = arith.constant 0 : index
    %786 = vector.load %arg12[%c2_537, %c0_538, %c0_539] : memref<8x8x128xf32, #tpu.memory_space<vmem>>, vector<1x8x128xf32>
    %787 = vector.shape_cast %786 : vector<1x8x128xf32> to vector<8x128xf32>
    %788 = vector.shape_cast %785 : vector<8x128xf32> to vector<1x8x128xf32>
    tpu.vector_store %arg12[%c2_537, %c0_538, %c0_539], %788 {strides = array<i32>} : memref<8x8x128xf32, #tpu.memory_space<vmem>>, vector<1x8x128xf32>,
    %cst_540 = arith.constant dense<0xFF800000> : vector<8xf32>
    %789 = vector.multi_reduction <maximumf>, %785, %cst_540 [1] : vector<8x128xf32> to vector<8xf32>
    %790 = vector.shape_cast %789 : vector<8xf32> to vector<8x1xf32>
    %791 = vector.broadcast %790 : vector<8x1xf32> to vector<8x128xf32>
    %792 = arith.cmpf oeq, %785, %791 : vector<8x128xf32>
    %c128_i32_541 = arith.constant 128 : i32
    %793 = vector.broadcast %c128_i32_541 : i32 to vector<8x128xi32>
    %794 = arith.select %792, %600, %793 : vector<8x128xi1>, vector<8x128xi32>
    %cst_542 = arith.constant dense<2147483647> : vector<8xi32>
    %795 = vector.multi_reduction <minsi>, %794, %cst_542 [1] : vector<8x128xi32> to vector<8xi32>
    %796 = vector.shape_cast %795 : vector<8xi32> to vector<8x1xi32>
    %797 = vector.broadcast %796 : vector<8x1xi32> to vector<8x128xi32>
    %798 = arith.cmpi eq, %600, %797 : vector<8x128xi32>
    %cst_543 = arith.constant 1.000000e+00 : f32
    %cst_544 = arith.constant 0.000000e+00 : f32
    %799 = vector.broadcast %cst_543 : f32 to vector<8x128xf32>
    %800 = vector.broadcast %cst_544 : f32 to vector<8x128xf32>
    %801 = arith.select %798, %799, %800 : vector<8x128xi1>, vector<8x128xf32>
    %c0_545 = arith.constant 0 : index
    %c0_546 = arith.constant 0 : index
    %802 = vector.load %arg9[%c0_545, %c0_546] : memref<128x32xf32, #tpu.memory_space<vmem>>, vector<128x32xf32>
    %cst_547 = arith.constant dense<0.000000e+00> : vector<8x32xf32>
    %803 = tpu.matmul %801, %802, %cst_547 {dimension_numbers = #tpu.dot_dimension_numbers<[1], [0], [0], [1], [0, 0, 1, 1], [], []>} : vector<8x128xf32>, vector<128x32xf32>, vector<8x32xf32> -> vector<8x32xf32>
    %c2_548 = arith.constant 2 : index
    %804 = memref.load %arg0[%c2_548] : memref<8xi32, #tpu.memory_space<smem>>
    %c0_i32_549 = arith.constant 0 : i32
    %805 = arith.cmpi sgt, %804, %c0_i32_549 : i32
    %cst_550 = arith.constant 1.000000e+00 : f32
    %cst_551 = arith.constant 0.000000e+00 : f32
    %806 = arith.select %805, %cst_550, %cst_551 : f32
    %c2_552 = arith.constant 2 : index
    %c0_553 = arith.constant 0 : index
    %c0_554 = arith.constant 0 : index
    %807 = vector.load %arg2[%c2_552, %c0_553, %c0_554] : memref<8x8x32xf32, #tpu.memory_space<vmem>>, vector<1x8x32xf32>
    %808 = vector.shape_cast %807 : vector<1x8x32xf32> to vector<8x32xf32>
    %809 = vector.broadcast %806 : f32 to vector<8x32xf32>
    %810 = arith.mulf %809, %808 : vector<8x32xf32>
    %cst_555 = arith.constant 1.000000e+00 : f32
    %811 = arith.subf %cst_555, %806 : f32
    %812 = vector.broadcast %811 : f32 to vector<8x32xf32>
    %813 = arith.mulf %812, %803 : vector<8x32xf32>
    %814 = arith.addf %810, %813 : vector<8x32xf32>
    %c0_556 = arith.constant 0 : index
    %c0_557 = arith.constant 0 : index
    %c0_558 = arith.constant 0 : index
    %815 = vector.load %arg6[%c0_556, %c0_557, %c0_558] : memref<2x32x128xf32, #tpu.memory_space<vmem>>, vector<1x32x128xf32>
    %816 = vector.shape_cast %815 : vector<1x32x128xf32> to vector<32x128xf32>
    %cst_559 = arith.constant dense<0.000000e+00> : vector<8x128xf32>
    %817 = tpu.matmul %814, %816, %cst_559 {dimension_numbers = #tpu.dot_dimension_numbers<[1], [0], [0], [1], [0, 0, 1, 1], [], []>} : vector<8x32xf32>, vector<32x128xf32>, vector<8x128xf32> -> vector<8x128xf32>
    %c0_560 = arith.constant 0 : index
    %c0_561 = arith.constant 0 : index
    %c0_562 = arith.constant 0 : index
    %818 = vector.load %arg13[%c0_560, %c0_561, %c0_562] : memref<2x8x32xf32, #tpu.memory_space<vmem>>, vector<1x8x32xf32>
    %819 = vector.shape_cast %818 : vector<1x8x32xf32> to vector<8x32xf32>
    %c0_563 = arith.constant 0 : index
    %c0_564 = arith.constant 0 : index
    %c0_565 = arith.constant 0 : index
    %820 = vector.load %arg7[%c0_563, %c0_564, %c0_565] : memref<2x32x128xf32, #tpu.memory_space<vmem>>, vector<1x32x128xf32>
    %821 = vector.shape_cast %820 : vector<1x32x128xf32> to vector<32x128xf32>
    %cst_566 = arith.constant dense<0.000000e+00> : vector<8x128xf32>
    %822 = tpu.matmul %819, %821, %cst_566 {dimension_numbers = #tpu.dot_dimension_numbers<[1], [0], [0], [1], [0, 0, 1, 1], [], []>} : vector<8x32xf32>, vector<32x128xf32>, vector<8x128xf32> -> vector<8x128xf32>
    %823 = arith.addf %817, %822 : vector<8x128xf32>
    %c0_567 = arith.constant 0 : index
    %c0_568 = arith.constant 0 : index
    %c0_569 = arith.constant 0 : index
    %824 = vector.load %arg8[%c0_567, %c0_568, %c0_569] : memref<2x1x128xf32, #tpu.memory_space<vmem>>, vector<1x1x128xf32>
    %825 = vector.shape_cast %824 : vector<1x1x128xf32> to vector<1x128xf32>
    %826 = vector.broadcast %825 : vector<1x128xf32> to vector<8x128xf32>
    %827 = arith.addf %823, %826 : vector<8x128xf32>
    %828 = arith.negf %827 : vector<8x128xf32>
    %829 = math.exp %828 : vector<8x128xf32>
    %cst_570 = arith.constant 1.000000e+00 : f32
    %830 = vector.broadcast %cst_570 : f32 to vector<8x128xf32>
    %831 = arith.addf %830, %829 : vector<8x128xf32>
    %832 = arith.divf %830, %831 : vector<8x128xf32>
    %833 = vector.extract_strided_slice %832 {offsets = [0, 0], sizes = [8, 32], strides = [1, 1]} : vector<8x128xf32> to vector<8x32xf32>
    %834 = vector.extract_strided_slice %832 {offsets = [0, 32], sizes = [8, 32], strides = [1, 1]} : vector<8x128xf32> to vector<8x32xf32>
    %835 = vector.extract_strided_slice %832 {offsets = [0, 96], sizes = [8, 32], strides = [1, 1]} : vector<8x128xf32> to vector<8x32xf32>
    %836 = vector.extract_strided_slice %827 {offsets = [0, 64], sizes = [8, 32], strides = [1, 1]} : vector<8x128xf32> to vector<8x32xf32>
    %837 = math.tanh %836 : vector<8x32xf32>
    %c0_571 = arith.constant 0 : index
    %c0_572 = arith.constant 0 : index
    %c0_573 = arith.constant 0 : index
    %838 = vector.load %arg14[%c0_571, %c0_572, %c0_573] : memref<2x8x32xf32, #tpu.memory_space<vmem>>, vector<1x8x32xf32>
    %839 = vector.shape_cast %838 : vector<1x8x32xf32> to vector<8x32xf32>
    %840 = arith.mulf %834, %839 : vector<8x32xf32>
    %841 = arith.mulf %833, %837 : vector<8x32xf32>
    %842 = arith.addf %840, %841 : vector<8x32xf32>
    %843 = math.tanh %842 : vector<8x32xf32>
    %844 = arith.mulf %835, %843 : vector<8x32xf32>
    %c0_574 = arith.constant 0 : index
    %c0_575 = arith.constant 0 : index
    %c0_576 = arith.constant 0 : index
    %845 = vector.load %arg14[%c0_574, %c0_575, %c0_576] : memref<2x8x32xf32, #tpu.memory_space<vmem>>, vector<1x8x32xf32>
    %846 = vector.shape_cast %845 : vector<1x8x32xf32> to vector<8x32xf32>
    %847 = vector.shape_cast %842 : vector<8x32xf32> to vector<1x8x32xf32>
    tpu.vector_store %arg14[%c0_574, %c0_575, %c0_576], %847 {strides = array<i32>} : memref<2x8x32xf32, #tpu.memory_space<vmem>>, vector<1x8x32xf32>,
    %c0_577 = arith.constant 0 : index
    %c0_578 = arith.constant 0 : index
    %c0_579 = arith.constant 0 : index
    %848 = vector.load %arg13[%c0_577, %c0_578, %c0_579] : memref<2x8x32xf32, #tpu.memory_space<vmem>>, vector<1x8x32xf32>
    %849 = vector.shape_cast %848 : vector<1x8x32xf32> to vector<8x32xf32>
    %850 = vector.shape_cast %844 : vector<8x32xf32> to vector<1x8x32xf32>
    tpu.vector_store %arg13[%c0_577, %c0_578, %c0_579], %850 {strides = array<i32>} : memref<2x8x32xf32, #tpu.memory_space<vmem>>, vector<1x8x32xf32>,
    %c1_580 = arith.constant 1 : index
    %c0_581 = arith.constant 0 : index
    %c0_582 = arith.constant 0 : index
    %851 = vector.load %arg6[%c1_580, %c0_581, %c0_582] : memref<2x32x128xf32, #tpu.memory_space<vmem>>, vector<1x32x128xf32>
    %852 = vector.shape_cast %851 : vector<1x32x128xf32> to vector<32x128xf32>
    %cst_583 = arith.constant dense<0.000000e+00> : vector<8x128xf32>
    %853 = tpu.matmul %844, %852, %cst_583 {dimension_numbers = #tpu.dot_dimension_numbers<[1], [0], [0], [1], [0, 0, 1, 1], [], []>} : vector<8x32xf32>, vector<32x128xf32>, vector<8x128xf32> -> vector<8x128xf32>
    %c1_584 = arith.constant 1 : index
    %c0_585 = arith.constant 0 : index
    %c0_586 = arith.constant 0 : index
    %854 = vector.load %arg13[%c1_584, %c0_585, %c0_586] : memref<2x8x32xf32, #tpu.memory_space<vmem>>, vector<1x8x32xf32>
    %855 = vector.shape_cast %854 : vector<1x8x32xf32> to vector<8x32xf32>
    %c1_587 = arith.constant 1 : index
    %c0_588 = arith.constant 0 : index
    %c0_589 = arith.constant 0 : index
    %856 = vector.load %arg7[%c1_587, %c0_588, %c0_589] : memref<2x32x128xf32, #tpu.memory_space<vmem>>, vector<1x32x128xf32>
    %857 = vector.shape_cast %856 : vector<1x32x128xf32> to vector<32x128xf32>
    %cst_590 = arith.constant dense<0.000000e+00> : vector<8x128xf32>
    %858 = tpu.matmul %855, %857, %cst_590 {dimension_numbers = #tpu.dot_dimension_numbers<[1], [0], [0], [1], [0, 0, 1, 1], [], []>} : vector<8x32xf32>, vector<32x128xf32>, vector<8x128xf32> -> vector<8x128xf32>
    %859 = arith.addf %853, %858 : vector<8x128xf32>
    %c1_591 = arith.constant 1 : index
    %c0_592 = arith.constant 0 : index
    %c0_593 = arith.constant 0 : index
    %860 = vector.load %arg8[%c1_591, %c0_592, %c0_593] : memref<2x1x128xf32, #tpu.memory_space<vmem>>, vector<1x1x128xf32>
    %861 = vector.shape_cast %860 : vector<1x1x128xf32> to vector<1x128xf32>
    %862 = vector.broadcast %861 : vector<1x128xf32> to vector<8x128xf32>
    %863 = arith.addf %859, %862 : vector<8x128xf32>
    %864 = arith.negf %863 : vector<8x128xf32>
    %865 = math.exp %864 : vector<8x128xf32>
    %cst_594 = arith.constant 1.000000e+00 : f32
    %866 = vector.broadcast %cst_594 : f32 to vector<8x128xf32>
    %867 = arith.addf %866, %865 : vector<8x128xf32>
    %868 = arith.divf %866, %867 : vector<8x128xf32>
    %869 = vector.extract_strided_slice %868 {offsets = [0, 0], sizes = [8, 32], strides = [1, 1]} : vector<8x128xf32> to vector<8x32xf32>
    %870 = vector.extract_strided_slice %868 {offsets = [0, 32], sizes = [8, 32], strides = [1, 1]} : vector<8x128xf32> to vector<8x32xf32>
    %871 = vector.extract_strided_slice %868 {offsets = [0, 96], sizes = [8, 32], strides = [1, 1]} : vector<8x128xf32> to vector<8x32xf32>
    %872 = vector.extract_strided_slice %863 {offsets = [0, 64], sizes = [8, 32], strides = [1, 1]} : vector<8x128xf32> to vector<8x32xf32>
    %873 = math.tanh %872 : vector<8x32xf32>
    %c1_595 = arith.constant 1 : index
    %c0_596 = arith.constant 0 : index
    %c0_597 = arith.constant 0 : index
    %874 = vector.load %arg14[%c1_595, %c0_596, %c0_597] : memref<2x8x32xf32, #tpu.memory_space<vmem>>, vector<1x8x32xf32>
    %875 = vector.shape_cast %874 : vector<1x8x32xf32> to vector<8x32xf32>
    %876 = arith.mulf %870, %875 : vector<8x32xf32>
    %877 = arith.mulf %869, %873 : vector<8x32xf32>
    %878 = arith.addf %876, %877 : vector<8x32xf32>
    %879 = math.tanh %878 : vector<8x32xf32>
    %880 = arith.mulf %871, %879 : vector<8x32xf32>
    %c1_598 = arith.constant 1 : index
    %c0_599 = arith.constant 0 : index
    %c0_600 = arith.constant 0 : index
    %881 = vector.load %arg14[%c1_598, %c0_599, %c0_600] : memref<2x8x32xf32, #tpu.memory_space<vmem>>, vector<1x8x32xf32>
    %882 = vector.shape_cast %881 : vector<1x8x32xf32> to vector<8x32xf32>
    %883 = vector.shape_cast %878 : vector<8x32xf32> to vector<1x8x32xf32>
    tpu.vector_store %arg14[%c1_598, %c0_599, %c0_600], %883 {strides = array<i32>} : memref<2x8x32xf32, #tpu.memory_space<vmem>>, vector<1x8x32xf32>,
    %c1_601 = arith.constant 1 : index
    %c0_602 = arith.constant 0 : index
    %c0_603 = arith.constant 0 : index
    %884 = vector.load %arg13[%c1_601, %c0_602, %c0_603] : memref<2x8x32xf32, #tpu.memory_space<vmem>>, vector<1x8x32xf32>
    %885 = vector.shape_cast %884 : vector<1x8x32xf32> to vector<8x32xf32>
    %886 = vector.shape_cast %880 : vector<8x32xf32> to vector<1x8x32xf32>
    tpu.vector_store %arg13[%c1_601, %c0_602, %c0_603], %886 {strides = array<i32>} : memref<2x8x32xf32, #tpu.memory_space<vmem>>, vector<1x8x32xf32>,
    %c0_604 = arith.constant 0 : index
    %c0_605 = arith.constant 0 : index
    %887 = vector.load %arg10[%c0_604, %c0_605] : memref<32x128xf32, #tpu.memory_space<vmem>>, vector<32x128xf32>
    %cst_606 = arith.constant dense<0.000000e+00> : vector<8x128xf32>
    %888 = tpu.matmul %880, %887, %cst_606 {dimension_numbers = #tpu.dot_dimension_numbers<[1], [0], [0], [1], [0, 0, 1, 1], [], []>} : vector<8x32xf32>, vector<32x128xf32>, vector<8x128xf32> -> vector<8x128xf32>
    %c0_607 = arith.constant 0 : index
    %c0_608 = arith.constant 0 : index
    %889 = vector.load %arg11[%c0_607, %c0_608] : memref<1x128xf32, #tpu.memory_space<vmem>>, vector<1x128xf32>
    %890 = vector.broadcast %889 : vector<1x128xf32> to vector<8x128xf32>
    %891 = arith.addf %888, %890 : vector<8x128xf32>
    %c3_609 = arith.constant 3 : index
    %c0_610 = arith.constant 0 : index
    %c0_611 = arith.constant 0 : index
    %892 = vector.load %arg12[%c3_609, %c0_610, %c0_611] : memref<8x8x128xf32, #tpu.memory_space<vmem>>, vector<1x8x128xf32>
    %893 = vector.shape_cast %892 : vector<1x8x128xf32> to vector<8x128xf32>
    %894 = vector.shape_cast %891 : vector<8x128xf32> to vector<1x8x128xf32>
    tpu.vector_store %arg12[%c3_609, %c0_610, %c0_611], %894 {strides = array<i32>} : memref<8x8x128xf32, #tpu.memory_space<vmem>>, vector<1x8x128xf32>,
    %cst_612 = arith.constant dense<0xFF800000> : vector<8xf32>
    %895 = vector.multi_reduction <maximumf>, %891, %cst_612 [1] : vector<8x128xf32> to vector<8xf32>
    %896 = vector.shape_cast %895 : vector<8xf32> to vector<8x1xf32>
    %897 = vector.broadcast %896 : vector<8x1xf32> to vector<8x128xf32>
    %898 = arith.cmpf oeq, %891, %897 : vector<8x128xf32>
    %c128_i32_613 = arith.constant 128 : i32
    %899 = vector.broadcast %c128_i32_613 : i32 to vector<8x128xi32>
    %900 = arith.select %898, %600, %899 : vector<8x128xi1>, vector<8x128xi32>
    %cst_614 = arith.constant dense<2147483647> : vector<8xi32>
    %901 = vector.multi_reduction <minsi>, %900, %cst_614 [1] : vector<8x128xi32> to vector<8xi32>
    %902 = vector.shape_cast %901 : vector<8xi32> to vector<8x1xi32>
    %903 = vector.broadcast %902 : vector<8x1xi32> to vector<8x128xi32>
    %904 = arith.cmpi eq, %600, %903 : vector<8x128xi32>
    %cst_615 = arith.constant 1.000000e+00 : f32
    %cst_616 = arith.constant 0.000000e+00 : f32
    %905 = vector.broadcast %cst_615 : f32 to vector<8x128xf32>
    %906 = vector.broadcast %cst_616 : f32 to vector<8x128xf32>
    %907 = arith.select %904, %905, %906 : vector<8x128xi1>, vector<8x128xf32>
    %c0_617 = arith.constant 0 : index
    %c0_618 = arith.constant 0 : index
    %908 = vector.load %arg9[%c0_617, %c0_618] : memref<128x32xf32, #tpu.memory_space<vmem>>, vector<128x32xf32>
    %cst_619 = arith.constant dense<0.000000e+00> : vector<8x32xf32>
    %909 = tpu.matmul %907, %908, %cst_619 {dimension_numbers = #tpu.dot_dimension_numbers<[1], [0], [0], [1], [0, 0, 1, 1], [], []>} : vector<8x128xf32>, vector<128x32xf32>, vector<8x32xf32> -> vector<8x32xf32>
    %c3_620 = arith.constant 3 : index
    %910 = memref.load %arg0[%c3_620] : memref<8xi32, #tpu.memory_space<smem>>
    %c0_i32_621 = arith.constant 0 : i32
    %911 = arith.cmpi sgt, %910, %c0_i32_621 : i32
    %cst_622 = arith.constant 1.000000e+00 : f32
    %cst_623 = arith.constant 0.000000e+00 : f32
    %912 = arith.select %911, %cst_622, %cst_623 : f32
    %c3_624 = arith.constant 3 : index
    %c0_625 = arith.constant 0 : index
    %c0_626 = arith.constant 0 : index
    %913 = vector.load %arg2[%c3_624, %c0_625, %c0_626] : memref<8x8x32xf32, #tpu.memory_space<vmem>>, vector<1x8x32xf32>
    %914 = vector.shape_cast %913 : vector<1x8x32xf32> to vector<8x32xf32>
    %915 = vector.broadcast %912 : f32 to vector<8x32xf32>
    %916 = arith.mulf %915, %914 : vector<8x32xf32>
    %cst_627 = arith.constant 1.000000e+00 : f32
    %917 = arith.subf %cst_627, %912 : f32
    %918 = vector.broadcast %917 : f32 to vector<8x32xf32>
    %919 = arith.mulf %918, %909 : vector<8x32xf32>
    %920 = arith.addf %916, %919 : vector<8x32xf32>
    %c0_628 = arith.constant 0 : index
    %c0_629 = arith.constant 0 : index
    %c0_630 = arith.constant 0 : index
    %921 = vector.load %arg6[%c0_628, %c0_629, %c0_630] : memref<2x32x128xf32, #tpu.memory_space<vmem>>, vector<1x32x128xf32>
    %922 = vector.shape_cast %921 : vector<1x32x128xf32> to vector<32x128xf32>
    %cst_631 = arith.constant dense<0.000000e+00> : vector<8x128xf32>
    %923 = tpu.matmul %920, %922, %cst_631 {dimension_numbers = #tpu.dot_dimension_numbers<[1], [0], [0], [1], [0, 0, 1, 1], [], []>} : vector<8x32xf32>, vector<32x128xf32>, vector<8x128xf32> -> vector<8x128xf32>
    %c0_632 = arith.constant 0 : index
    %c0_633 = arith.constant 0 : index
    %c0_634 = arith.constant 0 : index
    %924 = vector.load %arg13[%c0_632, %c0_633, %c0_634] : memref<2x8x32xf32, #tpu.memory_space<vmem>>, vector<1x8x32xf32>
    %925 = vector.shape_cast %924 : vector<1x8x32xf32> to vector<8x32xf32>
    %c0_635 = arith.constant 0 : index
    %c0_636 = arith.constant 0 : index
    %c0_637 = arith.constant 0 : index
    %926 = vector.load %arg7[%c0_635, %c0_636, %c0_637] : memref<2x32x128xf32, #tpu.memory_space<vmem>>, vector<1x32x128xf32>
    %927 = vector.shape_cast %926 : vector<1x32x128xf32> to vector<32x128xf32>
    %cst_638 = arith.constant dense<0.000000e+00> : vector<8x128xf32>
    %928 = tpu.matmul %925, %927, %cst_638 {dimension_numbers = #tpu.dot_dimension_numbers<[1], [0], [0], [1], [0, 0, 1, 1], [], []>} : vector<8x32xf32>, vector<32x128xf32>, vector<8x128xf32> -> vector<8x128xf32>
    %929 = arith.addf %923, %928 : vector<8x128xf32>
    %c0_639 = arith.constant 0 : index
    %c0_640 = arith.constant 0 : index
    %c0_641 = arith.constant 0 : index
    %930 = vector.load %arg8[%c0_639, %c0_640, %c0_641] : memref<2x1x128xf32, #tpu.memory_space<vmem>>, vector<1x1x128xf32>
    %931 = vector.shape_cast %930 : vector<1x1x128xf32> to vector<1x128xf32>
    %932 = vector.broadcast %931 : vector<1x128xf32> to vector<8x128xf32>
    %933 = arith.addf %929, %932 : vector<8x128xf32>
    %934 = arith.negf %933 : vector<8x128xf32>
    %935 = math.exp %934 : vector<8x128xf32>
    %cst_642 = arith.constant 1.000000e+00 : f32
    %936 = vector.broadcast %cst_642 : f32 to vector<8x128xf32>
    %937 = arith.addf %936, %935 : vector<8x128xf32>
    %938 = arith.divf %936, %937 : vector<8x128xf32>
    %939 = vector.extract_strided_slice %938 {offsets = [0, 0], sizes = [8, 32], strides = [1, 1]} : vector<8x128xf32> to vector<8x32xf32>
    %940 = vector.extract_strided_slice %938 {offsets = [0, 32], sizes = [8, 32], strides = [1, 1]} : vector<8x128xf32> to vector<8x32xf32>
    %941 = vector.extract_strided_slice %938 {offsets = [0, 96], sizes = [8, 32], strides = [1, 1]} : vector<8x128xf32> to vector<8x32xf32>
    %942 = vector.extract_strided_slice %933 {offsets = [0, 64], sizes = [8, 32], strides = [1, 1]} : vector<8x128xf32> to vector<8x32xf32>
    %943 = math.tanh %942 : vector<8x32xf32>
    %c0_643 = arith.constant 0 : index
    %c0_644 = arith.constant 0 : index
    %c0_645 = arith.constant 0 : index
    %944 = vector.load %arg14[%c0_643, %c0_644, %c0_645] : memref<2x8x32xf32, #tpu.memory_space<vmem>>, vector<1x8x32xf32>
    %945 = vector.shape_cast %944 : vector<1x8x32xf32> to vector<8x32xf32>
    %946 = arith.mulf %940, %945 : vector<8x32xf32>
    %947 = arith.mulf %939, %943 : vector<8x32xf32>
    %948 = arith.addf %946, %947 : vector<8x32xf32>
    %949 = math.tanh %948 : vector<8x32xf32>
    %950 = arith.mulf %941, %949 : vector<8x32xf32>
    %c0_646 = arith.constant 0 : index
    %c0_647 = arith.constant 0 : index
    %c0_648 = arith.constant 0 : index
    %951 = vector.load %arg14[%c0_646, %c0_647, %c0_648] : memref<2x8x32xf32, #tpu.memory_space<vmem>>, vector<1x8x32xf32>
    %952 = vector.shape_cast %951 : vector<1x8x32xf32> to vector<8x32xf32>
    %953 = vector.shape_cast %948 : vector<8x32xf32> to vector<1x8x32xf32>
    tpu.vector_store %arg14[%c0_646, %c0_647, %c0_648], %953 {strides = array<i32>} : memref<2x8x32xf32, #tpu.memory_space<vmem>>, vector<1x8x32xf32>,
    %c0_649 = arith.constant 0 : index
    %c0_650 = arith.constant 0 : index
    %c0_651 = arith.constant 0 : index
    %954 = vector.load %arg13[%c0_649, %c0_650, %c0_651] : memref<2x8x32xf32, #tpu.memory_space<vmem>>, vector<1x8x32xf32>
    %955 = vector.shape_cast %954 : vector<1x8x32xf32> to vector<8x32xf32>
    %956 = vector.shape_cast %950 : vector<8x32xf32> to vector<1x8x32xf32>
    tpu.vector_store %arg13[%c0_649, %c0_650, %c0_651], %956 {strides = array<i32>} : memref<2x8x32xf32, #tpu.memory_space<vmem>>, vector<1x8x32xf32>,
    %c1_652 = arith.constant 1 : index
    %c0_653 = arith.constant 0 : index
    %c0_654 = arith.constant 0 : index
    %957 = vector.load %arg6[%c1_652, %c0_653, %c0_654] : memref<2x32x128xf32, #tpu.memory_space<vmem>>, vector<1x32x128xf32>
    %958 = vector.shape_cast %957 : vector<1x32x128xf32> to vector<32x128xf32>
    %cst_655 = arith.constant dense<0.000000e+00> : vector<8x128xf32>
    %959 = tpu.matmul %950, %958, %cst_655 {dimension_numbers = #tpu.dot_dimension_numbers<[1], [0], [0], [1], [0, 0, 1, 1], [], []>} : vector<8x32xf32>, vector<32x128xf32>, vector<8x128xf32> -> vector<8x128xf32>
    %c1_656 = arith.constant 1 : index
    %c0_657 = arith.constant 0 : index
    %c0_658 = arith.constant 0 : index
    %960 = vector.load %arg13[%c1_656, %c0_657, %c0_658] : memref<2x8x32xf32, #tpu.memory_space<vmem>>, vector<1x8x32xf32>
    %961 = vector.shape_cast %960 : vector<1x8x32xf32> to vector<8x32xf32>
    %c1_659 = arith.constant 1 : index
    %c0_660 = arith.constant 0 : index
    %c0_661 = arith.constant 0 : index
    %962 = vector.load %arg7[%c1_659, %c0_660, %c0_661] : memref<2x32x128xf32, #tpu.memory_space<vmem>>, vector<1x32x128xf32>
    %963 = vector.shape_cast %962 : vector<1x32x128xf32> to vector<32x128xf32>
    %cst_662 = arith.constant dense<0.000000e+00> : vector<8x128xf32>
    %964 = tpu.matmul %961, %963, %cst_662 {dimension_numbers = #tpu.dot_dimension_numbers<[1], [0], [0], [1], [0, 0, 1, 1], [], []>} : vector<8x32xf32>, vector<32x128xf32>, vector<8x128xf32> -> vector<8x128xf32>
    %965 = arith.addf %959, %964 : vector<8x128xf32>
    %c1_663 = arith.constant 1 : index
    %c0_664 = arith.constant 0 : index
    %c0_665 = arith.constant 0 : index
    %966 = vector.load %arg8[%c1_663, %c0_664, %c0_665] : memref<2x1x128xf32, #tpu.memory_space<vmem>>, vector<1x1x128xf32>
    %967 = vector.shape_cast %966 : vector<1x1x128xf32> to vector<1x128xf32>
    %968 = vector.broadcast %967 : vector<1x128xf32> to vector<8x128xf32>
    %969 = arith.addf %965, %968 : vector<8x128xf32>
    %970 = arith.negf %969 : vector<8x128xf32>
    %971 = math.exp %970 : vector<8x128xf32>
    %cst_666 = arith.constant 1.000000e+00 : f32
    %972 = vector.broadcast %cst_666 : f32 to vector<8x128xf32>
    %973 = arith.addf %972, %971 : vector<8x128xf32>
    %974 = arith.divf %972, %973 : vector<8x128xf32>
    %975 = vector.extract_strided_slice %974 {offsets = [0, 0], sizes = [8, 32], strides = [1, 1]} : vector<8x128xf32> to vector<8x32xf32>
    %976 = vector.extract_strided_slice %974 {offsets = [0, 32], sizes = [8, 32], strides = [1, 1]} : vector<8x128xf32> to vector<8x32xf32>
    %977 = vector.extract_strided_slice %974 {offsets = [0, 96], sizes = [8, 32], strides = [1, 1]} : vector<8x128xf32> to vector<8x32xf32>
    %978 = vector.extract_strided_slice %969 {offsets = [0, 64], sizes = [8, 32], strides = [1, 1]} : vector<8x128xf32> to vector<8x32xf32>
    %979 = math.tanh %978 : vector<8x32xf32>
    %c1_667 = arith.constant 1 : index
    %c0_668 = arith.constant 0 : index
    %c0_669 = arith.constant 0 : index
    %980 = vector.load %arg14[%c1_667, %c0_668, %c0_669] : memref<2x8x32xf32, #tpu.memory_space<vmem>>, vector<1x8x32xf32>
    %981 = vector.shape_cast %980 : vector<1x8x32xf32> to vector<8x32xf32>
    %982 = arith.mulf %976, %981 : vector<8x32xf32>
    %983 = arith.mulf %975, %979 : vector<8x32xf32>
    %984 = arith.addf %982, %983 : vector<8x32xf32>
    %985 = math.tanh %984 : vector<8x32xf32>
    %986 = arith.mulf %977, %985 : vector<8x32xf32>
    %c1_670 = arith.constant 1 : index
    %c0_671 = arith.constant 0 : index
    %c0_672 = arith.constant 0 : index
    %987 = vector.load %arg14[%c1_670, %c0_671, %c0_672] : memref<2x8x32xf32, #tpu.memory_space<vmem>>, vector<1x8x32xf32>
    %988 = vector.shape_cast %987 : vector<1x8x32xf32> to vector<8x32xf32>
    %989 = vector.shape_cast %984 : vector<8x32xf32> to vector<1x8x32xf32>
    tpu.vector_store %arg14[%c1_670, %c0_671, %c0_672], %989 {strides = array<i32>} : memref<2x8x32xf32, #tpu.memory_space<vmem>>, vector<1x8x32xf32>,
    %c1_673 = arith.constant 1 : index
    %c0_674 = arith.constant 0 : index
    %c0_675 = arith.constant 0 : index
    %990 = vector.load %arg13[%c1_673, %c0_674, %c0_675] : memref<2x8x32xf32, #tpu.memory_space<vmem>>, vector<1x8x32xf32>
    %991 = vector.shape_cast %990 : vector<1x8x32xf32> to vector<8x32xf32>
    %992 = vector.shape_cast %986 : vector<8x32xf32> to vector<1x8x32xf32>
    tpu.vector_store %arg13[%c1_673, %c0_674, %c0_675], %992 {strides = array<i32>} : memref<2x8x32xf32, #tpu.memory_space<vmem>>, vector<1x8x32xf32>,
    %c0_676 = arith.constant 0 : index
    %c0_677 = arith.constant 0 : index
    %993 = vector.load %arg10[%c0_676, %c0_677] : memref<32x128xf32, #tpu.memory_space<vmem>>, vector<32x128xf32>
    %cst_678 = arith.constant dense<0.000000e+00> : vector<8x128xf32>
    %994 = tpu.matmul %986, %993, %cst_678 {dimension_numbers = #tpu.dot_dimension_numbers<[1], [0], [0], [1], [0, 0, 1, 1], [], []>} : vector<8x32xf32>, vector<32x128xf32>, vector<8x128xf32> -> vector<8x128xf32>
    %c0_679 = arith.constant 0 : index
    %c0_680 = arith.constant 0 : index
    %995 = vector.load %arg11[%c0_679, %c0_680] : memref<1x128xf32, #tpu.memory_space<vmem>>, vector<1x128xf32>
    %996 = vector.broadcast %995 : vector<1x128xf32> to vector<8x128xf32>
    %997 = arith.addf %994, %996 : vector<8x128xf32>
    %c4_681 = arith.constant 4 : index
    %c0_682 = arith.constant 0 : index
    %c0_683 = arith.constant 0 : index
    %998 = vector.load %arg12[%c4_681, %c0_682, %c0_683] : memref<8x8x128xf32, #tpu.memory_space<vmem>>, vector<1x8x128xf32>
    %999 = vector.shape_cast %998 : vector<1x8x128xf32> to vector<8x128xf32>
    %1000 = vector.shape_cast %997 : vector<8x128xf32> to vector<1x8x128xf32>
    tpu.vector_store %arg12[%c4_681, %c0_682, %c0_683], %1000 {strides = array<i32>} : memref<8x8x128xf32, #tpu.memory_space<vmem>>, vector<1x8x128xf32>,
    %cst_684 = arith.constant dense<0xFF800000> : vector<8xf32>
    %1001 = vector.multi_reduction <maximumf>, %997, %cst_684 [1] : vector<8x128xf32> to vector<8xf32>
    %1002 = vector.shape_cast %1001 : vector<8xf32> to vector<8x1xf32>
    %1003 = vector.broadcast %1002 : vector<8x1xf32> to vector<8x128xf32>
    %1004 = arith.cmpf oeq, %997, %1003 : vector<8x128xf32>
    %c128_i32_685 = arith.constant 128 : i32
    %1005 = vector.broadcast %c128_i32_685 : i32 to vector<8x128xi32>
    %1006 = arith.select %1004, %600, %1005 : vector<8x128xi1>, vector<8x128xi32>
    %cst_686 = arith.constant dense<2147483647> : vector<8xi32>
    %1007 = vector.multi_reduction <minsi>, %1006, %cst_686 [1] : vector<8x128xi32> to vector<8xi32>
    %1008 = vector.shape_cast %1007 : vector<8xi32> to vector<8x1xi32>
    %1009 = vector.broadcast %1008 : vector<8x1xi32> to vector<8x128xi32>
    %1010 = arith.cmpi eq, %600, %1009 : vector<8x128xi32>
    %cst_687 = arith.constant 1.000000e+00 : f32
    %cst_688 = arith.constant 0.000000e+00 : f32
    %1011 = vector.broadcast %cst_687 : f32 to vector<8x128xf32>
    %1012 = vector.broadcast %cst_688 : f32 to vector<8x128xf32>
    %1013 = arith.select %1010, %1011, %1012 : vector<8x128xi1>, vector<8x128xf32>
    %c0_689 = arith.constant 0 : index
    %c0_690 = arith.constant 0 : index
    %1014 = vector.load %arg9[%c0_689, %c0_690] : memref<128x32xf32, #tpu.memory_space<vmem>>, vector<128x32xf32>
    %cst_691 = arith.constant dense<0.000000e+00> : vector<8x32xf32>
    %1015 = tpu.matmul %1013, %1014, %cst_691 {dimension_numbers = #tpu.dot_dimension_numbers<[1], [0], [0], [1], [0, 0, 1, 1], [], []>} : vector<8x128xf32>, vector<128x32xf32>, vector<8x32xf32> -> vector<8x32xf32>
    %c4_692 = arith.constant 4 : index
    %1016 = memref.load %arg0[%c4_692] : memref<8xi32, #tpu.memory_space<smem>>
    %c0_i32_693 = arith.constant 0 : i32
    %1017 = arith.cmpi sgt, %1016, %c0_i32_693 : i32
    %cst_694 = arith.constant 1.000000e+00 : f32
    %cst_695 = arith.constant 0.000000e+00 : f32
    %1018 = arith.select %1017, %cst_694, %cst_695 : f32
    %c4_696 = arith.constant 4 : index
    %c0_697 = arith.constant 0 : index
    %c0_698 = arith.constant 0 : index
    %1019 = vector.load %arg2[%c4_696, %c0_697, %c0_698] : memref<8x8x32xf32, #tpu.memory_space<vmem>>, vector<1x8x32xf32>
    %1020 = vector.shape_cast %1019 : vector<1x8x32xf32> to vector<8x32xf32>
    %1021 = vector.broadcast %1018 : f32 to vector<8x32xf32>
    %1022 = arith.mulf %1021, %1020 : vector<8x32xf32>
    %cst_699 = arith.constant 1.000000e+00 : f32
    %1023 = arith.subf %cst_699, %1018 : f32
    %1024 = vector.broadcast %1023 : f32 to vector<8x32xf32>
    %1025 = arith.mulf %1024, %1015 : vector<8x32xf32>
    %1026 = arith.addf %1022, %1025 : vector<8x32xf32>
    %c0_700 = arith.constant 0 : index
    %c0_701 = arith.constant 0 : index
    %c0_702 = arith.constant 0 : index
    %1027 = vector.load %arg6[%c0_700, %c0_701, %c0_702] : memref<2x32x128xf32, #tpu.memory_space<vmem>>, vector<1x32x128xf32>
    %1028 = vector.shape_cast %1027 : vector<1x32x128xf32> to vector<32x128xf32>
    %cst_703 = arith.constant dense<0.000000e+00> : vector<8x128xf32>
    %1029 = tpu.matmul %1026, %1028, %cst_703 {dimension_numbers = #tpu.dot_dimension_numbers<[1], [0], [0], [1], [0, 0, 1, 1], [], []>} : vector<8x32xf32>, vector<32x128xf32>, vector<8x128xf32> -> vector<8x128xf32>
    %c0_704 = arith.constant 0 : index
    %c0_705 = arith.constant 0 : index
    %c0_706 = arith.constant 0 : index
    %1030 = vector.load %arg13[%c0_704, %c0_705, %c0_706] : memref<2x8x32xf32, #tpu.memory_space<vmem>>, vector<1x8x32xf32>
    %1031 = vector.shape_cast %1030 : vector<1x8x32xf32> to vector<8x32xf32>
    %c0_707 = arith.constant 0 : index
    %c0_708 = arith.constant 0 : index
    %c0_709 = arith.constant 0 : index
    %1032 = vector.load %arg7[%c0_707, %c0_708, %c0_709] : memref<2x32x128xf32, #tpu.memory_space<vmem>>, vector<1x32x128xf32>
    %1033 = vector.shape_cast %1032 : vector<1x32x128xf32> to vector<32x128xf32>
    %cst_710 = arith.constant dense<0.000000e+00> : vector<8x128xf32>
    %1034 = tpu.matmul %1031, %1033, %cst_710 {dimension_numbers = #tpu.dot_dimension_numbers<[1], [0], [0], [1], [0, 0, 1, 1], [], []>} : vector<8x32xf32>, vector<32x128xf32>, vector<8x128xf32> -> vector<8x128xf32>
    %1035 = arith.addf %1029, %1034 : vector<8x128xf32>
    %c0_711 = arith.constant 0 : index
    %c0_712 = arith.constant 0 : index
    %c0_713 = arith.constant 0 : index
    %1036 = vector.load %arg8[%c0_711, %c0_712, %c0_713] : memref<2x1x128xf32, #tpu.memory_space<vmem>>, vector<1x1x128xf32>
    %1037 = vector.shape_cast %1036 : vector<1x1x128xf32> to vector<1x128xf32>
    %1038 = vector.broadcast %1037 : vector<1x128xf32> to vector<8x128xf32>
    %1039 = arith.addf %1035, %1038 : vector<8x128xf32>
    %1040 = arith.negf %1039 : vector<8x128xf32>
    %1041 = math.exp %1040 : vector<8x128xf32>
    %cst_714 = arith.constant 1.000000e+00 : f32
    %1042 = vector.broadcast %cst_714 : f32 to vector<8x128xf32>
    %1043 = arith.addf %1042, %1041 : vector<8x128xf32>
    %1044 = arith.divf %1042, %1043 : vector<8x128xf32>
    %1045 = vector.extract_strided_slice %1044 {offsets = [0, 0], sizes = [8, 32], strides = [1, 1]} : vector<8x128xf32> to vector<8x32xf32>
    %1046 = vector.extract_strided_slice %1044 {offsets = [0, 32], sizes = [8, 32], strides = [1, 1]} : vector<8x128xf32> to vector<8x32xf32>
    %1047 = vector.extract_strided_slice %1044 {offsets = [0, 96], sizes = [8, 32], strides = [1, 1]} : vector<8x128xf32> to vector<8x32xf32>
    %1048 = vector.extract_strided_slice %1039 {offsets = [0, 64], sizes = [8, 32], strides = [1, 1]} : vector<8x128xf32> to vector<8x32xf32>
    %1049 = math.tanh %1048 : vector<8x32xf32>
    %c0_715 = arith.constant 0 : index
    %c0_716 = arith.constant 0 : index
    %c0_717 = arith.constant 0 : index
    %1050 = vector.load %arg14[%c0_715, %c0_716, %c0_717] : memref<2x8x32xf32, #tpu.memory_space<vmem>>, vector<1x8x32xf32>
    %1051 = vector.shape_cast %1050 : vector<1x8x32xf32> to vector<8x32xf32>
    %1052 = arith.mulf %1046, %1051 : vector<8x32xf32>
    %1053 = arith.mulf %1045, %1049 : vector<8x32xf32>
    %1054 = arith.addf %1052, %1053 : vector<8x32xf32>
    %1055 = math.tanh %1054 : vector<8x32xf32>
    %1056 = arith.mulf %1047, %1055 : vector<8x32xf32>
    %c0_718 = arith.constant 0 : index
    %c0_719 = arith.constant 0 : index
    %c0_720 = arith.constant 0 : index
    %1057 = vector.load %arg14[%c0_718, %c0_719, %c0_720] : memref<2x8x32xf32, #tpu.memory_space<vmem>>, vector<1x8x32xf32>
    %1058 = vector.shape_cast %1057 : vector<1x8x32xf32> to vector<8x32xf32>
    %1059 = vector.shape_cast %1054 : vector<8x32xf32> to vector<1x8x32xf32>
    tpu.vector_store %arg14[%c0_718, %c0_719, %c0_720], %1059 {strides = array<i32>} : memref<2x8x32xf32, #tpu.memory_space<vmem>>, vector<1x8x32xf32>,
    %c0_721 = arith.constant 0 : index
    %c0_722 = arith.constant 0 : index
    %c0_723 = arith.constant 0 : index
    %1060 = vector.load %arg13[%c0_721, %c0_722, %c0_723] : memref<2x8x32xf32, #tpu.memory_space<vmem>>, vector<1x8x32xf32>
    %1061 = vector.shape_cast %1060 : vector<1x8x32xf32> to vector<8x32xf32>
    %1062 = vector.shape_cast %1056 : vector<8x32xf32> to vector<1x8x32xf32>
    tpu.vector_store %arg13[%c0_721, %c0_722, %c0_723], %1062 {strides = array<i32>} : memref<2x8x32xf32, #tpu.memory_space<vmem>>, vector<1x8x32xf32>,
    %c1_724 = arith.constant 1 : index
    %c0_725 = arith.constant 0 : index
    %c0_726 = arith.constant 0 : index
    %1063 = vector.load %arg6[%c1_724, %c0_725, %c0_726] : memref<2x32x128xf32, #tpu.memory_space<vmem>>, vector<1x32x128xf32>
    %1064 = vector.shape_cast %1063 : vector<1x32x128xf32> to vector<32x128xf32>
    %cst_727 = arith.constant dense<0.000000e+00> : vector<8x128xf32>
    %1065 = tpu.matmul %1056, %1064, %cst_727 {dimension_numbers = #tpu.dot_dimension_numbers<[1], [0], [0], [1], [0, 0, 1, 1], [], []>} : vector<8x32xf32>, vector<32x128xf32>, vector<8x128xf32> -> vector<8x128xf32>
    %c1_728 = arith.constant 1 : index
    %c0_729 = arith.constant 0 : index
    %c0_730 = arith.constant 0 : index
    %1066 = vector.load %arg13[%c1_728, %c0_729, %c0_730] : memref<2x8x32xf32, #tpu.memory_space<vmem>>, vector<1x8x32xf32>
    %1067 = vector.shape_cast %1066 : vector<1x8x32xf32> to vector<8x32xf32>
    %c1_731 = arith.constant 1 : index
    %c0_732 = arith.constant 0 : index
    %c0_733 = arith.constant 0 : index
    %1068 = vector.load %arg7[%c1_731, %c0_732, %c0_733] : memref<2x32x128xf32, #tpu.memory_space<vmem>>, vector<1x32x128xf32>
    %1069 = vector.shape_cast %1068 : vector<1x32x128xf32> to vector<32x128xf32>
    %cst_734 = arith.constant dense<0.000000e+00> : vector<8x128xf32>
    %1070 = tpu.matmul %1067, %1069, %cst_734 {dimension_numbers = #tpu.dot_dimension_numbers<[1], [0], [0], [1], [0, 0, 1, 1], [], []>} : vector<8x32xf32>, vector<32x128xf32>, vector<8x128xf32> -> vector<8x128xf32>
    %1071 = arith.addf %1065, %1070 : vector<8x128xf32>
    %c1_735 = arith.constant 1 : index
    %c0_736 = arith.constant 0 : index
    %c0_737 = arith.constant 0 : index
    %1072 = vector.load %arg8[%c1_735, %c0_736, %c0_737] : memref<2x1x128xf32, #tpu.memory_space<vmem>>, vector<1x1x128xf32>
    %1073 = vector.shape_cast %1072 : vector<1x1x128xf32> to vector<1x128xf32>
    %1074 = vector.broadcast %1073 : vector<1x128xf32> to vector<8x128xf32>
    %1075 = arith.addf %1071, %1074 : vector<8x128xf32>
    %1076 = arith.negf %1075 : vector<8x128xf32>
    %1077 = math.exp %1076 : vector<8x128xf32>
    %cst_738 = arith.constant 1.000000e+00 : f32
    %1078 = vector.broadcast %cst_738 : f32 to vector<8x128xf32>
    %1079 = arith.addf %1078, %1077 : vector<8x128xf32>
    %1080 = arith.divf %1078, %1079 : vector<8x128xf32>
    %1081 = vector.extract_strided_slice %1080 {offsets = [0, 0], sizes = [8, 32], strides = [1, 1]} : vector<8x128xf32> to vector<8x32xf32>
    %1082 = vector.extract_strided_slice %1080 {offsets = [0, 32], sizes = [8, 32], strides = [1, 1]} : vector<8x128xf32> to vector<8x32xf32>
    %1083 = vector.extract_strided_slice %1080 {offsets = [0, 96], sizes = [8, 32], strides = [1, 1]} : vector<8x128xf32> to vector<8x32xf32>
    %1084 = vector.extract_strided_slice %1075 {offsets = [0, 64], sizes = [8, 32], strides = [1, 1]} : vector<8x128xf32> to vector<8x32xf32>
    %1085 = math.tanh %1084 : vector<8x32xf32>
    %c1_739 = arith.constant 1 : index
    %c0_740 = arith.constant 0 : index
    %c0_741 = arith.constant 0 : index
    %1086 = vector.load %arg14[%c1_739, %c0_740, %c0_741] : memref<2x8x32xf32, #tpu.memory_space<vmem>>, vector<1x8x32xf32>
    %1087 = vector.shape_cast %1086 : vector<1x8x32xf32> to vector<8x32xf32>
    %1088 = arith.mulf %1082, %1087 : vector<8x32xf32>
    %1089 = arith.mulf %1081, %1085 : vector<8x32xf32>
    %1090 = arith.addf %1088, %1089 : vector<8x32xf32>
    %1091 = math.tanh %1090 : vector<8x32xf32>
    %1092 = arith.mulf %1083, %1091 : vector<8x32xf32>
    %c1_742 = arith.constant 1 : index
    %c0_743 = arith.constant 0 : index
    %c0_744 = arith.constant 0 : index
    %1093 = vector.load %arg14[%c1_742, %c0_743, %c0_744] : memref<2x8x32xf32, #tpu.memory_space<vmem>>, vector<1x8x32xf32>
    %1094 = vector.shape_cast %1093 : vector<1x8x32xf32> to vector<8x32xf32>
    %1095 = vector.shape_cast %1090 : vector<8x32xf32> to vector<1x8x32xf32>
    tpu.vector_store %arg14[%c1_742, %c0_743, %c0_744], %1095 {strides = array<i32>} : memref<2x8x32xf32, #tpu.memory_space<vmem>>, vector<1x8x32xf32>,
    %c1_745 = arith.constant 1 : index
    %c0_746 = arith.constant 0 : index
    %c0_747 = arith.constant 0 : index
    %1096 = vector.load %arg13[%c1_745, %c0_746, %c0_747] : memref<2x8x32xf32, #tpu.memory_space<vmem>>, vector<1x8x32xf32>
    %1097 = vector.shape_cast %1096 : vector<1x8x32xf32> to vector<8x32xf32>
    %1098 = vector.shape_cast %1092 : vector<8x32xf32> to vector<1x8x32xf32>
    tpu.vector_store %arg13[%c1_745, %c0_746, %c0_747], %1098 {strides = array<i32>} : memref<2x8x32xf32, #tpu.memory_space<vmem>>, vector<1x8x32xf32>,
    %c0_748 = arith.constant 0 : index
    %c0_749 = arith.constant 0 : index
    %1099 = vector.load %arg10[%c0_748, %c0_749] : memref<32x128xf32, #tpu.memory_space<vmem>>, vector<32x128xf32>
    %cst_750 = arith.constant dense<0.000000e+00> : vector<8x128xf32>
    %1100 = tpu.matmul %1092, %1099, %cst_750 {dimension_numbers = #tpu.dot_dimension_numbers<[1], [0], [0], [1], [0, 0, 1, 1], [], []>} : vector<8x32xf32>, vector<32x128xf32>, vector<8x128xf32> -> vector<8x128xf32>
    %c0_751 = arith.constant 0 : index
    %c0_752 = arith.constant 0 : index
    %1101 = vector.load %arg11[%c0_751, %c0_752] : memref<1x128xf32, #tpu.memory_space<vmem>>, vector<1x128xf32>
    %1102 = vector.broadcast %1101 : vector<1x128xf32> to vector<8x128xf32>
    %1103 = arith.addf %1100, %1102 : vector<8x128xf32>
    %c5_753 = arith.constant 5 : index
    %c0_754 = arith.constant 0 : index
    %c0_755 = arith.constant 0 : index
    %1104 = vector.load %arg12[%c5_753, %c0_754, %c0_755] : memref<8x8x128xf32, #tpu.memory_space<vmem>>, vector<1x8x128xf32>
    %1105 = vector.shape_cast %1104 : vector<1x8x128xf32> to vector<8x128xf32>
    %1106 = vector.shape_cast %1103 : vector<8x128xf32> to vector<1x8x128xf32>
    tpu.vector_store %arg12[%c5_753, %c0_754, %c0_755], %1106 {strides = array<i32>} : memref<8x8x128xf32, #tpu.memory_space<vmem>>, vector<1x8x128xf32>,
    %cst_756 = arith.constant dense<0xFF800000> : vector<8xf32>
    %1107 = vector.multi_reduction <maximumf>, %1103, %cst_756 [1] : vector<8x128xf32> to vector<8xf32>
    %1108 = vector.shape_cast %1107 : vector<8xf32> to vector<8x1xf32>
    %1109 = vector.broadcast %1108 : vector<8x1xf32> to vector<8x128xf32>
    %1110 = arith.cmpf oeq, %1103, %1109 : vector<8x128xf32>
    %c128_i32_757 = arith.constant 128 : i32
    %1111 = vector.broadcast %c128_i32_757 : i32 to vector<8x128xi32>
    %1112 = arith.select %1110, %600, %1111 : vector<8x128xi1>, vector<8x128xi32>
    %cst_758 = arith.constant dense<2147483647> : vector<8xi32>
    %1113 = vector.multi_reduction <minsi>, %1112, %cst_758 [1] : vector<8x128xi32> to vector<8xi32>
    %1114 = vector.shape_cast %1113 : vector<8xi32> to vector<8x1xi32>
    %1115 = vector.broadcast %1114 : vector<8x1xi32> to vector<8x128xi32>
    %1116 = arith.cmpi eq, %600, %1115 : vector<8x128xi32>
    %cst_759 = arith.constant 1.000000e+00 : f32
    %cst_760 = arith.constant 0.000000e+00 : f32
    %1117 = vector.broadcast %cst_759 : f32 to vector<8x128xf32>
    %1118 = vector.broadcast %cst_760 : f32 to vector<8x128xf32>
    %1119 = arith.select %1116, %1117, %1118 : vector<8x128xi1>, vector<8x128xf32>
    %c0_761 = arith.constant 0 : index
    %c0_762 = arith.constant 0 : index
    %1120 = vector.load %arg9[%c0_761, %c0_762] : memref<128x32xf32, #tpu.memory_space<vmem>>, vector<128x32xf32>
    %cst_763 = arith.constant dense<0.000000e+00> : vector<8x32xf32>
    %1121 = tpu.matmul %1119, %1120, %cst_763 {dimension_numbers = #tpu.dot_dimension_numbers<[1], [0], [0], [1], [0, 0, 1, 1], [], []>} : vector<8x128xf32>, vector<128x32xf32>, vector<8x32xf32> -> vector<8x32xf32>
    %c5_764 = arith.constant 5 : index
    %1122 = memref.load %arg0[%c5_764] : memref<8xi32, #tpu.memory_space<smem>>
    %c0_i32_765 = arith.constant 0 : i32
    %1123 = arith.cmpi sgt, %1122, %c0_i32_765 : i32
    %cst_766 = arith.constant 1.000000e+00 : f32
    %cst_767 = arith.constant 0.000000e+00 : f32
    %1124 = arith.select %1123, %cst_766, %cst_767 : f32
    %c5_768 = arith.constant 5 : index
    %c0_769 = arith.constant 0 : index
    %c0_770 = arith.constant 0 : index
    %1125 = vector.load %arg2[%c5_768, %c0_769, %c0_770] : memref<8x8x32xf32, #tpu.memory_space<vmem>>, vector<1x8x32xf32>
    %1126 = vector.shape_cast %1125 : vector<1x8x32xf32> to vector<8x32xf32>
    %1127 = vector.broadcast %1124 : f32 to vector<8x32xf32>
    %1128 = arith.mulf %1127, %1126 : vector<8x32xf32>
    %cst_771 = arith.constant 1.000000e+00 : f32
    %1129 = arith.subf %cst_771, %1124 : f32
    %1130 = vector.broadcast %1129 : f32 to vector<8x32xf32>
    %1131 = arith.mulf %1130, %1121 : vector<8x32xf32>
    %1132 = arith.addf %1128, %1131 : vector<8x32xf32>
    %c0_772 = arith.constant 0 : index
    %c0_773 = arith.constant 0 : index
    %c0_774 = arith.constant 0 : index
    %1133 = vector.load %arg6[%c0_772, %c0_773, %c0_774] : memref<2x32x128xf32, #tpu.memory_space<vmem>>, vector<1x32x128xf32>
    %1134 = vector.shape_cast %1133 : vector<1x32x128xf32> to vector<32x128xf32>
    %cst_775 = arith.constant dense<0.000000e+00> : vector<8x128xf32>
    %1135 = tpu.matmul %1132, %1134, %cst_775 {dimension_numbers = #tpu.dot_dimension_numbers<[1], [0], [0], [1], [0, 0, 1, 1], [], []>} : vector<8x32xf32>, vector<32x128xf32>, vector<8x128xf32> -> vector<8x128xf32>
    %c0_776 = arith.constant 0 : index
    %c0_777 = arith.constant 0 : index
    %c0_778 = arith.constant 0 : index
    %1136 = vector.load %arg13[%c0_776, %c0_777, %c0_778] : memref<2x8x32xf32, #tpu.memory_space<vmem>>, vector<1x8x32xf32>
    %1137 = vector.shape_cast %1136 : vector<1x8x32xf32> to vector<8x32xf32>
    %c0_779 = arith.constant 0 : index
    %c0_780 = arith.constant 0 : index
    %c0_781 = arith.constant 0 : index
    %1138 = vector.load %arg7[%c0_779, %c0_780, %c0_781] : memref<2x32x128xf32, #tpu.memory_space<vmem>>, vector<1x32x128xf32>
    %1139 = vector.shape_cast %1138 : vector<1x32x128xf32> to vector<32x128xf32>
    %cst_782 = arith.constant dense<0.000000e+00> : vector<8x128xf32>
    %1140 = tpu.matmul %1137, %1139, %cst_782 {dimension_numbers = #tpu.dot_dimension_numbers<[1], [0], [0], [1], [0, 0, 1, 1], [], []>} : vector<8x32xf32>, vector<32x128xf32>, vector<8x128xf32> -> vector<8x128xf32>
    %1141 = arith.addf %1135, %1140 : vector<8x128xf32>
    %c0_783 = arith.constant 0 : index
    %c0_784 = arith.constant 0 : index
    %c0_785 = arith.constant 0 : index
    %1142 = vector.load %arg8[%c0_783, %c0_784, %c0_785] : memref<2x1x128xf32, #tpu.memory_space<vmem>>, vector<1x1x128xf32>
    %1143 = vector.shape_cast %1142 : vector<1x1x128xf32> to vector<1x128xf32>
    %1144 = vector.broadcast %1143 : vector<1x128xf32> to vector<8x128xf32>
    %1145 = arith.addf %1141, %1144 : vector<8x128xf32>
    %1146 = arith.negf %1145 : vector<8x128xf32>
    %1147 = math.exp %1146 : vector<8x128xf32>
    %cst_786 = arith.constant 1.000000e+00 : f32
    %1148 = vector.broadcast %cst_786 : f32 to vector<8x128xf32>
    %1149 = arith.addf %1148, %1147 : vector<8x128xf32>
    %1150 = arith.divf %1148, %1149 : vector<8x128xf32>
    %1151 = vector.extract_strided_slice %1150 {offsets = [0, 0], sizes = [8, 32], strides = [1, 1]} : vector<8x128xf32> to vector<8x32xf32>
    %1152 = vector.extract_strided_slice %1150 {offsets = [0, 32], sizes = [8, 32], strides = [1, 1]} : vector<8x128xf32> to vector<8x32xf32>
    %1153 = vector.extract_strided_slice %1150 {offsets = [0, 96], sizes = [8, 32], strides = [1, 1]} : vector<8x128xf32> to vector<8x32xf32>
    %1154 = vector.extract_strided_slice %1145 {offsets = [0, 64], sizes = [8, 32], strides = [1, 1]} : vector<8x128xf32> to vector<8x32xf32>
    %1155 = math.tanh %1154 : vector<8x32xf32>
    %c0_787 = arith.constant 0 : index
    %c0_788 = arith.constant 0 : index
    %c0_789 = arith.constant 0 : index
    %1156 = vector.load %arg14[%c0_787, %c0_788, %c0_789] : memref<2x8x32xf32, #tpu.memory_space<vmem>>, vector<1x8x32xf32>
    %1157 = vector.shape_cast %1156 : vector<1x8x32xf32> to vector<8x32xf32>
    %1158 = arith.mulf %1152, %1157 : vector<8x32xf32>
    %1159 = arith.mulf %1151, %1155 : vector<8x32xf32>
    %1160 = arith.addf %1158, %1159 : vector<8x32xf32>
    %1161 = math.tanh %1160 : vector<8x32xf32>
    %1162 = arith.mulf %1153, %1161 : vector<8x32xf32>
    %c0_790 = arith.constant 0 : index
    %c0_791 = arith.constant 0 : index
    %c0_792 = arith.constant 0 : index
    %1163 = vector.load %arg14[%c0_790, %c0_791, %c0_792] : memref<2x8x32xf32, #tpu.memory_space<vmem>>, vector<1x8x32xf32>
    %1164 = vector.shape_cast %1163 : vector<1x8x32xf32> to vector<8x32xf32>
    %1165 = vector.shape_cast %1160 : vector<8x32xf32> to vector<1x8x32xf32>
    tpu.vector_store %arg14[%c0_790, %c0_791, %c0_792], %1165 {strides = array<i32>} : memref<2x8x32xf32, #tpu.memory_space<vmem>>, vector<1x8x32xf32>,
    %c0_793 = arith.constant 0 : index
    %c0_794 = arith.constant 0 : index
    %c0_795 = arith.constant 0 : index
    %1166 = vector.load %arg13[%c0_793, %c0_794, %c0_795] : memref<2x8x32xf32, #tpu.memory_space<vmem>>, vector<1x8x32xf32>
    %1167 = vector.shape_cast %1166 : vector<1x8x32xf32> to vector<8x32xf32>
    %1168 = vector.shape_cast %1162 : vector<8x32xf32> to vector<1x8x32xf32>
    tpu.vector_store %arg13[%c0_793, %c0_794, %c0_795], %1168 {strides = array<i32>} : memref<2x8x32xf32, #tpu.memory_space<vmem>>, vector<1x8x32xf32>,
    %c1_796 = arith.constant 1 : index
    %c0_797 = arith.constant 0 : index
    %c0_798 = arith.constant 0 : index
    %1169 = vector.load %arg6[%c1_796, %c0_797, %c0_798] : memref<2x32x128xf32, #tpu.memory_space<vmem>>, vector<1x32x128xf32>
    %1170 = vector.shape_cast %1169 : vector<1x32x128xf32> to vector<32x128xf32>
    %cst_799 = arith.constant dense<0.000000e+00> : vector<8x128xf32>
    %1171 = tpu.matmul %1162, %1170, %cst_799 {dimension_numbers = #tpu.dot_dimension_numbers<[1], [0], [0], [1], [0, 0, 1, 1], [], []>} : vector<8x32xf32>, vector<32x128xf32>, vector<8x128xf32> -> vector<8x128xf32>
    %c1_800 = arith.constant 1 : index
    %c0_801 = arith.constant 0 : index
    %c0_802 = arith.constant 0 : index
    %1172 = vector.load %arg13[%c1_800, %c0_801, %c0_802] : memref<2x8x32xf32, #tpu.memory_space<vmem>>, vector<1x8x32xf32>
    %1173 = vector.shape_cast %1172 : vector<1x8x32xf32> to vector<8x32xf32>
    %c1_803 = arith.constant 1 : index
    %c0_804 = arith.constant 0 : index
    %c0_805 = arith.constant 0 : index
    %1174 = vector.load %arg7[%c1_803, %c0_804, %c0_805] : memref<2x32x128xf32, #tpu.memory_space<vmem>>, vector<1x32x128xf32>
    %1175 = vector.shape_cast %1174 : vector<1x32x128xf32> to vector<32x128xf32>
    %cst_806 = arith.constant dense<0.000000e+00> : vector<8x128xf32>
    %1176 = tpu.matmul %1173, %1175, %cst_806 {dimension_numbers = #tpu.dot_dimension_numbers<[1], [0], [0], [1], [0, 0, 1, 1], [], []>} : vector<8x32xf32>, vector<32x128xf32>, vector<8x128xf32> -> vector<8x128xf32>
    %1177 = arith.addf %1171, %1176 : vector<8x128xf32>
    %c1_807 = arith.constant 1 : index
    %c0_808 = arith.constant 0 : index
    %c0_809 = arith.constant 0 : index
    %1178 = vector.load %arg8[%c1_807, %c0_808, %c0_809] : memref<2x1x128xf32, #tpu.memory_space<vmem>>, vector<1x1x128xf32>
    %1179 = vector.shape_cast %1178 : vector<1x1x128xf32> to vector<1x128xf32>
    %1180 = vector.broadcast %1179 : vector<1x128xf32> to vector<8x128xf32>
    %1181 = arith.addf %1177, %1180 : vector<8x128xf32>
    %1182 = arith.negf %1181 : vector<8x128xf32>
    %1183 = math.exp %1182 : vector<8x128xf32>
    %cst_810 = arith.constant 1.000000e+00 : f32
    %1184 = vector.broadcast %cst_810 : f32 to vector<8x128xf32>
    %1185 = arith.addf %1184, %1183 : vector<8x128xf32>
    %1186 = arith.divf %1184, %1185 : vector<8x128xf32>
    %1187 = vector.extract_strided_slice %1186 {offsets = [0, 0], sizes = [8, 32], strides = [1, 1]} : vector<8x128xf32> to vector<8x32xf32>
    %1188 = vector.extract_strided_slice %1186 {offsets = [0, 32], sizes = [8, 32], strides = [1, 1]} : vector<8x128xf32> to vector<8x32xf32>
    %1189 = vector.extract_strided_slice %1186 {offsets = [0, 96], sizes = [8, 32], strides = [1, 1]} : vector<8x128xf32> to vector<8x32xf32>
    %1190 = vector.extract_strided_slice %1181 {offsets = [0, 64], sizes = [8, 32], strides = [1, 1]} : vector<8x128xf32> to vector<8x32xf32>
    %1191 = math.tanh %1190 : vector<8x32xf32>
    %c1_811 = arith.constant 1 : index
    %c0_812 = arith.constant 0 : index
    %c0_813 = arith.constant 0 : index
    %1192 = vector.load %arg14[%c1_811, %c0_812, %c0_813] : memref<2x8x32xf32, #tpu.memory_space<vmem>>, vector<1x8x32xf32>
    %1193 = vector.shape_cast %1192 : vector<1x8x32xf32> to vector<8x32xf32>
    %1194 = arith.mulf %1188, %1193 : vector<8x32xf32>
    %1195 = arith.mulf %1187, %1191 : vector<8x32xf32>
    %1196 = arith.addf %1194, %1195 : vector<8x32xf32>
    %1197 = math.tanh %1196 : vector<8x32xf32>
    %1198 = arith.mulf %1189, %1197 : vector<8x32xf32>
    %c1_814 = arith.constant 1 : index
    %c0_815 = arith.constant 0 : index
    %c0_816 = arith.constant 0 : index
    %1199 = vector.load %arg14[%c1_814, %c0_815, %c0_816] : memref<2x8x32xf32, #tpu.memory_space<vmem>>, vector<1x8x32xf32>
    %1200 = vector.shape_cast %1199 : vector<1x8x32xf32> to vector<8x32xf32>
    %1201 = vector.shape_cast %1196 : vector<8x32xf32> to vector<1x8x32xf32>
    tpu.vector_store %arg14[%c1_814, %c0_815, %c0_816], %1201 {strides = array<i32>} : memref<2x8x32xf32, #tpu.memory_space<vmem>>, vector<1x8x32xf32>,
    %c1_817 = arith.constant 1 : index
    %c0_818 = arith.constant 0 : index
    %c0_819 = arith.constant 0 : index
    %1202 = vector.load %arg13[%c1_817, %c0_818, %c0_819] : memref<2x8x32xf32, #tpu.memory_space<vmem>>, vector<1x8x32xf32>
    %1203 = vector.shape_cast %1202 : vector<1x8x32xf32> to vector<8x32xf32>
    %1204 = vector.shape_cast %1198 : vector<8x32xf32> to vector<1x8x32xf32>
    tpu.vector_store %arg13[%c1_817, %c0_818, %c0_819], %1204 {strides = array<i32>} : memref<2x8x32xf32, #tpu.memory_space<vmem>>, vector<1x8x32xf32>,
    %c0_820 = arith.constant 0 : index
    %c0_821 = arith.constant 0 : index
    %1205 = vector.load %arg10[%c0_820, %c0_821] : memref<32x128xf32, #tpu.memory_space<vmem>>, vector<32x128xf32>
    %cst_822 = arith.constant dense<0.000000e+00> : vector<8x128xf32>
    %1206 = tpu.matmul %1198, %1205, %cst_822 {dimension_numbers = #tpu.dot_dimension_numbers<[1], [0], [0], [1], [0, 0, 1, 1], [], []>} : vector<8x32xf32>, vector<32x128xf32>, vector<8x128xf32> -> vector<8x128xf32>
    %c0_823 = arith.constant 0 : index
    %c0_824 = arith.constant 0 : index
    %1207 = vector.load %arg11[%c0_823, %c0_824] : memref<1x128xf32, #tpu.memory_space<vmem>>, vector<1x128xf32>
    %1208 = vector.broadcast %1207 : vector<1x128xf32> to vector<8x128xf32>
    %1209 = arith.addf %1206, %1208 : vector<8x128xf32>
    %c6_825 = arith.constant 6 : index
    %c0_826 = arith.constant 0 : index
    %c0_827 = arith.constant 0 : index
    %1210 = vector.load %arg12[%c6_825, %c0_826, %c0_827] : memref<8x8x128xf32, #tpu.memory_space<vmem>>, vector<1x8x128xf32>
    %1211 = vector.shape_cast %1210 : vector<1x8x128xf32> to vector<8x128xf32>
    %1212 = vector.shape_cast %1209 : vector<8x128xf32> to vector<1x8x128xf32>
    tpu.vector_store %arg12[%c6_825, %c0_826, %c0_827], %1212 {strides = array<i32>} : memref<8x8x128xf32, #tpu.memory_space<vmem>>, vector<1x8x128xf32>,
    %cst_828 = arith.constant dense<0xFF800000> : vector<8xf32>
    %1213 = vector.multi_reduction <maximumf>, %1209, %cst_828 [1] : vector<8x128xf32> to vector<8xf32>
    %1214 = vector.shape_cast %1213 : vector<8xf32> to vector<8x1xf32>
    %1215 = vector.broadcast %1214 : vector<8x1xf32> to vector<8x128xf32>
    %1216 = arith.cmpf oeq, %1209, %1215 : vector<8x128xf32>
    %c128_i32_829 = arith.constant 128 : i32
    %1217 = vector.broadcast %c128_i32_829 : i32 to vector<8x128xi32>
    %1218 = arith.select %1216, %600, %1217 : vector<8x128xi1>, vector<8x128xi32>
    %cst_830 = arith.constant dense<2147483647> : vector<8xi32>
    %1219 = vector.multi_reduction <minsi>, %1218, %cst_830 [1] : vector<8x128xi32> to vector<8xi32>
    %1220 = vector.shape_cast %1219 : vector<8xi32> to vector<8x1xi32>
    %1221 = vector.broadcast %1220 : vector<8x1xi32> to vector<8x128xi32>
    %1222 = arith.cmpi eq, %600, %1221 : vector<8x128xi32>
    %cst_831 = arith.constant 1.000000e+00 : f32
    %cst_832 = arith.constant 0.000000e+00 : f32
    %1223 = vector.broadcast %cst_831 : f32 to vector<8x128xf32>
    %1224 = vector.broadcast %cst_832 : f32 to vector<8x128xf32>
    %1225 = arith.select %1222, %1223, %1224 : vector<8x128xi1>, vector<8x128xf32>
    %c0_833 = arith.constant 0 : index
    %c0_834 = arith.constant 0 : index
    %1226 = vector.load %arg9[%c0_833, %c0_834] : memref<128x32xf32, #tpu.memory_space<vmem>>, vector<128x32xf32>
    %cst_835 = arith.constant dense<0.000000e+00> : vector<8x32xf32>
    %1227 = tpu.matmul %1225, %1226, %cst_835 {dimension_numbers = #tpu.dot_dimension_numbers<[1], [0], [0], [1], [0, 0, 1, 1], [], []>} : vector<8x128xf32>, vector<128x32xf32>, vector<8x32xf32> -> vector<8x32xf32>
    %c6_836 = arith.constant 6 : index
    %1228 = memref.load %arg0[%c6_836] : memref<8xi32, #tpu.memory_space<smem>>
    %c0_i32_837 = arith.constant 0 : i32
    %1229 = arith.cmpi sgt, %1228, %c0_i32_837 : i32
    %cst_838 = arith.constant 1.000000e+00 : f32
    %cst_839 = arith.constant 0.000000e+00 : f32
    %1230 = arith.select %1229, %cst_838, %cst_839 : f32
    %c6_840 = arith.constant 6 : index
    %c0_841 = arith.constant 0 : index
    %c0_842 = arith.constant 0 : index
    %1231 = vector.load %arg2[%c6_840, %c0_841, %c0_842] : memref<8x8x32xf32, #tpu.memory_space<vmem>>, vector<1x8x32xf32>
    %1232 = vector.shape_cast %1231 : vector<1x8x32xf32> to vector<8x32xf32>
    %1233 = vector.broadcast %1230 : f32 to vector<8x32xf32>
    %1234 = arith.mulf %1233, %1232 : vector<8x32xf32>
    %cst_843 = arith.constant 1.000000e+00 : f32
    %1235 = arith.subf %cst_843, %1230 : f32
    %1236 = vector.broadcast %1235 : f32 to vector<8x32xf32>
    %1237 = arith.mulf %1236, %1227 : vector<8x32xf32>
    %1238 = arith.addf %1234, %1237 : vector<8x32xf32>
    %c0_844 = arith.constant 0 : index
    %c0_845 = arith.constant 0 : index
    %c0_846 = arith.constant 0 : index
    %1239 = vector.load %arg6[%c0_844, %c0_845, %c0_846] : memref<2x32x128xf32, #tpu.memory_space<vmem>>, vector<1x32x128xf32>
    %1240 = vector.shape_cast %1239 : vector<1x32x128xf32> to vector<32x128xf32>
    %cst_847 = arith.constant dense<0.000000e+00> : vector<8x128xf32>
    %1241 = tpu.matmul %1238, %1240, %cst_847 {dimension_numbers = #tpu.dot_dimension_numbers<[1], [0], [0], [1], [0, 0, 1, 1], [], []>} : vector<8x32xf32>, vector<32x128xf32>, vector<8x128xf32> -> vector<8x128xf32>
    %c0_848 = arith.constant 0 : index
    %c0_849 = arith.constant 0 : index
    %c0_850 = arith.constant 0 : index
    %1242 = vector.load %arg13[%c0_848, %c0_849, %c0_850] : memref<2x8x32xf32, #tpu.memory_space<vmem>>, vector<1x8x32xf32>
    %1243 = vector.shape_cast %1242 : vector<1x8x32xf32> to vector<8x32xf32>
    %c0_851 = arith.constant 0 : index
    %c0_852 = arith.constant 0 : index
    %c0_853 = arith.constant 0 : index
    %1244 = vector.load %arg7[%c0_851, %c0_852, %c0_853] : memref<2x32x128xf32, #tpu.memory_space<vmem>>, vector<1x32x128xf32>
    %1245 = vector.shape_cast %1244 : vector<1x32x128xf32> to vector<32x128xf32>
    %cst_854 = arith.constant dense<0.000000e+00> : vector<8x128xf32>
    %1246 = tpu.matmul %1243, %1245, %cst_854 {dimension_numbers = #tpu.dot_dimension_numbers<[1], [0], [0], [1], [0, 0, 1, 1], [], []>} : vector<8x32xf32>, vector<32x128xf32>, vector<8x128xf32> -> vector<8x128xf32>
    %1247 = arith.addf %1241, %1246 : vector<8x128xf32>
    %c0_855 = arith.constant 0 : index
    %c0_856 = arith.constant 0 : index
    %c0_857 = arith.constant 0 : index
    %1248 = vector.load %arg8[%c0_855, %c0_856, %c0_857] : memref<2x1x128xf32, #tpu.memory_space<vmem>>, vector<1x1x128xf32>
    %1249 = vector.shape_cast %1248 : vector<1x1x128xf32> to vector<1x128xf32>
    %1250 = vector.broadcast %1249 : vector<1x128xf32> to vector<8x128xf32>
    %1251 = arith.addf %1247, %1250 : vector<8x128xf32>
    %1252 = arith.negf %1251 : vector<8x128xf32>
    %1253 = math.exp %1252 : vector<8x128xf32>
    %cst_858 = arith.constant 1.000000e+00 : f32
    %1254 = vector.broadcast %cst_858 : f32 to vector<8x128xf32>
    %1255 = arith.addf %1254, %1253 : vector<8x128xf32>
    %1256 = arith.divf %1254, %1255 : vector<8x128xf32>
    %1257 = vector.extract_strided_slice %1256 {offsets = [0, 0], sizes = [8, 32], strides = [1, 1]} : vector<8x128xf32> to vector<8x32xf32>
    %1258 = vector.extract_strided_slice %1256 {offsets = [0, 32], sizes = [8, 32], strides = [1, 1]} : vector<8x128xf32> to vector<8x32xf32>
    %1259 = vector.extract_strided_slice %1256 {offsets = [0, 96], sizes = [8, 32], strides = [1, 1]} : vector<8x128xf32> to vector<8x32xf32>
    %1260 = vector.extract_strided_slice %1251 {offsets = [0, 64], sizes = [8, 32], strides = [1, 1]} : vector<8x128xf32> to vector<8x32xf32>
    %1261 = math.tanh %1260 : vector<8x32xf32>
    %c0_859 = arith.constant 0 : index
    %c0_860 = arith.constant 0 : index
    %c0_861 = arith.constant 0 : index
    %1262 = vector.load %arg14[%c0_859, %c0_860, %c0_861] : memref<2x8x32xf32, #tpu.memory_space<vmem>>, vector<1x8x32xf32>
    %1263 = vector.shape_cast %1262 : vector<1x8x32xf32> to vector<8x32xf32>
    %1264 = arith.mulf %1258, %1263 : vector<8x32xf32>
    %1265 = arith.mulf %1257, %1261 : vector<8x32xf32>
    %1266 = arith.addf %1264, %1265 : vector<8x32xf32>
    %1267 = math.tanh %1266 : vector<8x32xf32>
    %1268 = arith.mulf %1259, %1267 : vector<8x32xf32>
    %c0_862 = arith.constant 0 : index
    %c0_863 = arith.constant 0 : index
    %c0_864 = arith.constant 0 : index
    %1269 = vector.load %arg14[%c0_862, %c0_863, %c0_864] : memref<2x8x32xf32, #tpu.memory_space<vmem>>, vector<1x8x32xf32>
    %1270 = vector.shape_cast %1269 : vector<1x8x32xf32> to vector<8x32xf32>
    %1271 = vector.shape_cast %1266 : vector<8x32xf32> to vector<1x8x32xf32>
    tpu.vector_store %arg14[%c0_862, %c0_863, %c0_864], %1271 {strides = array<i32>} : memref<2x8x32xf32, #tpu.memory_space<vmem>>, vector<1x8x32xf32>,
    %c0_865 = arith.constant 0 : index
    %c0_866 = arith.constant 0 : index
    %c0_867 = arith.constant 0 : index
    %1272 = vector.load %arg13[%c0_865, %c0_866, %c0_867] : memref<2x8x32xf32, #tpu.memory_space<vmem>>, vector<1x8x32xf32>
    %1273 = vector.shape_cast %1272 : vector<1x8x32xf32> to vector<8x32xf32>
    %1274 = vector.shape_cast %1268 : vector<8x32xf32> to vector<1x8x32xf32>
    tpu.vector_store %arg13[%c0_865, %c0_866, %c0_867], %1274 {strides = array<i32>} : memref<2x8x32xf32, #tpu.memory_space<vmem>>, vector<1x8x32xf32>,
    %c1_868 = arith.constant 1 : index
    %c0_869 = arith.constant 0 : index
    %c0_870 = arith.constant 0 : index
    %1275 = vector.load %arg6[%c1_868, %c0_869, %c0_870] : memref<2x32x128xf32, #tpu.memory_space<vmem>>, vector<1x32x128xf32>
    %1276 = vector.shape_cast %1275 : vector<1x32x128xf32> to vector<32x128xf32>
    %cst_871 = arith.constant dense<0.000000e+00> : vector<8x128xf32>
    %1277 = tpu.matmul %1268, %1276, %cst_871 {dimension_numbers = #tpu.dot_dimension_numbers<[1], [0], [0], [1], [0, 0, 1, 1], [], []>} : vector<8x32xf32>, vector<32x128xf32>, vector<8x128xf32> -> vector<8x128xf32>
    %c1_872 = arith.constant 1 : index
    %c0_873 = arith.constant 0 : index
    %c0_874 = arith.constant 0 : index
    %1278 = vector.load %arg13[%c1_872, %c0_873, %c0_874] : memref<2x8x32xf32, #tpu.memory_space<vmem>>, vector<1x8x32xf32>
    %1279 = vector.shape_cast %1278 : vector<1x8x32xf32> to vector<8x32xf32>
    %c1_875 = arith.constant 1 : index
    %c0_876 = arith.constant 0 : index
    %c0_877 = arith.constant 0 : index
    %1280 = vector.load %arg7[%c1_875, %c0_876, %c0_877] : memref<2x32x128xf32, #tpu.memory_space<vmem>>, vector<1x32x128xf32>
    %1281 = vector.shape_cast %1280 : vector<1x32x128xf32> to vector<32x128xf32>
    %cst_878 = arith.constant dense<0.000000e+00> : vector<8x128xf32>
    %1282 = tpu.matmul %1279, %1281, %cst_878 {dimension_numbers = #tpu.dot_dimension_numbers<[1], [0], [0], [1], [0, 0, 1, 1], [], []>} : vector<8x32xf32>, vector<32x128xf32>, vector<8x128xf32> -> vector<8x128xf32>
    %1283 = arith.addf %1277, %1282 : vector<8x128xf32>
    %c1_879 = arith.constant 1 : index
    %c0_880 = arith.constant 0 : index
    %c0_881 = arith.constant 0 : index
    %1284 = vector.load %arg8[%c1_879, %c0_880, %c0_881] : memref<2x1x128xf32, #tpu.memory_space<vmem>>, vector<1x1x128xf32>
    %1285 = vector.shape_cast %1284 : vector<1x1x128xf32> to vector<1x128xf32>
    %1286 = vector.broadcast %1285 : vector<1x128xf32> to vector<8x128xf32>
    %1287 = arith.addf %1283, %1286 : vector<8x128xf32>
    %1288 = arith.negf %1287 : vector<8x128xf32>
    %1289 = math.exp %1288 : vector<8x128xf32>
    %cst_882 = arith.constant 1.000000e+00 : f32
    %1290 = vector.broadcast %cst_882 : f32 to vector<8x128xf32>
    %1291 = arith.addf %1290, %1289 : vector<8x128xf32>
    %1292 = arith.divf %1290, %1291 : vector<8x128xf32>
    %1293 = vector.extract_strided_slice %1292 {offsets = [0, 0], sizes = [8, 32], strides = [1, 1]} : vector<8x128xf32> to vector<8x32xf32>
    %1294 = vector.extract_strided_slice %1292 {offsets = [0, 32], sizes = [8, 32], strides = [1, 1]} : vector<8x128xf32> to vector<8x32xf32>
    %1295 = vector.extract_strided_slice %1292 {offsets = [0, 96], sizes = [8, 32], strides = [1, 1]} : vector<8x128xf32> to vector<8x32xf32>
    %1296 = vector.extract_strided_slice %1287 {offsets = [0, 64], sizes = [8, 32], strides = [1, 1]} : vector<8x128xf32> to vector<8x32xf32>
    %1297 = math.tanh %1296 : vector<8x32xf32>
    %c1_883 = arith.constant 1 : index
    %c0_884 = arith.constant 0 : index
    %c0_885 = arith.constant 0 : index
    %1298 = vector.load %arg14[%c1_883, %c0_884, %c0_885] : memref<2x8x32xf32, #tpu.memory_space<vmem>>, vector<1x8x32xf32>
    %1299 = vector.shape_cast %1298 : vector<1x8x32xf32> to vector<8x32xf32>
    %1300 = arith.mulf %1294, %1299 : vector<8x32xf32>
    %1301 = arith.mulf %1293, %1297 : vector<8x32xf32>
    %1302 = arith.addf %1300, %1301 : vector<8x32xf32>
    %1303 = math.tanh %1302 : vector<8x32xf32>
    %1304 = arith.mulf %1295, %1303 : vector<8x32xf32>
    %c1_886 = arith.constant 1 : index
    %c0_887 = arith.constant 0 : index
    %c0_888 = arith.constant 0 : index
    %1305 = vector.load %arg14[%c1_886, %c0_887, %c0_888] : memref<2x8x32xf32, #tpu.memory_space<vmem>>, vector<1x8x32xf32>
    %1306 = vector.shape_cast %1305 : vector<1x8x32xf32> to vector<8x32xf32>
    %1307 = vector.shape_cast %1302 : vector<8x32xf32> to vector<1x8x32xf32>
    tpu.vector_store %arg14[%c1_886, %c0_887, %c0_888], %1307 {strides = array<i32>} : memref<2x8x32xf32, #tpu.memory_space<vmem>>, vector<1x8x32xf32>,
    %c1_889 = arith.constant 1 : index
    %c0_890 = arith.constant 0 : index
    %c0_891 = arith.constant 0 : index
    %1308 = vector.load %arg13[%c1_889, %c0_890, %c0_891] : memref<2x8x32xf32, #tpu.memory_space<vmem>>, vector<1x8x32xf32>
    %1309 = vector.shape_cast %1308 : vector<1x8x32xf32> to vector<8x32xf32>
    %1310 = vector.shape_cast %1304 : vector<8x32xf32> to vector<1x8x32xf32>
    tpu.vector_store %arg13[%c1_889, %c0_890, %c0_891], %1310 {strides = array<i32>} : memref<2x8x32xf32, #tpu.memory_space<vmem>>, vector<1x8x32xf32>,
    %c0_892 = arith.constant 0 : index
    %c0_893 = arith.constant 0 : index
    %1311 = vector.load %arg10[%c0_892, %c0_893] : memref<32x128xf32, #tpu.memory_space<vmem>>, vector<32x128xf32>
    %cst_894 = arith.constant dense<0.000000e+00> : vector<8x128xf32>
    %1312 = tpu.matmul %1304, %1311, %cst_894 {dimension_numbers = #tpu.dot_dimension_numbers<[1], [0], [0], [1], [0, 0, 1, 1], [], []>} : vector<8x32xf32>, vector<32x128xf32>, vector<8x128xf32> -> vector<8x128xf32>
    %c0_895 = arith.constant 0 : index
    %c0_896 = arith.constant 0 : index
    %1313 = vector.load %arg11[%c0_895, %c0_896] : memref<1x128xf32, #tpu.memory_space<vmem>>, vector<1x128xf32>
    %1314 = vector.broadcast %1313 : vector<1x128xf32> to vector<8x128xf32>
    %1315 = arith.addf %1312, %1314 : vector<8x128xf32>
    %c7_897 = arith.constant 7 : index
    %c0_898 = arith.constant 0 : index
    %c0_899 = arith.constant 0 : index
    %1316 = vector.load %arg12[%c7_897, %c0_898, %c0_899] : memref<8x8x128xf32, #tpu.memory_space<vmem>>, vector<1x8x128xf32>
    %1317 = vector.shape_cast %1316 : vector<1x8x128xf32> to vector<8x128xf32>
    %1318 = vector.shape_cast %1315 : vector<8x128xf32> to vector<1x8x128xf32>
    tpu.vector_store %arg12[%c7_897, %c0_898, %c0_899], %1318 {strides = array<i32>} : memref<8x8x128xf32, #tpu.memory_space<vmem>>, vector<1x8x128xf32>,
    return
  }
}

</mosaic_0001>

<bundles_post_ra>
// kernel: seq2seq_forward.1
= control target key start
LH: loop header
LB: loop body
LE: loop exit
PB: predicated region body
PF: predicated region fallthrough
CT: control target
= control target key end

     0   :  { %17 = vsyncpa [#allocation5], 0  ;;  %s11554_s0 = inlined_call_operand.vmem [shape: s32[8], index: 0, kind: input, shape index: {}]   ;;  %s11555_s1 = inlined_call_operand.vmem [shape: f32[8,8,32], index: 1, kind: input, shape index: {}]   ;;  %s11556_s2 = inlined_call_operand.vmem [shape: f32[8,8,32], index: 2, kind: input, shape index: {}]   ;;  %s11557_s3 = inlined_call_operand.vmem [shape: f32[2,32,128], index: 3, kind: input, shape index: {}]   ;;  %s11558_s4 = inlined_call_operand.vmem [shape: f32[2,32,128], index: 4, kind: input, shape index: {}]   ;;  %s11559_s5 = inlined_call_operand.vmem [shape: f32[2,1,128], index: 5, kind: input, shape index: {}]   ;;  %s11560_s6 = inlined_call_operand.vmem [shape: f32[2,32,128], index: 6, kind: input, shape index: {}]   ;;  %s11561_s7 = inlined_call_operand.vmem [shape: f32[2,32,128], index: 7, kind: input, shape index: {}]   ;;  %s11562_s8 = inlined_call_operand.vmem [shape: f32[2,1,128], index: 8, kind: input, shape index: {}]   ;;  %s11563_s9 = inlined_call_operand.vmem [shape: f32[128,32], index: 9, kind: input, shape index: {}]   ;;  %s11564_s10 = inlined_call_operand.vmem [shape: f32[32,128], index: 10, kind: input, shape index: {}]   ;;  %s11565_s11 = inlined_call_operand.vmem [shape: f32[1,128], index: 11, kind: input, shape index: {}]   ;;  %s11566_s12 = inlined_call_operand.vmem [shape: f32[8,8,128], index: 12, kind: output, shape index: {}]  }
   0x1   :  { %s24_s23 = sshll.u32 %s11554_s0, 4  ;;  %s25_s23 = int_to_ptr.vmem [resolvable:$true] %s24_s23 }
   0x2   :  { %s9915_s24 = scalar_lea.vmem %s25_s23, 16  ;;  %p9920_p1 = scmp.lt.s32.totalorder %s25_s23, %s25_s23 }
   0x3   :  { %p9916_p0 = scmp.ne.s32.totalorder %s25_s23, %s9915_s24  ;;  %p9921_p2 = scmp.lt.s32.totalorder %s9915_s24, %s9915_s24 }
   0x5   :  { %p9922_p3 = por %p9921_p2, %p9920_p1 }
   0x7   :  { %p9923_p4 = pnand %p9922_p3, %p9916_p0 }
   0x9   :  { %9926 = shalt.err (!%p9923_p4)
}
   0xa   :  { %s9929_s25 = smov [#allocation4]  }
   0xb   :  { %27 = dma.vmem_to_smem %s25_s23, 16, %s9929_s25, [#allocation5]  }
   0xc   :  { %9927 = dma.done.wait [#allocation5], 16  }
   0xd   :  { %9928 = vsyncadd [#allocation5], 4294967280 }
   0xe   :  { %53 = sfence }
   0xf   :  { %v65_v0 = vld [vmem:[%s11558_s4] sm:$0xff]  ;;  %v66_v1 = vld [vmem:[%s11558_s4 + $0x8] sm:$0xff]  ;;  %v9930_v3 = vmov 0.0|0.0   ;;  %v67_v6 = vld [vmem:[%s11558_s4 + $0x10] sm:$0xff]  ;;  %v9931_v8 = vmov 0.0   ;;  %vm54_vm0 = vcmask 261120  }
  0x10   :  { %v60_v2 = vld [vmem:[%s11557_s3] sm:$0xff]  ;;  %9118 = vmatprep.subr.bf16.mxu0 %v9930_v3  ;;  %9124 = vmatprep.subr.bf16.mxu1 %v9930_v3  ;;  %v10016_v4 = vpack.c.bf16 %v66_v1, %v65_v0  ;;  %v61_v5 = vld [vmem:[%s11557_s3 + $0x8] sm:$0xff]  ;;  %v68_v7 = vld [vmem:[%s11558_s4 + $0x18] sm:$0xff]  ;;  %3303 = vst [vmem:[%s11566_s12] sm:$0xff] %v9931_v8  ;;  %vm9932_vm1 = vmmov 0   ;;  %s9933_s29 = smov 64   ;;  %s9934_s0 = smov 32  }
  0x11   :  { %v10031_v9 = vpack.c.bf16 %v61_v5, %v60_v2  ;;  %v62_v10 = vld [vmem:[%s11557_s3 + $0x10] sm:$0xff]  ;;  %v63_v11 = vld [vmem:[%s11557_s3 + $0x18] sm:$0xff]  ;;  %8179 = vmatprep.mubr.msk.f32.mxu0 %vm9932_vm1, %v9931_v8  ;;  %8190 = vmatprep.mubr.msk.f32.mxu1 %vm9932_vm1, %v9931_v8  ;;  %55 = vst.msk [vmem:[#allocation2] sm:$0xff] %vm54_vm0, %v9931_v8  ;;  %56 = vst.msk [vmem:[#allocation2 + $0x8] sm:$0xff] %vm54_vm0, %v9931_v8  ;;  %v10052_v12 = vpack.c.bf16 %v68_v7, %v67_v6  ;;  %s9935_s28 = smov 96   ;;  %s7597_s16 = sld [smem:[#allocation4 + $0x1]] }
  0x12   :  { %57 = vst.msk [vmem:[#allocation3] sm:$0xff] %vm54_vm0, %v9931_v8  ;;  %58 = vst.msk [vmem:[#allocation3 + $0x8] sm:$0xff] %vm54_vm0, %v9931_v8  ;;  %9120 = vmatpush3.bf16.msra.mxu0 %v10016_v4  ;;  %v10056_v13 = vpack.c.bf16 %v63_v11, %v62_v10  ;;  %v59_v14 = vld [vmem:[%s11555_s1] sm:$0xff]  ;;  %v7442_v36 = vld [vmem:[%s11558_s4 + $0x28] sm:$0xff]  ;;  %s7620_s25 = sld [smem:[#allocation4 + $0x2]]  ;;  %s7643_s26 = sld [smem:[#allocation4 + $0x3]] }
  0x13   :  { %9126 = vmatpush3.bf16.msra.mxu1 %v10031_v9  ;;  %9121 = vmatprep.subr.bf16.mxu0 %v9930_v3  ;;  %v10075_v18 = vld [vmem:[%s11559_s5] ss:$0 sm:$0xff]  ;;  %v7438_v39 = vld [vmem:[%s11557_s3 + $0x28] sm:$0xff]  ;;  %v7443_v40 = vld [vmem:[%s11558_s4 + $0x30] sm:$0xff] }
  0x14   :  { %9127 = vmatprep.subr.bf16.mxu1 %v9930_v3  ;;  %v7441_v35 = vld [vmem:[%s11558_s4 + $0x20] sm:$0xff]  ;;  %v7444_v41 = vld [vmem:[%s11558_s4 + $0x38] sm:$0xff]  ;;  %v7439_v43 = vld [vmem:[%s11557_s3 + $0x30] sm:$0xff] }
  0x15   :  { %v7437_v37 = vld [vmem:[%s11557_s3 + $0x20] sm:$0xff]  ;;  %v10090_v38 = vpack.c.bf16 %v7442_v36, %v7441_v35  ;;  %v7440_v44 = vld [vmem:[%s11557_s3 + $0x38] sm:$0xff]  ;;  %v10110_v45 = vpack.c.bf16 %v7444_v41, %v7443_v40  ;;  %v7450_v55 = vld [vmem:[%s11555_s1 + $0x8] sm:$0xff] }
  0x16   :  { %9123 = vmatpush3.bf16.msra.mxu0 %v10052_v12  ;;  %v10101_v42 = vpack.c.bf16 %v7438_v39, %v7437_v37  ;;  %v10114_v46 = vpack.c.bf16 %v7440_v44, %v7439_v43  ;;  %v10160_v58 = vld [vmem:[%s11559_s5 + $0x1] ss:$0 sm:$0xff] }
  0x17   :  { %9129 = vmatpush3.bf16.msra.mxu1 %v10056_v13  ;;  %9130 = vmatprep.subr.bf16.mxu0 %v9930_v3  ;;  %p3905_p5 = scmp.gt.s32.totalorder %s7597_s16, 0 }
  0x18   :  { %v64_v15 = vld [vmem:[#allocation2] sm:$0xff]  ;;  %9136 = vmatprep.subr.bf16.mxu1 %v9930_v3  ;;  %v268_v47 = vld [vmem:[#allocation2 + $0x8] sm:$0xff]  ;;  %p4510_p6 = scmp.gt.s32.totalorder %s7620_s25, 0  ;;  %p5115_p7 = scmp.gt.s32.totalorder %s7643_s26, 0 }
  0x19   :  { %8180 = vmatmul.mubr.msk.f32.vlgmr.msra.gmra.mrb[0].mxu0 %vm54_vm0, %v64_v15  ;;  %v230_v24 = vld [vmem:[#allocation3] sm:$0xff]  ;;  %v436_v7 = vld [vmem:[#allocation3 + $0x8] sm:$0xff]  ;;  %s3906_s17 = scalar_select %p3905_p5, 1.0, 0.0 }
  0x1a   :  { %8191 = vmatmul.mubr.msk.f32.vlgmr.msra.gmra.mrb[0].mxu1 %vm54_vm0, %v59_v14  ;;  %8201 = vmatprep.mubr.msk.f32.mxu0 %vm9932_vm1, %v9931_v8  ;;  %s5116_s27 = scalar_select %p5115_p7, 1.0, 0.0 }
  0x1b   :  { %8212 = vmatprep.mubr.msk.f32.mxu1 %vm9932_vm1, %v9931_v8  ;;  %9132 = vmatpush3.bf16.msra.mxu0 %v10090_v38  ;;  %s3911_s18 = ssub.f32 1.0, %s3906_s17  ;;  %s7689_s25 = sld [smem:[#allocation4 + $0x5]] }
  0x1c   :  { %9138 = vmatpush3.bf16.msra.mxu1 %v10101_v42  ;;  %9133 = vmatprep.subr.bf16.mxu0 %v9930_v3  ;;  %s5121_s30 = ssub.f32 1.0, %s5116_s27 }
  0x1d   :  { %9139 = vmatprep.subr.bf16.mxu1 %v9930_v3 }
  0x1f   :  { %9135 = vmatpush3.bf16.msra.mxu0 %v10110_v45 }
  0x20   :  { %9141 = vmatpush3.bf16.msra.mxu1 %v10114_v46  ;;  %9142 = vmatprep.subr.bf16.mxu0 %v9930_v3 }
  0x21   :  { %9148 = vmatprep.subr.bf16.mxu1 %v9930_v3  ;;  %p6325_p9 = scmp.gt.s32.totalorder %s7689_s25, 0 }
  0x22   :  { %8202 = vmatmul.mubr.msk.f32.vlgmr.msra.gmra.mrb[2].mxu0 %vm54_vm0, %v268_v47 }
  0x23   :  { %9144 = vmatpush3.bf16.msra.mxu0 %v10016_v4  ;;  %8223 = vmatprep.mubr.msk.f32.mxu0 %vm9932_vm1, %v9931_v8 }
  0x24   :  { %9145 = vmatprep.subr.bf16.mxu0 %v9930_v3 }
  0x27   :  { %9147 = vmatpush3.bf16.msra.mxu0 %v10052_v12 }
  0x28   :  { %9154 = vmatprep.subr.bf16.mxu0 %v9930_v3 }
  0xec   :  { %v138_v16 = vpop.f32.mrb[0].mxu0 }
  0xed   :  { %v211_v17 = vpop.f32.mrb[0].mxu1  ;;  %v8181_v19 = vpop.f32.mrb[1].mxu0 }
  0xee   :  { %v212_v20 = vadd.f32 %v211_v17, %v138_v16  ;;  %v8192_v21 = vpop.f32.mrb[1].mxu1 }
  0xf0   :  { %v222_v22 = vadd.f32 %v10075_v18, %v212_v20 }
  0xf2   :  { %9672 = vtanh.f32 %v222_v22  ;;  %v7436_v25 = vmul.f32 -1.442695, %v222_v22 }
  0xf4   :  { %9674 = vpow2.f32 %v7436_v25 }
  0xf5   :  { %v343_v52 = vpop.f32.mrb[2].mxu0 }
  0xf6   :  { %v8203_v53 = vpop.f32.mrb[3].mxu0 }
  0xfc   :  { %v9673_v23 = vpop.eup %9672 }
  0xfd   :  { %237 = vrot.lane.b32.xlu0 %v9673_v23, %s9933_s29 }
  0xfe   :  { %v9675_v26 = vpop.eup %9674 }
  0xff   :  { %v226_v27 = vadd.f32 1.0, %v9675_v26 }
 0x101   :  { %232 = vrot.lane.b32.xlu0 %v230_v24, %s9934_s0  ;;  %9676 = vrcp.f32 %v226_v27 }
 0x10b   :  { %v9677_v28 = vpop.eup %9676 }
 0x16f   :  { %v238_v29 = vpop.permute.xlu0 %237 }
 0x170   :  { %v240_v30 = vmul.f32 %v9677_v28, %v238_v29 }
 0x172   :  { %242 = vrot.lane.b32.xlu1 %v240_v30, %s9934_s0 }
 0x173   :  { %v233_v31 = vpop.permute.xlu0 %232 }
 0x174   :  { %v235_v32 = vmul.f32 %v9677_v28, %v233_v31 }
 0x1e4   :  { %v243_v33 = vpop.permute.xlu1 %242 }
 0x1e5   :  { %v245_v34 = vadd.f32 %v243_v33, %v235_v32 }
 0x1e7   :  { %9678 = vtanh.f32 %v245_v34 }
 0x1f1   :  { %v9679_v48 = vpop.eup %9678 }
 0x1f2   :  { %248 = vrot.lane.b32.xlu1 %v9679_v48, %s9933_s29 }
 0x1f6   :  { %253 = vrot.lane.b32.xlu1 %v245_v34, %s9935_s28 }
 0x264   :  { %v249_v49 = vpop.permute.xlu1 %248 }
 0x265   :  { %v251_v50 = vmul.f32 %v9677_v28, %v249_v49 }
 0x267   :  { %258 = vrot.lane.b32.xlu0 %v251_v50, %s9934_s0  ;;  %v7468_v50 = vld [vmem:[%s11555_s1 + $0x10] sm:$0xff] }
 0x268   :  { %v254_v51 = vpop.permute.xlu1 %253 }
 0x269   :  { %256 = vst.msk [vmem:[#allocation3] sm:$0xff] %vm54_vm0, %v254_v51 }
 0x270   :  { %v640_v11 = vld [vmem:[#allocation3] sm:$0xff] }
 0x2d9   :  { %v259_v54 = vpop.permute.xlu0 %258 }
 0x2da   :  { %261 = vst.msk [vmem:[#allocation2] sm:$0xff] %vm54_vm0, %v259_v54  ;;  %8213 = vmatmul.mubr.msk.f32.vlgmr.msra.gmra.mrb[2].mxu1 %vm54_vm0, %v259_v54 }
 0x2db   :  { %9150 = vmatpush3.bf16.msra.mxu1 %v10031_v9  ;;  %8234 = vmatprep.mubr.msk.f32.mxu1 %vm9932_vm1, %v9931_v8 }
 0x2dc   :  { %9151 = vmatprep.subr.bf16.mxu1 %v9930_v3 }
 0x2df   :  { %9153 = vmatpush3.bf16.msra.mxu1 %v10056_v13 }
 0x2e0   :  { %9160 = vmatprep.subr.bf16.mxu1 %v9930_v3 }
 0x2e1   :  { %v474_v56 = vld [vmem:[#allocation2] sm:$0xff] }
 0x2e2   :  { %8235 = vmatmul.mubr.msk.f32.vlgmr.msra.gmra.mrb[4].mxu1 %vm54_vm0, %v7450_v55  ;;  %8224 = vmatmul.mubr.msk.f32.vlgmr.msra.gmra.mrb[4].mxu0 %vm54_vm0, %v474_v56 }
 0x2e3   :  { %9162 = vmatpush3.bf16.msra.mxu1 %v10101_v42  ;;  %9156 = vmatpush3.bf16.msra.mxu0 %v10090_v38 }
 0x2e4   :  { %9163 = vmatprep.subr.bf16.mxu1 %v9930_v3  ;;  %9157 = vmatprep.subr.bf16.mxu0 %v9930_v3 }
 0x2e5   :  { %8245 = vmatprep.mubr.msk.f32.mxu0 %vm9932_vm1, %v9931_v8  ;;  %8256 = vmatprep.mubr.msk.f32.mxu1 %vm9932_vm1, %v9931_v8 }
 0x2e7   :  { %9165 = vmatpush3.bf16.msra.mxu1 %v10114_v46  ;;  %9159 = vmatpush3.bf16.msra.mxu0 %v10110_v45 }
 0x2e8   :  { %9172 = vmatprep.subr.bf16.mxu1 %v9930_v3  ;;  %9166 = vmatprep.subr.bf16.mxu0 %v9930_v3 }
 0x3ad   :  { %v415_v57 = vpop.f32.mrb[2].mxu1 }
 0x3ae   :  { %v416_v59 = vadd.f32 %v415_v57, %v343_v52  ;;  %v8214_v60 = vpop.f32.mrb[3].mxu1 }
 0x3b0   :  { %v427_v61 = vadd.f32 %v10160_v58, %v416_v59 }
 0x3b2   :  { %9680 = vtanh.f32 %v427_v61  ;;  %v7449_v14 = vmul.f32 -1.442695, %v427_v61 }
 0x3b5   :  { %v621_v62 = vpop.f32.mrb[4].mxu1  ;;  %v548_v63 = vpop.f32.mrb[4].mxu0 }
 0x3b6   :  { %v622_v0 = vadd.f32 %v621_v62, %v548_v63  ;;  %v8236_v1 = vpop.f32.mrb[5].mxu1  ;;  %v8225_v2 = vpop.f32.mrb[5].mxu0 }
 0x3b8   :  { %v632_v5 = vadd.f32 %v10075_v18, %v622_v0 }
 0x3ba   :  { %9682 = vtanh.f32 %v632_v5  ;;  %v7454_v15 = vmul.f32 -1.442695, %v632_v5 }
 0x3bb   :  { %9684 = vpow2.f32 %v7449_v14 }
 0x3bc   :  { %v9681_v6 = vpop.eup %9680  ;;  %9686 = vpow2.f32 %v7454_v15 }
 0x3bd   :  { %443 = vrot.lane.b32.xlu0 %v9681_v6, %s9933_s29 }
 0x3c1   :  { %438 = vrot.lane.b32.xlu0 %v436_v7, %s9934_s0 }
 0x3c4   :  { %v9683_v10 = vpop.eup %9682 }
 0x3c5   :  { %642 = vrot.lane.b32.xlu0 %v640_v11, %s9934_s0  ;;  %647 = vrot.lane.b32.xlu1 %v9683_v10, %s9933_s29  ;;  %v9685_v16 = vpop.eup %9684 }
 0x3c6   :  { %v431_v17 = vadd.f32 1.0, %v9685_v16  ;;  %v9687_v19 = vpop.eup %9686 }
 0x3c7   :  { %v636_v20 = vadd.f32 1.0, %v9687_v19 }
 0x3c8   :  { %9688 = vrcp.f32 %v431_v17 }
 0x3c9   :  { %9690 = vrcp.f32 %v636_v20 }
 0x3d2   :  { %v9689_v21 = vpop.eup %9688 }
 0x3d3   :  { %v9691_v24 = vpop.eup %9690 }
 0x42f   :  { %v444_v22 = vpop.permute.xlu0 %443 }
 0x430   :  { %v446_v23 = vmul.f32 %v9689_v21, %v444_v22 }
 0x432   :  { %448 = vrot.lane.b32.xlu1 %v446_v23, %s9934_s0 }
 0x433   :  { %v439_v27 = vpop.permute.xlu0 %438 }
 0x434   :  { %v441_v28 = vmul.f32 %v9689_v21, %v439_v27 }
 0x437   :  { %v648_v25 = vpop.permute.xlu1 %647  ;;  %v643_v31 = vpop.permute.xlu0 %642 }
 0x438   :  { %v650_v26 = vmul.f32 %v9691_v24, %v648_v25  ;;  %v645_v32 = vmul.f32 %v9691_v24, %v643_v31 }
 0x43a   :  { %652 = vrot.lane.b32.xlu1 %v650_v26, %s9934_s0 }
 0x4a4   :  { %v449_v29 = vpop.permute.xlu1 %448 }
 0x4a5   :  { %v451_v30 = vadd.f32 %v449_v29, %v441_v28 }
 0x4a7   :  { %9692 = vtanh.f32 %v451_v30 }
 0x4ac   :  { %v653_v33 = vpop.permute.xlu1 %652 }
 0x4ad   :  { %v655_v34 = vadd.f32 %v653_v33, %v645_v32 }
 0x4af   :  { %9694 = vtanh.f32 %v655_v34 }
 0x4b1   :  { %v9693_v35 = vpop.eup %9692 }
 0x4b2   :  { %454 = vrot.lane.b32.xlu0 %v9693_v35, %s9933_s29 }
 0x4b9   :  { %v9695_v36 = vpop.eup %9694 }
 0x4ba   :  { %658 = vrot.lane.b32.xlu1 %v9695_v36, %s9933_s29 }
 0x524   :  { %v455_v37 = vpop.permute.xlu0 %454 }
 0x525   :  { %v457_v39 = vmul.f32 %v9689_v21, %v455_v37 }
 0x527   :  { %464 = vrot.lane.b32.xlu0 %v457_v39, %s9934_s0 }
 0x52b   :  { %459 = vrot.lane.b32.xlu0 %v451_v30, %s9935_s28 }
 0x52c   :  { %v659_v40 = vpop.permute.xlu1 %658 }
 0x52d   :  { %v661_v41 = vmul.f32 %v9691_v24, %v659_v40 }
 0x52f   :  { %668 = vrot.lane.b32.xlu1 %v661_v41, %s9934_s0 }
 0x533   :  { %663 = vrot.lane.b32.xlu1 %v655_v34, %s9935_s28 }
 0x599   :  { %v465_v43 = vpop.permute.xlu0 %464 }
 0x59a   :  { %467 = vst.msk [vmem:[#allocation2 + $0x8] sm:$0xff] %vm54_vm0, %v465_v43 }
 0x59d   :  { %v460_v44 = vpop.permute.xlu0 %459 }
 0x59e   :  { %462 = vst.msk [vmem:[#allocation3 + $0x8] sm:$0xff] %vm54_vm0, %v460_v44 }
 0x5a1   :  { %v669_v47 = vpop.permute.xlu1 %668  ;;  %v676_v48 = vld [vmem:[#allocation2 + $0x8] sm:$0xff] }
 0x5a2   :  { %671 = vst.msk [vmem:[#allocation2] sm:$0xff] %vm54_vm0, %v669_v47  ;;  %8246 = vmatmul.mubr.msk.f32.vlgmr.msra.gmra.mrb[6].mxu0 %vm54_vm0, %v676_v48  ;;  %8257 = vmatmul.mubr.msk.f32.vlgmr.msra.gmra.mrb[6].mxu1 %vm54_vm0, %v669_v47  ;;  %v7486_v47 = vld [vmem:[%s11555_s1 + $0x18] sm:$0xff] }
 0x5a3   :  { %9174 = vmatpush3.bf16.msra.mxu1 %v10031_v9  ;;  %9168 = vmatpush3.bf16.msra.mxu0 %v10016_v4 }
 0x5a4   :  { %9175 = vmatprep.subr.bf16.mxu1 %v9930_v3  ;;  %9169 = vmatprep.subr.bf16.mxu0 %v9930_v3 }
 0x5a5   :  { %v664_v49 = vpop.permute.xlu1 %663  ;;  %8278 = vmatprep.mubr.msk.f32.mxu1 %vm9932_vm1, %v9931_v8  ;;  %8267 = vmatprep.mubr.msk.f32.mxu0 %vm9932_vm1, %v9931_v8  ;;  %v841_v2 = vld [vmem:[#allocation3 + $0x8] sm:$0xff] }
 0x5a6   :  { %666 = vst.msk [vmem:[#allocation3] sm:$0xff] %vm54_vm0, %v664_v49 }
 0x5a7   :  { %9177 = vmatpush3.bf16.msra.mxu1 %v10056_v13  ;;  %9171 = vmatpush3.bf16.msra.mxu0 %v10052_v12 }
 0x5a8   :  { %9184 = vmatprep.subr.bf16.mxu1 %v9930_v3  ;;  %9178 = vmatprep.subr.bf16.mxu0 %v9930_v3 }
 0x5a9   :  { %v879_v51 = vld [vmem:[#allocation2] sm:$0xff] }
 0x5aa   :  { %8279 = vmatmul.mubr.msk.f32.vlgmr.msra.gmra.mrb[8].mxu1 %vm54_vm0, %v7468_v50  ;;  %8268 = vmatmul.mubr.msk.f32.vlgmr.msra.gmra.mrb[8].mxu0 %vm54_vm0, %v879_v51 }
 0x5ab   :  { %9186 = vmatpush3.bf16.msra.mxu1 %v10101_v42  ;;  %9180 = vmatpush3.bf16.msra.mxu0 %v10090_v38 }
 0x5ac   :  { %9187 = vmatprep.subr.bf16.mxu1 %v9930_v3  ;;  %9181 = vmatprep.subr.bf16.mxu0 %v9930_v3 }
 0x5ad   :  { %8289 = vmatprep.mubr.msk.f32.mxu0 %vm9932_vm1, %v9931_v8  ;;  %8300 = vmatprep.mubr.msk.f32.mxu1 %vm9932_vm1, %v9931_v8  ;;  %v1045_v6 = vld [vmem:[#allocation3] sm:$0xff] }
 0x5af   :  { %9189 = vmatpush3.bf16.msra.mxu1 %v10114_v46  ;;  %9183 = vmatpush3.bf16.msra.mxu0 %v10110_v45 }
 0x5b0   :  { %9196 = vmatprep.subr.bf16.mxu1 %v9930_v3  ;;  %9190 = vmatprep.subr.bf16.mxu0 %v9930_v3 }
 0x675   :  { %v750_v52 = vpop.f32.mrb[6].mxu0  ;;  %v822_v53 = vpop.f32.mrb[6].mxu1 }
 0x676   :  { %v823_v54 = vadd.f32 %v822_v53, %v750_v52  ;;  %v8247_v55 = vpop.f32.mrb[7].mxu0  ;;  %v8258_v56 = vpop.f32.mrb[7].mxu1 }
 0x678   :  { %v833_v57 = vadd.f32 %v10160_v58, %v823_v54 }
 0x67a   :  { %9696 = vtanh.f32 %v833_v57  ;;  %v7467_v7 = vmul.f32 -1.442695, %v833_v57 }
 0x67d   :  { %v1026_v59 = vpop.f32.mrb[8].mxu1  ;;  %v953_v60 = vpop.f32.mrb[8].mxu0 }
 0x67e   :  { %v1027_v61 = vadd.f32 %v1026_v59, %v953_v60  ;;  %v8280_v62 = vpop.f32.mrb[9].mxu1  ;;  %v8269_v63 = vpop.f32.mrb[9].mxu0 }
 0x680   :  { %v1037_v0 = vadd.f32 %v10075_v18, %v1027_v61 }
 0x682   :  { %9698 = vtanh.f32 %v1037_v0  ;;  %v7472_v10 = vmul.f32 -1.442695, %v1037_v0 }
 0x683   :  { %9700 = vpow2.f32 %v7467_v7 }
 0x684   :  { %v9697_v1 = vpop.eup %9696  ;;  %9702 = vpow2.f32 %v7472_v10 }
 0x685   :  { %848 = vrot.lane.b32.xlu0 %v9697_v1, %s9933_s29 }
 0x689   :  { %843 = vrot.lane.b32.xlu0 %v841_v2, %s9934_s0 }
 0x68c   :  { %v9699_v5 = vpop.eup %9698 }
 0x68d   :  { %1047 = vrot.lane.b32.xlu0 %v1045_v6, %s9934_s0  ;;  %1052 = vrot.lane.b32.xlu1 %v9699_v5, %s9933_s29  ;;  %v9701_v11 = vpop.eup %9700 }
 0x68e   :  { %v837_v14 = vadd.f32 1.0, %v9701_v11  ;;  %v9703_v15 = vpop.eup %9702 }
 0x68f   :  { %v1041_v16 = vadd.f32 1.0, %v9703_v15 }
 0x690   :  { %9704 = vrcp.f32 %v837_v14 }
 0x691   :  { %9706 = vrcp.f32 %v1041_v16 }
 0x69a   :  { %v9705_v17 = vpop.eup %9704 }
 0x69b   :  { %v9707_v21 = vpop.eup %9706 }
 0x6f7   :  { %v849_v19 = vpop.permute.xlu0 %848 }
 0x6f8   :  { %v851_v20 = vmul.f32 %v9705_v17, %v849_v19 }
 0x6fa   :  { %853 = vrot.lane.b32.xlu1 %v851_v20, %s9934_s0 }
 0x6fb   :  { %v844_v24 = vpop.permute.xlu0 %843 }
 0x6fc   :  { %v846_v25 = vmul.f32 %v9705_v17, %v844_v24 }
 0x6ff   :  { %v1053_v22 = vpop.permute.xlu1 %1052  ;;  %v1048_v28 = vpop.permute.xlu0 %1047 }
 0x700   :  { %v1055_v23 = vmul.f32 %v9707_v21, %v1053_v22  ;;  %v1050_v29 = vmul.f32 %v9707_v21, %v1048_v28 }
 0x702   :  { %1057 = vrot.lane.b32.xlu1 %v1055_v23, %s9934_s0 }
 0x76c   :  { %v854_v26 = vpop.permute.xlu1 %853 }
 0x76d   :  { %v856_v27 = vadd.f32 %v854_v26, %v846_v25 }
 0x76f   :  { %9708 = vtanh.f32 %v856_v27 }
 0x774   :  { %v1058_v30 = vpop.permute.xlu1 %1057 }
 0x775   :  { %v1060_v31 = vadd.f32 %v1058_v30, %v1050_v29 }
 0x777   :  { %9710 = vtanh.f32 %v1060_v31 }
 0x779   :  { %v9709_v32 = vpop.eup %9708 }
 0x77a   :  { %859 = vrot.lane.b32.xlu0 %v9709_v32, %s9933_s29 }
 0x781   :  { %v9711_v33 = vpop.eup %9710 }
 0x782   :  { %1063 = vrot.lane.b32.xlu1 %v9711_v33, %s9933_s29 }
 0x7ec   :  { %v860_v34 = vpop.permute.xlu0 %859 }
 0x7ed   :  { %v862_v35 = vmul.f32 %v9705_v17, %v860_v34 }
 0x7ef   :  { %869 = vrot.lane.b32.xlu0 %v862_v35, %s9934_s0 }
 0x7f3   :  { %864 = vrot.lane.b32.xlu0 %v856_v27, %s9935_s28 }
 0x7f4   :  { %v1064_v36 = vpop.permute.xlu1 %1063 }
 0x7f5   :  { %v1066_v37 = vmul.f32 %v9707_v21, %v1064_v36 }
 0x7f7   :  { %1073 = vrot.lane.b32.xlu1 %v1066_v37, %s9934_s0 }
 0x7fb   :  { %1068 = vrot.lane.b32.xlu1 %v1060_v31, %s9935_s28 }
 0x861   :  { %v870_v39 = vpop.permute.xlu0 %869 }
 0x862   :  { %872 = vst.msk [vmem:[#allocation2 + $0x8] sm:$0xff] %vm54_vm0, %v870_v39 }
 0x865   :  { %v865_v40 = vpop.permute.xlu0 %864 }
 0x866   :  { %867 = vst.msk [vmem:[#allocation3 + $0x8] sm:$0xff] %vm54_vm0, %v865_v40 }
 0x869   :  { %v1074_v41 = vpop.permute.xlu1 %1073  ;;  %v1081_v43 = vld [vmem:[#allocation2 + $0x8] sm:$0xff] }
 0x86a   :  { %1076 = vst.msk [vmem:[#allocation2] sm:$0xff] %vm54_vm0, %v1074_v41  ;;  %8290 = vmatmul.mubr.msk.f32.vlgmr.msra.gmra.mrb[10].mxu0 %vm54_vm0, %v1081_v43  ;;  %8301 = vmatmul.mubr.msk.f32.vlgmr.msra.gmra.mrb[10].mxu1 %vm54_vm0, %v1074_v41 }
 0x86b   :  { %9198 = vmatpush3.bf16.msra.mxu1 %v10031_v9  ;;  %9192 = vmatpush3.bf16.msra.mxu0 %v10016_v4 }
 0x86c   :  { %9199 = vmatprep.subr.bf16.mxu1 %v9930_v3  ;;  %9193 = vmatprep.subr.bf16.mxu0 %v9930_v3 }
 0x86d   :  { %v1069_v44 = vpop.permute.xlu1 %1068  ;;  %8322 = vmatprep.mubr.msk.f32.mxu1 %vm9932_vm1, %v9931_v8  ;;  %8311 = vmatprep.mubr.msk.f32.mxu0 %vm9932_vm1, %v9931_v8  ;;  %v1246_v63 = vld [vmem:[#allocation3 + $0x8] sm:$0xff] }
 0x86e   :  { %1071 = vst.msk [vmem:[#allocation3] sm:$0xff] %vm54_vm0, %v1069_v44 }
 0x86f   :  { %9201 = vmatpush3.bf16.msra.mxu1 %v10056_v13  ;;  %9195 = vmatpush3.bf16.msra.mxu0 %v10052_v12 }
 0x870   :  { %9208 = vmatprep.subr.bf16.mxu1 %v9930_v3  ;;  %9202 = vmatprep.subr.bf16.mxu0 %v9930_v3 }
 0x871   :  { %v1284_v48 = vld [vmem:[#allocation2] sm:$0xff] }
 0x872   :  { %8323 = vmatmul.mubr.msk.f32.vlgmr.msra.gmra.mrb[12].mxu1 %vm54_vm0, %v7486_v47  ;;  %8312 = vmatmul.mubr.msk.f32.vlgmr.msra.gmra.mrb[12].mxu0 %vm54_vm0, %v1284_v48 }
 0x873   :  { %9210 = vmatpush3.bf16.msra.mxu1 %v10101_v42  ;;  %9204 = vmatpush3.bf16.msra.mxu0 %v10090_v38 }
 0x874   :  { %9211 = vmatprep.subr.bf16.mxu1 %v9930_v3  ;;  %9205 = vmatprep.subr.bf16.mxu0 %v9930_v3 }
 0x875   :  { %8333 = vmatprep.mubr.msk.f32.mxu0 %vm9932_vm1, %v9931_v8  ;;  %8344 = vmatprep.mubr.msk.f32.mxu1 %vm9932_vm1, %v9931_v8  ;;  %v1450_v1 = vld [vmem:[#allocation3] sm:$0xff] }
 0x877   :  { %9213 = vmatpush3.bf16.msra.mxu1 %v10114_v46  ;;  %9207 = vmatpush3.bf16.msra.mxu0 %v10110_v45 }
 0x878   :  { %9220 = vmatprep.subr.bf16.mxu1 %v9930_v3  ;;  %9214 = vmatprep.subr.bf16.mxu0 %v9930_v3 }
 0x93d   :  { %v1155_v49 = vpop.f32.mrb[10].mxu0  ;;  %v1227_v50 = vpop.f32.mrb[10].mxu1 }
 0x93e   :  { %v1228_v51 = vadd.f32 %v1227_v50, %v1155_v49  ;;  %v8291_v52 = vpop.f32.mrb[11].mxu0  ;;  %v8302_v53 = vpop.f32.mrb[11].mxu1 }
 0x940   :  { %v1238_v54 = vadd.f32 %v10160_v58, %v1228_v51 }
 0x942   :  { %9712 = vtanh.f32 %v1238_v54  ;;  %v7485_v2 = vmul.f32 -1.442695, %v1238_v54 }
 0x945   :  { %v1431_v55 = vpop.f32.mrb[12].mxu1  ;;  %v1358_v56 = vpop.f32.mrb[12].mxu0 }
 0x946   :  { %v1432_v57 = vadd.f32 %v1431_v55, %v1358_v56  ;;  %v8324_v59 = vpop.f32.mrb[13].mxu1  ;;  %v8313_v60 = vpop.f32.mrb[13].mxu0 }
 0x948   :  { %v1442_v61 = vadd.f32 %v10075_v18, %v1432_v57 }
 0x94a   :  { %9714 = vtanh.f32 %v1442_v61  ;;  %v7490_v5 = vmul.f32 -1.442695, %v1442_v61 }
 0x94b   :  { %9716 = vpow2.f32 %v7485_v2 }
 0x94c   :  { %v9713_v62 = vpop.eup %9712  ;;  %9718 = vpow2.f32 %v7490_v5 }
 0x94d   :  { %1253 = vrot.lane.b32.xlu0 %v9713_v62, %s9933_s29 }
 0x951   :  { %1248 = vrot.lane.b32.xlu0 %v1246_v63, %s9934_s0 }
 0x954   :  { %v9715_v0 = vpop.eup %9714 }
 0x955   :  { %1452 = vrot.lane.b32.xlu0 %v1450_v1, %s9934_s0  ;;  %1457 = vrot.lane.b32.xlu1 %v9715_v0, %s9933_s29  ;;  %v9717_v6 = vpop.eup %9716 }
 0x956   :  { %v1242_v7 = vadd.f32 1.0, %v9717_v6  ;;  %v9719_v10 = vpop.eup %9718 }
 0x957   :  { %v1446_v11 = vadd.f32 1.0, %v9719_v10 }
 0x958   :  { %9720 = vrcp.f32 %v1242_v7 }
 0x959   :  { %9722 = vrcp.f32 %v1446_v11 }
 0x962   :  { %v9721_v14 = vpop.eup %9720 }
 0x963   :  { %v9723_v17 = vpop.eup %9722 }
 0x9bf   :  { %v1254_v15 = vpop.permute.xlu0 %1253 }
 0x9c0   :  { %v1256_v16 = vmul.f32 %v9721_v14, %v1254_v15 }
 0x9c2   :  { %1258 = vrot.lane.b32.xlu1 %v1256_v16, %s9934_s0 }
 0x9c3   :  { %v1249_v21 = vpop.permute.xlu0 %1248 }
 0x9c4   :  { %v1251_v22 = vmul.f32 %v9721_v14, %v1249_v21 }
 0x9c7   :  { %v1458_v19 = vpop.permute.xlu1 %1457  ;;  %v1453_v25 = vpop.permute.xlu0 %1452 }
 0x9c8   :  { %v1460_v20 = vmul.f32 %v9723_v17, %v1458_v19  ;;  %v1455_v26 = vmul.f32 %v9723_v17, %v1453_v25  ;;  %v2091_v25 = vld [vmem:[%s11557_s3 + $0x8] sm:$0xff] }
 0x9ca   :  { %1462 = vrot.lane.b32.xlu1 %v1460_v20, %s9934_s0 }
 0xa34   :  { %v1259_v23 = vpop.permute.xlu1 %1258 }
 0xa35   :  { %v1261_v24 = vadd.f32 %v1259_v23, %v1251_v22 }
 0xa37   :  { %9724 = vtanh.f32 %v1261_v24 }
 0xa3c   :  { %v1463_v27 = vpop.permute.xlu1 %1462 }
 0xa3d   :  { %v1465_v28 = vadd.f32 %v1463_v27, %v1455_v26  ;;  %v2095_v26 = vld [vmem:[%s11558_s4] sm:$0xff]  ;;  %v2096_v27 = vld [vmem:[%s11558_s4 + $0x8] sm:$0xff] }
 0xa3f   :  { %9726 = vtanh.f32 %v1465_v28 }
 0xa41   :  { %v9725_v29 = vpop.eup %9724 }
 0xa42   :  { %1264 = vrot.lane.b32.xlu0 %v9725_v29, %s9933_s29 }
 0xa49   :  { %v9727_v30 = vpop.eup %9726 }
 0xa4a   :  { %1468 = vrot.lane.b32.xlu1 %v9727_v30, %s9933_s29  ;;  %v10339_v30 = vpack.c.bf16 %v2096_v27, %v2095_v26  ;;  %v7533_v27 = vld [vmem:[%s11558_s4 + $0x30] sm:$0xff] }
 0xab4   :  { %v1265_v31 = vpop.permute.xlu0 %1264 }
 0xab5   :  { %v1267_v32 = vmul.f32 %v9721_v14, %v1265_v31  ;;  %v2092_v31 = vld [vmem:[%s11557_s3 + $0x10] sm:$0xff] }
 0xab7   :  { %1274 = vrot.lane.b32.xlu0 %v1267_v32, %s9934_s0  ;;  %v2093_v32 = vld [vmem:[%s11557_s3 + $0x18] sm:$0xff] }
 0xabb   :  { %1269 = vrot.lane.b32.xlu0 %v1261_v24, %s9935_s28  ;;  %v2090_v24 = vld [vmem:[%s11557_s3] sm:$0xff] }
 0xabc   :  { %v1469_v33 = vpop.permute.xlu1 %1468  ;;  %v10337_v29 = vpack.c.bf16 %v2091_v25, %v2090_v24  ;;  %v7529_v24 = vld [vmem:[%s11557_s3 + $0x30] sm:$0xff]  ;;  %v7530_v25 = vld [vmem:[%s11557_s3 + $0x38] sm:$0xff] }
 0xabd   :  { %v1471_v34 = vmul.f32 %v9723_v17, %v1469_v33  ;;  %v2097_v33 = vld [vmem:[%s11558_s4 + $0x10] sm:$0xff]  ;;  %v10423_v26 = vpack.c.bf16 %v7530_v25, %v7529_v24 }
 0xabf   :  { %1478 = vrot.lane.b32.xlu1 %v1471_v34, %s9934_s0  ;;  %v2098_v34 = vld [vmem:[%s11558_s4 + $0x18] sm:$0xff] }
 0xac3   :  { %1473 = vrot.lane.b32.xlu1 %v1465_v28, %s9935_s28 }
 0xb29   :  { %v1275_v35 = vpop.permute.xlu0 %1274 }
 0xb2a   :  { %1277 = vst.msk [vmem:[#allocation2 + $0x8] sm:$0xff] %vm54_vm0, %v1275_v35 }
 0xb2d   :  { %v1270_v36 = vpop.permute.xlu0 %1269 }
 0xb2e   :  { %1272 = vst.msk [vmem:[#allocation3 + $0x8] sm:$0xff] %vm54_vm0, %v1270_v36 }
 0xb31   :  { %v1479_v37 = vpop.permute.xlu1 %1478  ;;  %v1486_v39 = vld [vmem:[#allocation2 + $0x8] sm:$0xff] }
 0xb32   :  { %1481 = vst.msk [vmem:[#allocation2] sm:$0xff] %vm54_vm0, %v1479_v37  ;;  %8334 = vmatmul.mubr.msk.f32.vlgmr.msra.gmra.mrb[14].mxu0 %vm54_vm0, %v1486_v39  ;;  %8345 = vmatmul.mubr.msk.f32.vlgmr.msra.gmra.mrb[14].mxu1 %vm54_vm0, %v1479_v37  ;;  %v10358_v37 = vpack.c.bf16 %v2093_v32, %v2092_v31  ;;  %v10360_v39 = vpack.c.bf16 %v2098_v34, %v2097_v33 }
 0xb33   :  { %9222 = vmatpush3.bf16.msra.mxu1 %v10031_v9  ;;  %9216 = vmatpush3.bf16.msra.mxu0 %v10016_v4  ;;  %v7504_v4 = vld [vmem:[%s11555_s1 + $0x20] sm:$0xff] }
 0xb34   :  { %9223 = vmatprep.subr.bf16.mxu1 %v9930_v3  ;;  %9217 = vmatprep.subr.bf16.mxu0 %v9930_v3 }
 0xb35   :  { %v1474_v40 = vpop.permute.xlu1 %1473  ;;  %8366 = vmatprep.mubr.msk.f32.mxu1 %vm9932_vm1, %v9931_v8  ;;  %8355 = vmatprep.mubr.msk.f32.mxu0 %vm9932_vm1, %v9931_v8  ;;  %v1651_v51 = vld [vmem:[#allocation3 + $0x8] sm:$0xff] }
 0xb36   :  { %1476 = vst.msk [vmem:[#allocation3] sm:$0xff] %vm54_vm0, %v1474_v40 }
 0xb37   :  { %9225 = vmatpush3.bf16.msra.mxu1 %v10056_v13  ;;  %9219 = vmatpush3.bf16.msra.mxu0 %v10052_v12 }
 0xb38   :  { %9232 = vmatprep.subr.bf16.mxu1 %v9930_v3  ;;  %9226 = vmatprep.subr.bf16.mxu0 %v9930_v3 }
 0xb39   :  { %v1689_v9 = vld [vmem:[#allocation2] sm:$0xff] }
 0xb3a   :  { %8367 = vmatmul.mubr.msk.f32.vlgmr.msra.gmra.mrb[16].mxu1 %vm54_vm0, %v7504_v4  ;;  %8356 = vmatmul.mubr.msk.f32.vlgmr.msra.gmra.mrb[16].mxu0 %vm54_vm0, %v1689_v9  ;;  %v7522_v4 = vld [vmem:[%s11555_s1 + $0x28] sm:$0xff] }
 0xb3b   :  { %9234 = vmatpush3.bf16.msra.mxu1 %v10101_v42  ;;  %9228 = vmatpush3.bf16.msra.mxu0 %v10090_v38 }
 0xb3c   :  { %9235 = vmatprep.subr.bf16.mxu1 %v9930_v3  ;;  %9229 = vmatprep.subr.bf16.mxu0 %v9930_v3 }
 0xb3d   :  { %8377 = vmatprep.mubr.msk.f32.mxu0 %vm9932_vm1, %v9931_v8  ;;  %8388 = vmatprep.mubr.msk.f32.mxu1 %vm9932_vm1, %v9931_v8  ;;  %v1855_v53 = vld [vmem:[#allocation3] sm:$0xff] }
 0xb3f   :  { %9237 = vmatpush3.bf16.msra.mxu1 %v10114_v46  ;;  %9231 = vmatpush3.bf16.msra.mxu0 %v10110_v45 }
 0xb40   :  { %9244 = vmatprep.subr.bf16.mxu1 %v9930_v3  ;;  %9238 = vmatprep.subr.bf16.mxu0 %v9930_v3 }
 0xc05   :  { %v1560_v12 = vpop.f32.mrb[14].mxu0  ;;  %v1632_v13 = vpop.f32.mrb[14].mxu1 }
 0xc06   :  { %v1633_v38 = vadd.f32 %v1632_v13, %v1560_v12  ;;  %v8335_v42 = vpop.f32.mrb[15].mxu0  ;;  %v8346_v41 = vpop.f32.mrb[15].mxu1 }
 0xc08   :  { %v1643_v43 = vadd.f32 %v10160_v58, %v1633_v38 }
 0xc0a   :  { %9728 = vtanh.f32 %v1643_v43  ;;  %v7503_v54 = vmul.f32 -1.442695, %v1643_v43 }
 0xc0d   :  { %v1836_v44 = vpop.f32.mrb[16].mxu1  ;;  %v1763_v47 = vpop.f32.mrb[16].mxu0 }
 0xc0e   :  { %v1837_v48 = vadd.f32 %v1836_v44, %v1763_v47  ;;  %v8368_v49 = vpop.f32.mrb[17].mxu1  ;;  %v8357_v50 = vpop.f32.mrb[17].mxu0 }
 0xc10   :  { %v1847_v46 = vadd.f32 %v10075_v18, %v1837_v48  ;;  %v10386_v48 = vld [vmem:[%s11559_s5] ss:$0 sm:$0xff] }
 0xc12   :  { %9730 = vtanh.f32 %v1847_v46  ;;  %v7508_v55 = vmul.f32 -1.442695, %v1847_v46 }
 0xc13   :  { %9732 = vpow2.f32 %v7503_v54 }
 0xc14   :  { %v9729_v45 = vpop.eup %9728  ;;  %9734 = vpow2.f32 %v7508_v55 }
 0xc15   :  { %1658 = vrot.lane.b32.xlu0 %v9729_v45, %s9933_s29 }
 0xc19   :  { %1653 = vrot.lane.b32.xlu0 %v1651_v51, %s9934_s0 }
 0xc1c   :  { %v9731_v52 = vpop.eup %9730 }
 0xc1d   :  { %1857 = vrot.lane.b32.xlu0 %v1855_v53, %s9934_s0  ;;  %1862 = vrot.lane.b32.xlu1 %v9731_v52, %s9933_s29  ;;  %v9733_v56 = vpop.eup %9732 }
 0xc1e   :  { %v1647_v57 = vadd.f32 1.0, %v9733_v56  ;;  %v9735_v18 = vpop.eup %9734 }
 0xc1f   :  { %v1851_v59 = vadd.f32 1.0, %v9735_v18 }
 0xc20   :  { %9736 = vrcp.f32 %v1647_v57 }
 0xc21   :  { %9738 = vrcp.f32 %v1851_v59 }
 0xc2a   :  { %v9737_v60 = vpop.eup %9736 }
 0xc2b   :  { %v9739_v63 = vpop.eup %9738 }
 0xc87   :  { %v1659_v61 = vpop.permute.xlu0 %1658 }
 0xc88   :  { %v1661_v62 = vmul.f32 %v9737_v60, %v1659_v61 }
 0xc8a   :  { %1663 = vrot.lane.b32.xlu1 %v1661_v62, %s9934_s0 }
 0xc8b   :  { %v1654_v2 = vpop.permute.xlu0 %1653 }
 0xc8c   :  { %v1656_v5 = vmul.f32 %v9737_v60, %v1654_v2 }
 0xc8f   :  { %v1863_v0 = vpop.permute.xlu1 %1862  ;;  %v1858_v10 = vpop.permute.xlu0 %1857 }
 0xc90   :  { %v1865_v1 = vmul.f32 %v9739_v63, %v1863_v0  ;;  %v1860_v11 = vmul.f32 %v9739_v63, %v1858_v10 }
 0xc92   :  { %1867 = vrot.lane.b32.xlu1 %v1865_v1, %s9934_s0 }
 0xcfc   :  { %v1664_v6 = vpop.permute.xlu1 %1663 }
 0xcfd   :  { %v1666_v7 = vadd.f32 %v1664_v6, %v1656_v5 }
 0xcff   :  { %9740 = vtanh.f32 %v1666_v7 }
 0xd04   :  { %v1868_v14 = vpop.permute.xlu1 %1867 }
 0xd05   :  { %v1870_v15 = vadd.f32 %v1868_v14, %v1860_v11 }
 0xd07   :  { %9742 = vtanh.f32 %v1870_v15 }
 0xd09   :  { %v9741_v16 = vpop.eup %9740 }
 0xd0a   :  { %1669 = vrot.lane.b32.xlu0 %v9741_v16, %s9933_s29 }
 0xd11   :  { %v9743_v17 = vpop.eup %9742 }
 0xd12   :  { %1873 = vrot.lane.b32.xlu1 %v9743_v17, %s9933_s29  ;;  %v7527_v17 = vld [vmem:[%s11557_s3 + $0x20] sm:$0xff] }
 0xd7c   :  { %v1670_v19 = vpop.permute.xlu0 %1669 }
 0xd7d   :  { %v1672_v20 = vmul.f32 %v9737_v60, %v1670_v19  ;;  %v7528_v19 = vld [vmem:[%s11557_s3 + $0x28] sm:$0xff]  ;;  %s4511_s3 = scalar_select %p4510_p6, 1.0, 0.0 }
 0xd7f   :  { %1679 = vrot.lane.b32.xlu0 %v1672_v20, %s9934_s0  ;;  %v10403_v20 = vpack.c.bf16 %v7528_v19, %v7527_v17 }
 0xd83   :  { %1674 = vrot.lane.b32.xlu0 %v1666_v7, %s9935_s28 }
 0xd84   :  { %v1874_v21 = vpop.permute.xlu1 %1873 }
 0xd85   :  { %v1876_v22 = vmul.f32 %v9739_v63, %v1874_v21  ;;  %v7531_v21 = vld [vmem:[%s11558_s4 + $0x20] sm:$0xff] }
 0xd87   :  { %1883 = vrot.lane.b32.xlu1 %v1876_v22, %s9934_s0  ;;  %v7532_v22 = vld [vmem:[%s11558_s4 + $0x28] sm:$0xff] }
 0xd8b   :  { %1878 = vrot.lane.b32.xlu1 %v1870_v15, %s9935_s28 }
 0xdf1   :  { %v1680_v23 = vpop.permute.xlu0 %1679 }
 0xdf2   :  { %1682 = vst.msk [vmem:[#allocation2 + $0x8] sm:$0xff] %vm54_vm0, %v1680_v23  ;;  %v10411_v23 = vpack.c.bf16 %v7532_v22, %v7531_v21 }
 0xdf5   :  { %v1675_v28 = vpop.permute.xlu0 %1674 }
 0xdf6   :  { %1677 = vst.msk [vmem:[#allocation3 + $0x8] sm:$0xff] %vm54_vm0, %v1675_v28  ;;  %v7534_v28 = vld [vmem:[%s11558_s4 + $0x38] sm:$0xff]  ;;  %s4516_s4 = ssub.f32 1.0, %s4511_s3 }
 0xdf7   :  { %v10431_v31 = vpack.c.bf16 %v7534_v28, %v7533_v27 }
 0xdf9   :  { %v1884_v35 = vpop.permute.xlu1 %1883  ;;  %v1891_v36 = vld [vmem:[#allocation2 + $0x8] sm:$0xff] }
 0xdfa   :  { %1886 = vst.msk [vmem:[#allocation2] sm:$0xff] %vm54_vm0, %v1884_v35  ;;  %8378 = vmatmul.mubr.msk.f32.vlgmr.msra.gmra.mrb[18].mxu0 %vm54_vm0, %v1891_v36  ;;  %8389 = vmatmul.mubr.msk.f32.vlgmr.msra.gmra.mrb[18].mxu1 %vm54_vm0, %v1884_v35 }
 0xdfb   :  { %9246 = vmatpush3.bf16.msra.mxu1 %v10337_v29  ;;  %9240 = vmatpush3.bf16.msra.mxu0 %v10339_v30 }
 0xdfc   :  { %9247 = vmatprep.subr.bf16.mxu1 %v9930_v3  ;;  %9241 = vmatprep.subr.bf16.mxu0 %v9930_v3 }
 0xdfd   :  { %v1879_v40 = vpop.permute.xlu1 %1878  ;;  %8410 = vmatprep.mubr.msk.f32.mxu1 %vm9932_vm1, %v9931_v8  ;;  %8399 = vmatprep.mubr.msk.f32.mxu0 %vm9932_vm1, %v9931_v8  ;;  %v2056_v51 = vld [vmem:[#allocation3 + $0x8] sm:$0xff] }
 0xdfe   :  { %1881 = vst.msk [vmem:[#allocation3] sm:$0xff] %vm54_vm0, %v1879_v40 }
 0xdff   :  { %9249 = vmatpush3.bf16.msra.mxu1 %v10358_v37  ;;  %9243 = vmatpush3.bf16.msra.mxu0 %v10360_v39 }
 0xe00   :  { %9256 = vmatprep.subr.bf16.mxu1 %v9930_v3  ;;  %9250 = vmatprep.subr.bf16.mxu0 %v9930_v3 }
 0xe01   :  { %v2094_v9 = vld [vmem:[#allocation2] sm:$0xff] }
 0xe02   :  { %8411 = vmatmul.mubr.msk.f32.vlgmr.msra.gmra.mrb[20].mxu1 %vm54_vm0, %v7522_v4  ;;  %8400 = vmatmul.mubr.msk.f32.vlgmr.msra.gmra.mrb[20].mxu0 %vm54_vm0, %v2094_v9 }
 0xe03   :  { %8421 = vmatprep.mubr.msk.f32.mxu0 %vm9932_vm1, %v9931_v8  ;;  %8432 = vmatprep.mubr.msk.f32.mxu1 %vm9932_vm1, %v9931_v8 }
 0xe04   :  { %9258 = vmatpush3.bf16.msra.mxu1 %v10403_v20  ;;  %9252 = vmatpush3.bf16.msra.mxu0 %v10411_v23 }
 0xe05   :  { %v2260_v52 = vld [vmem:[#allocation3] sm:$0xff]  ;;  %9259 = vmatprep.subr.bf16.mxu1 %v9930_v3  ;;  %9253 = vmatprep.subr.bf16.mxu0 %v9930_v3 }
 0xe08   :  { %9261 = vmatpush3.bf16.msra.mxu1 %v10423_v26  ;;  %9255 = vmatpush3.bf16.msra.mxu0 %v10431_v31 }
 0xe09   :  { %9268 = vmatprep.subr.bf16.mxu1 %v9930_v3  ;;  %9262 = vmatprep.subr.bf16.mxu0 %v9930_v3 }
 0xecd   :  { %v1965_v12 = vpop.f32.mrb[18].mxu0  ;;  %v2037_v13 = vpop.f32.mrb[18].mxu1 }
 0xece   :  { %v2038_v38 = vadd.f32 %v2037_v13, %v1965_v12  ;;  %v8379_v42 = vpop.f32.mrb[19].mxu0  ;;  %v8390_v41 = vpop.f32.mrb[19].mxu1  ;;  %v10453_v13 = vld [vmem:[%s11566_s12] sm:$0xff] }
 0xed0   :  { %v2048_v43 = vadd.f32 %v10160_v58, %v2038_v38  ;;  %v7540_v38 = vld [vmem:[%s11555_s1 + $0x30] sm:$0xff] }
 0xed2   :  { %9744 = vtanh.f32 %v2048_v43  ;;  %v7521_v53 = vmul.f32 -1.442695, %v2048_v43 }
 0xed5   :  { %v2241_v44 = vpop.f32.mrb[20].mxu1  ;;  %v2168_v47 = vpop.f32.mrb[20].mxu0 }
 0xed6   :  { %v2242_v49 = vadd.f32 %v2241_v44, %v2168_v47  ;;  %v8412_v50 = vpop.f32.mrb[21].mxu1  ;;  %v8401_v46 = vpop.f32.mrb[21].mxu0  ;;  %v10484_v44 = vld [vmem:[%s11559_s5 + $0x1] ss:$0 sm:$0xff] }
 0xed8   :  { %v2252_v8 = vadd.f32 %v10386_v48, %v2242_v49 }
 0xeda   :  { %9746 = vtanh.f32 %v2252_v8  ;;  %v7526_v54 = vmul.f32 -1.442695, %v2252_v8 }
 0xedb   :  { %9748 = vpow2.f32 %v7521_v53 }
 0xedc   :  { %v9745_v45 = vpop.eup %9744  ;;  %9750 = vpow2.f32 %v7526_v54 }
 0xedd   :  { %2063 = vrot.lane.b32.xlu0 %v9745_v45, %s9933_s29 }
 0xee1   :  { %2058 = vrot.lane.b32.xlu0 %v2056_v51, %s9934_s0 }
 0xee4   :  { %v9747_v58 = vpop.eup %9746 }
 0xee5   :  { %2262 = vrot.lane.b32.xlu0 %v2260_v52, %s9934_s0  ;;  %2267 = vrot.lane.b32.xlu1 %v9747_v58, %s9933_s29  ;;  %v9749_v55 = vpop.eup %9748 }
 0xee6   :  { %v2052_v56 = vadd.f32 1.0, %v9749_v55  ;;  %v9751_v57 = vpop.eup %9750 }
 0xee7   :  { %v2256_v18 = vadd.f32 1.0, %v9751_v57 }
 0xee8   :  { %9752 = vrcp.f32 %v2052_v56 }
 0xee9   :  { %9754 = vrcp.f32 %v2256_v18 }
 0xef2   :  { %v9753_v59 = vpop.eup %9752 }
 0xef3   :  { %v9755_v62 = vpop.eup %9754 }
 0xf4f   :  { %v2064_v60 = vpop.permute.xlu0 %2063 }
 0xf50   :  { %v2066_v61 = vmul.f32 %v9753_v59, %v2064_v60 }
 0xf52   :  { %2068 = vrot.lane.b32.xlu1 %v2066_v61, %s9934_s0 }
 0xf53   :  { %v2059_v1 = vpop.permute.xlu0 %2058 }
 0xf54   :  { %v2061_v2 = vmul.f32 %v9753_v59, %v2059_v1 }
 0xf57   :  { %v2268_v63 = vpop.permute.xlu1 %2267  ;;  %v2263_v7 = vpop.permute.xlu0 %2262 }
 0xf58   :  { %v2270_v0 = vmul.f32 %v9755_v62, %v2268_v63  ;;  %v2265_v10 = vmul.f32 %v9755_v62, %v2263_v7 }
 0xf5a   :  { %2272 = vrot.lane.b32.xlu1 %v2270_v0, %s9934_s0 }
 0xfc4   :  { %v2069_v5 = vpop.permute.xlu1 %2068 }
 0xfc5   :  { %v2071_v6 = vadd.f32 %v2069_v5, %v2061_v2 }
 0xfc7   :  { %9756 = vtanh.f32 %v2071_v6 }
 0xfcc   :  { %v2273_v11 = vpop.permute.xlu1 %2272 }
 0xfcd   :  { %v2275_v14 = vadd.f32 %v2273_v11, %v2265_v10 }
 0xfcf   :  { %9758 = vtanh.f32 %v2275_v14 }
 0xfd1   :  { %v9757_v15 = vpop.eup %9756 }
 0xfd2   :  { %2074 = vrot.lane.b32.xlu0 %v9757_v15, %s9933_s29 }
 0xfd9   :  { %v9759_v16 = vpop.eup %9758 }
 0xfda   :  { %2278 = vrot.lane.b32.xlu1 %v9759_v16, %s9933_s29 }
0x1044   :  { %v2075_v32 = vpop.permute.xlu0 %2074 }
0x1045   :  { %v2077_v33 = vmul.f32 %v9753_v59, %v2075_v32 }
0x1047   :  { %2084 = vrot.lane.b32.xlu0 %v2077_v33, %s9934_s0 }
0x104b   :  { %2079 = vrot.lane.b32.xlu0 %v2071_v6, %s9935_s28 }
0x104c   :  { %v2279_v34 = vpop.permute.xlu1 %2278 }
0x104d   :  { %v2281_v35 = vmul.f32 %v9755_v62, %v2279_v34 }
0x104f   :  { %2288 = vrot.lane.b32.xlu1 %v2281_v35, %s9934_s0 }
0x1053   :  { %2283 = vrot.lane.b32.xlu1 %v2275_v14, %s9935_s28 }
0x10b9   :  { %v2085_v36 = vpop.permute.xlu0 %2084 }
0x10ba   :  { %2087 = vst.msk [vmem:[#allocation2 + $0x8] sm:$0xff] %vm54_vm0, %v2085_v36 }
0x10bd   :  { %v2080_v40 = vpop.permute.xlu0 %2079 }
0x10be   :  { %2082 = vst.msk [vmem:[#allocation3 + $0x8] sm:$0xff] %vm54_vm0, %v2080_v40 }
0x10c1   :  { %v2289_v4 = vpop.permute.xlu1 %2288  ;;  %v2296_v9 = vld [vmem:[#allocation2 + $0x8] sm:$0xff] }
0x10c2   :  { %2291 = vst.msk [vmem:[#allocation2] sm:$0xff] %vm54_vm0, %v2289_v4  ;;  %8422 = vmatmul.mubr.msk.f32.vlgmr.msra.gmra.mrb[22].mxu0 %vm54_vm0, %v2296_v9  ;;  %8433 = vmatmul.mubr.msk.f32.vlgmr.msra.gmra.mrb[22].mxu1 %vm54_vm0, %v2289_v4 }
0x10c3   :  { %9270 = vmatpush3.bf16.msra.mxu1 %v10337_v29  ;;  %9264 = vmatpush3.bf16.msra.mxu0 %v10339_v30 }
0x10c4   :  { %9271 = vmatprep.subr.bf16.mxu1 %v9930_v3  ;;  %9265 = vmatprep.subr.bf16.mxu0 %v9930_v3 }
0x10c5   :  { %v2284_v12 = vpop.permute.xlu1 %2283  ;;  %8454 = vmatprep.mubr.msk.f32.mxu1 %vm9932_vm1, %v10453_v13  ;;  %8443 = vmatprep.mubr.msk.f32.mxu0 %vm9932_vm1, %v10453_v13  ;;  %v2461_v55 = vld [vmem:[#allocation3 + $0x8] sm:$0xff] }
0x10c6   :  { %2286 = vst.msk [vmem:[#allocation3] sm:$0xff] %vm54_vm0, %v2284_v12 }
0x10c7   :  { %9273 = vmatpush3.bf16.msra.mxu1 %v10358_v37  ;;  %9267 = vmatpush3.bf16.msra.mxu0 %v10360_v39 }
0x10c8   :  { %9280 = vmatprep.subr.bf16.mxu1 %v9930_v3  ;;  %9274 = vmatprep.subr.bf16.mxu0 %v9930_v3 }
0x10c9   :  { %v2499_v42 = vld [vmem:[#allocation2] sm:$0xff] }
0x10ca   :  { %8455 = vmatmul.mubr.msk.f32.vlgmr.msra.gmra.mrb[24].mxu1 %vm54_vm0, %v7540_v38  ;;  %8444 = vmatmul.mubr.msk.f32.vlgmr.msra.gmra.mrb[24].mxu0 %vm54_vm0, %v2499_v42 }
0x10cb   :  { %9282 = vmatpush3.bf16.msra.mxu1 %v10403_v20  ;;  %9276 = vmatpush3.bf16.msra.mxu0 %v10411_v23 }
0x10cc   :  { %9283 = vmatprep.subr.bf16.mxu1 %v9930_v3  ;;  %9277 = vmatprep.subr.bf16.mxu0 %v9930_v3 }
0x10cd   :  { %8465 = vmatprep.mubr.msk.f32.mxu0 %vm9932_vm1, %v10453_v13  ;;  %8476 = vmatprep.mubr.msk.f32.mxu1 %vm9932_vm1, %v10453_v13  ;;  %v2665_v57 = vld [vmem:[#allocation3] sm:$0xff] }
0x10cf   :  { %9285 = vmatpush3.bf16.msra.mxu1 %v10423_v26  ;;  %9279 = vmatpush3.bf16.msra.mxu0 %v10431_v31 }
0x10d0   :  { %9292 = vmatprep.subr.bf16.mxu1 %v9930_v3  ;;  %9286 = vmatprep.subr.bf16.mxu0 %v9930_v3 }
0x1195   :  { %v2370_v41 = vpop.f32.mrb[22].mxu0  ;;  %v2442_v43 = vpop.f32.mrb[22].mxu1 }
0x1196   :  { %v2443_v47 = vadd.f32 %v2442_v43, %v2370_v41  ;;  %v8423_v49 = vpop.f32.mrb[23].mxu0  ;;  %v8434_v50 = vpop.f32.mrb[23].mxu1 }
0x1198   :  { %v2453_v46 = vadd.f32 %v10484_v44, %v2443_v47 }
0x119a   :  { %9760 = vtanh.f32 %v2453_v46  ;;  %v7539_v18 = vmul.f32 -1.442695, %v2453_v46 }
0x119d   :  { %v2646_v8 = vpop.f32.mrb[24].mxu1  ;;  %v2573_v45 = vpop.f32.mrb[24].mxu0 }
0x119e   :  { %v2647_v51 = vadd.f32 %v2646_v8, %v2573_v45  ;;  %v8456_v58 = vpop.f32.mrb[25].mxu1  ;;  %v8445_v52 = vpop.f32.mrb[25].mxu0 }
0x11a0   :  { %v2657_v53 = vadd.f32 %v10386_v48, %v2647_v51 }
0x11a2   :  { %9762 = vtanh.f32 %v2657_v53  ;;  %v7544_v59 = vmul.f32 -1.442695, %v2657_v53 }
0x11a3   :  { %9764 = vpow2.f32 %v7539_v18 }
0x11a4   :  { %v9761_v54 = vpop.eup %9760  ;;  %9766 = vpow2.f32 %v7544_v59 }
0x11a5   :  { %2468 = vrot.lane.b32.xlu0 %v9761_v54, %s9933_s29 }
0x11a9   :  { %2463 = vrot.lane.b32.xlu0 %v2461_v55, %s9934_s0 }
0x11ac   :  { %v9763_v56 = vpop.eup %9762 }
0x11ad   :  { %2667 = vrot.lane.b32.xlu0 %v2665_v57, %s9934_s0  ;;  %2672 = vrot.lane.b32.xlu1 %v9763_v56, %s9933_s29  ;;  %v9765_v60 = vpop.eup %9764 }
0x11ae   :  { %v2457_v61 = vadd.f32 1.0, %v9765_v60  ;;  %v9767_v62 = vpop.eup %9766 }
0x11af   :  { %v2661_v63 = vadd.f32 1.0, %v9767_v62 }
0x11b0   :  { %9768 = vrcp.f32 %v2457_v61 }
0x11b1   :  { %9770 = vrcp.f32 %v2661_v63 }
0x11ba   :  { %v9769_v0 = vpop.eup %9768 }
0x11bb   :  { %v9771_v5 = vpop.eup %9770 }
0x1217   :  { %v2469_v1 = vpop.permute.xlu0 %2468 }
0x1218   :  { %v2471_v2 = vmul.f32 %v9769_v0, %v2469_v1 }
0x121a   :  { %2473 = vrot.lane.b32.xlu1 %v2471_v2, %s9934_s0 }
0x121b   :  { %v2464_v10 = vpop.permute.xlu0 %2463 }
0x121c   :  { %v2466_v11 = vmul.f32 %v9769_v0, %v2464_v10 }
0x121f   :  { %v2673_v6 = vpop.permute.xlu1 %2672  ;;  %v2668_v16 = vpop.permute.xlu0 %2667 }
0x1220   :  { %v2675_v7 = vmul.f32 %v9771_v5, %v2673_v6  ;;  %v2670_v17 = vmul.f32 %v9771_v5, %v2668_v16  ;;  %v3308_v16 = vld [vmem:[%s11560_s6 + $0x8] sm:$0xff] }
0x1222   :  { %2677 = vrot.lane.b32.xlu1 %v2675_v7, %s9934_s0 }
0x128c   :  { %v2474_v14 = vpop.permute.xlu1 %2473 }
0x128d   :  { %v2476_v15 = vadd.f32 %v2474_v14, %v2466_v11 }
0x128f   :  { %9772 = vtanh.f32 %v2476_v15 }
0x1294   :  { %v2678_v19 = vpop.permute.xlu1 %2677 }
0x1295   :  { %v2680_v21 = vadd.f32 %v2678_v19, %v2670_v17  ;;  %v3312_v17 = vld [vmem:[%s11561_s7] sm:$0xff]  ;;  %v3313_v19 = vld [vmem:[%s11561_s7 + $0x8] sm:$0xff] }
0x1297   :  { %9774 = vtanh.f32 %v2680_v21 }
0x1299   :  { %v9773_v22 = vpop.eup %9772 }
0x129a   :  { %2479 = vrot.lane.b32.xlu0 %v9773_v22, %s9933_s29 }
0x12a1   :  { %v9775_v24 = vpop.eup %9774 }
0x12a2   :  { %2683 = vrot.lane.b32.xlu1 %v9775_v24, %s9933_s29  ;;  %v10565_v24 = vpack.c.bf16 %v3313_v19, %v3312_v17  ;;  %v7587_v17 = vld [vmem:[%s11561_s7 + $0x38] sm:$0xff]  ;;  %v7582_v19 = vld [vmem:[%s11560_s6 + $0x30] sm:$0xff] }
0x130c   :  { %v2480_v25 = vpop.permute.xlu0 %2479 }
0x130d   :  { %v2482_v27 = vmul.f32 %v9769_v0, %v2480_v25  ;;  %v3309_v25 = vld [vmem:[%s11560_s6 + $0x10] sm:$0xff] }
0x130f   :  { %2489 = vrot.lane.b32.xlu0 %v2482_v27, %s9934_s0  ;;  %v3310_v27 = vld [vmem:[%s11560_s6 + $0x18] sm:$0xff] }
0x1313   :  { %2484 = vrot.lane.b32.xlu0 %v2476_v15, %s9935_s28  ;;  %v3307_v15 = vld [vmem:[%s11560_s6] sm:$0xff] }
0x1314   :  { %v2684_v28 = vpop.permute.xlu1 %2683  ;;  %v10563_v22 = vpack.c.bf16 %v3308_v16, %v3307_v15  ;;  %v7586_v16 = vld [vmem:[%s11561_s7 + $0x30] sm:$0xff] }
0x1315   :  { %v2686_v32 = vmul.f32 %v9771_v5, %v2684_v28  ;;  %v3314_v28 = vld [vmem:[%s11561_s7 + $0x10] sm:$0xff] }
0x1317   :  { %2693 = vrot.lane.b32.xlu1 %v2686_v32, %s9934_s0  ;;  %v3315_v32 = vld [vmem:[%s11561_s7 + $0x18] sm:$0xff] }
0x131b   :  { %2688 = vrot.lane.b32.xlu1 %v2680_v21, %s9935_s28 }
0x1381   :  { %v2490_v33 = vpop.permute.xlu0 %2489 }
0x1382   :  { %2492 = vst.msk [vmem:[#allocation2 + $0x8] sm:$0xff] %vm54_vm0, %v2490_v33 }
0x1385   :  { %v2485_v34 = vpop.permute.xlu0 %2484 }
0x1386   :  { %2487 = vst.msk [vmem:[#allocation3 + $0x8] sm:$0xff] %vm54_vm0, %v2485_v34 }
0x1389   :  { %v2694_v35 = vpop.permute.xlu1 %2693  ;;  %v2701_v36 = vld [vmem:[#allocation2 + $0x8] sm:$0xff] }
0x138a   :  { %2696 = vst.msk [vmem:[#allocation2] sm:$0xff] %vm54_vm0, %v2694_v35  ;;  %8466 = vmatmul.mubr.msk.f32.vlgmr.msra.gmra.mrb[26].mxu0 %vm54_vm0, %v2701_v36  ;;  %8477 = vmatmul.mubr.msk.f32.vlgmr.msra.gmra.mrb[26].mxu1 %vm54_vm0, %v2694_v35  ;;  %v10584_v35 = vpack.c.bf16 %v3310_v27, %v3309_v25  ;;  %v10586_v36 = vpack.c.bf16 %v3315_v32, %v3314_v28  ;;  %v7583_v25 = vld [vmem:[%s11560_s6 + $0x38] sm:$0xff] }
0x138b   :  { %9294 = vmatpush3.bf16.msra.mxu1 %v10337_v29  ;;  %9288 = vmatpush3.bf16.msra.mxu0 %v10339_v30  ;;  %v7558_v29 = vld [vmem:[%s11555_s1 + $0x38] sm:$0xff]  ;;  %v10660_v27 = vpack.c.bf16 %v7583_v25, %v7582_v19  ;;  %v3818_v19 = vld [vmem:[%s11563_s9] sm:$0xff]  ;;  %v3819_v25 = vld [vmem:[%s11563_s9 + $0x8] sm:$0xff] }
0x138c   :  { %9295 = vmatprep.subr.bf16.mxu1 %v9930_v3  ;;  %9289 = vmatprep.subr.bf16.mxu0 %v9930_v3 }
0x138d   :  { %v2689_v40 = vpop.permute.xlu1 %2688  ;;  %8498 = vmatprep.mubr.msk.f32.mxu1 %vm9932_vm1, %v10453_v13  ;;  %8487 = vmatprep.mubr.msk.f32.mxu0 %vm9932_vm1, %v10453_v13  ;;  %v2866_v47 = vld [vmem:[#allocation3 + $0x8] sm:$0xff] }
0x138e   :  { %2691 = vst.msk [vmem:[#allocation3] sm:$0xff] %vm54_vm0, %v2689_v40 }
0x138f   :  { %9297 = vmatpush3.bf16.msra.mxu1 %v10358_v37  ;;  %9291 = vmatpush3.bf16.msra.mxu0 %v10360_v39 }
0x1390   :  { %9304 = vmatprep.subr.bf16.mxu1 %v9930_v3  ;;  %9298 = vmatprep.subr.bf16.mxu0 %v9930_v3 }
0x1391   :  { %v2904_v30 = vld [vmem:[#allocation2] sm:$0xff] }
0x1392   :  { %8499 = vmatmul.mubr.msk.f32.vlgmr.msra.gmra.mrb[28].mxu1 %vm54_vm0, %v7558_v29  ;;  %8488 = vmatmul.mubr.msk.f32.vlgmr.msra.gmra.mrb[28].mxu0 %vm54_vm0, %v2904_v30  ;;  %v3306_v29 = vld [vmem:[%s11556_s2] sm:$0xff] }
0x1393   :  { %9306 = vmatpush3.bf16.msra.mxu1 %v10403_v20  ;;  %9300 = vmatpush3.bf16.msra.mxu0 %v10411_v23 }
0x1394   :  { %9307 = vmatprep.subr.bf16.mxu1 %v9930_v3  ;;  %9301 = vmatprep.subr.bf16.mxu0 %v9930_v3 }
0x1395   :  { %8509 = vmatprep.mubr.msk.f32.mxu0 %vm9932_vm1, %v10453_v13  ;;  %8520 = vmatprep.mubr.msk.f32.mxu1 %vm9932_vm1, %v10453_v13  ;;  %v3070_v50 = vld [vmem:[#allocation3] sm:$0xff] }
0x1397   :  { %9309 = vmatpush3.bf16.msra.mxu1 %v10423_v26  ;;  %9303 = vmatpush3.bf16.msra.mxu0 %v10431_v31 }
0x1398   :  { %9316 = vmatprep.subr.bf16.mxu1 %v9930_v3  ;;  %9310 = vmatprep.subr.bf16.mxu0 %v9930_v3 }
0x145d   :  { %v2775_v37 = vpop.f32.mrb[26].mxu0  ;;  %v2847_v39 = vpop.f32.mrb[26].mxu1 }
0x145e   :  { %v2848_v20 = vadd.f32 %v2847_v39, %v2775_v37  ;;  %v8467_v23 = vpop.f32.mrb[27].mxu0  ;;  %v8478_v4 = vpop.f32.mrb[27].mxu1 }
0x1460   :  { %v2858_v9 = vadd.f32 %v10484_v44, %v2848_v20 }
0x1462   :  { %9776 = vtanh.f32 %v2858_v9  ;;  %v7557_v46 = vmul.f32 -1.442695, %v2858_v9 }
0x1465   :  { %v3051_v12 = vpop.f32.mrb[28].mxu1  ;;  %v2978_v38 = vpop.f32.mrb[28].mxu0 }
0x1466   :  { %v3052_v42 = vadd.f32 %v3051_v12, %v2978_v38  ;;  %v8500_v41 = vpop.f32.mrb[29].mxu1  ;;  %v8489_v43 = vpop.f32.mrb[29].mxu0 }
0x1468   :  { %v3062_v26 = vadd.f32 %v10386_v48, %v3052_v42  ;;  %v10612_v42 = vld [vmem:[%s11562_s8] ss:$0 sm:$0xff] }
0x146a   :  { %9778 = vtanh.f32 %v3062_v26  ;;  %v7562_v8 = vmul.f32 -1.442695, %v3062_v26 }
0x146b   :  { %9780 = vpow2.f32 %v7557_v46 }
0x146c   :  { %v9777_v31 = vpop.eup %9776  ;;  %9782 = vpow2.f32 %v7562_v8 }
0x146d   :  { %2873 = vrot.lane.b32.xlu0 %v9777_v31, %s9933_s29 }
0x1471   :  { %2868 = vrot.lane.b32.xlu0 %v2866_v47, %s9934_s0 }
0x1474   :  { %v9779_v49 = vpop.eup %9778 }
0x1475   :  { %3072 = vrot.lane.b32.xlu0 %v3070_v50, %s9934_s0  ;;  %3077 = vrot.lane.b32.xlu1 %v9779_v49, %s9933_s29  ;;  %v9781_v45 = vpop.eup %9780 }
0x1476   :  { %v2862_v51 = vadd.f32 1.0, %v9781_v45  ;;  %v9783_v48 = vpop.eup %9782 }
0x1477   :  { %v3066_v58 = vadd.f32 1.0, %v9783_v48 }
0x1478   :  { %9784 = vrcp.f32 %v2862_v51 }
0x1479   :  { %9786 = vrcp.f32 %v3066_v58 }
0x1482   :  { %v9785_v52 = vpop.eup %9784 }
0x1483   :  { %v9787_v55 = vpop.eup %9786 }
0x14df   :  { %v2874_v53 = vpop.permute.xlu0 %2873 }
0x14e0   :  { %v2876_v54 = vmul.f32 %v9785_v52, %v2874_v53 }
0x14e2   :  { %2878 = vrot.lane.b32.xlu1 %v2876_v54, %s9934_s0 }
0x14e3   :  { %v2869_v18 = vpop.permute.xlu0 %2868 }
0x14e4   :  { %v2871_v59 = vmul.f32 %v9785_v52, %v2869_v18 }
0x14e7   :  { %v3078_v56 = vpop.permute.xlu1 %3077  ;;  %v3073_v62 = vpop.permute.xlu0 %3072 }
0x14e8   :  { %v3080_v57 = vmul.f32 %v9787_v55, %v3078_v56  ;;  %v3075_v63 = vmul.f32 %v9787_v55, %v3073_v62 }
0x14ea   :  { %3082 = vrot.lane.b32.xlu1 %v3080_v57, %s9934_s0 }
0x1554   :  { %v2879_v60 = vpop.permute.xlu1 %2878 }
0x1555   :  { %v2881_v61 = vadd.f32 %v2879_v60, %v2871_v59 }
0x1557   :  { %9788 = vtanh.f32 %v2881_v61 }
0x155c   :  { %v3083_v0 = vpop.permute.xlu1 %3082 }
0x155d   :  { %v3085_v1 = vadd.f32 %v3083_v0, %v3075_v63 }
0x155f   :  { %9790 = vtanh.f32 %v3085_v1 }
0x1561   :  { %v9789_v2 = vpop.eup %9788 }
0x1562   :  { %2884 = vrot.lane.b32.xlu0 %v9789_v2, %s9933_s29 }
0x1569   :  { %v9791_v5 = vpop.eup %9790 }
0x156a   :  { %3088 = vrot.lane.b32.xlu1 %v9791_v5, %s9933_s29 }
0x15d4   :  { %v2885_v6 = vpop.permute.xlu0 %2884 }
0x15d5   :  { %v2887_v7 = vmul.f32 %v9785_v52, %v2885_v6  ;;  %v7584_v6 = vld [vmem:[%s11561_s7 + $0x20] sm:$0xff] }
0x15d7   :  { %2894 = vrot.lane.b32.xlu0 %v2887_v7, %s9934_s0  ;;  %v7585_v7 = vld [vmem:[%s11561_s7 + $0x28] sm:$0xff] }
0x15db   :  { %2889 = vrot.lane.b32.xlu0 %v2881_v61, %s9935_s28 }
0x15dc   :  { %v3089_v10 = vpop.permute.xlu1 %3088 }
0x15dd   :  { %v3091_v11 = vmul.f32 %v9787_v55, %v3089_v10  ;;  %v7580_v10 = vld [vmem:[%s11560_s6 + $0x20] sm:$0xff] }
0x15df   :  { %3098 = vrot.lane.b32.xlu1 %v3091_v11, %s9934_s0  ;;  %v10635_v11 = vpack.c.bf16 %v7585_v7, %v7584_v6  ;;  %v3304_v6 = vlaneseq }
0x15e1   :  { %v10738_v7 = vand.u32 127, %v3304_v6 }
0x15e3   :  { %3093 = vrot.lane.b32.xlu1 %v3085_v1, %s9935_s28 }
0x1649   :  { %v2895_v14 = vpop.permute.xlu0 %2894 }
0x164a   :  { %2897 = vst.msk [vmem:[#allocation2 + $0x8] sm:$0xff] %vm54_vm0, %v2895_v14  ;;  %v7581_v14 = vld [vmem:[%s11560_s6 + $0x28] sm:$0xff] }
0x164b   :  { %v10640_v15 = vpack.c.bf16 %v7581_v14, %v7580_v10 }
0x164d   :  { %v2890_v21 = vpop.permute.xlu0 %2889 }
0x164e   :  { %2892 = vst.msk [vmem:[#allocation3 + $0x8] sm:$0xff] %vm54_vm0, %v2890_v21  ;;  %v10655_v21 = vpack.c.bf16 %v7587_v17, %v7586_v16 }
0x1651   :  { %v3099_v33 = vpop.permute.xlu1 %3098  ;;  %v3106_v34 = vld [vmem:[#allocation2 + $0x8] sm:$0xff] }
0x1652   :  { %3101 = vst.msk [vmem:[#allocation2] sm:$0xff] %vm54_vm0, %v3099_v33  ;;  %8510 = vmatmul.mubr.msk.f32.vlgmr.msra.gmra.mrb[30].mxu0 %vm54_vm0, %v3106_v34  ;;  %8521 = vmatmul.mubr.msk.f32.vlgmr.msra.gmra.mrb[30].mxu1 %vm54_vm0, %v3099_v33 }
0x1653   :  { %9318 = vmatpush3.bf16.msra.mxu1 %v10563_v22  ;;  %9312 = vmatpush3.bf16.msra.mxu0 %v10565_v24 }
0x1654   :  { %9319 = vmatprep.subr.bf16.mxu1 %v9930_v3  ;;  %9313 = vmatprep.subr.bf16.mxu0 %v9930_v3 }
0x1655   :  { %v3094_v40 = vpop.permute.xlu1 %3093  ;;  %8542 = vmatprep.mubr.msk.f32.mxu1 %vm9932_vm1, %v10453_v13  ;;  %8531 = vmatprep.mubr.msk.f32.mxu0 %vm9932_vm1, %v10453_v13  ;;  %v3271_v49 = vld [vmem:[#allocation3 + $0x8] sm:$0xff] }
0x1656   :  { %3096 = vst.msk [vmem:[#allocation3] sm:$0xff] %vm54_vm0, %v3094_v40 }
0x1657   :  { %9321 = vmatpush3.bf16.msra.mxu1 %v10584_v35  ;;  %9315 = vmatpush3.bf16.msra.mxu0 %v10586_v36 }
0x1658   :  { %9322 = vmatprep.subr.bf16.mxu0 %v9930_v3  ;;  %9328 = vmatprep.subr.bf16.mxu1 %v9930_v3 }
0x1659   :  { %v3311_v30 = vld [vmem:[#allocation2] sm:$0xff] }
0x165a   :  { %8543 = vmatmul.mubr.msk.f32.vlgmr.msra.gmra.mrb[32].mxu1 %vm54_vm0, %v3306_v29  ;;  %8532 = vmatmul.mubr.msk.f32.vlgmr.msra.gmra.mrb[32].mxu0 %vm54_vm0, %v3311_v30 }
0x165b   :  { %8553 = vmatprep.mubr.msk.f32.mxu0 %vm9932_vm1, %v10453_v13  ;;  %8564 = vmatprep.mubr.msk.f32.mxu1 %vm9932_vm1, %v10453_v13 }
0x165c   :  { %9324 = vmatpush3.bf16.msra.mxu0 %v10635_v11  ;;  %9330 = vmatpush3.bf16.msra.mxu1 %v10640_v15 }
0x165d   :  { %v3477_v50 = vld [vmem:[#allocation3] sm:$0xff]  ;;  %9325 = vmatprep.subr.bf16.mxu0 %v9930_v3  ;;  %9331 = vmatprep.subr.bf16.mxu1 %v9930_v3 }
0x1660   :  { %9327 = vmatpush3.bf16.msra.mxu0 %v10655_v21  ;;  %9333 = vmatpush3.bf16.msra.mxu1 %v10660_v27 }
0x1661   :  { %9334 = vmatprep.subr.bf16.mxu0 %v9930_v3  ;;  %9340 = vmatprep.subr.bf16.mxu1 %v9930_v3 }
0x1725   :  { %v3180_v37 = vpop.f32.mrb[30].mxu0  ;;  %v3252_v39 = vpop.f32.mrb[30].mxu1 }
0x1726   :  { %v3253_v20 = vadd.f32 %v3252_v39, %v3180_v37  ;;  %v8511_v23 = vpop.f32.mrb[31].mxu0  ;;  %v8522_v4 = vpop.f32.mrb[31].mxu1 }
0x1727   :  { %v10682_v4 = vld [vmem:[%s11562_s8 + $0x1] ss:$0 sm:$0xff] }
0x1728   :  { %v3263_v9 = vadd.f32 %v10484_v44, %v3253_v20 }
0x172a   :  { %9792 = vtanh.f32 %v3263_v9  ;;  %v7575_v46 = vmul.f32 -1.442695, %v3263_v9 }
0x172d   :  { %v3458_v12 = vpop.f32.mrb[32].mxu1  ;;  %v3385_v38 = vpop.f32.mrb[32].mxu0 }
0x172e   :  { %v3459_v41 = vadd.f32 %v3458_v12, %v3385_v38  ;;  %v8544_v43 = vpop.f32.mrb[33].mxu1  ;;  %v8533_v26 = vpop.f32.mrb[33].mxu0 }
0x1730   :  { %v3469_v31 = vadd.f32 %v10612_v42, %v3459_v41 }
0x1732   :  { %9794 = vtanh.f32 %v3469_v31  ;;  %v7579_v8 = vmul.f32 -1.442695, %v3469_v31 }
0x1733   :  { %9796 = vpow2.f32 %v7575_v46 }
0x1734   :  { %v9793_v47 = vpop.eup %9792  ;;  %9798 = vpow2.f32 %v7579_v8 }
0x1735   :  { %3278 = vrot.lane.b32.xlu0 %v9793_v47, %s9933_s29 }
0x1739   :  { %3273 = vrot.lane.b32.xlu0 %v3271_v49, %s9934_s0 }
0x173c   :  { %v9795_v44 = vpop.eup %9794 }
0x173d   :  { %3479 = vrot.lane.b32.xlu0 %v3477_v50, %s9934_s0  ;;  %3484 = vrot.lane.b32.xlu1 %v9795_v44, %s9933_s29  ;;  %v9797_v45 = vpop.eup %9796 }
0x173e   :  { %v3267_v51 = vadd.f32 1.0, %v9797_v45  ;;  %v9799_v48 = vpop.eup %9798 }
0x173f   :  { %v3473_v58 = vadd.f32 1.0, %v9799_v48  ;;  %v3713_v48 = vld [vmem:[%s11564_s10] sm:$0xff] }
0x1740   :  { %9800 = vrcp.f32 %v3267_v51 }
0x1741   :  { %9802 = vrcp.f32 %v3473_v58  ;;  %v3714_v58 = vld [vmem:[%s11564_s10 + $0x8] sm:$0xff] }
0x174a   :  { %v9801_v52 = vpop.eup %9800 }
0x174b   :  { %v9803_v55 = vpop.eup %9802 }
0x17a7   :  { %v3279_v53 = vpop.permute.xlu0 %3278 }
0x17a8   :  { %v3281_v54 = vmul.f32 %v9801_v52, %v3279_v53  ;;  %v10699_v53 = vpack.c.bf16 %v3714_v58, %v3713_v48 }
0x17aa   :  { %3283 = vrot.lane.b32.xlu1 %v3281_v54, %s9934_s0  ;;  %v3716_v54 = vld [vmem:[%s11564_s10 + $0x18] sm:$0xff] }
0x17ab   :  { %v3274_v18 = vpop.permute.xlu0 %3273 }
0x17ac   :  { %v3276_v59 = vmul.f32 %v9801_v52, %v3274_v18 }
0x17af   :  { %v3485_v56 = vpop.permute.xlu1 %3484  ;;  %v3480_v62 = vpop.permute.xlu0 %3479 }
0x17b0   :  { %v3487_v57 = vmul.f32 %v9803_v55, %v3485_v56  ;;  %v3482_v63 = vmul.f32 %v9803_v55, %v3480_v62 }
0x17b2   :  { %3489 = vrot.lane.b32.xlu1 %v3487_v57, %s9934_s0 }
0x181c   :  { %v3284_v60 = vpop.permute.xlu1 %3283 }
0x181d   :  { %v3286_v61 = vadd.f32 %v3284_v60, %v3276_v59 }
0x181f   :  { %9804 = vtanh.f32 %v3286_v61 }
0x1824   :  { %v3490_v0 = vpop.permute.xlu1 %3489 }
0x1825   :  { %v10621_v1 = vadd.f32 %v3490_v0, %v3482_v63 }
0x1827   :  { %9806 = vtanh.f32 %v10621_v1 }
0x1829   :  { %v9805_v2 = vpop.eup %9804 }
0x182a   :  { %3289 = vrot.lane.b32.xlu0 %v9805_v2, %s9933_s29 }
0x1831   :  { %v9807_v5 = vpop.eup %9806 }
0x1832   :  { %3495 = vrot.lane.b32.xlu1 %v9807_v5, %s9933_s29 }
0x189c   :  { %v3290_v28 = vpop.permute.xlu0 %3289 }
0x189d   :  { %v3292_v32 = vmul.f32 %v9801_v52, %v3290_v28  ;;  %v3715_v52 = vld [vmem:[%s11564_s10 + $0x10] sm:$0xff] }
0x189e   :  { %v3820_v28 = vld [vmem:[%s11563_s9 + $0x10] sm:$0xff] }
0x189f   :  { %3299 = vrot.lane.b32.xlu0 %v3292_v32, %s9934_s0  ;;  %v10750_v32 = vpack.c.bf16 %v3819_v25, %v3818_v19 }
0x18a3   :  { %3294 = vrot.lane.b32.xlu0 %v3286_v61, %s9935_s28  ;;  %v10730_v61 = vld [vmem:[%s11565_s11] ss:$0 sm:$0xff] }
0x18a4   :  { %v3496_v33 = vpop.permute.xlu1 %3495 }
0x18a5   :  { %v3498_v34 = vmul.f32 %v9803_v55, %v3496_v33  ;;  %v10705_v55 = vpack.c.bf16 %v3716_v54, %v3715_v52  ;;  %v3821_v33 = vld [vmem:[%s11563_s9 + $0x18] sm:$0xff] }
0x18a7   :  { %3505 = vrot.lane.b32.xlu1 %v3498_v34, %s9934_s0  ;;  %v10756_v34 = vpack.c.bf16 %v3821_v33, %v3820_v28 }
0x1911   :  { %v3300_v40 = vpop.permute.xlu0 %3299 }
0x1912   :  { %3302 = vst.msk [vmem:[#allocation2 + $0x8] sm:$0xff] %vm54_vm0, %v3300_v40  ;;  %v3822_v40 = vld [vmem:[%s11563_s9 + $0x20] sm:$0xff] }
0x1915   :  { %v3295_v29 = vpop.permute.xlu0 %3294 }
0x1916   :  { %3297 = vst.msk [vmem:[#allocation3 + $0x8] sm:$0xff] %vm54_vm0, %v3295_v29  ;;  %v3823_v29 = vld [vmem:[%s11563_s9 + $0x28] sm:$0xff] }
0x1919   :  { %v3506_v30 = vpop.permute.xlu1 %3505  ;;  %v3514_v37 = vld [vmem:[#allocation2 + $0x8] sm:$0xff] }
0x191a   :  { %3508 = vst.msk [vmem:[#allocation2] sm:$0xff] %vm54_vm0, %v3506_v30  ;;  %8554 = vmatmul.mubr.msk.f32.vlgmr.msra.gmra.mrb[34].mxu0 %vm54_vm0, %v3514_v37  ;;  %8565 = vmatmul.mubr.msk.f32.vlgmr.msra.gmra.mrb[34].mxu1 %vm54_vm0, %v3506_v30  ;;  %v10766_v30 = vpack.c.bf16 %v3823_v29, %v3822_v40  ;;  %v3824_v37 = vld [vmem:[%s11563_s9 + $0x30] sm:$0xff] }
0x191b   :  { %8575 = vmatprep.mubr.msk.f32.mxu0 %vm9932_vm1, %v10453_v13  ;;  %8610 = vmatprep.mubr.msk.f32.mxu1 %vm9932_vm1, %v10453_v13 }
0x191c   :  { %9336 = vmatpush3.bf16.msra.mxu0 %v10699_v53  ;;  %9342 = vmatpush3.bf16.msra.mxu1 %v10750_v32 }
0x191d   :  { %v3681_v39 = vld [vmem:[#allocation3 + $0x8] sm:$0xff]  ;;  %9337 = vmatprep.subr.bf16.mxu0 %v9930_v3  ;;  %9343 = vmatprep.subr.bf16.mxu1 %v9930_v3 }
0x191e   :  { %3683 = vrot.lane.b32.xlu0 %v3681_v39, %s9934_s0  ;;  %v3825_v39 = vld [vmem:[%s11563_s9 + $0x38] sm:$0xff] }
0x1920   :  { %9339 = vmatpush3.bf16.msra.mxu0 %v10705_v55  ;;  %9345 = vmatpush3.bf16.msra.mxu1 %v10756_v34 }
0x1921   :  { %9364 = vmatprep.subr.bf16.mxu0 %v9930_v3  ;;  %v3919_v60 = vld [vmem:[#allocation2] sm:$0xff]  ;;  %9346 = vmatprep.subr.bf16.mxu1 %v9930_v3 }
0x1924   :  { %9348 = vmatpush3.bf16.msra.mxu1 %v10766_v30 }
0x1925   :  { %9349 = vmatprep.subr.bf16.mxu1 %v9930_v3 }
0x1990   :  { %v3684_v46 = vpop.permute.xlu0 %3683 }
0x19ed   :  { %v3589_v20 = vpop.f32.mrb[34].mxu0  ;;  %v3661_v23 = vpop.f32.mrb[34].mxu1 }
0x19ee   :  { %v3662_v9 = vadd.f32 %v3661_v23, %v3589_v20  ;;  %v8555_v12 = vpop.f32.mrb[35].mxu0  ;;  %v8566_v38 = vpop.f32.mrb[35].mxu1  ;;  %v10776_v20 = vpack.c.bf16 %v3825_v39, %v3824_v37  ;;  %v3826_v23 = vld [vmem:[%s11563_s9 + $0x40] sm:$0xff] }
0x19ef   :  { %v3828_v38 = vld [vmem:[%s11563_s9 + $0x50] sm:$0xff] }
0x19f0   :  { %v3673_v41 = vadd.f32 %v10682_v4, %v3662_v9  ;;  %v3827_v9 = vld [vmem:[%s11563_s9 + $0x48] sm:$0xff]  ;;  %9351 = vmatpush3.bf16.msra.mxu1 %v10776_v20 }
0x19f1   :  { %v10786_v12 = vpack.c.bf16 %v3827_v9, %v3826_v23  ;;  %9352 = vmatprep.subr.bf16.mxu1 %v9930_v3 }
0x19f2   :  { %9808 = vtanh.f32 %v3673_v41  ;;  %v7592_v26 = vmul.f32 -1.442695, %v3673_v41  ;;  %v3829_v41 = vld [vmem:[%s11563_s9 + $0x58] sm:$0xff] }
0x19f4   :  { %9810 = vpow2.f32 %v7592_v26  ;;  %9354 = vmatpush3.bf16.msra.mxu1 %v10786_v12  ;;  %v3830_v26 = vld [vmem:[%s11563_s9 + $0x60] sm:$0xff] }
0x19f5   :  { %9355 = vmatprep.subr.bf16.mxu1 %v9930_v3 }
0x19fc   :  { %v9809_v43 = vpop.eup %9808 }
0x19fd   :  { %3688 = vrot.lane.b32.xlu1 %v9809_v43, %s9933_s29  ;;  %v10796_v43 = vpack.c.bf16 %v3829_v41, %v3828_v38 }
0x19fe   :  { %v9811_v31 = vpop.eup %9810 }
0x19ff   :  { %v3677_v47 = vadd.f32 1.0, %v9811_v31  ;;  %v3831_v31 = vld [vmem:[%s11563_s9 + $0x68] sm:$0xff]  ;;  %9357 = vmatpush3.bf16.msra.mxu1 %v10796_v43 }
0x1a00   :  { %9358 = vmatprep.subr.bf16.mxu1 %v9930_v3 }
0x1a01   :  { %9812 = vrcp.f32 %v3677_v47  ;;  %v10806_v47 = vpack.c.bf16 %v3831_v31, %v3830_v26 }
0x1a03   :  { %9360 = vmatpush3.bf16.msra.mxu1 %v10806_v47 }
0x1a04   :  { %9361 = vmatprep.subr.bf16.mxu1 %v9930_v3 }
0x1a0b   :  { %v9813_v49 = vpop.eup %9812 }
0x1a0c   :  { %v3686_v8 = vmul.f32 %v9813_v49, %v3684_v46 }
0x1a6f   :  { %v3689_v44 = vpop.permute.xlu1 %3688 }
0x1a70   :  { %v3691_v50 = vmul.f32 %v9813_v49, %v3689_v44 }
0x1a72   :  { %3693 = vrot.lane.b32.xlu1 %v3691_v50, %s9934_s0 }
0x1ae4   :  { %v3694_v45 = vpop.permute.xlu1 %3693 }
0x1ae5   :  { %v10687_v51 = vadd.f32 %v3694_v45, %v3686_v8  ;;  %v3832_v8 = vld [vmem:[%s11563_s9 + $0x70] sm:$0xff]  ;;  %v3833_v45 = vld [vmem:[%s11563_s9 + $0x78] sm:$0xff] }
0x1ae6   :  { %v10817_v48 = vpack.c.bf16 %v3833_v45, %v3832_v8 }
0x1ae7   :  { %9814 = vtanh.f32 %v10687_v51 }
0x1ae8   :  { %9363 = vmatpush3.bf16.msra.mxu1 %v10817_v48 }
0x1ae9   :  { %9388 = vmatprep.subr.bf16.mxu1 %v9930_v3 }
0x1af1   :  { %v9815_v56 = vpop.eup %9814 }
0x1af2   :  { %3699 = vrot.lane.b32.xlu0 %v9815_v56, %s9933_s29 }
0x1b64   :  { %v3700_v57 = vpop.permute.xlu0 %3699 }
0x1b65   :  { %v3702_v18 = vmul.f32 %v9813_v49, %v3700_v57 }
0x1b67   :  { %3709 = vrot.lane.b32.xlu1 %v3702_v18, %s9934_s0 }
0x1bd9   :  { %v3710_v59 = vpop.permute.xlu1 %3709 }
0x1bda   :  { %3712 = vst.msk [vmem:[#allocation2 + $0x8] sm:$0xff] %vm54_vm0, %v3710_v59  ;;  %8576 = vmatmul.mubr.msk.f32.vlgmr.msra.gmra.mrb[36].mxu0 %vm54_vm0, %v3710_v59  ;;  %v9936_v59 = vmov 1.0  }
0x1bdb   :  { %9366 = vmatpush3.bf16.msra.mxu0 %v10565_v24  ;;  %8621 = vmatprep.mubr.msk.f32.mxu0 %vm9932_vm1, %v10453_v13 }
0x1bdc   :  { %9367 = vmatprep.subr.bf16.mxu0 %v9930_v3 }
0x1bdf   :  { %9369 = vmatpush3.bf16.msra.mxu0 %v10586_v36 }
0x1be0   :  { %9370 = vmatprep.subr.bf16.mxu0 %v9930_v3 }
0x1be2   :  { %8622 = vmatmul.mubr.msk.f32.vlgmr.msra.gmra.mrb[38].mxu0 %vm54_vm0, %v3919_v60  ;;  %v3909_v60 = vstv %s3906_s17 }
0x1be3   :  { %9372 = vmatpush3.bf16.msra.mxu0 %v10563_v22  ;;  %8632 = vmatprep.mubr.msk.f32.mxu0 %vm9932_vm1, %v10453_v13 }
0x1be4   :  { %9373 = vmatprep.subr.bf16.mxu0 %v9930_v3 }
0x1be7   :  { %9375 = vmatpush3.bf16.msra.mxu0 %v10584_v35 }
0x1be8   :  { %9376 = vmatprep.subr.bf16.mxu0 %v9930_v3 }
0x1cad   :  { %v3792_v62 = vpop.f32.mrb[36].mxu0 }
0x1cae   :  { %v3793_v63 = vadd.f32 %v10730_v61, %v3792_v62  ;;  %v8577_v0 = vpop.f32.mrb[37].mxu0  ;;  %v3912_v62 = vstv %s3911_s18 }
0x1cb0   :  { %7595 = vst [vmem:[%s11566_s12 + $0x8] sm:$0xff] %v3793_v63  ;;  %3798 = vmax.xlane.f32.xlu0 %v3793_v63 }
0x1cb5   :  { %v10736_v2 = vpop.f32.mrb[38].mxu0 }
0x1cb6   :  { %v8623_v5 = vpop.f32.mrb[39].mxu0 }
0x1d3d   :  { %v3799_v10 = vpop.xlane.xlu0 %3798 }
0x1d3e   :  { %vm3800_vm2 = vcmp.eq.f32.partialorder %v3793_v63, %v3799_v10 }
0x1d3f   :  { %v3801_v14 = vsel %vm3800_vm2, %v10738_v7, 128 }
0x1d40   :  { %v3803_v16 = vshra.s32 %v3801_v14, 16  ;;  %v3802_v49 = vand.u32 65535, %v3801_v14  ;;  %v4121_v14 = vld [vmem:[#allocation2 + $0x8] sm:$0xff] }
0x1d42   :  { %v3805_v17 = vcvt.s32.f32 %v3803_v16  ;;  %v3804_v44 = vcvt.s32.f32 %v3802_v49 }
0x1d44   :  { %3806 = vmin.xlane.f32.xlu1 %v3805_v17 }
0x1dd1   :  { %v3807_v50 = vpop.xlane.xlu1 %3806 }
0x1dd2   :  { %vm3808_vm3 = vcmp.eq.f32.partialorder %v3805_v17, %v3807_v50  ;;  %v3813_v58 = vcvt.f32.s32 %v3807_v50 }
0x1dd3   :  { %v3809_v46 = vsel %vm3808_vm3, %v3804_v44, inf }
0x1dd4   :  { %3810 = vmin.xlane.f32.xlu0 %v3809_v46  ;;  %v3814_v54 = vshll.u32 %v3813_v58, 16 }
0x1dea   :  { %3500 = vrot.lane.b32.xlu0 %v10621_v1, %s9935_s28  ;;  %v7598_v1 = vld [vmem:[%s11556_s2 + $0x8] sm:$0xff] }
0x1deb   :  { %v3910_v63 = vmul.f32 %v7598_v1, %v3909_v60 }
0x1e61   :  { %v3811_v52 = vpop.xlane.xlu0 %3810 }
0x1e62   :  { %v3812_v56 = vcvt.f32.s32 %v3811_v52 }
0x1e64   :  { %v3815_v57 = vadd.s32 %v3814_v54, %v3812_v56 }
0x1e65   :  { %v3501_v18 = vpop.permute.xlu0 %3500 }
0x1e66   :  { %vm3816_vm4 = vcmp.eq.s32.totalorder %v10738_v7, %v3815_v57  ;;  %3503 = vst.msk [vmem:[#allocation3] sm:$0xff] %vm54_vm0, %v3501_v18 }
0x1e67   :  { %8611 = vmatmul.mubr.msk.f32.vlgmr.msra.gmra.mrb[36].mxu1 %vm3816_vm4, %v9936_v59 }
0x1e68   :  { %9390 = vmatpush3.bf16.msra.mxu1 %v10699_v53  ;;  %8665 = vmatprep.mubr.msk.f32.mxu1 %vm9932_vm1, %v10453_v13 }
0x1e69   :  { %9391 = vmatprep.subr.bf16.mxu1 %v9930_v3 }
0x1e6c   :  { %9393 = vmatpush3.bf16.msra.mxu1 %v10705_v55 }
0x1e6d   :  { %9418 = vmatprep.subr.bf16.mxu1 %v9930_v3  ;;  %v4085_v29 = vld [vmem:[#allocation3] sm:$0xff] }
0x1f3a   :  { %v3900_v0 = vpop.f32.mrb[36].mxu1 }
0x1f3b   :  { %v3913_v5 = vmul.f32 %v3912_v62, %v3900_v0  ;;  %v8612_v6 = vpop.f32.mrb[37].mxu1 }
0x1f3d   :  { %v3914_v10 = vadd.f32 %v3913_v5, %v3910_v63 }
0x1f3f   :  { %8633 = vmatmul.mubr.msk.f32.vlgmr.msra.gmra.mrb[40].mxu0 %vm54_vm0, %v3914_v10 }
0x1f40   :  { %9378 = vmatpush3.bf16.msra.mxu0 %v10635_v11  ;;  %8643 = vmatprep.mubr.msk.f32.mxu0 %vm9932_vm1, %v10453_v13 }
0x1f41   :  { %9379 = vmatprep.subr.bf16.mxu0 %v9930_v3 }
0x1f44   :  { %9381 = vmatpush3.bf16.msra.mxu0 %v10655_v21 }
0x1f45   :  { %9382 = vmatprep.subr.bf16.mxu0 %v9930_v3 }
0x1f47   :  { %8644 = vmatmul.mubr.msk.f32.vlgmr.msra.gmra.mrb[42].mxu0 %vm54_vm0, %v4121_v14 }
0x1f48   :  { %9384 = vmatpush3.bf16.msra.mxu0 %v10640_v15  ;;  %8654 = vmatprep.mubr.msk.f32.mxu0 %vm9932_vm1, %v10453_v13 }
0x1f49   :  { %9385 = vmatprep.subr.bf16.mxu0 %v9930_v3 }
0x1f4c   :  { %9387 = vmatpush3.bf16.msra.mxu0 %v10660_v27 }
0x1f4d   :  { %9394 = vmatprep.subr.bf16.mxu0 %v9930_v3 }
0x2012   :  { %v4066_v16 = vpop.f32.mrb[40].mxu0 }
0x2013   :  { %v4067_v17 = vadd.f32 %v4066_v16, %v10736_v2  ;;  %v8634_v19 = vpop.f32.mrb[41].mxu0 }
0x2015   :  { %v4077_v25 = vadd.f32 %v10612_v42, %v4067_v17 }
0x2017   :  { %9816 = vtanh.f32 %v4077_v25  ;;  %v7602_v37 = vmul.f32 -1.442695, %v4077_v25  ;;  %v10897_v25 = vld [vmem:[%s11566_s12] sm:$0xff] }
0x2019   :  { %9818 = vpow2.f32 %v7602_v37 }
0x201a   :  { %v4195_v28 = vpop.f32.mrb[42].mxu0 }
0x201b   :  { %v8645_v33 = vpop.f32.mrb[43].mxu0 }
0x2021   :  { %v9817_v40 = vpop.eup %9816 }
0x2022   :  { %4092 = vrot.lane.b32.xlu1 %v9817_v40, %s9933_s29 }
0x2023   :  { %v9819_v39 = vpop.eup %9818 }
0x2024   :  { %v4081_v23 = vadd.f32 1.0, %v9819_v39 }
0x2026   :  { %4087 = vrot.lane.b32.xlu1 %v4085_v29, %s9934_s0  ;;  %9820 = vrcp.f32 %v4081_v23 }
0x2030   :  { %v9821_v9 = vpop.eup %9820 }
0x2094   :  { %v4093_v38 = vpop.permute.xlu1 %4092 }
0x2095   :  { %v4095_v2 = vmul.f32 %v9821_v9, %v4093_v38 }
0x2097   :  { %4097 = vrot.lane.b32.xlu0 %v4095_v2, %s9934_s0 }
0x2098   :  { %v4088_v41 = vpop.permute.xlu1 %4087 }
0x2099   :  { %v4090_v26 = vmul.f32 %v9821_v9, %v4088_v41 }
0x2109   :  { %v4098_v31 = vpop.permute.xlu0 %4097 }
0x210a   :  { %v10854_v49 = vadd.f32 %v4098_v31, %v4090_v26 }
0x210c   :  { %9822 = vtanh.f32 %v10854_v49 }
0x2116   :  { %v9823_v44 = vpop.eup %9822 }
0x2117   :  { %4103 = vrot.lane.b32.xlu1 %v9823_v44, %s9933_s29 }
0x211b   :  { %3704 = vrot.lane.b32.xlu1 %v10687_v51, %s9935_s28 }
0x2189   :  { %v4104_v50 = vpop.permute.xlu1 %4103 }
0x218a   :  { %v4106_v46 = vmul.f32 %v9821_v9, %v4104_v50 }
0x218c   :  { %4113 = vrot.lane.b32.xlu0 %v4106_v46, %s9934_s0 }
0x218d   :  { %v3705_v8 = vpop.permute.xlu1 %3704 }
0x218e   :  { %3707 = vst.msk [vmem:[#allocation3 + $0x8] sm:$0xff] %vm54_vm0, %v3705_v8  ;;  %v7621_v8 = vld [vmem:[%s11556_s2 + $0x10] sm:$0xff] }
0x2195   :  { %v4286_v45 = vld [vmem:[#allocation3 + $0x8] sm:$0xff] }
0x2196   :  { %4288 = vrot.lane.b32.xlu1 %v4286_v45, %s9934_s0  ;;  %v4514_v45 = vstv %s4511_s3  ;;  %s6326_s3 = scalar_select %p6325_p9, 1.0, 0.0 }
0x21fe   :  { %v4114_v58 = vpop.permute.xlu0 %4113 }
0x21ff   :  { %4116 = vst.msk [vmem:[#allocation2] sm:$0xff] %vm54_vm0, %v4114_v58  ;;  %8655 = vmatmul.mubr.msk.f32.vlgmr.msra.gmra.mrb[44].mxu0 %vm54_vm0, %v4114_v58  ;;  %v4517_v58 = vstv %s4516_s4  ;;  %s6331_s4 = ssub.f32 1.0, %s6326_s3 }
0x2200   :  { %9396 = vmatpush3.bf16.msra.mxu0 %v10750_v32  ;;  %8700 = vmatprep.mubr.msk.f32.mxu0 %vm9932_vm1, %v10453_v13 }
0x2201   :  { %9397 = vmatprep.subr.bf16.mxu0 %v9930_v3 }
0x2204   :  { %9399 = vmatpush3.bf16.msra.mxu0 %v10756_v34 }
0x2205   :  { %9400 = vmatprep.subr.bf16.mxu0 %v9930_v3 }
0x2208   :  { %9402 = vmatpush3.bf16.msra.mxu0 %v10766_v30  ;;  %v4289_v0 = vpop.permute.xlu1 %4288 }
0x2209   :  { %9403 = vmatprep.subr.bf16.mxu0 %v9930_v3 }
0x220c   :  { %9405 = vmatpush3.bf16.msra.mxu0 %v10776_v20 }
0x220d   :  { %9406 = vmatprep.subr.bf16.mxu0 %v9930_v3 }
0x2210   :  { %9408 = vmatpush3.bf16.msra.mxu0 %v10786_v12 }
0x2211   :  { %9409 = vmatprep.subr.bf16.mxu0 %v9930_v3 }
0x2214   :  { %9411 = vmatpush3.bf16.msra.mxu0 %v10796_v43 }
0x2215   :  { %9412 = vmatprep.subr.bf16.mxu0 %v9930_v3 }
0x2218   :  { %9414 = vmatpush3.bf16.msra.mxu0 %v10806_v47 }
0x2219   :  { %9415 = vmatprep.subr.bf16.mxu0 %v9930_v3 }
0x221c   :  { %9417 = vmatpush3.bf16.msra.mxu0 %v10817_v48 }
0x221d   :  { %9442 = vmatprep.subr.bf16.mxu0 %v9930_v3 }
0x22d2   :  { %v4267_v13 = vpop.f32.mrb[44].mxu0 }
0x22d3   :  { %v4268_v51 = vadd.f32 %v4267_v13, %v4195_v28  ;;  %v8656_v52 = vpop.f32.mrb[45].mxu0  ;;  %v4524_v28 = vld [vmem:[#allocation2] sm:$0xff] }
0x22d5   :  { %v4278_v54 = vadd.f32 %v10682_v4, %v4268_v51 }
0x22d7   :  { %9824 = vtanh.f32 %v4278_v54  ;;  %v7615_v57 = vmul.f32 -1.442695, %v4278_v54 }
0x22d9   :  { %9826 = vpow2.f32 %v7615_v57 }
0x22e1   :  { %v9825_v56 = vpop.eup %9824 }
0x22e2   :  { %4293 = vrot.lane.b32.xlu0 %v9825_v56, %s9933_s29 }
0x22e3   :  { %v9827_v18 = vpop.eup %9826 }
0x22e4   :  { %v4282_v1 = vadd.f32 1.0, %v9827_v18 }
0x22e6   :  { %9828 = vrcp.f32 %v4282_v1 }
0x22f0   :  { %v9829_v60 = vpop.eup %9828 }
0x22f1   :  { %v4291_v5 = vmul.f32 %v9829_v60, %v4289_v0 }
0x2354   :  { %v4294_v62 = vpop.permute.xlu0 %4293 }
0x2355   :  { %v4296_v63 = vmul.f32 %v9829_v60, %v4294_v62 }
0x2357   :  { %4298 = vrot.lane.b32.xlu0 %v4296_v63, %s9934_s0 }
0x23c9   :  { %v4299_v6 = vpop.permute.xlu0 %4298 }
0x23ca   :  { %v10886_v10 = vadd.f32 %v4299_v6, %v4291_v5 }
0x23cc   :  { %9830 = vtanh.f32 %v10886_v10 }
0x23d6   :  { %v9831_v14 = vpop.eup %9830 }
0x23d7   :  { %4304 = vrot.lane.b32.xlu1 %v9831_v14, %s9933_s29 }
0x2449   :  { %v4305_v16 = vpop.permute.xlu1 %4304 }
0x244a   :  { %v4307_v17 = vmul.f32 %v9829_v60, %v4305_v16 }
0x244c   :  { %4314 = vrot.lane.b32.xlu0 %v4307_v17, %s9934_s0 }
0x24be   :  { %v4315_v19 = vpop.permute.xlu0 %4314 }
0x24bf   :  { %4317 = vst.msk [vmem:[#allocation2 + $0x8] sm:$0xff] %vm54_vm0, %v4315_v19  ;;  %8666 = vmatmul.mubr.msk.f32.vlgmr.msra.gmra.mrb[38].mxu1 %vm54_vm0, %v4315_v19 }
0x24c0   :  { %9420 = vmatpush3.bf16.msra.mxu1 %v10565_v24  ;;  %8711 = vmatprep.mubr.msk.f32.mxu1 %vm9932_vm1, %v10897_v25 }
0x24c1   :  { %9421 = vmatprep.subr.bf16.mxu1 %v9930_v3 }
0x24c4   :  { %9423 = vmatpush3.bf16.msra.mxu1 %v10586_v36 }
0x24c5   :  { %9424 = vmatprep.subr.bf16.mxu1 %v9930_v3 }
0x24c7   :  { %8712 = vmatmul.mubr.msk.f32.vlgmr.msra.gmra.mrb[40].mxu1 %vm54_vm0, %v4524_v28 }
0x24c8   :  { %9426 = vmatpush3.bf16.msra.mxu1 %v10563_v22  ;;  %8722 = vmatprep.mubr.msk.f32.mxu1 %vm9932_vm1, %v10897_v25 }
0x24c9   :  { %9427 = vmatprep.subr.bf16.mxu1 %v9930_v3 }
0x24cc   :  { %9429 = vmatpush3.bf16.msra.mxu1 %v10584_v35 }
0x24cd   :  { %9430 = vmatprep.subr.bf16.mxu1 %v9930_v3 }
0x2592   :  { %v4397_v24 = vpop.f32.mrb[38].mxu1 }
0x2593   :  { %v4398_v33 = vadd.f32 %v10730_v61, %v4397_v24  ;;  %v8667_v36 = vpop.f32.mrb[39].mxu1 }
0x2595   :  { %7618 = vst [vmem:[%s11566_s12 + $0x10] sm:$0xff] %v4398_v33  ;;  %4403 = vmax.xlane.f32.xlu1 %v4398_v33 }
0x259a   :  { %v4598_v40 = vpop.f32.mrb[40].mxu1 }
0x259b   :  { %v8713_v22 = vpop.f32.mrb[41].mxu1 }
0x25a6   :  { %4108 = vrot.lane.b32.xlu1 %v10854_v49, %s9935_s28 }
0x2622   :  { %v4404_v29 = vpop.xlane.xlu1 %4403 }
0x2623   :  { %vm4405_vm5 = vcmp.eq.f32.partialorder %v4398_v33, %v4404_v29 }
0x2624   :  { %v4406_v35 = vsel %vm4405_vm5, %v10738_v7, 128 }
0x2625   :  { %v4408_v37 = vshra.s32 %v4406_v35, 16  ;;  %v4407_v38 = vand.u32 65535, %v4406_v35 }
0x2626   :  { %v4109_v39 = vpop.permute.xlu1 %4108 }
0x2627   :  { %v4410_v23 = vcvt.s32.f32 %v4408_v37  ;;  %4111 = vst.msk [vmem:[#allocation3] sm:$0xff] %vm54_vm0, %v4109_v39  ;;  %v4409_v2 = vcvt.s32.f32 %v4407_v38  ;;  %v5130_v38 = vld [vmem:[%s11561_s7] sm:$0xff] }
0x2629   :  { %4411 = vmin.xlane.f32.xlu0 %v4410_v23 }
0x262e   :  { %v4690_v9 = vld [vmem:[#allocation3] sm:$0xff] }
0x262f   :  { %4692 = vrot.lane.b32.xlu1 %v4690_v9, %s9934_s0 }
0x26a1   :  { %v4693_v6 = vpop.permute.xlu1 %4692 }
0x26b6   :  { %v4412_v41 = vpop.xlane.xlu0 %4411 }
0x26b7   :  { %vm4413_vm6 = vcmp.eq.f32.partialorder %v4410_v23, %v4412_v41  ;;  %v4418_v31 = vcvt.f32.s32 %v4412_v41 }
0x26b8   :  { %v4414_v26 = vsel %vm4413_vm6, %v4409_v2, inf  ;;  %v5131_v2 = vld [vmem:[%s11561_s7 + $0x8] sm:$0xff] }
0x26b9   :  { %4415 = vmin.xlane.f32.xlu0 %v4414_v26  ;;  %v4419_v44 = vshll.u32 %v4418_v31, 16  ;;  %v10991_v41 = vpack.c.bf16 %v5131_v2, %v5130_v38  ;;  %v5132_v26 = vld [vmem:[%s11561_s7 + $0x10] sm:$0xff]  ;;  %v5133_v31 = vld [vmem:[%s11561_s7 + $0x18] sm:$0xff] }
0x2746   :  { %v4416_v49 = vpop.xlane.xlu0 %4415 }
0x2747   :  { %v4417_v50 = vcvt.f32.s32 %v4416_v49 }
0x2749   :  { %v4420_v46 = vadd.s32 %v4419_v44, %v4417_v50  ;;  %v11002_v44 = vpack.c.bf16 %v5133_v31, %v5132_v26 }
0x274b   :  { %vm4421_vm7 = vcmp.eq.s32.totalorder %v10738_v7, %v4420_v46 }
0x274c   :  { %8701 = vmatmul.mubr.msk.f32.vlgmr.msra.gmra.mrb[46].mxu0 %vm4421_vm7, %v9936_v59 }
0x274d   :  { %9444 = vmatpush3.bf16.msra.mxu0 %v10699_v53  ;;  %8755 = vmatprep.mubr.msk.f32.mxu0 %vm9932_vm1, %v10897_v25  ;;  %v4515_v53 = vmul.f32 %v7621_v8, %v4514_v45 }
0x274e   :  { %9445 = vmatprep.subr.bf16.mxu0 %v9930_v3 }
0x2751   :  { %9447 = vmatpush3.bf16.msra.mxu0 %v10705_v55  ;;  %v4726_v55 = vld [vmem:[#allocation2 + $0x8] sm:$0xff] }
0x2752   :  { %9472 = vmatprep.subr.bf16.mxu0 %v9930_v3 }
0x281f   :  { %v4505_v13 = vpop.f32.mrb[46].mxu0 }
0x2820   :  { %v4518_v51 = vmul.f32 %v4517_v58, %v4505_v13  ;;  %v8702_v52 = vpop.f32.mrb[47].mxu0 }
0x2822   :  { %v4519_v54 = vadd.f32 %v4518_v51, %v4515_v53 }
0x2824   :  { %8723 = vmatmul.mubr.msk.f32.vlgmr.msra.gmra.mrb[42].mxu1 %vm54_vm0, %v4519_v54 }
0x2825   :  { %9432 = vmatpush3.bf16.msra.mxu1 %v10635_v11  ;;  %8733 = vmatprep.mubr.msk.f32.mxu1 %vm9932_vm1, %v10897_v25 }
0x2826   :  { %9433 = vmatprep.subr.bf16.mxu1 %v9930_v3 }
0x2829   :  { %9435 = vmatpush3.bf16.msra.mxu1 %v10655_v21 }
0x282a   :  { %9436 = vmatprep.subr.bf16.mxu1 %v9930_v3 }
0x282c   :  { %8734 = vmatmul.mubr.msk.f32.vlgmr.msra.gmra.mrb[44].mxu1 %vm54_vm0, %v4726_v55 }
0x282d   :  { %9438 = vmatpush3.bf16.msra.mxu1 %v10640_v15  ;;  %8744 = vmatprep.mubr.msk.f32.mxu1 %vm9932_vm1, %v10897_v25 }
0x282e   :  { %9439 = vmatprep.subr.bf16.mxu1 %v9930_v3 }
0x2831   :  { %9441 = vmatpush3.bf16.msra.mxu1 %v10660_v27 }
0x2832   :  { %9448 = vmatprep.subr.bf16.mxu1 %v9930_v3 }
0x28f7   :  { %v4671_v11 = vpop.f32.mrb[42].mxu1 }
0x28f8   :  { %v4672_v56 = vadd.f32 %v4671_v11, %v4598_v40  ;;  %v8724_v57 = vpop.f32.mrb[43].mxu1 }
0x28f9   :  { %v5125_v57 = vld [vmem:[%s11560_s6] sm:$0xff] }
0x28fa   :  { %v4682_v21 = vadd.f32 %v10612_v42, %v4672_v56 }
0x28fc   :  { %9832 = vtanh.f32 %v4682_v21  ;;  %v7625_v15 = vmul.f32 -1.442695, %v4682_v21  ;;  %v5126_v21 = vld [vmem:[%s11560_s6 + $0x8] sm:$0xff] }
0x28fe   :  { %9834 = vpow2.f32 %v7625_v15 }
0x28ff   :  { %v4800_v18 = vpop.f32.mrb[44].mxu1 }
0x2900   :  { %v8735_v1 = vpop.f32.mrb[45].mxu1 }
0x2906   :  { %v9833_v60 = vpop.eup %9832 }
0x2907   :  { %4697 = vrot.lane.b32.xlu0 %v9833_v60, %s9933_s29 }
0x2908   :  { %v9835_v62 = vpop.eup %9834 }
0x2909   :  { %v4686_v63 = vadd.f32 1.0, %v9835_v62 }
0x290b   :  { %9836 = vrcp.f32 %v4686_v63 }
0x2915   :  { %v9837_v0 = vpop.eup %9836 }
0x2916   :  { %v4695_v14 = vmul.f32 %v9837_v0, %v4693_v6 }
0x2979   :  { %v4698_v27 = vpop.permute.xlu0 %4697 }
0x297a   :  { %v4700_v5 = vmul.f32 %v9837_v0, %v4698_v27  ;;  %v5127_v27 = vld [vmem:[%s11560_s6 + $0x10] sm:$0xff] }
0x297c   :  { %4702 = vrot.lane.b32.xlu1 %v4700_v5, %s9934_s0  ;;  %v5128_v5 = vld [vmem:[%s11560_s6 + $0x18] sm:$0xff] }
0x297d   :  { %v11042_v6 = vpack.c.bf16 %v5128_v5, %v5127_v27 }
0x29ee   :  { %v4703_v16 = vpop.permute.xlu1 %4702 }
0x29ef   :  { %v10948_v42 = vadd.f32 %v4703_v16, %v4695_v14  ;;  %v7644_v14 = vld [vmem:[%s11556_s2 + $0x18] sm:$0xff]  ;;  %v5119_v16 = vstv %s5116_s27 }
0x29f1   :  { %9838 = vtanh.f32 %v10948_v42 }
0x29fb   :  { %v9839_v17 = vpop.eup %9838 }
0x29fc   :  { %4708 = vrot.lane.b32.xlu0 %v9839_v17, %s9933_s29  ;;  %v5120_v17 = vmul.f32 %v7644_v14, %v5119_v16 }
0x2a00   :  { %4309 = vrot.lane.b32.xlu0 %v10886_v10, %s9935_s28 }
0x2a6e   :  { %v4709_v19 = vpop.permute.xlu0 %4708 }
0x2a6f   :  { %v4711_v28 = vmul.f32 %v9837_v0, %v4709_v19  ;;  %v7653_v19 = vld [vmem:[%s11561_s7 + $0x20] sm:$0xff] }
0x2a71   :  { %4718 = vrot.lane.b32.xlu1 %v4711_v28, %s9934_s0  ;;  %v7654_v28 = vld [vmem:[%s11561_s7 + $0x28] sm:$0xff] }
0x2a72   :  { %v4310_v24 = vpop.permute.xlu0 %4309 }
0x2a73   :  { %4312 = vst.msk [vmem:[#allocation3 + $0x8] sm:$0xff] %vm54_vm0, %v4310_v24 }
0x2a7a   :  { %v4891_v33 = vld [vmem:[#allocation3 + $0x8] sm:$0xff] }
0x2a7b   :  { %4893 = vrot.lane.b32.xlu0 %v4891_v33, %s9934_s0 }
0x2ae3   :  { %v4719_v36 = vpop.permute.xlu1 %4718 }
0x2ae4   :  { %4721 = vst.msk [vmem:[#allocation2] sm:$0xff] %vm54_vm0, %v4719_v36  ;;  %8745 = vmatmul.mubr.msk.f32.vlgmr.msra.gmra.mrb[46].mxu1 %vm54_vm0, %v4719_v36 }
0x2ae5   :  { %9450 = vmatpush3.bf16.msra.mxu1 %v10750_v32  ;;  %8790 = vmatprep.mubr.msk.f32.mxu1 %vm9932_vm1, %v10897_v25 }
0x2ae6   :  { %9451 = vmatprep.subr.bf16.mxu1 %v9930_v3 }
0x2ae9   :  { %9453 = vmatpush3.bf16.msra.mxu1 %v10756_v34 }
0x2aea   :  { %9454 = vmatprep.subr.bf16.mxu1 %v9930_v3 }
0x2aeb   :  { %v5129_v50 = vld [vmem:[#allocation2] sm:$0xff] }
0x2aed   :  { %9456 = vmatpush3.bf16.msra.mxu1 %v10766_v30 }
0x2aee   :  { %9457 = vmatprep.subr.bf16.mxu1 %v9930_v3 }
0x2af1   :  { %9459 = vmatpush3.bf16.msra.mxu1 %v10776_v20 }
0x2af2   :  { %9460 = vmatprep.subr.bf16.mxu1 %v9930_v3 }
0x2af5   :  { %9462 = vmatpush3.bf16.msra.mxu1 %v10786_v12 }
0x2af6   :  { %9463 = vmatprep.subr.bf16.mxu1 %v9930_v3 }
0x2af9   :  { %9465 = vmatpush3.bf16.msra.mxu1 %v10796_v43 }
0x2afa   :  { %9466 = vmatprep.subr.bf16.mxu1 %v9930_v3 }
0x2afd   :  { %9468 = vmatpush3.bf16.msra.mxu1 %v10806_v47 }
0x2afe   :  { %9469 = vmatprep.subr.bf16.mxu1 %v9930_v3 }
0x2b01   :  { %9471 = vmatpush3.bf16.msra.mxu1 %v10817_v48  ;;  %v4894_v48 = vpop.permute.xlu0 %4893 }
0x2b02   :  { %9496 = vmatprep.subr.bf16.mxu1 %v9930_v3 }
0x2bb7   :  { %v4872_v32 = vpop.f32.mrb[46].mxu1 }
0x2bb8   :  { %v4873_v34 = vadd.f32 %v4872_v32, %v4800_v18  ;;  %v8746_v30 = vpop.f32.mrb[47].mxu1  ;;  %v11025_v18 = vpack.c.bf16 %v5126_v21, %v5125_v57  ;;  %v11055_v32 = vpack.c.bf16 %v7654_v28, %v7653_v19  ;;  %v11121_v21 = vld [vmem:[%s11562_s8 + $0x1] ss:$0 sm:$0xff] }
0x2bb9   :  { %v7655_v30 = vld [vmem:[%s11561_s7 + $0x30] sm:$0xff] }
0x2bba   :  { %v4883_v20 = vadd.f32 %v10682_v4, %v4873_v34 }
0x2bbc   :  { %9840 = vtanh.f32 %v4883_v20  ;;  %v7638_v43 = vmul.f32 -1.442695, %v4883_v20  ;;  %v7656_v20 = vld [vmem:[%s11561_s7 + $0x38] sm:$0xff] }
0x2bbe   :  { %9842 = vpow2.f32 %v7638_v43 }
0x2bc6   :  { %v9841_v12 = vpop.eup %9840 }
0x2bc7   :  { %4898 = vrot.lane.b32.xlu1 %v9841_v12, %s9933_s29  ;;  %v11065_v12 = vpack.c.bf16 %v7656_v20, %v7655_v30  ;;  %v5531_v30 = vld [vmem:[%s11564_s10 + $0x18] sm:$0xff] }
0x2bc8   :  { %v9843_v10 = vpop.eup %9842 }
0x2bc9   :  { %v4887_v40 = vadd.f32 1.0, %v9843_v10 }
0x2bcb   :  { %9844 = vrcp.f32 %v4887_v40  ;;  %v11078_v40 = vld [vmem:[%s11562_s8] ss:$0 sm:$0xff] }
0x2bd5   :  { %v9845_v47 = vpop.eup %9844 }
0x2bd6   :  { %v4896_v35 = vmul.f32 %v9845_v47, %v4894_v48 }
0x2c39   :  { %v4899_v22 = vpop.permute.xlu1 %4898 }
0x2c3a   :  { %v4901_v29 = vmul.f32 %v9845_v47, %v4899_v22 }
0x2c3c   :  { %4903 = vrot.lane.b32.xlu1 %v4901_v29, %s9934_s0 }
0x2cae   :  { %v4904_v37 = vpop.permute.xlu1 %4903 }
0x2caf   :  { %v10980_v39 = vadd.f32 %v4904_v37, %v4896_v35 }
0x2cb1   :  { %9846 = vtanh.f32 %v10980_v39 }
0x2cbb   :  { %v9847_v4 = vpop.eup %9846 }
0x2cbc   :  { %4909 = vrot.lane.b32.xlu0 %v9847_v4, %s9933_s29 }
0x2d2e   :  { %v4910_v23 = vpop.permute.xlu0 %4909 }
0x2d2f   :  { %v4912_v9 = vmul.f32 %v9845_v47, %v4910_v23 }
0x2d31   :  { %4919 = vrot.lane.b32.xlu1 %v4912_v9, %s9934_s0 }
0x2da3   :  { %v4920_v49 = vpop.permute.xlu1 %4919 }
0x2da4   :  { %4922 = vst.msk [vmem:[#allocation2 + $0x8] sm:$0xff] %vm54_vm0, %v4920_v49  ;;  %8756 = vmatmul.mubr.msk.f32.vlgmr.msra.gmra.mrb[48].mxu0 %vm54_vm0, %v4920_v49 }
0x2da5   :  { %9474 = vmatpush3.bf16.msra.mxu0 %v10991_v41  ;;  %8801 = vmatprep.mubr.msk.f32.mxu0 %vm9932_vm1, %v10897_v25 }
0x2da6   :  { %9475 = vmatprep.subr.bf16.mxu0 %v9930_v3 }
0x2da9   :  { %9477 = vmatpush3.bf16.msra.mxu0 %v11002_v44 }
0x2daa   :  { %9478 = vmatprep.subr.bf16.mxu0 %v9930_v3 }
0x2dab   :  { %v5331_v43 = vld [vmem:[#allocation2 + $0x8] sm:$0xff] }
0x2dac   :  { %8802 = vmatmul.mubr.msk.f32.vlgmr.msra.gmra.mrb[50].mxu0 %vm54_vm0, %v5129_v50 }
0x2dad   :  { %8812 = vmatprep.mubr.msk.f32.mxu0 %vm9932_vm1, %v10897_v25  ;;  %9480 = vmatpush3.bf16.msra.mxu0 %v11025_v18 }
0x2dae   :  { %9481 = vmatprep.subr.bf16.mxu0 %v9930_v3 }
0x2db1   :  { %9483 = vmatpush3.bf16.msra.mxu0 %v11042_v6 }
0x2db2   :  { %9484 = vmatprep.subr.bf16.mxu0 %v9930_v3 }
0x2e77   :  { %v5002_v46 = vpop.f32.mrb[48].mxu0 }
0x2e78   :  { %v5003_v8 = vadd.f32 %v10730_v61, %v5002_v46  ;;  %v8757_v45 = vpop.f32.mrb[49].mxu0 }
0x2e7a   :  { %7641 = vst [vmem:[%s11566_s12 + $0x18] sm:$0xff] %v5003_v8  ;;  %5008 = vmax.xlane.f32.xlu0 %v5003_v8 }
0x2e7f   :  { %v11016_v58 = vpop.f32.mrb[50].mxu0 }
0x2e80   :  { %v8803_v53 = vpop.f32.mrb[51].mxu0 }
0x2e81   :  { %v7650_v53 = vld [vmem:[%s11560_s6 + $0x28] sm:$0xff] }
0x2f07   :  { %v5009_v13 = vpop.xlane.xlu0 %5008 }
0x2f08   :  { %vm5010_vm8 = vcmp.eq.f32.partialorder %v5003_v8, %v5009_v13  ;;  %v7651_v13 = vld [vmem:[%s11560_s6 + $0x30] sm:$0xff] }
0x2f09   :  { %v5011_v51 = vsel %vm5010_vm8, %v10738_v7, 128 }
0x2f0a   :  { %v5013_v52 = vshra.s32 %v5011_v51, 16  ;;  %v5012_v55 = vand.u32 65535, %v5011_v51 }
0x2f0c   :  { %v5015_v54 = vcvt.s32.f32 %v5013_v52  ;;  %v5014_v11 = vcvt.s32.f32 %v5012_v55  ;;  %v7652_v52 = vld [vmem:[%s11560_s6 + $0x38] sm:$0xff] }
0x2f0e   :  { %5016 = vmin.xlane.f32.xlu1 %v5015_v54 }
0x2f9b   :  { %v5017_v56 = vpop.xlane.xlu1 %5016 }
0x2f9c   :  { %vm5018_vm9 = vcmp.eq.f32.partialorder %v5015_v54, %v5017_v56  ;;  %v5023_v1 = vcvt.f32.s32 %v5017_v56  ;;  %v11104_v54 = vpack.c.bf16 %v7652_v52, %v7651_v13  ;;  %v5637_v52 = vld [vmem:[%s11563_s9 + $0x20] sm:$0xff] }
0x2f9d   :  { %v5019_v61 = vsel %vm5018_vm9, %v5014_v11, inf }
0x2f9e   :  { %5020 = vmin.xlane.f32.xlu0 %v5019_v61  ;;  %v5024_v15 = vshll.u32 %v5023_v1, 16 }
0x2fb4   :  { %4713 = vrot.lane.b32.xlu0 %v10948_v42, %s9935_s28  ;;  %v5122_v42 = vstv %s5121_s30 }
0x302b   :  { %v5021_v60 = vpop.xlane.xlu0 %5020 }
0x302c   :  { %v5022_v62 = vcvt.f32.s32 %v5021_v60 }
0x302e   :  { %v5025_v63 = vadd.s32 %v5024_v15, %v5022_v62 }
0x302f   :  { %v4714_v0 = vpop.permute.xlu0 %4713 }
0x3030   :  { %vm5026_vm10 = vcmp.eq.s32.totalorder %v10738_v7, %v5025_v63  ;;  %4716 = vst.msk [vmem:[#allocation3] sm:$0xff] %vm54_vm0, %v4714_v0 }
0x3031   :  { %8791 = vmatmul.mubr.msk.f32.vlgmr.msra.gmra.mrb[48].mxu1 %vm5026_vm10, %v9936_v59 }
0x3032   :  { %8845 = vmatprep.mubr.msk.f32.mxu1 %vm9932_vm1, %v10897_v25 }
0x3037   :  { %v5295_v4 = vld [vmem:[#allocation3] sm:$0xff] }
0x3104   :  { %v5110_v24 = vpop.f32.mrb[48].mxu1 }
0x3105   :  { %v5123_v33 = vmul.f32 %v5122_v42, %v5110_v24  ;;  %v8792_v36 = vpop.f32.mrb[49].mxu1  ;;  %v5528_v24 = vld [vmem:[%s11564_s10] sm:$0xff] }
0x3106   :  { %v5530_v36 = vld [vmem:[%s11564_s10 + $0x10] sm:$0xff] }
0x3107   :  { %v5124_v34 = vadd.f32 %v5123_v33, %v5120_v17  ;;  %v5529_v33 = vld [vmem:[%s11564_s10 + $0x8] sm:$0xff]  ;;  %v11144_v20 = vpack.c.bf16 %v5531_v30, %v5530_v36 }
0x3109   :  { %8813 = vmatmul.mubr.msk.f32.vlgmr.msra.gmra.mrb[52].mxu0 %vm54_vm0, %v5124_v34  ;;  %v11138_v34 = vpack.c.bf16 %v5529_v33, %v5528_v24  ;;  %v5648_v24 = vld [vmem:[%s11563_s9 + $0x78] sm:$0xff] }
0x310a   :  { %9486 = vmatpush3.bf16.msra.mxu0 %v11055_v32  ;;  %8823 = vmatprep.mubr.msk.f32.mxu0 %vm9932_vm1, %v10897_v25 }
0x310b   :  { %9487 = vmatprep.subr.bf16.mxu0 %v9930_v3  ;;  %9498 = vmatpush3.bf16.msra.mxu1 %v11138_v34 }
0x310c   :  { %9499 = vmatprep.subr.bf16.mxu1 %v9930_v3 }
0x310e   :  { %9489 = vmatpush3.bf16.msra.mxu0 %v11065_v12 }
0x310f   :  { %9490 = vmatprep.subr.bf16.mxu0 %v9930_v3  ;;  %9501 = vmatpush3.bf16.msra.mxu1 %v11144_v20 }
0x3110   :  { %9526 = vmatprep.subr.bf16.mxu1 %v9930_v3 }
0x3111   :  { %8824 = vmatmul.mubr.msk.f32.vlgmr.msra.gmra.mrb[54].mxu0 %vm54_vm0, %v5331_v43 }
0x3112   :  { %8834 = vmatprep.mubr.msk.f32.mxu0 %vm9932_vm1, %v10897_v25 }
0x31dc   :  { %v5276_v10 = vpop.f32.mrb[52].mxu0 }
0x31dd   :  { %v5277_v47 = vadd.f32 %v5276_v10, %v11016_v58  ;;  %v8814_v22 = vpop.f32.mrb[53].mxu0  ;;  %v7649_v58 = vld [vmem:[%s11560_s6 + $0x20] sm:$0xff] }
0x31de   :  { %v11098_v51 = vpack.c.bf16 %v7650_v53, %v7649_v58  ;;  %v5636_v53 = vld [vmem:[%s11563_s9 + $0x18] sm:$0xff] }
0x31df   :  { %v5287_v29 = vadd.f32 %v11078_v40, %v5277_v47 }
0x31e0   :  { %9492 = vmatpush3.bf16.msra.mxu0 %v11098_v51 }
0x31e1   :  { %9848 = vtanh.f32 %v5287_v29  ;;  %v7648_v23 = vmul.f32 -1.442695, %v5287_v29  ;;  %9493 = vmatprep.subr.bf16.mxu0 %v9930_v3 }
0x31e3   :  { %9850 = vpow2.f32 %v7648_v23 }
0x31e4   :  { %v5405_v48 = vpop.f32.mrb[54].mxu0  ;;  %9495 = vmatpush3.bf16.msra.mxu0 %v11104_v54 }
0x31e5   :  { %v8825_v35 = vpop.f32.mrb[55].mxu0  ;;  %9502 = vmatprep.subr.bf16.mxu0 %v9930_v3 }
0x31eb   :  { %v9849_v37 = vpop.eup %9848 }
0x31ec   :  { %5302 = vrot.lane.b32.xlu1 %v9849_v37, %s9933_s29 }
0x31ed   :  { %v9851_v9 = vpop.eup %9850 }
0x31ee   :  { %v5291_v38 = vadd.f32 1.0, %v9851_v9 }
0x31f0   :  { %5297 = vrot.lane.b32.xlu1 %v5295_v4, %s9934_s0  ;;  %9852 = vrcp.f32 %v5291_v38 }
0x31fa   :  { %v9853_v2 = vpop.eup %9852 }
0x325e   :  { %v5303_v26 = vpop.permute.xlu1 %5302 }
0x325f   :  { %v5305_v31 = vmul.f32 %v9853_v2, %v5303_v26 }
0x3261   :  { %5307 = vrot.lane.b32.xlu0 %v5305_v31, %s9934_s0 }
0x3262   :  { %v5298_v49 = vpop.permute.xlu1 %5297 }
0x3263   :  { %v5300_v50 = vmul.f32 %v9853_v2, %v5298_v49 }
0x32d3   :  { %v5308_v46 = vpop.permute.xlu0 %5307 }
0x32d4   :  { %v11085_v8 = vadd.f32 %v5308_v46, %v5300_v50  ;;  %v5633_v46 = vld [vmem:[%s11563_s9] sm:$0xff] }
0x32d6   :  { %9854 = vtanh.f32 %v11085_v8 }
0x32e0   :  { %v9855_v45 = vpop.eup %9854 }
0x32e1   :  { %5313 = vrot.lane.b32.xlu1 %v9855_v45, %s9933_s29  ;;  %v5635_v45 = vld [vmem:[%s11563_s9 + $0x10] sm:$0xff] }
0x32e2   :  { %v11197_v13 = vpack.c.bf16 %v5636_v53, %v5635_v45 }
0x32e5   :  { %4914 = vrot.lane.b32.xlu1 %v10980_v39, %s9935_s28 }
0x3353   :  { %v5314_v55 = vpop.permute.xlu1 %5313 }
0x3354   :  { %v5316_v11 = vmul.f32 %v9853_v2, %v5314_v55  ;;  %v5638_v55 = vld [vmem:[%s11563_s9 + $0x28] sm:$0xff] }
0x3356   :  { %5323 = vrot.lane.b32.xlu0 %v5316_v11, %s9934_s0  ;;  %v11207_v11 = vpack.c.bf16 %v5638_v55, %v5637_v52 }
0x3357   :  { %v4915_v56 = vpop.permute.xlu1 %4914 }
0x3358   :  { %4917 = vst.msk [vmem:[#allocation3 + $0x8] sm:$0xff] %vm54_vm0, %v4915_v56  ;;  %v5639_v56 = vld [vmem:[%s11563_s9 + $0x30] sm:$0xff] }
0x335f   :  { %v5496_v61 = vld [vmem:[#allocation3 + $0x8] sm:$0xff] }
0x3360   :  { %5498 = vrot.lane.b32.xlu1 %v5496_v61, %s9934_s0  ;;  %v5640_v61 = vld [vmem:[%s11563_s9 + $0x38] sm:$0xff] }
0x33c8   :  { %v5324_v57 = vpop.permute.xlu0 %5323 }
0x33c9   :  { %5326 = vst.msk [vmem:[#allocation2] sm:$0xff] %vm54_vm0, %v5324_v57  ;;  %8835 = vmatmul.mubr.msk.f32.vlgmr.msra.gmra.mrb[56].mxu0 %vm54_vm0, %v5324_v57  ;;  %v11217_v57 = vpack.c.bf16 %v5640_v61, %v5639_v56 }
0x33ca   :  { %8880 = vmatprep.mubr.msk.f32.mxu0 %vm9932_vm1, %v10897_v25 }
0x33d0   :  { %v5734_v29 = vld [vmem:[#allocation2] sm:$0xff] }
0x33d2   :  { %v5499_v42 = vpop.permute.xlu1 %5498 }
0x349c   :  { %v5477_v39 = vpop.f32.mrb[56].mxu0 }
0x349d   :  { %v5478_v1 = vadd.f32 %v5477_v39, %v5405_v48  ;;  %v8836_v60 = vpop.f32.mrb[57].mxu0  ;;  %v11169_v48 = vld [vmem:[%s11565_s11] ss:$0 sm:$0xff] }
0x349e   :  { %v5641_v39 = vld [vmem:[%s11563_s9 + $0x40] sm:$0xff] }
0x349f   :  { %v5488_v15 = vadd.f32 %v11121_v21, %v5478_v1  ;;  %v5642_v1 = vld [vmem:[%s11563_s9 + $0x48] sm:$0xff] }
0x34a0   :  { %v11227_v60 = vpack.c.bf16 %v5642_v1, %v5641_v39 }
0x34a1   :  { %9856 = vtanh.f32 %v5488_v15  ;;  %v7661_v63 = vmul.f32 -1.442695, %v5488_v15  ;;  %v5643_v15 = vld [vmem:[%s11563_s9 + $0x50] sm:$0xff] }
0x34a3   :  { %9858 = vpow2.f32 %v7661_v63 }
0x34ab   :  { %v9857_v62 = vpop.eup %9856 }
0x34ac   :  { %5503 = vrot.lane.b32.xlu0 %v9857_v62, %s9933_s29  ;;  %v5644_v62 = vld [vmem:[%s11563_s9 + $0x58] sm:$0xff] }
0x34ad   :  { %v9859_v0 = vpop.eup %9858  ;;  %v11237_v63 = vpack.c.bf16 %v5644_v62, %v5643_v15 }
0x34ae   :  { %v5492_v27 = vadd.f32 1.0, %v9859_v0  ;;  %v5645_v0 = vld [vmem:[%s11563_s9 + $0x60] sm:$0xff] }
0x34b0   :  { %9860 = vrcp.f32 %v5492_v27  ;;  %v5646_v27 = vld [vmem:[%s11563_s9 + $0x68] sm:$0xff] }
0x34ba   :  { %v9861_v5 = vpop.eup %9860 }
0x34bb   :  { %v5501_v17 = vmul.f32 %v9861_v5, %v5499_v42 }
0x351e   :  { %v5504_v14 = vpop.permute.xlu0 %5503 }
0x351f   :  { %v5506_v16 = vmul.f32 %v9861_v5, %v5504_v14 }
0x3521   :  { %5508 = vrot.lane.b32.xlu0 %v5506_v16, %s9934_s0 }
0x3593   :  { %v5509_v19 = vpop.permute.xlu0 %5508 }
0x3594   :  { %v11126_v28 = vadd.f32 %v5509_v19, %v5501_v17  ;;  %v5647_v19 = vld [vmem:[%s11563_s9 + $0x70] sm:$0xff] }
0x3595   :  { %v11258_v33 = vpack.c.bf16 %v5648_v24, %v5647_v19 }
0x3596   :  { %9862 = vtanh.f32 %v11126_v28 }
0x35a0   :  { %v9863_v43 = vpop.eup %9862 }
0x35a1   :  { %5514 = vrot.lane.b32.xlu1 %v9863_v43, %s9933_s29 }
0x3613   :  { %v5515_v10 = vpop.permute.xlu1 %5514 }
0x3614   :  { %v5517_v47 = vmul.f32 %v9861_v5, %v5515_v10  ;;  %v11247_v5 = vpack.c.bf16 %v5646_v27, %v5645_v0 }
0x3616   :  { %5524 = vrot.lane.b32.xlu0 %v5517_v47, %s9934_s0 }
0x3688   :  { %v5525_v22 = vpop.permute.xlu0 %5524 }
0x3689   :  { %5527 = vst.msk [vmem:[#allocation2 + $0x8] sm:$0xff] %vm54_vm0, %v5525_v22  ;;  %8846 = vmatmul.mubr.msk.f32.vlgmr.msra.gmra.mrb[50].mxu1 %vm54_vm0, %v5525_v22  ;;  %v7667_v22 = vld [vmem:[%s11556_s2 + $0x20] sm:$0xff] }
0x368a   :  { %9528 = vmatpush3.bf16.msra.mxu1 %v10991_v41  ;;  %8891 = vmatprep.mubr.msk.f32.mxu1 %vm9932_vm1, %v10897_v25 }
0x368b   :  { %9529 = vmatprep.subr.bf16.mxu1 %v9930_v3 }
0x368e   :  { %9531 = vmatpush3.bf16.msra.mxu1 %v11002_v44 }
0x368f   :  { %9532 = vmatprep.subr.bf16.mxu1 %v9930_v3 }
0x3691   :  { %8892 = vmatmul.mubr.msk.f32.vlgmr.msra.gmra.mrb[52].mxu1 %vm54_vm0, %v5734_v29 }
0x3692   :  { %9534 = vmatpush3.bf16.msra.mxu1 %v11025_v18  ;;  %8902 = vmatprep.mubr.msk.f32.mxu1 %vm9932_vm1, %v10897_v25 }
0x3693   :  { %9535 = vmatprep.subr.bf16.mxu1 %v9930_v3 }
0x3696   :  { %9537 = vmatpush3.bf16.msra.mxu1 %v11042_v6 }
0x3697   :  { %9538 = vmatprep.subr.bf16.mxu1 %v9930_v3 }
0x375c   :  { %v5607_v35 = vpop.f32.mrb[50].mxu1 }
0x375d   :  { %v5608_v37 = vadd.f32 %v11169_v48, %v5607_v35  ;;  %v8847_v4 = vpop.f32.mrb[51].mxu1 }
0x375f   :  { %7664 = vst [vmem:[%s11566_s12 + $0x20] sm:$0xff] %v5608_v37  ;;  %5613 = vmax.xlane.f32.xlu1 %v5608_v37 }
0x3764   :  { %v11175_v23 = vpop.f32.mrb[52].mxu1 }
0x3765   :  { %v8893_v9 = vpop.f32.mrb[53].mxu1 }
0x3770   :  { %5318 = vrot.lane.b32.xlu1 %v11085_v8, %s9935_s28  ;;  %v5634_v8 = vld [vmem:[%s11563_s9 + $0x8] sm:$0xff]  ;;  %s7666_s9 = sld [smem:[#allocation4 + $0x4]] }
0x3771   :  { %v11191_v58 = vpack.c.bf16 %v5634_v8, %v5633_v46 }
0x3773   :  { %9504 = vmatpush3.bf16.msra.mxu0 %v11191_v58 }
0x3774   :  { %9505 = vmatprep.subr.bf16.mxu0 %v9930_v3 }
0x3776   :  { %p5720_p8 = scmp.gt.s32.totalorder %s7666_s9, 0 }
0x3777   :  { %9507 = vmatpush3.bf16.msra.mxu0 %v11197_v13 }
0x3778   :  { %9508 = vmatprep.subr.bf16.mxu0 %v9930_v3  ;;  %s5721_s17 = scalar_select %p5720_p8, 1.0, 0.0 }
0x377a   :  { %s5726_s18 = ssub.f32 1.0, %s5721_s17  ;;  %v5724_v29 = vstv %s5721_s17 }
0x377b   :  { %9510 = vmatpush3.bf16.msra.mxu0 %v11207_v11 }
0x377c   :  { %9511 = vmatprep.subr.bf16.mxu0 %v9930_v3  ;;  %v5727_v35 = vstv %s5726_s18 }
0x377f   :  { %9513 = vmatpush3.bf16.msra.mxu0 %v11217_v57 }
0x3780   :  { %9514 = vmatprep.subr.bf16.mxu0 %v9930_v3 }
0x3783   :  { %9516 = vmatpush3.bf16.msra.mxu0 %v11227_v60 }
0x3784   :  { %9517 = vmatprep.subr.bf16.mxu0 %v9930_v3 }
0x3787   :  { %9519 = vmatpush3.bf16.msra.mxu0 %v11237_v63 }
0x3788   :  { %9520 = vmatprep.subr.bf16.mxu0 %v9930_v3 }
0x378b   :  { %9522 = vmatpush3.bf16.msra.mxu0 %v11247_v5 }
0x378c   :  { %9523 = vmatprep.subr.bf16.mxu0 %v9930_v3 }
0x378f   :  { %9525 = vmatpush3.bf16.msra.mxu0 %v11258_v33 }
0x3790   :  { %9550 = vmatprep.subr.bf16.mxu0 %v9930_v3 }
0x37ec   :  { %v5614_v38 = vpop.xlane.xlu1 %5613 }
0x37ed   :  { %vm5615_vm11 = vcmp.eq.f32.partialorder %v5608_v37, %v5614_v38  ;;  %v5725_v37 = vmul.f32 %v7667_v22, %v5724_v29 }
0x37ee   :  { %v5616_v2 = vsel %vm5615_vm11, %v10738_v7, 128 }
0x37ef   :  { %v5618_v26 = vshra.s32 %v5616_v2, 16  ;;  %v5617_v14 = vand.u32 65535, %v5616_v2 }
0x37f0   :  { %v5319_v31 = vpop.permute.xlu1 %5318 }
0x37f1   :  { %v5620_v49 = vcvt.s32.f32 %v5618_v26  ;;  %5321 = vst.msk [vmem:[#allocation3] sm:$0xff] %vm54_vm0, %v5319_v31  ;;  %v5619_v16 = vcvt.s32.f32 %v5617_v14  ;;  %v5936_v26 = vld [vmem:[#allocation2 + $0x8] sm:$0xff] }
0x37f3   :  { %5621 = vmin.xlane.f32.xlu0 %v5620_v49 }
0x37f8   :  { %v5900_v50 = vld [vmem:[#allocation3] sm:$0xff] }
0x37f9   :  { %5902 = vrot.lane.b32.xlu1 %v5900_v50, %s9934_s0 }
0x3880   :  { %v5622_v42 = vpop.xlane.xlu0 %5621 }
0x3881   :  { %vm5623_vm12 = vcmp.eq.f32.partialorder %v5620_v49, %v5622_v42  ;;  %v5628_v36 = vcvt.f32.s32 %v5622_v42 }
0x3882   :  { %v5624_v17 = vsel %vm5623_vm12, %v5619_v16, inf }
0x3883   :  { %5625 = vmin.xlane.f32.xlu0 %v5624_v17  ;;  %v5629_v43 = vshll.u32 %v5628_v36, 16 }
0x3910   :  { %v5626_v30 = vpop.xlane.xlu0 %5625 }
0x3911   :  { %v5627_v10 = vcvt.f32.s32 %v5626_v30 }
0x3913   :  { %v5630_v47 = vadd.s32 %v5629_v43, %v5627_v10 }
0x3915   :  { %vm5631_vm13 = vcmp.eq.s32.totalorder %v10738_v7, %v5630_v47 }
0x3916   :  { %8881 = vmatmul.mubr.msk.f32.vlgmr.msra.gmra.mrb[58].mxu0 %vm5631_vm13, %v9936_v59 }
0x3917   :  { %9552 = vmatpush3.bf16.msra.mxu0 %v11138_v34  ;;  %8935 = vmatprep.mubr.msk.f32.mxu0 %vm9932_vm1, %v10897_v25 }
0x3918   :  { %9553 = vmatprep.subr.bf16.mxu0 %v9930_v3 }
0x391b   :  { %9555 = vmatpush3.bf16.msra.mxu0 %v11144_v20 }
0x391c   :  { %9580 = vmatprep.subr.bf16.mxu0 %v9930_v3 }
0x39e9   :  { %v5715_v4 = vpop.f32.mrb[58].mxu0 }
0x39ea   :  { %v5728_v9 = vmul.f32 %v5727_v35, %v5715_v4  ;;  %v8882_v38 = vpop.f32.mrb[59].mxu0 }
0x39ec   :  { %v5729_v2 = vadd.f32 %v5728_v9, %v5725_v37 }
0x39ee   :  { %8903 = vmatmul.mubr.msk.f32.vlgmr.msra.gmra.mrb[54].mxu1 %vm54_vm0, %v5729_v2 }
0x39ef   :  { %9540 = vmatpush3.bf16.msra.mxu1 %v11055_v32  ;;  %8913 = vmatprep.mubr.msk.f32.mxu1 %vm9932_vm1, %v10897_v25 }
0x39f0   :  { %9541 = vmatprep.subr.bf16.mxu1 %v9930_v3 }
0x39f3   :  { %9543 = vmatpush3.bf16.msra.mxu1 %v11065_v12 }
0x39f4   :  { %9544 = vmatprep.subr.bf16.mxu1 %v9930_v3 }
0x39f6   :  { %8914 = vmatmul.mubr.msk.f32.vlgmr.msra.gmra.mrb[56].mxu1 %vm54_vm0, %v5936_v26 }
0x39f7   :  { %9546 = vmatpush3.bf16.msra.mxu1 %v11098_v51  ;;  %8924 = vmatprep.mubr.msk.f32.mxu1 %vm9932_vm1, %v10897_v25 }
0x39f8   :  { %9547 = vmatprep.subr.bf16.mxu1 %v9930_v3 }
0x39fb   :  { %9549 = vmatpush3.bf16.msra.mxu1 %v11104_v54 }
0x39fc   :  { %9556 = vmatprep.subr.bf16.mxu1 %v9930_v3 }
0x3ac1   :  { %v5881_v31 = vpop.f32.mrb[54].mxu1 }
0x3ac2   :  { %v5882_v49 = vadd.f32 %v5881_v31, %v11175_v23  ;;  %v8904_v50 = vpop.f32.mrb[55].mxu1  ;;  %v5903_v23 = vpop.permute.xlu1 %5902 }
0x3ac3   :  { %v11334_v50 = vld [vmem:[%s11566_s12] sm:$0xff] }
0x3ac4   :  { %v5892_v46 = vadd.f32 %v11078_v40, %v5882_v49 }
0x3ac6   :  { %9864 = vtanh.f32 %v5892_v46  ;;  %v7671_v52 = vmul.f32 -1.442695, %v5892_v46 }
0x3ac8   :  { %9866 = vpow2.f32 %v7671_v52 }
0x3ac9   :  { %v6010_v8 = vpop.f32.mrb[56].mxu1 }
0x3aca   :  { %v8915_v45 = vpop.f32.mrb[57].mxu1 }
0x3ad0   :  { %v9865_v53 = vpop.eup %9864 }
0x3ad1   :  { %5907 = vrot.lane.b32.xlu0 %v9865_v53, %s9933_s29 }
0x3ad2   :  { %v9867_v55 = vpop.eup %9866 }
0x3ad3   :  { %v5896_v56 = vadd.f32 1.0, %v9867_v55 }
0x3ad5   :  { %9868 = vrcp.f32 %v5896_v56 }
0x3adf   :  { %v9869_v61 = vpop.eup %9868 }
0x3ae0   :  { %v5905_v15 = vmul.f32 %v9869_v61, %v5903_v23 }
0x3b43   :  { %v5908_v39 = vpop.permute.xlu0 %5907 }
0x3b44   :  { %v5910_v1 = vmul.f32 %v9869_v61, %v5908_v39 }
0x3b46   :  { %5912 = vrot.lane.b32.xlu1 %v5910_v1, %s9934_s0 }
0x3bb8   :  { %v5913_v62 = vpop.permute.xlu1 %5912 }
0x3bb9   :  { %v11291_v0 = vadd.f32 %v5913_v62, %v5905_v15 }
0x3bbb   :  { %9870 = vtanh.f32 %v11291_v0 }
0x3bc5   :  { %v9871_v27 = vpop.eup %9870 }
0x3bc6   :  { %5918 = vrot.lane.b32.xlu0 %v9871_v27, %s9933_s29 }
0x3bca   :  { %5519 = vrot.lane.b32.xlu0 %v11126_v28, %s9935_s28 }
0x3c38   :  { %v5919_v14 = vpop.permute.xlu0 %5918 }
0x3c39   :  { %v5921_v16 = vmul.f32 %v9869_v61, %v5919_v14 }
0x3c3b   :  { %5928 = vrot.lane.b32.xlu1 %v5921_v16, %s9934_s0 }
0x3c3c   :  { %v5520_v42 = vpop.permute.xlu0 %5519 }
0x3c3d   :  { %5522 = vst.msk [vmem:[#allocation3 + $0x8] sm:$0xff] %vm54_vm0, %v5520_v42  ;;  %v6329_v42 = vstv %s6326_s3 }
0x3c44   :  { %v6101_v17 = vld [vmem:[#allocation3 + $0x8] sm:$0xff] }
0x3c45   :  { %6103 = vrot.lane.b32.xlu0 %v6101_v17, %s9934_s0  ;;  %v6332_v17 = vstv %s6331_s4  ;;  %s7712_s4 = sld [smem:[#allocation4 + $0x6]] }
0x3c4b   :  { %p6930_p10 = scmp.gt.s32.totalorder %s7712_s4, 0 }
0x3c4d   :  { %s6931_s26 = scalar_select %p6930_p10, 1.0, 0.0 }
0x3c4f   :  { %s6936_s27 = ssub.f32 1.0, %s6931_s26 }
0x3cad   :  { %v5929_v19 = vpop.permute.xlu1 %5928 }
0x3cae   :  { %5931 = vst.msk [vmem:[#allocation2] sm:$0xff] %vm54_vm0, %v5929_v19  ;;  %8925 = vmatmul.mubr.msk.f32.vlgmr.msra.gmra.mrb[58].mxu1 %vm54_vm0, %v5929_v19 }
0x3caf   :  { %9558 = vmatpush3.bf16.msra.mxu1 %v11191_v58  ;;  %8970 = vmatprep.mubr.msk.f32.mxu1 %vm9932_vm1, %v10897_v25 }
0x3cb0   :  { %9559 = vmatprep.subr.bf16.mxu1 %v9930_v3 }
0x3cb3   :  { %9561 = vmatpush3.bf16.msra.mxu1 %v11197_v13 }
0x3cb4   :  { %9562 = vmatprep.subr.bf16.mxu1 %v9930_v3 }
0x3cb5   :  { %v6339_v46 = vld [vmem:[#allocation2] sm:$0xff] }
0x3cb7   :  { %9564 = vmatpush3.bf16.msra.mxu1 %v11207_v11  ;;  %v6104_v37 = vpop.permute.xlu0 %6103 }
0x3cb8   :  { %9565 = vmatprep.subr.bf16.mxu1 %v9930_v3 }
0x3cbb   :  { %9567 = vmatpush3.bf16.msra.mxu1 %v11217_v57 }
0x3cbc   :  { %9568 = vmatprep.subr.bf16.mxu1 %v9930_v3 }
0x3cbf   :  { %9570 = vmatpush3.bf16.msra.mxu1 %v11227_v60 }
0x3cc0   :  { %9571 = vmatprep.subr.bf16.mxu1 %v9930_v3 }
0x3cc3   :  { %9573 = vmatpush3.bf16.msra.mxu1 %v11237_v63 }
0x3cc4   :  { %9574 = vmatprep.subr.bf16.mxu1 %v9930_v3 }
0x3cc7   :  { %9576 = vmatpush3.bf16.msra.mxu1 %v11247_v5 }
0x3cc8   :  { %9577 = vmatprep.subr.bf16.mxu1 %v9930_v3 }
0x3ccb   :  { %9579 = vmatpush3.bf16.msra.mxu1 %v11258_v33 }
0x3ccc   :  { %9604 = vmatprep.subr.bf16.mxu1 %v9930_v3 }
0x3d81   :  { %v6082_v25 = vpop.f32.mrb[58].mxu1 }
0x3d82   :  { %v6083_v28 = vadd.f32 %v6082_v25, %v6010_v8  ;;  %v8926_v24 = vpop.f32.mrb[59].mxu1 }
0x3d84   :  { %v6093_v36 = vadd.f32 %v11121_v21, %v6083_v28 }
0x3d86   :  { %9872 = vtanh.f32 %v6093_v36  ;;  %v7684_v43 = vmul.f32 -1.442695, %v6093_v36 }
0x3d88   :  { %9874 = vpow2.f32 %v7684_v43 }
0x3d90   :  { %v9873_v30 = vpop.eup %9872 }
0x3d91   :  { %6108 = vrot.lane.b32.xlu1 %v9873_v30, %s9933_s29 }
0x3d92   :  { %v9875_v10 = vpop.eup %9874 }
0x3d93   :  { %v6097_v47 = vadd.f32 1.0, %v9875_v10 }
0x3d95   :  { %9876 = vrcp.f32 %v6097_v47 }
0x3d9f   :  { %v9877_v22 = vpop.eup %9876 }
0x3da0   :  { %v6106_v4 = vmul.f32 %v9877_v22, %v6104_v37 }
0x3e03   :  { %v6109_v29 = vpop.permute.xlu1 %6108 }
0x3e04   :  { %v6111_v35 = vmul.f32 %v9877_v22, %v6109_v29 }
0x3e06   :  { %6113 = vrot.lane.b32.xlu1 %v6111_v35, %s9934_s0 }
0x3e78   :  { %v6114_v9 = vpop.permute.xlu1 %6113 }
0x3e79   :  { %v11323_v38 = vadd.f32 %v6114_v9, %v6106_v4 }
0x3e7b   :  { %9878 = vtanh.f32 %v11323_v38 }
0x3e85   :  { %v9879_v2 = vpop.eup %9878 }
0x3e86   :  { %6119 = vrot.lane.b32.xlu0 %v9879_v2, %s9933_s29 }
0x3ef8   :  { %v6120_v26 = vpop.permute.xlu0 %6119 }
0x3ef9   :  { %v6122_v31 = vmul.f32 %v9877_v22, %v6120_v26 }
0x3efb   :  { %6129 = vrot.lane.b32.xlu1 %v6122_v31, %s9934_s0 }
0x3f6d   :  { %v6130_v49 = vpop.permute.xlu1 %6129 }
0x3f6e   :  { %6132 = vst.msk [vmem:[#allocation2 + $0x8] sm:$0xff] %vm54_vm0, %v6130_v49  ;;  %8936 = vmatmul.mubr.msk.f32.vlgmr.msra.gmra.mrb[60].mxu0 %vm54_vm0, %v6130_v49 }
0x3f6f   :  { %9582 = vmatpush3.bf16.msra.mxu0 %v10991_v41  ;;  %8981 = vmatprep.mubr.msk.f32.mxu0 %vm9932_vm1, %v11334_v50 }
0x3f70   :  { %9583 = vmatprep.subr.bf16.mxu0 %v9930_v3 }
0x3f73   :  { %9585 = vmatpush3.bf16.msra.mxu0 %v11002_v44 }
0x3f74   :  { %9586 = vmatprep.subr.bf16.mxu0 %v9930_v3 }
0x3f76   :  { %8982 = vmatmul.mubr.msk.f32.vlgmr.msra.gmra.mrb[62].mxu0 %vm54_vm0, %v6339_v46 }
0x3f77   :  { %9588 = vmatpush3.bf16.msra.mxu0 %v11025_v18  ;;  %8992 = vmatprep.mubr.msk.f32.mxu0 %vm9932_vm1, %v11334_v50 }
0x3f78   :  { %9589 = vmatprep.subr.bf16.mxu0 %v9930_v3 }
0x3f7b   :  { %9591 = vmatpush3.bf16.msra.mxu0 %v11042_v6 }
0x3f7c   :  { %9592 = vmatprep.subr.bf16.mxu0 %v9930_v3 }
0x4041   :  { %v6212_v41 = vpop.f32.mrb[60].mxu0 }
0x4042   :  { %v6213_v8 = vadd.f32 %v11169_v48, %v6212_v41  ;;  %v8937_v44 = vpop.f32.mrb[61].mxu0 }
0x4044   :  { %7687 = vst [vmem:[%s11566_s12 + $0x28] sm:$0xff] %v6213_v8  ;;  %6218 = vmax.xlane.f32.xlu0 %v6213_v8 }
0x4049   :  { %v6413_v45 = vpop.f32.mrb[62].mxu0 }
0x404a   :  { %v8983_v18 = vpop.f32.mrb[63].mxu0 }
0x40d1   :  { %v6219_v53 = vpop.xlane.xlu0 %6218 }
0x40d2   :  { %vm6220_vm14 = vcmp.eq.f32.partialorder %v6213_v8, %v6219_v53 }
0x40d3   :  { %v6221_v52 = vsel %vm6220_vm14, %v10738_v7, 128 }
0x40d4   :  { %v6223_v55 = vshra.s32 %v6221_v52, 16  ;;  %v6222_v6 = vand.u32 65535, %v6221_v52 }
0x40d6   :  { %v6225_v56 = vcvt.s32.f32 %v6223_v55  ;;  %v6224_v61 = vcvt.s32.f32 %v6222_v6 }
0x40d8   :  { %6226 = vmin.xlane.f32.xlu1 %v6225_v56 }
0x4165   :  { %v6227_v39 = vpop.xlane.xlu1 %6226 }
0x4166   :  { %vm6228_vm15 = vcmp.eq.f32.partialorder %v6225_v56, %v6227_v39  ;;  %v6233_v23 = vcvt.f32.s32 %v6227_v39  ;;  %v6945_v39 = vld [vmem:[%s11561_s7] sm:$0xff] }
0x4167   :  { %v6229_v1 = vsel %vm6228_vm15, %v6224_v61, inf }
0x4168   :  { %6230 = vmin.xlane.f32.xlu0 %v6229_v1  ;;  %v6234_v62 = vshll.u32 %v6233_v23, 16  ;;  %v6946_v1 = vld [vmem:[%s11561_s7 + $0x8] sm:$0xff] }
0x4169   :  { %v9635_v23 = vpack.c.bf16 %v6946_v1, %v6945_v39 }
0x417e   :  { %5923 = vrot.lane.b32.xlu0 %v11291_v0, %s9935_s28  ;;  %v7690_v0 = vld [vmem:[%s11556_s2 + $0x28] sm:$0xff] }
0x41f5   :  { %v6231_v15 = vpop.xlane.xlu0 %6230 }
0x41f6   :  { %v6232_v27 = vcvt.f32.s32 %v6231_v15  ;;  %v6947_v15 = vld [vmem:[%s11561_s7 + $0x10] sm:$0xff] }
0x41f8   :  { %v6235_v14 = vadd.s32 %v6234_v62, %v6232_v27  ;;  %v6948_v62 = vld [vmem:[%s11561_s7 + $0x18] sm:$0xff] }
0x41f9   :  { %v5924_v16 = vpop.permute.xlu0 %5923 }
0x41fa   :  { %vm6236_vm2 = vcmp.eq.s32.totalorder %v10738_v7, %v6235_v14  ;;  %5926 = vst.msk [vmem:[#allocation3] sm:$0xff] %vm54_vm0, %v5924_v16  ;;  %v9638_v14 = vpack.c.bf16 %v6948_v62, %v6947_v15 }
0x41fb   :  { %8971 = vmatmul.mubr.msk.f32.vlgmr.msra.gmra.mrb[60].mxu1 %vm6236_vm2, %v9936_v59 }
0x41fc   :  { %9606 = vmatpush3.bf16.msra.mxu1 %v11138_v34  ;;  %9025 = vmatprep.mubr.msk.f32.mxu1 %vm9932_vm1, %v11334_v50  ;;  %v6330_v34 = vmul.f32 %v7690_v0, %v6329_v42 }
0x41fd   :  { %9607 = vmatprep.subr.bf16.mxu1 %v9930_v3 }
0x4200   :  { %9609 = vmatpush3.bf16.msra.mxu1 %v11144_v20  ;;  %v6541_v20 = vld [vmem:[#allocation2 + $0x8] sm:$0xff] }
0x4201   :  { %9634 = vmatprep.subr.bf16.mxu1 %v9930_v3 }
0x42ce   :  { %v6320_v19 = vpop.f32.mrb[60].mxu1 }
0x42cf   :  { %v6333_v25 = vmul.f32 %v6332_v17, %v6320_v19  ;;  %v8972_v28 = vpop.f32.mrb[61].mxu1 }
0x42d1   :  { %v6334_v24 = vadd.f32 %v6333_v25, %v6330_v34 }
0x42d3   :  { %8993 = vmatmul.mubr.msk.f32.vlgmr.msra.gmra.mrb[64].mxu0 %vm54_vm0, %v6334_v24 }
0x42d4   :  { %9594 = vmatpush3.bf16.msra.mxu0 %v11055_v32  ;;  %9003 = vmatprep.mubr.msk.f32.mxu0 %vm9932_vm1, %v11334_v50 }
0x42d5   :  { %9595 = vmatprep.subr.bf16.mxu0 %v9930_v3 }
0x42d8   :  { %9597 = vmatpush3.bf16.msra.mxu0 %v11065_v12 }
0x42d9   :  { %9598 = vmatprep.subr.bf16.mxu0 %v9930_v3 }
0x42db   :  { %9004 = vmatmul.mubr.msk.f32.vlgmr.msra.gmra.mrb[66].mxu0 %vm54_vm0, %v6541_v20 }
0x42dc   :  { %9600 = vmatpush3.bf16.msra.mxu0 %v11098_v51  ;;  %9014 = vmatprep.mubr.msk.f32.mxu0 %vm9932_vm1, %v11334_v50  ;;  %v6505_v51 = vld [vmem:[#allocation3] sm:$0xff] }
0x42dd   :  { %9601 = vmatprep.subr.bf16.mxu0 %v9930_v3 }
0x42e0   :  { %9603 = vmatpush3.bf16.msra.mxu0 %v11104_v54 }
0x42e1   :  { %9610 = vmatprep.subr.bf16.mxu0 %v9930_v3 }
0x43a6   :  { %v6486_v32 = vpop.f32.mrb[64].mxu0 }
0x43a7   :  { %v6487_v36 = vadd.f32 %v6486_v32, %v6413_v45  ;;  %v8994_v30 = vpop.f32.mrb[65].mxu0 }
0x43a9   :  { %v6497_v12 = vadd.f32 %v11078_v40, %v6487_v36 }
0x43ab   :  { %9880 = vtanh.f32 %v6497_v12  ;;  %v7694_v22 = vmul.f32 -1.442695, %v6497_v12 }
0x43ad   :  { %9882 = vpow2.f32 %v7694_v22 }
0x43ae   :  { %v6615_v43 = vpop.f32.mrb[66].mxu0 }
0x43af   :  { %v9005_v10 = vpop.f32.mrb[67].mxu0 }
0x43b0   :  { %v6940_v10 = vld [vmem:[%s11560_s6] sm:$0xff] }
0x43b5   :  { %v9881_v47 = vpop.eup %9880 }
0x43b6   :  { %6512 = vrot.lane.b32.xlu1 %v9881_v47, %s9933_s29  ;;  %v6941_v47 = vld [vmem:[%s11560_s6 + $0x8] sm:$0xff] }
0x43b7   :  { %v9883_v29 = vpop.eup %9882 }
0x43b8   :  { %v6501_v54 = vadd.f32 1.0, %v9883_v29 }
0x43ba   :  { %6507 = vrot.lane.b32.xlu1 %v6505_v51, %s9934_s0  ;;  %9884 = vrcp.f32 %v6501_v54  ;;  %v9641_v51 = vpack.c.bf16 %v6941_v47, %v6940_v10 }
0x43c4   :  { %v9885_v35 = vpop.eup %9884 }
0x4428   :  { %v6513_v37 = vpop.permute.xlu1 %6512 }
0x4429   :  { %v6515_v4 = vmul.f32 %v9885_v35, %v6513_v37 }
0x442b   :  { %6517 = vrot.lane.b32.xlu0 %v6515_v4, %s9934_s0  ;;  %v6942_v4 = vld [vmem:[%s11560_s6 + $0x10] sm:$0xff] }
0x442c   :  { %v6508_v40 = vpop.permute.xlu1 %6507 }
0x442d   :  { %v6510_v9 = vmul.f32 %v9885_v35, %v6508_v40  ;;  %v6943_v40 = vld [vmem:[%s11560_s6 + $0x18] sm:$0xff] }
0x449d   :  { %v6518_v2 = vpop.permute.xlu0 %6517 }
0x449e   :  { %v11385_v26 = vadd.f32 %v6518_v2, %v6510_v9  ;;  %v9644_v9 = vpack.c.bf16 %v6943_v40, %v6942_v4  ;;  %v6937_v2 = vstv %s6936_s27  ;;  %v7343_v40 = vld [vmem:[%s11564_s10] sm:$0xff] }
0x44a0   :  { %9886 = vtanh.f32 %v11385_v26 }
0x44aa   :  { %v9887_v31 = vpop.eup %9886 }
0x44ab   :  { %6523 = vrot.lane.b32.xlu1 %v9887_v31, %s9933_s29  ;;  %v7722_v31 = vld [vmem:[%s11561_s7 + $0x20] sm:$0xff] }
0x44af   :  { %6124 = vrot.lane.b32.xlu1 %v11323_v38, %s9935_s28 }
0x451d   :  { %v6524_v49 = vpop.permute.xlu1 %6523 }
0x451e   :  { %v6526_v46 = vmul.f32 %v9885_v35, %v6524_v49  ;;  %v7723_v49 = vld [vmem:[%s11561_s7 + $0x28] sm:$0xff] }
0x4520   :  { %6533 = vrot.lane.b32.xlu0 %v6526_v46, %s9934_s0 }
0x4521   :  { %v6125_v41 = vpop.permute.xlu1 %6124 }
0x4522   :  { %6127 = vst.msk [vmem:[#allocation3 + $0x8] sm:$0xff] %vm54_vm0, %v6125_v41 }
0x4529   :  { %v6706_v8 = vld [vmem:[#allocation3 + $0x8] sm:$0xff] }
0x452a   :  { %6708 = vrot.lane.b32.xlu1 %v6706_v8, %s9934_s0 }
0x4592   :  { %v6534_v44 = vpop.permute.xlu0 %6533 }
0x4593   :  { %6536 = vst.msk [vmem:[#allocation2] sm:$0xff] %vm54_vm0, %v6534_v44  ;;  %9015 = vmatmul.mubr.msk.f32.vlgmr.msra.gmra.mrb[68].mxu0 %vm54_vm0, %v6534_v44  ;;  %v9647_v44 = vpack.c.bf16 %v7723_v49, %v7722_v31 }
0x4594   :  { %9612 = vmatpush3.bf16.msra.mxu0 %v11191_v58  ;;  %9060 = vmatprep.mubr.msk.f32.mxu0 %vm9932_vm1, %v11334_v50 }
0x4595   :  { %9613 = vmatprep.subr.bf16.mxu0 %v9930_v3 }
0x4598   :  { %9615 = vmatpush3.bf16.msra.mxu0 %v11197_v13 }
0x4599   :  { %9616 = vmatprep.subr.bf16.mxu0 %v9930_v3 }
0x459a   :  { %v6944_v16 = vld [vmem:[#allocation2] sm:$0xff] }
0x459c   :  { %9618 = vmatpush3.bf16.msra.mxu0 %v11207_v11 }
0x459d   :  { %9619 = vmatprep.subr.bf16.mxu0 %v9930_v3 }
0x45a0   :  { %9621 = vmatpush3.bf16.msra.mxu0 %v11217_v57 }
0x45a1   :  { %9622 = vmatprep.subr.bf16.mxu0 %v9930_v3 }
0x45a4   :  { %9624 = vmatpush3.bf16.msra.mxu0 %v11227_v60 }
0x45a5   :  { %9625 = vmatprep.subr.bf16.mxu0 %v9930_v3 }
0x45a8   :  { %9627 = vmatpush3.bf16.msra.mxu0 %v11237_v63 }
0x45a9   :  { %9628 = vmatprep.subr.bf16.mxu0 %v9930_v3 }
0x45ac   :  { %9630 = vmatpush3.bf16.msra.mxu0 %v11247_v5 }
0x45ad   :  { %9631 = vmatprep.subr.bf16.mxu0 %v9930_v3 }
0x45b0   :  { %9633 = vmatpush3.bf16.msra.mxu0 %v11258_v33  ;;  %v6709_v33 = vpop.permute.xlu1 %6708 }
0x45b1   :  { %9658 = vmatprep.subr.bf16.mxu0 %v9930_v3 }
0x4666   :  { %v6687_v58 = vpop.f32.mrb[68].mxu0 }
0x4667   :  { %v6688_v13 = vadd.f32 %v6687_v58, %v6615_v43  ;;  %v9016_v11 = vpop.f32.mrb[69].mxu0 }
0x4668   :  { %v7725_v11 = vld [vmem:[%s11561_s7 + $0x38] sm:$0xff] }
0x4669   :  { %v6698_v57 = vadd.f32 %v11121_v21, %v6688_v13  ;;  %v7724_v13 = vld [vmem:[%s11561_s7 + $0x30] sm:$0xff] }
0x466b   :  { %9888 = vtanh.f32 %v6698_v57  ;;  %v7707_v63 = vmul.f32 -1.442695, %v6698_v57  ;;  %v9650_v57 = vpack.c.bf16 %v7725_v11, %v7724_v13 }
0x466d   :  { %9890 = vpow2.f32 %v7707_v63 }
0x4675   :  { %v9889_v60 = vpop.eup %9888 }
0x4676   :  { %6713 = vrot.lane.b32.xlu0 %v9889_v60, %s9933_s29 }
0x4677   :  { %v9891_v38 = vpop.eup %9890 }
0x4678   :  { %v6702_v45 = vadd.f32 1.0, %v9891_v38  ;;  %v7716_v38 = vld [vmem:[%s11562_s8] ss:$0 sm:$0xff] }
0x467a   :  { %9892 = vrcp.f32 %v6702_v45 }
0x4684   :  { %v9893_v5 = vpop.eup %9892 }
0x4685   :  { %v6711_v52 = vmul.f32 %v9893_v5, %v6709_v33 }
0x46e8   :  { %v6714_v18 = vpop.permute.xlu0 %6713 }
0x46e9   :  { %v6716_v53 = vmul.f32 %v9893_v5, %v6714_v18 }
0x46eb   :  { %6718 = vrot.lane.b32.xlu0 %v6716_v53, %s9934_s0 }
0x475d   :  { %v6719_v55 = vpop.permute.xlu0 %6718 }
0x475e   :  { %v11417_v56 = vadd.f32 %v6719_v55, %v6711_v52 }
0x4760   :  { %9894 = vtanh.f32 %v11417_v56 }
0x476a   :  { %v9895_v21 = vpop.eup %9894 }
0x476b   :  { %6724 = vrot.lane.b32.xlu1 %v9895_v21, %s9933_s29 }
0x47dd   :  { %v6725_v6 = vpop.permute.xlu1 %6724 }
0x47de   :  { %v6727_v61 = vmul.f32 %v9893_v5, %v6725_v6 }
0x47e0   :  { %6734 = vrot.lane.b32.xlu0 %v6727_v61, %s9934_s0 }
0x4852   :  { %v6735_v27 = vpop.permute.xlu0 %6734 }
0x4853   :  { %6737 = vst.msk [vmem:[#allocation2 + $0x8] sm:$0xff] %vm54_vm0, %v6735_v27  ;;  %9026 = vmatmul.mubr.msk.f32.vlgmr.msra.gmra.mrb[62].mxu1 %vm54_vm0, %v6735_v27 }
0x4854   :  { %9636 = vmatpush3.bf16.msra.mxu1 %v9635_v23  ;;  %9071 = vmatprep.mubr.msk.f32.mxu1 %vm9932_vm1, %v11334_v50 }
0x4855   :  { %9637 = vmatprep.subr.bf16.mxu1 %v9930_v3 }
0x4858   :  { %9639 = vmatpush3.bf16.msra.mxu1 %v9638_v14  ;;  %v7718_v14 = vld [vmem:[%s11560_s6 + $0x20] sm:$0xff] }
0x4859   :  { %9640 = vmatprep.subr.bf16.mxu1 %v9930_v3 }
0x485a   :  { %v7146_v60 = vld [vmem:[#allocation2 + $0x8] sm:$0xff] }
0x485b   :  { %9072 = vmatmul.mubr.msk.f32.vlgmr.msra.gmra.mrb[64].mxu1 %vm54_vm0, %v6944_v16  ;;  %v7719_v16 = vld [vmem:[%s11560_s6 + $0x28] sm:$0xff] }
0x485c   :  { %9082 = vmatprep.mubr.msk.f32.mxu1 %vm9932_vm1, %v11334_v50  ;;  %9642 = vmatpush3.bf16.msra.mxu1 %v9641_v51 }
0x485d   :  { %9643 = vmatprep.subr.bf16.mxu1 %v9930_v3 }
0x4860   :  { %9645 = vmatpush3.bf16.msra.mxu1 %v9644_v9  ;;  %v7344_v9 = vld [vmem:[%s11564_s10 + $0x8] sm:$0xff] }
0x4861   :  { %9646 = vmatprep.subr.bf16.mxu1 %v9930_v3 }
0x4926   :  { %v6817_v0 = vpop.f32.mrb[62].mxu1 }
0x4927   :  { %v6818_v42 = vadd.f32 %v11169_v48, %v6817_v0  ;;  %v9027_v17 = vpop.f32.mrb[63].mxu1  ;;  %v7720_v0 = vld [vmem:[%s11560_s6 + $0x30] sm:$0xff] }
0x4928   :  { %v7721_v17 = vld [vmem:[%s11560_s6 + $0x38] sm:$0xff] }
0x4929   :  { %7710 = vst [vmem:[%s11566_s12 + $0x30] sm:$0xff] %v6818_v42  ;;  %6823 = vmax.xlane.f32.xlu1 %v6818_v42 }
0x492e   :  { %v11447_v34 = vpop.f32.mrb[64].mxu1 }
0x492f   :  { %v9073_v19 = vpop.f32.mrb[65].mxu1 }
0x493a   :  { %6528 = vrot.lane.b32.xlu1 %v11385_v26, %s9935_s28 }
0x49b6   :  { %v6824_v25 = vpop.xlane.xlu1 %6823 }
0x49b7   :  { %vm6825_vm3 = vcmp.eq.f32.partialorder %v6818_v42, %v6824_v25  ;;  %v9653_v42 = vpack.c.bf16 %v7719_v16, %v7718_v14 }
0x49b8   :  { %v6826_v28 = vsel %vm6825_vm3, %v10738_v7, 128 }
0x49b9   :  { %v6828_v24 = vshra.s32 %v6826_v28, 16  ;;  %v6827_v36 = vand.u32 65535, %v6826_v28 }
0x49ba   :  { %v6529_v20 = vpop.permute.xlu1 %6528 }
0x49bb   :  { %v6830_v32 = vcvt.s32.f32 %v6828_v24  ;;  %6531 = vst.msk [vmem:[#allocation3] sm:$0xff] %vm54_vm0, %v6529_v20  ;;  %v6829_v30 = vcvt.s32.f32 %v6827_v36 }
0x49bd   :  { %6831 = vmin.xlane.f32.xlu0 %v6830_v32 }
0x49c2   :  { %v7110_v48 = vld [vmem:[#allocation3] sm:$0xff] }
0x49c3   :  { %7112 = vrot.lane.b32.xlu1 %v7110_v48, %s9934_s0 }
0x4a35   :  { %v7113_v1 = vpop.permute.xlu1 %7112 }
0x4a4a   :  { %v6832_v12 = vpop.xlane.xlu0 %6831 }
0x4a4b   :  { %vm6833_vm4 = vcmp.eq.f32.partialorder %v6830_v32, %v6832_v12  ;;  %v6838_v22 = vcvt.f32.s32 %v6832_v12 }
0x4a4c   :  { %v6834_v43 = vsel %vm6833_vm4, %v6829_v30, inf }
0x4a4d   :  { %6835 = vmin.xlane.f32.xlu0 %v6834_v43  ;;  %v6839_v54 = vshll.u32 %v6838_v22, 16 }
0x4ada   :  { %v6836_v29 = vpop.xlane.xlu0 %6835 }
0x4adb   :  { %v6837_v35 = vcvt.f32.s32 %v6836_v29 }
0x4add   :  { %v6840_v37 = vadd.s32 %v6839_v54, %v6837_v35 }
0x4adf   :  { %vm6841_vm5 = vcmp.eq.s32.totalorder %v10738_v7, %v6840_v37  ;;  %v7713_v7 = vld [vmem:[%s11556_s2 + $0x30] sm:$0xff] }
0x4ae0   :  { %9061 = vmatmul.mubr.msk.f32.vlgmr.msra.gmra.mrb[70].mxu0 %vm6841_vm5, %v9936_v59  ;;  %v6934_v59 = vstv %s6931_s26 }
0x4ae1   :  { %9115 = vmatprep.mubr.msk.f32.mxu0 %vm9932_vm1, %v11334_v50  ;;  %v6935_v26 = vmul.f32 %v7713_v7, %v6934_v59  ;;  %v7345_v7 = vld [vmem:[%s11564_s10 + $0x10] sm:$0xff]  ;;  %v9659_v59 = vpack.c.bf16 %v7344_v9, %v7343_v40 }
0x4ae3   :  { %9660 = vmatpush3.bf16.msra.mxu0 %v9659_v59 }
0x4ae4   :  { %9661 = vmatprep.subr.bf16.mxu0 %v9930_v3 }
0x4bb3   :  { %v6925_v46 = vpop.f32.mrb[70].mxu0 }
0x4bb4   :  { %v6938_v41 = vmul.f32 %v6937_v2, %v6925_v46  ;;  %v9062_v8 = vpop.f32.mrb[71].mxu0  ;;  %v7346_v2 = vld [vmem:[%s11564_s10 + $0x18] sm:$0xff] }
0x4bb6   :  { %v6939_v58 = vadd.f32 %v6938_v41, %v6935_v26  ;;  %v9662_v26 = vpack.c.bf16 %v7346_v2, %v7345_v7 }
0x4bb8   :  { %9083 = vmatmul.mubr.msk.f32.vlgmr.msra.gmra.mrb[66].mxu1 %vm54_vm0, %v6939_v58  ;;  %9663 = vmatpush3.bf16.msra.mxu0 %v9662_v26 }
0x4bb9   :  { %9648 = vmatpush3.bf16.msra.mxu1 %v9647_v44  ;;  %9093 = vmatprep.mubr.msk.f32.mxu1 %vm9932_vm1, %v11334_v50  ;;  %v7731_v44 = vld [vmem:[%s11565_s11] ss:$0 sm:$0xff] }
0x4bba   :  { %9649 = vmatprep.subr.bf16.mxu1 %v9930_v3 }
0x4bbd   :  { %9651 = vmatpush3.bf16.msra.mxu1 %v9650_v57 }
0x4bbe   :  { %9652 = vmatprep.subr.bf16.mxu1 %v9930_v3 }
0x4bc0   :  { %9094 = vmatmul.mubr.msk.f32.vlgmr.msra.gmra.mrb[68].mxu1 %vm54_vm0, %v7146_v60 }
0x4bc1   :  { %9104 = vmatprep.mubr.msk.f32.mxu1 %vm9932_vm1, %v11334_v50  ;;  %9654 = vmatpush3.bf16.msra.mxu1 %v9653_v42 }
0x4bc2   :  { %9655 = vmatprep.subr.bf16.mxu1 %v9930_v3 }
0x4c8b   :  { %v7091_v63 = vpop.f32.mrb[66].mxu1 }
0x4c8c   :  { %v7092_v45 = vadd.f32 %v7091_v63, %v11447_v34  ;;  %v9084_v5 = vpop.f32.mrb[67].mxu1  ;;  %v9656_v34 = vpack.c.bf16 %v7721_v17, %v7720_v0 }
0x4c8e   :  { %v7102_v18 = vadd.f32 %v7716_v38, %v7092_v45  ;;  %9657 = vmatpush3.bf16.msra.mxu1 %v9656_v34 }
0x4c90   :  { %9896 = vtanh.f32 %v7102_v18  ;;  %v7717_v55 = vmul.f32 -1.442695, %v7102_v18 }
0x4c92   :  { %9898 = vpow2.f32 %v7717_v55 }
0x4c93   :  { %v7220_v53 = vpop.f32.mrb[68].mxu1 }
0x4c94   :  { %v9095_v33 = vpop.f32.mrb[69].mxu1 }
0x4c9a   :  { %v9897_v52 = vpop.eup %9896 }
0x4c9b   :  { %7117 = vrot.lane.b32.xlu0 %v9897_v52, %s9933_s29 }
0x4c9c   :  { %v9899_v21 = vpop.eup %9898 }
0x4c9d   :  { %v7106_v6 = vadd.f32 1.0, %v9899_v21 }
0x4c9f   :  { %9900 = vrcp.f32 %v7106_v6 }
0x4ca9   :  { %v9901_v50 = vpop.eup %9900 }
0x4caa   :  { %v7115_v23 = vmul.f32 %v9901_v50, %v7113_v1 }
0x4d0d   :  { %v7118_v61 = vpop.permute.xlu0 %7117 }
0x4d0e   :  { %v7120_v39 = vmul.f32 %v9901_v50, %v7118_v61 }
0x4d10   :  { %7122 = vrot.lane.b32.xlu1 %v7120_v39, %s9934_s0 }
0x4d82   :  { %v7123_v15 = vpop.permute.xlu1 %7122 }
0x4d83   :  { %v7125_v62 = vadd.f32 %v7123_v15, %v7115_v23 }
0x4d85   :  { %9902 = vtanh.f32 %v7125_v62 }
0x4d8f   :  { %v9903_v27 = vpop.eup %9902 }
0x4d90   :  { %7128 = vrot.lane.b32.xlu0 %v9903_v27, %s9933_s29 }
0x4d94   :  { %6729 = vrot.lane.b32.xlu0 %v11417_v56, %s9935_s28  ;;  %v7729_v56 = vld [vmem:[%s11562_s8 + $0x1] ss:$0 sm:$0xff] }
0x4e02   :  { %v7129_v19 = vpop.permute.xlu0 %7128 }
0x4e03   :  { %v7131_v25 = vmul.f32 %v9901_v50, %v7129_v19 }
0x4e05   :  { %7138 = vrot.lane.b32.xlu1 %v7131_v25, %s9934_s0 }
0x4e06   :  { %v6730_v28 = vpop.permute.xlu0 %6729 }
0x4e07   :  { %6732 = vst.msk [vmem:[#allocation3 + $0x8] sm:$0xff] %vm54_vm0, %v6730_v28 }
0x4e0e   :  { %v7311_v24 = vld [vmem:[#allocation3 + $0x8] sm:$0xff] }
0x4e0f   :  { %7313 = vrot.lane.b32.xlu0 %v7311_v24, %s9934_s0 }
0x4e77   :  { %v7139_v20 = vpop.permute.xlu1 %7138 }
0x4e78   :  { %7141 = vst.msk [vmem:[#allocation2] sm:$0xff] %vm54_vm0, %v7139_v20  ;;  %9105 = vmatmul.mubr.msk.f32.vlgmr.msra.gmra.mrb[70].mxu1 %vm54_vm0, %v7139_v20 }
0x4e81   :  { %v7314_v54 = vpop.permute.xlu0 %7313 }
0x4f4b   :  { %v7292_v32 = vpop.f32.mrb[70].mxu1 }
0x4f4c   :  { %v7293_v48 = vadd.f32 %v7292_v32, %v7220_v53  ;;  %v9106_v36 = vpop.f32.mrb[71].mxu1 }
0x4f4e   :  { %v7303_v30 = vadd.f32 %v7729_v56, %v7293_v48 }
0x4f50   :  { %9904 = vtanh.f32 %v7303_v30  ;;  %v7730_v43 = vmul.f32 -1.442695, %v7303_v30 }
0x4f52   :  { %9906 = vpow2.f32 %v7730_v43 }
0x4f5a   :  { %v9905_v12 = vpop.eup %9904 }
0x4f5b   :  { %7318 = vrot.lane.b32.xlu1 %v9905_v12, %s9933_s29 }
0x4f5c   :  { %v9907_v10 = vpop.eup %9906 }
0x4f5d   :  { %v7307_v47 = vadd.f32 1.0, %v9907_v10 }
0x4f5f   :  { %9908 = vrcp.f32 %v7307_v47 }
0x4f69   :  { %v9909_v51 = vpop.eup %9908 }
0x4f6a   :  { %v7316_v35 = vmul.f32 %v9909_v51, %v7314_v54 }
0x4fcd   :  { %v7319_v22 = vpop.permute.xlu1 %7318 }
0x4fce   :  { %v7321_v29 = vmul.f32 %v9909_v51, %v7319_v22 }
0x4fd0   :  { %7323 = vrot.lane.b32.xlu1 %v7321_v29, %s9934_s0 }
0x5042   :  { %v7324_v37 = vpop.permute.xlu1 %7323 }
0x5043   :  { %v7326_v4 = vadd.f32 %v7324_v37, %v7316_v35 }
0x5045   :  { %9910 = vtanh.f32 %v7326_v4 }
0x504f   :  { %v9911_v31 = vpop.eup %9910 }
0x5050   :  { %7329 = vrot.lane.b32.xlu0 %v9911_v31, %s9933_s29 }
0x5054   :  { %7133 = vrot.lane.b32.xlu0 %v7125_v62, %s9935_s28 }
0x50c2   :  { %v7330_v49 = vpop.permute.xlu0 %7329 }
0x50c3   :  { %v7332_v46 = vmul.f32 %v9909_v51, %v7330_v49 }
0x50c5   :  { %7339 = vrot.lane.b32.xlu1 %v7332_v46, %s9934_s0 }
0x50c6   :  { %v7134_v41 = vpop.permute.xlu0 %7133 }
0x50c7   :  { %7136 = vst.msk [vmem:[#allocation3] sm:$0xff] %vm54_vm0, %v7134_v41 }
0x50c9   :  { %7334 = vrot.lane.b32.xlu1 %v7326_v4, %s9935_s28 }
0x5137   :  { %v7340_v8 = vpop.permute.xlu1 %7339 }
0x5138   :  { %7342 = vst.msk [vmem:[#allocation2 + $0x8] sm:$0xff] %vm54_vm0, %v7340_v8  ;;  %9116 = vmatmul.mubr.msk.f32.vlgmr.msra.gmra.mrb[72].mxu0 %vm54_vm0, %v7340_v8 }
0x513b   :  { %v7335_v3 = vpop.permute.xlu1 %7334 }
0x513c   :  { %7337 = vst.msk [vmem:[#allocation3 + $0x8] sm:$0xff] %vm54_vm0, %v7335_v3 }
0x520b   :  { %v7422_v58 = vpop.f32.mrb[72].mxu0 }
0x520c   :  { %v7423_v13 = vadd.f32 %v7731_v44, %v7422_v58  ;;  %v9117_v11 = vpop.f32.mrb[73].mxu0 }
0x520e   :  { %7733 = vst [vmem:[%s11566_s12 + $0x38] sm:$0xff] %v7423_v13 }
0x520f   :  { %7432 = vsyncpa [#allocation5], 1 }

</bundles_post_ra>
